<compile_context>
chip_gen: v7x
topology: tpu7x:2x2x1
jax: 0.10.0
libtpu: 0.0.40
codegen_flags: <defaults>
</compile_context>

<pallas_src>
import functools
import math

import jax
import jax.numpy as jnp
from jax.experimental import pallas as pl
from jax.experimental.pallas import tpu as pltpu

EPS = 1e-5
F32 = jnp.float32
BF16 = jnp.bfloat16
VMEM_LIMIT = 48 * 1024 * 1024        # safe on v5e/v6e (128 MiB) and v7x (64 MiB physical)


def _round_up(x, m):
    return (x + m - 1) // m * m


def _pick_tile(dim, cap, align):
    """Pick a tile size (multiple of `align`, or the full dim) and the padded dim."""
    if dim <= cap:
        return dim, dim                       # full-dim block: no padding, no alignment needed
    floor = max(align, (cap // 4) // align * align)
    t = cap // align * align
    while t >= floor:
        if dim % t == 0:                      # exact divisor -> no padding at all
            return t, dim
        t -= align
    nblk = -(-dim // cap)                     # balanced fallback with minimal padding
    t = _round_up(-(-dim // nblk), align)
    return t, t * nblk


# ----------------------------------------------------------------------------
# Pallas kernels
# ----------------------------------------------------------------------------

def _mm_stats_kernel(a_ref, b_ref, o_ref, sum_ref, sq_ref, acc_ref):
    """Tiled bf16 matmul with f32 VMEM accumulation; the conv output is stored (in o_ref.dtype,
    normally bf16) on the last K step, and the BatchNorm per-channel sum / sum-of-squares are
    computed from the f32 accumulator in the same epilogue."""
    k = pl.program_id(2)

    @pl.when(k == 0)
    def _():
        acc_ref[...] = jnp.zeros_like(acc_ref)

    acc_ref[...] += jnp.dot(a_ref[...], b_ref[...], preferred_element_type=jnp.float32)

    @pl.when(k == pl.num_programs(2) - 1)
    def _():
        y = acc_ref[...]
        o_ref[...] = y.astype(o_ref.dtype)
        sum_ref[...] = jnp.broadcast_to(jnp.sum(y, axis=0, keepdims=True), sum_ref.shape)
        sq_ref[...] = jnp.broadcast_to(jnp.sum(y * y, axis=0, keepdims=True), sq_ref.shape)


def _mm_bias_kernel(a_ref, b_ref, bias_ref, o_ref):
    o_ref[...] = (jnp.dot(a_ref[...], b_ref[...], preferred_element_type=jnp.float32)
                  + bias_ref[...])


def _bn_act_kernel(x_ref, scale_ref, shift_ref, o_ref, *, relu):
    y = x_ref[...].astype(jnp.float32) * scale_ref[...] + shift_ref[...]
    if relu:
        y = jnp.maximum(y, 0.0)
    o_ref[...] = y.astype(o_ref.dtype)


def _bn_add_relu_kernel(x_ref, res_ref, scale_ref, shift_ref, o_ref):
    y = (x_ref[...].astype(jnp.float32) * scale_ref[...] + shift_ref[...]
         + res_ref[...].astype(jnp.float32))
    o_ref[...] = jnp.maximum(y, 0.0).astype(o_ref.dtype)


def _win_max_kernel(w_ref, o_ref):
    o_ref[...] = jnp.max(w_ref[...], axis=0)


def _avgpool_kernel(x_ref, o_ref):
    o_ref[...] = jnp.mean(x_ref[...].astype(jnp.float32), axis=1)


def _softmax_kernel(x_ref, o_ref):
    x = x_ref[...]
    m = jnp.max(x, axis=-1, keepdims=True)
    e = jnp.exp(x - m)
    o_ref[...] = e / jnp.sum(e, axis=-1, keepdims=True)


# ----------------------------------------------------------------------------
# Pallas wrappers
# ----------------------------------------------------------------------------

def pallas_matmul_stats(a, b, out_dtype=BF16):
    """(M,K) @ (K,N) in bf16 -> y (out_dtype) plus fused f32 per-column sum / sum-of-squares."""
    M, K = a.shape
    _, N = b.shape
    a = a if a.dtype == BF16 else a.astype(BF16)
    b = b if b.dtype == BF16 else b.astype(BF16)

    tm, Mp = _pick_tile(M, 512, 8)
    n_tgt = max(_round_up(N, 128), 128)          # lane-dense outputs: never below 128
    tn, Np = _pick_tile(n_tgt, 512, 128)
    tk, Kp = _pick_tile(_round_up(K, 128), 2048, 128)

    a_p = a if (Mp == M and Kp == K) else jnp.pad(a, ((0, Mp - M), (0, Kp - K)))
    b_p = b if (Kp == K and Np == N) else jnp.pad(b, ((0, Kp - K), (0, Np - N)))

    ni, nj, nk = Mp // tm, Np // tn, Kp // tk
    # v7x megacore: keep >=2 parallel (i,j) blocks when it is free to do so.
    if ni == 1 and nj == 1 and Np >= 256 and (Np // 2) % 128 == 0:
        tn = Np // 2
        nj = 2

    y, s, sq = pl.pallas_call(
        _mm_stats_kernel,
        out_shape=(jax.ShapeDtypeStruct((Mp, Np), out_dtype),
                   jax.ShapeDtypeStruct((8 * ni, Np), F32),
                   jax.ShapeDtypeStruct((8 * ni, Np), F32)),
        grid_spec=pltpu.PrefetchScalarGridSpec(
            num_scalar_prefetch=0,
            grid=(ni, nj, nk),
            in_specs=[pl.BlockSpec((tm, tk), lambda i, j, k: (i, k)),
                      pl.BlockSpec((tk, tn), lambda i, j, k: (k, j))],
            out_specs=(pl.BlockSpec((tm, tn), lambda i, j, k: (i, j)),
                       pl.BlockSpec((8, tn), lambda i, j, k: (i, j)),
                       pl.BlockSpec((8, tn), lambda i, j, k: (i, j))),
            scratch_shapes=[pltpu.VMEM((tm, tn), F32)]),
        compiler_params=pltpu.CompilerParams(
            dimension_semantics=("parallel", "parallel", "arbitrary"),
            vmem_limit_bytes=VMEM_LIMIT),
    )(a_p, b_p)

    if Mp != M or Np != N:
        y = y[:M, :N]
    col_sum = jnp.sum(s[:, :N], axis=0) * 0.125   # each i-tile wrote its sum to 8 identical rows
    col_sq = jnp.sum(sq[:, :N], axis=0) * 0.125
    return y, col_sum, col_sq


def pallas_matmul_bias(a, b, bias):
    """Small dense layer: (M,K) @ (K,N) + bias[N] (f32, single-block kernel)."""
    M, K = a.shape
    _, N = b.shape
    Kp = _round_up(K, 128)
    Np = _round_up(N, 128)
    a_p = a.astype(F32) if Kp == K else jnp.pad(a.astype(F32), ((0, 0), (0, Kp - K)))
    b_p = b.astype(F32)
    if Kp != K or Np != N:
        b_p = jnp.pad(b_p, ((0, Kp - K), (0, Np - N)))
    bias_p = jnp.pad(bias.reshape(1, N).astype(F32), ((0, 0), (0, Np - N)))
    out = pl.pallas_call(
        _mm_bias_kernel,
        out_shape=jax.ShapeDtypeStruct((M, Np), F32),
        grid_spec=pltpu.PrefetchScalarGridSpec(
            num_scalar_prefetch=0,
            grid=(1,),
            in_specs=[pl.BlockSpec((M, Kp), lambda i: (0, 0)),
                      pl.BlockSpec((Kp, Np), lambda i: (0, 0)),
                      pl.BlockSpec((1, Np), lambda i: (0, 0))],
            out_specs=pl.BlockSpec((M, Np), lambda i: (0, 0))),
    )(a_p, b_p, bias_p)
    return out[:, :N]


def _bn_row_tile(M, C, itemsize):
    # ~2 MiB per stream (v7x-safe), at most 8192 rows.
    cap = max(8, min(8192, (2 << 20) // (C * itemsize)) // 8 * 8)
    return _pick_tile(M, cap, 8)


def pallas_bn_act(x, scale, shift, relu, out_dtype=BF16):
    M, C = x.shape
    tm, Mp = _bn_row_tile(M, C, x.dtype.itemsize)
    xp = x if Mp == M else jnp.pad(x, ((0, Mp - M), (0, 0)))
    mat_spec = pl.BlockSpec((tm, C), lambda i: (i, 0))
    vec_spec = pl.BlockSpec((1, C), lambda i: (0, 0))
    out = pl.pallas_call(
        functools.partial(_bn_act_kernel, relu=relu),
        out_shape=jax.ShapeDtypeStruct((Mp, C), out_dtype),
        grid_spec=pltpu.PrefetchScalarGridSpec(
            num_scalar_prefetch=0,
            grid=(Mp // tm,),
            in_specs=[mat_spec, vec_spec, vec_spec],
            out_specs=mat_spec),
        compiler_params=pltpu.CompilerParams(
            dimension_semantics=("parallel",), vmem_limit_bytes=VMEM_LIMIT),
    )(xp, scale.reshape(1, C).astype(F32), shift.reshape(1, C).astype(F32))
    return out[:M] if Mp != M else out


def pallas_bn_add_relu(x, residual, scale, shift, out_dtype=BF16):
    M, C = x.shape
    tm, Mp = _bn_row_tile(M, C, x.dtype.itemsize)
    xp = x if Mp == M else jnp.pad(x, ((0, Mp - M), (0, 0)))
    rp = residual if Mp == M else jnp.pad(residual, ((0, Mp - M), (0, 0)))
    mat_spec = pl.BlockSpec((tm, C), lambda i: (i, 0))
    vec_spec = pl.BlockSpec((1, C), lambda i: (0, 0))
    out = pl.pallas_call(
        _bn_add_relu_kernel,
        out_shape=jax.ShapeDtypeStruct((Mp, C), out_dtype),
        grid_spec=pltpu.PrefetchScalarGridSpec(
            num_scalar_prefetch=0,
            grid=(Mp // tm,),
            in_specs=[mat_spec, mat_spec, vec_spec, vec_spec],
            out_specs=mat_spec),
        compiler_params=pltpu.CompilerParams(
            dimension_semantics=("parallel",), vmem_limit_bytes=VMEM_LIMIT),
    )(xp, rp, scale.reshape(1, C).astype(F32), shift.reshape(1, C).astype(F32))
    return out[:M] if Mp != M else out


def pallas_window_max(win):
    """win: (9, M, C) -> (M, C): max over the 9 window taps (3x3 maxpool reduction)."""
    T, M, C = win.shape
    itemsize = win.dtype.itemsize
    cap = max(8, min(8192, (2 << 20) // (T * C * itemsize)) // 8 * 8)
    tm, Mp = _pick_tile(M, cap, 8)
    w = win if Mp == M else jnp.pad(win, ((0, 0), (0, Mp - M), (0, 0)),
                                    constant_values=-jnp.inf)
    out = pl.pallas_call(
        _win_max_kernel,
        out_shape=jax.ShapeDtypeStruct((Mp, C), win.dtype),
        grid_spec=pltpu.PrefetchScalarGridSpec(
            num_scalar_prefetch=0,
            grid=(Mp // tm,),
            in_specs=[pl.BlockSpec((T, tm, C), lambda i: (0, i, 0))],
            out_specs=pl.BlockSpec((tm, C), lambda i: (i, 0))),
        compiler_params=pltpu.CompilerParams(
            dimension_semantics=("parallel",), vmem_limit_bytes=VMEM_LIMIT),
    )(w)
    return out[:M] if Mp != M else out


def pallas_avgpool(x3d):
    """x3d: (N, S, C) -> (N, C): mean over the spatial axis (AvgPool2d(7) on 7x7 features)."""
    N, S, C = x3d.shape
    return pl.pallas_call(
        _avgpool_kernel,
        out_shape=jax.ShapeDtypeStruct((N, C), F32),
        grid_spec=pltpu.PrefetchScalarGridSpec(
            num_scalar_prefetch=0,
            grid=(1,),
            in_specs=[pl.BlockSpec((N, S, C), lambda i: (0, 0, 0))],
            out_specs=pl.BlockSpec((N, C), lambda i: (0, 0))),
    )(x3d)


def pallas_softmax(x):
    N, D = x.shape
    return pl.pallas_call(
        _softmax_kernel,
        out_shape=jax.ShapeDtypeStruct((N, D), F32),
        grid_spec=pltpu.PrefetchScalarGridSpec(
            num_scalar_prefetch=0,
            grid=(1,),
            in_specs=[pl.BlockSpec((N, D), lambda i: (0, 0))],
            out_specs=pl.BlockSpec((N, D), lambda i: (0, 0))),
    )(x)


# ----------------------------------------------------------------------------
# Conv / deconv / pool building blocks (XLA glue fused around the Pallas calls per-shape jit)
# ----------------------------------------------------------------------------

def im2col(x_nhwc, k, stride, pad):
    if pad:
        x_nhwc = jnp.pad(x_nhwc, ((0, 0), (pad, pad), (pad, pad), (0, 0)))
    N, Hp, Wp, C = x_nhwc.shape
    OH = (Hp - k) // stride + 1
    OW = (Wp - k) // stride + 1
    cols = [x_nhwc[:, i:i + stride * (OH - 1) + 1:stride,
                   j:j + stride * (OW - 1) + 1:stride, :]
            for i in range(k) for j in range(k)]
    patches = jnp.stack(cols, axis=3)                # (N, OH, OW, k*k, C)
    return patches.reshape(N * OH * OW, k * k * C), (N, OH, OW)


def _finish_bn_params(col_sum, col_sq, m):
    mean = col_sum / m
    var = jnp.maximum(col_sq / m - mean * mean, 0.0)   # biased batch variance (gamma=1, beta=0)
    scale = jax.lax.rsqrt(var + EPS)
    shift = -mean * scale
    return scale, shift


@functools.partial(jax.jit, static_argnames=("shp", "stride", "pad", "relu"))
def _conv_bn_core(mat, w, residual, shp, stride, pad, relu):
    """Conv2d (no bias) -> BatchNorm (batch stats) -> [+ residual] -> [ReLU].  All bf16 I/O."""
    N, H, W = shp
    cin = mat.shape[1]
    k = w.shape[0]
    cout = w.shape[3]
    mat = mat if mat.dtype == BF16 else mat.astype(BF16)
    if k == 1:
        if stride == 1:
            a = mat                                              # 1x1 conv: no im2col at all
        else:
            a = mat.reshape(N, H, W, cin)[:, ::stride, ::stride, :].reshape(-1, cin)
    else:
        # TODO(synk): form the k*k taps inside the matmul kernel (halo row tiles) to avoid
        # materializing the im2col patch matrix in HBM for 3x3 / 7x7 convs.
        a, _ = im2col(mat.reshape(N, H, W, cin), k, stride, pad)
    y, col_sum, col_sq = pallas_matmul_stats(a, w.reshape(k * k * cin, cout))
    scale, shift = _finish_bn_params(col_sum, col_sq, a.shape[0])
    if residual is None:
        return pallas_bn_act(y, scale, shift, relu)
    return pallas_bn_add_relu(y, residual, scale, shift)


def conv_bn(mat, shp, w, stride=1, pad=0, relu=True, residual=None):
    N, H, W = shp
    k = w.shape[0]
    OH = (H + 2 * pad - k) // stride + 1
    OW = (W + 2 * pad - k) // stride + 1
    y = _conv_bn_core(mat, w, residual, shp=shp, stride=stride, pad=pad, relu=relu)
    return y, (N, OH, OW)


@functools.partial(jax.jit, static_argnames=("shp", "stride"))
def _deconv_core(mat, w, shp, stride):
    """ConvTranspose2d == zero-dilate input, pad by k-1, ordinary conv -> BatchNorm -> ReLU."""
    N, H, W = shp
    C = mat.shape[1]
    k = w.shape[0]
    cout = w.shape[3]
    x = mat.reshape(N, H, W, C).astype(BF16)
    Hd, Wd = (H - 1) * stride + 1, (W - 1) * stride + 1
    # TODO(synk): decompose into stride^2 interleaved sub-convolutions to skip the structural
    # zeros of the dilated input (~4x FLOP / bandwidth cut on the decoder).
    xd = jnp.zeros((N, Hd, Wd, C), BF16).at[:, ::stride, ::stride, :].set(x)
    cols, (_, OH, OW) = im2col(xd, k, 1, k - 1)
    y, col_sum, col_sq = pallas_matmul_stats(cols, w.reshape(k * k * C, cout),
                                             out_dtype=BF16 if cout > 1 else F32)
    scale, shift = _finish_bn_params(col_sum, col_sq, y.shape[0])
    # ConvTranspose2d bias omitted: a constant per-channel shift cancels under batch-stat BN.
    if cout == 1:
        # lane-dense layout for the single-channel map: put W on the lane axis.
        y2 = pallas_bn_act(y.reshape(N * OH, OW),
                           jnp.broadcast_to(scale, (OW,)),
                           jnp.broadcast_to(shift, (OW,)), True, out_dtype=F32)
        return y2.reshape(N * OH * OW, 1)
    return pallas_bn_act(y, scale, shift, True, out_dtype=BF16)


def deconv_bn_relu(mat, shp, w, stride):
    N, H, W = shp
    k = w.shape[0]
    OH, OW = (H - 1) * stride + k, (W - 1) * stride + k
    return _deconv_core(mat, w, shp=shp, stride=stride), (N, OH, OW)


@functools.partial(jax.jit, static_argnames=("shp",))
def _maxpool_core(mat, shp):
    N, H, W = shp
    C = mat.shape[1]
    x = mat.reshape(N, H, W, C)
    xp = jnp.pad(x, ((0, 0), (1, 1), (1, 1), (0, 0)), constant_values=-jnp.inf)
    OH = (H + 2 - 3) // 2 + 1
    OW = (W + 2 - 3) // 2 + 1
    # TODO(synk): replace the 9-tap stack with a halo-read Pallas kernel over (N,H,W,C).
    cols = [xp[:, i:i + 2 * (OH - 1) + 1:2, j:j + 2 * (OW - 1) + 1:2, :].reshape(N * OH * OW, C)
            for i in range(3) for j in range(3)]
    return pallas_window_max(jnp.stack(cols, axis=0))


def maxpool_3x3_s2_p1(mat, shp):
    N, H, W = shp
    OH = (H + 2 - 3) // 2 + 1
    OW = (W + 2 - 3) // 2 + 1
    return _maxpool_core(mat, shp=shp), (N, OH, OW)


@jax.jit
def _maxpool_head(x):
    """MaxPool2d(3, 2, 1) on a single-channel (N, H, W) map; W rides on the lane axis."""
    N, H, W = x.shape
    xp = jnp.pad(x, ((0, 0), (1, 1), (1, 1)), constant_values=-jnp.inf)
    OH = (H + 2 - 3) // 2 + 1
    OW = (W + 2 - 3) // 2 + 1
    cols = [xp[:, i:i + 2 * (OH - 1) + 1:2, j:j + 2 * (OW - 1) + 1:2].reshape(N * OH, OW)
            for i in range(3) for j in range(3)]
    return pallas_window_max(jnp.stack(cols, axis=0)).reshape(N, OH, OW)


@jax.jit
def _attention_head(head_reduced, face_feat, attn_w, attn_b):
    Nb = head_reduced.shape[0]
    C = face_feat.shape[1]
    face_feat_reduced = pallas_avgpool(face_feat.reshape(Nb, 49, C))
    attn_in = jnp.concatenate([head_reduced, face_feat_reduced], axis=1)
    logits = pallas_matmul_bias(attn_in, attn_w, attn_b)
    return pallas_softmax(logits)


@jax.jit
def _fuse_scene_face(scene_feat, face_feat, attn_weights):
    Nb = attn_weights.shape[0]
    attn_flat = attn_weights.reshape(Nb * 49, 1)
    scaled = (scene_feat.astype(F32) * attn_flat).astype(BF16)
    return jnp.concatenate([scaled, face_feat], axis=1)


@jax.jit
def _fc_inout(eio, w, b):
    Nb = eio.shape[0] // 49
    return pallas_matmul_bias(eio.reshape(Nb, 49), w, b)


@jax.jit
def _conv4_affine(x2d, w, b):
    """conv4 is a 1x1x1->1 conv == per-pixel affine; apply with W on the lane axis."""
    C = x2d.shape[1]
    scale = jnp.broadcast_to(w.reshape(()).astype(F32), (C,))
    shift = jnp.broadcast_to(b.reshape(()).astype(F32), (C,))
    return pallas_bn_act(x2d, scale, shift, False, out_dtype=F32)


def bottleneck(mat, shp, p):
    stride = p['stride']
    out, s1 = conv_bn(mat, shp, p['w1'], 1, 0, True)
    out, s2 = conv_bn(out, s1, p['w2'], stride, 1, True)
    if 'wd' in p:
        res, _ = conv_bn(mat, shp, p['wd'], stride, 0, False)
    else:
        res = mat
    out, s3 = conv_bn(out, s2, p['w3'], 1, 0, True, residual=res)
    return out, s3


def run_layer(mat, shp, layer_params):
    for p in layer_params:
        mat, shp = bottleneck(mat, shp, p)
    return mat, shp


# ----------------------------------------------------------------------------
# Deterministic parameter construction (synthetic init, matching module shapes)
# ----------------------------------------------------------------------------

class ParamGen:
    def __init__(self, seed=0):
        self._key = jax.random.PRNGKey(seed)
        self._i = 0

    def _next(self):
        self._i += 1
        return jax.random.fold_in(self._key, self._i)

    def conv(self, k, cin, cout, dtype=BF16):
        # PyTorch init: normal(0, sqrt(2 / (k*k*out_channels))). Stored as (k, k, cin, cout).
        std = math.sqrt(2.0 / (k * k * cout))
        w = jax.random.normal(self._next(), (k, k, cin, cout), F32) * std
        return w.astype(dtype)                 # MXU weights live in bf16

    def linear(self, fin, fout):
        bound = 1.0 / math.sqrt(fin)
        w = jax.random.uniform(self._next(), (fin, fout), F32, -bound, bound)
        b = jax.random.uniform(self._next(), (fout,), F32, -bound, bound)
        return w, b

    def bias(self, n, fan_in):
        bound = 1.0 / math.sqrt(fan_in)
        return jax.random.uniform(self._next(), (n,), F32, -bound, bound)


def make_layer(g, inplanes, planes, blocks, stride=1):
    layer = []
    p = {'w1': g.conv(1, inplanes, planes),
         'w2': g.conv(3, planes, planes),
         'w3': g.conv(1, planes, planes * 4),
         'stride': stride}
    if stride != 1 or inplanes != planes * 4:
        p['wd'] = g.conv(1, inplanes, planes * 4)
    layer.append(p)
    inplanes = planes * 4
    for _ in range(1, blocks):
        layer.append({'w1': g.conv(1, inplanes, planes),
                      'w2': g.conv(3, planes, planes),
                      'w3': g.conv(1, planes, planes * 4),
                      'stride': 1})
    return layer, inplanes


def init_params(seed=0, layers_scene=(3, 4, 6, 3, 2), layers_face=(3, 4, 6, 3, 2)):
    g = ParamGen(seed)
    P = {}
    P['conv1_scene'] = g.conv(7, 5, 64)
    inp = 64
    P['layer1_scene'], inp = make_layer(g, inp, 64, layers_scene[0])
    P['layer2_scene'], inp = make_layer(g, inp, 128, layers_scene[1], 2)
    P['layer3_scene'], inp = make_layer(g, inp, 256, layers_scene[2], 2)
    P['layer4_scene'], inp = make_layer(g, inp, 512, layers_scene[3], 2)
    P['layer5_scene'], inp = make_layer(g, inp, 256, layers_scene[4], 1)
    P['conv1_face'] = g.conv(7, 3, 64)
    inp = 64
    P['layer1_face'], inp = make_layer(g, inp, 64, layers_face[0])
    P['layer2_face'], inp = make_layer(g, inp, 128, layers_face[1], 2)
    P['layer3_face'], inp = make_layer(g, inp, 256, layers_face[2], 2)
    P['layer4_face'], inp = make_layer(g, inp, 512, layers_face[3], 2)
    P['layer5_face'], inp = make_layer(g, inp, 256, layers_face[4], 1)
    P['attn_w'], P['attn_b'] = g.linear(1808, 49)
    P['compress_conv1'] = g.conv(1, 2048, 1024)
    P['compress_conv2'] = g.conv(1, 1024, 512)
    P['compress_conv1_inout'] = g.conv(1, 2048, 512)
    P['compress_conv2_inout'] = g.conv(1, 512, 1)
    P['fc_inout_w'], P['fc_inout_b'] = g.linear(49, 1)
    # ConvTranspose2d biases are not generated: they cancel exactly under training-mode BN.
    P['deconv1_w'] = g.conv(3, 512, 256)
    P['deconv2_w'] = g.conv(3, 256, 128)
    P['deconv3_w'] = g.conv(4, 128, 1)
    P['conv4_w'] = g.conv(1, 1, 1, dtype=F32)
    P['conv4_b'] = g.bias(1, 1)
    return P


# ----------------------------------------------------------------------------
# Full forward pass
# ----------------------------------------------------------------------------

def hypo_chong_forward(P, images, head, face, object_channel):
    Nb = images.shape[0]

    def nchw_to_mat(x):
        x = jnp.transpose(x, (0, 2, 3, 1)).astype(BF16)   # NCHW -> NHWC, bf16 activations
        N, H, W, C = x.shape
        return x.reshape(N * H * W, C), (N, H, W)

    # ---- face tower ----
    f, fs = nchw_to_mat(face)
    f, fs = conv_bn(f, fs, P['conv1_face'], stride=2, pad=3, relu=True)
    f, fs = maxpool_3x3_s2_p1(f, fs)
    for name in ('layer1_face', 'layer2_face', 'layer3_face', 'layer4_face', 'layer5_face'):
        f, fs = run_layer(f, fs, P[name])
    face_feat = f                                        # (Nb*49, 1024) bf16 @ 7x7

    # ---- attention weights ----
    h = head[:, 0].astype(F32)                           # (Nb, 224, 224)
    h = _maxpool_head(_maxpool_head(_maxpool_head(h)))   # (Nb, 28, 28)
    head_reduced = h.reshape(Nb, 784)
    attn_weights = _attention_head(head_reduced, face_feat, P['attn_w'], P['attn_b'])  # (Nb, 49)

    # ---- scene tower ----
    im_nchw = jnp.concatenate([images, head, object_channel], axis=1)   # 5 channels
    s, ss = nchw_to_mat(im_nchw)
    s, ss = conv_bn(s, ss, P['conv1_scene'], stride=2, pad=3, relu=True)
    s, ss = maxpool_3x3_s2_p1(s, ss)
    for name in ('layer1_scene', 'layer2_scene', 'layer3_scene', 'layer4_scene', 'layer5_scene'):
        s, ss = run_layer(s, ss, P[name])
    scene_feat, sfs = s, ss                              # (Nb*49, 1024) bf16 @ 7x7

    # ---- attention-weighted fusion ----
    scene_face_feat = _fuse_scene_face(scene_feat, face_feat, attn_weights)   # (Nb*49, 2048) bf16

    # ---- in/out branch ----
    eio, _ = conv_bn(scene_face_feat, sfs, P['compress_conv1_inout'], relu=True)
    eio, _ = conv_bn(eio, sfs, P['compress_conv2_inout'], relu=True)
    encoding_inout = _fc_inout(eio, P['fc_inout_w'], P['fc_inout_b'])   # (Nb, 1)

    # ---- heatmap branch ----
    enc, _ = conv_bn(scene_face_feat, sfs, P['compress_conv1'], relu=True)
    enc, _ = conv_bn(enc, sfs, P['compress_conv2'], relu=True)
    x, xs = deconv_bn_relu(enc, sfs, P['deconv1_w'], 2)    # 7  -> 15
    x, xs = deconv_bn_relu(x, xs, P['deconv2_w'], 2)       # 15 -> 31
    x, xs = deconv_bn_relu(x, xs, P['deconv3_w'], 2)       # 31 -> 64
    _, Hh, Wh = xs
    heat = _conv4_affine(x.reshape(Nb * Hh, Wh), P['conv4_w'], P['conv4_b'])
    heatmap = heat.reshape(Nb, Hh, Wh, 1).transpose(0, 3, 1, 2)          # (Nb, 1, 64, 64)

    # torch.mean(attn_weights, 1, keepdim=True) over a size-1 dim == identity
    attn_out = attn_weights.reshape(Nb, 1, 7, 7)
    return heatmap, attn_out, encoding_inout


# ----------------------------------------------------------------------------
if __name__ == "__main__":
    key = jax.random.PRNGKey(0)
    k1, k2, k3, k4 = jax.random.split(key, 4)
    N = 2
    # Spatial size 224 is fixed by the module (view(-1, 784), Linear(1808, 49), fc_inout(49)).
    images = jax.random.normal(k1, (N, 3, 224, 224), F32)
    head = jax.random.uniform(k2, (N, 1, 224, 224), F32)
    face = jax.random.normal(k3, (N, 3, 224, 224), F32)
    object_channel = jax.random.uniform(k4, (N, 1, 224, 224), F32)

    params = init_params(seed=0)

    heatmap, attn_out, enc_inout = hypo_chong_forward(
        params, images, head, face, object_channel)
    (heatmap, attn_out, enc_inout) = jax.block_until_ready(
        (heatmap, attn_out, enc_inout))

    assert heatmap.shape == (N, 1, 64, 64)
    assert attn_out.shape == (N, 1, 7, 7)
    assert enc_inout.shape == (N, 1)
    assert bool(jnp.all(jnp.isfinite(heatmap)))
    assert bool(jnp.all(jnp.isfinite(attn_out)))
    assert bool(jnp.all(jnp.isfinite(enc_inout)))
    print("KERNEL_OK")
</pallas_src>

<mosaic_0001>
module attributes {stable_mosaic.version = 11 : i64} {
  func.func @_mm_stats_kernel(%arg0: i32, %arg1: i32, %arg2: i32, %arg3: memref<512x256xbf16, #tpu.memory_space<vmem>>, %arg4: memref<256x128xbf16, #tpu.memory_space<vmem>>, %arg5: memref<512x128xbf16, #tpu.memory_space<vmem>>, %arg6: memref<8x128xf32, #tpu.memory_space<vmem>>, %arg7: memref<8x128xf32, #tpu.memory_space<vmem>>, %arg8: memref<512x128xf32, #tpu.memory_space<vmem>>) attributes {dimension_semantics = [#tpu.dimension_semantics<parallel>, #tpu.dimension_semantics<parallel>, #tpu.dimension_semantics<arbitrary>], iteration_bounds = array<i64: 49, 1, 1>, scalar_prefetch = 0 : i64, scratch_operands = 1 : i64, tpu.core_type = #tpu.core_type<tc>, window_params = [{transform_indices = @transform_0, window_bounds = array<i64: 512, 256>}, {transform_indices = @transform_1, window_bounds = array<i64: 256, 128>}, {transform_indices = @transform_2, window_bounds = array<i64: 512, 128>}, {transform_indices = @transform_3, window_bounds = array<i64: 8, 128>}, {transform_indices = @transform_4, window_bounds = array<i64: 8, 128>}]} {
    %c0_i32 = arith.constant 0 : i32
    %0 = arith.cmpi eq, %arg2, %c0_i32 : i32
    %1 = arith.extui %0 : i1 to i32
    %c0_i32_0 = arith.constant 0 : i32
    %2 = arith.cmpi ne, %1, %c0_i32_0 : i32
    scf.if %2 {
      %cst_10 = arith.constant 0.000000e+00 : f32
      %12 = vector.broadcast %cst_10 : f32 to vector<512x128xf32>
      %c0_11 = arith.constant 0 : index
      %c0_12 = arith.constant 0 : index
      %13 = vector.load %arg8[%c0_11, %c0_12] : memref<512x128xf32, #tpu.memory_space<vmem>>, vector<512x128xf32>
      tpu.vector_store %arg8[%c0_11, %c0_12], %12 {strides = array<i32>} : memref<512x128xf32, #tpu.memory_space<vmem>>, vector<512x128xf32>,
    } else {
    }
    %c0 = arith.constant 0 : index
    %c0_1 = arith.constant 0 : index
    %3 = vector.load %arg8[%c0, %c0_1] : memref<512x128xf32, #tpu.memory_space<vmem>>, vector<512x128xf32>
    %c0_2 = arith.constant 0 : index
    %c0_3 = arith.constant 0 : index
    %4 = vector.load %arg3[%c0_2, %c0_3] : memref<512x256xbf16, #tpu.memory_space<vmem>>, vector<512x256xbf16>
    %c0_4 = arith.constant 0 : index
    %c0_5 = arith.constant 0 : index
    %5 = vector.load %arg4[%c0_4, %c0_5] : memref<256x128xbf16, #tpu.memory_space<vmem>>, vector<256x128xbf16>
    %cst = arith.constant dense<0.000000e+00> : vector<512x128xf32>
    %6 = tpu.matmul %4, %5, %cst {dimension_numbers = #tpu.dot_dimension_numbers<[1], [0], [0], [1], [0, 0, 1, 1], [], []>} : vector<512x256xbf16>, vector<256x128xbf16>, vector<512x128xf32> -> vector<512x128xf32>
    %7 = arith.addf %3, %6 : vector<512x128xf32>
    %c0_6 = arith.constant 0 : index
    %c0_7 = arith.constant 0 : index
    %8 = vector.load %arg8[%c0_6, %c0_7] : memref<512x128xf32, #tpu.memory_space<vmem>>, vector<512x128xf32>
    tpu.vector_store %arg8[%c0_6, %c0_7], %7 {strides = array<i32>} : memref<512x128xf32, #tpu.memory_space<vmem>>, vector<512x128xf32>,
    %c0_i32_8 = arith.constant 0 : i32
    %9 = arith.cmpi eq, %arg2, %c0_i32_8 : i32
    %10 = arith.extui %9 : i1 to i32
    %c0_i32_9 = arith.constant 0 : i32
    %11 = arith.cmpi ne, %10, %c0_i32_9 : i32
    scf.if %11 {
      %c0_10 = arith.constant 0 : index
      %c0_11 = arith.constant 0 : index
      %12 = vector.load %arg8[%c0_10, %c0_11] : memref<512x128xf32, #tpu.memory_space<vmem>>, vector<512x128xf32>
      %13 = arith.truncf %12 : vector<512x128xf32> to vector<512x128xbf16>
      %c0_12 = arith.constant 0 : index
      %c0_13 = arith.constant 0 : index
      %14 = vector.load %arg5[%c0_12, %c0_13] : memref<512x128xbf16, #tpu.memory_space<vmem>>, vector<512x128xbf16>
      tpu.vector_store %arg5[%c0_12, %c0_13], %13 {strides = array<i32>} : memref<512x128xbf16, #tpu.memory_space<vmem>>, vector<512x128xbf16>,
      %cst_14 = arith.constant dense<0.000000e+00> : vector<128xf32>
      %15 = vector.multi_reduction <add>, %12, %cst_14 [0] : vector<512x128xf32> to vector<128xf32>
      %16 = vector.shape_cast %15 : vector<128xf32> to vector<1x128xf32>
      %17 = vector.shape_cast %16 : vector<1x128xf32> to vector<1x128xf32>
      %18 = vector.broadcast %17 : vector<1x128xf32> to vector<8x128xf32>
      %c0_15 = arith.constant 0 : index
      %c0_16 = arith.constant 0 : index
      %19 = vector.load %arg6[%c0_15, %c0_16] : memref<8x128xf32, #tpu.memory_space<vmem>>, vector<8x128xf32>
      tpu.vector_store %arg6[%c0_15, %c0_16], %18 {strides = array<i32>} : memref<8x128xf32, #tpu.memory_space<vmem>>, vector<8x128xf32>,
      %20 = arith.mulf %12, %12 : vector<512x128xf32>
      %cst_17 = arith.constant dense<0.000000e+00> : vector<128xf32>
      %21 = vector.multi_reduction <add>, %20, %cst_17 [0] : vector<512x128xf32> to vector<128xf32>
      %22 = vector.shape_cast %21 : vector<128xf32> to vector<1x128xf32>
      %23 = vector.shape_cast %22 : vector<1x128xf32> to vector<1x128xf32>
      %24 = vector.broadcast %23 : vector<1x128xf32> to vector<8x128xf32>
      %c0_18 = arith.constant 0 : index
      %c0_19 = arith.constant 0 : index
      %25 = vector.load %arg7[%c0_18, %c0_19] : memref<8x128xf32, #tpu.memory_space<vmem>>, vector<8x128xf32>
      tpu.vector_store %arg7[%c0_18, %c0_19], %24 {strides = array<i32>} : memref<8x128xf32, #tpu.memory_space<vmem>>, vector<8x128xf32>,
    } else {
    }
    return
  }
  func.func @transform_0(%arg0: i32, %arg1: i32, %arg2: i32) -> (i32, i32) {
    %c0_i32 = arith.constant 0 : i32
    return %arg0, %arg2 : i32, i32
  }
  func.func @transform_1(%arg0: i32, %arg1: i32, %arg2: i32) -> (i32, i32) {
    %c0_i32 = arith.constant 0 : i32
    return %arg2, %arg1 : i32, i32
  }
  func.func @transform_2(%arg0: i32, %arg1: i32, %arg2: i32) -> (i32, i32) {
    %c0_i32 = arith.constant 0 : i32
    return %arg0, %arg1 : i32, i32
  }
  func.func @transform_3(%arg0: i32, %arg1: i32, %arg2: i32) -> (i32, i32) {
    %c0_i32 = arith.constant 0 : i32
    return %arg0, %arg1 : i32, i32
  }
  func.func @transform_4(%arg0: i32, %arg1: i32, %arg2: i32) -> (i32, i32) {
    %c0_i32 = arith.constant 0 : i32
    return %arg0, %arg1 : i32, i32
  }
}

module attributes {stable_mosaic.version = 11 : i64} {
  func.func @_bn_act_kernel(%arg0: i32, %arg1: memref<6272x64xbf16, #tpu.memory_space<vmem>>, %arg2: memref<1x64xf32, #tpu.memory_space<vmem>>, %arg3: memref<1x64xf32, #tpu.memory_space<vmem>>, %arg4: memref<6272x64xbf16, #tpu.memory_space<vmem>>) attributes {dimension_semantics = [#tpu.dimension_semantics<parallel>], iteration_bounds = array<i64: 4>, scalar_prefetch = 0 : i64, scratch_operands = 0 : i64, tpu.core_type = #tpu.core_type<tc>, window_params = [{transform_indices = @transform_0, window_bounds = array<i64: 6272, 64>}, {pipeline_mode = #tpu.pipeline_mode<synchronous>, transform_indices = @transform_1, window_bounds = array<i64: 1, 64>}, {pipeline_mode = #tpu.pipeline_mode<synchronous>, transform_indices = @transform_2, window_bounds = array<i64: 1, 64>}, {transform_indices = @transform_3, window_bounds = array<i64: 6272, 64>}]} {
    %c0 = arith.constant 0 : index
    %c0_0 = arith.constant 0 : index
    %0 = vector.load %arg1[%c0, %c0_0] : memref<6272x64xbf16, #tpu.memory_space<vmem>>, vector<6272x64xbf16>
    %1 = arith.extf %0 : vector<6272x64xbf16> to vector<6272x64xf32>
    %c0_1 = arith.constant 0 : index
    %c0_2 = arith.constant 0 : index
    %2 = vector.load %arg2[%c0_1, %c0_2] : memref<1x64xf32, #tpu.memory_space<vmem>>, vector<1x64xf32>
    %3 = vector.broadcast %2 : vector<1x64xf32> to vector<6272x64xf32>
    %4 = arith.mulf %1, %3 : vector<6272x64xf32>
    %c0_3 = arith.constant 0 : index
    %c0_4 = arith.constant 0 : index
    %5 = vector.load %arg3[%c0_3, %c0_4] : memref<1x64xf32, #tpu.memory_space<vmem>>, vector<1x64xf32>
    %6 = vector.broadcast %5 : vector<1x64xf32> to vector<6272x64xf32>
    %7 = arith.addf %4, %6 : vector<6272x64xf32>
    %cst = arith.constant 0.000000e+00 : f32
    %8 = vector.broadcast %cst : f32 to vector<6272x64xf32>
    %9 = arith.maximumf %7, %8 : vector<6272x64xf32>
    %10 = arith.truncf %9 : vector<6272x64xf32> to vector<6272x64xbf16>
    %c0_5 = arith.constant 0 : index
    %c0_6 = arith.constant 0 : index
    %11 = vector.load %arg4[%c0_5, %c0_6] : memref<6272x64xbf16, #tpu.memory_space<vmem>>, vector<6272x64xbf16>
    tpu.vector_store %arg4[%c0_5, %c0_6], %10 {strides = array<i32>} : memref<6272x64xbf16, #tpu.memory_space<vmem>>, vector<6272x64xbf16>,
    return
  }
  func.func @transform_0(%arg0: i32) -> (i32, i32) {
    %c0_i32 = arith.constant 0 : i32
    %c0_i32_0 = arith.constant 0 : i32
    return %arg0, %c0_i32 : i32, i32
  }
  func.func @transform_1(%arg0: i32) -> (i32, i32) {
    %c0_i32 = arith.constant 0 : i32
    %c0_i32_0 = arith.constant 0 : i32
    %c0_i32_1 = arith.constant 0 : i32
    return %c0_i32, %c0_i32_0 : i32, i32
  }
  func.func @transform_2(%arg0: i32) -> (i32, i32) {
    %c0_i32 = arith.constant 0 : i32
    %c0_i32_0 = arith.constant 0 : i32
    %c0_i32_1 = arith.constant 0 : i32
    return %c0_i32, %c0_i32_0 : i32, i32
  }
  func.func @transform_3(%arg0: i32) -> (i32, i32) {
    %c0_i32 = arith.constant 0 : i32
    %c0_i32_0 = arith.constant 0 : i32
    return %arg0, %c0_i32 : i32, i32
  }
}

</mosaic_0001>

<bundles_post_ra>
// kernel: _conv_bn_core.2
= control target key start
LH: loop header
LB: loop body
LE: loop exit
PB: predicated region body
PF: predicated region fallthrough
CT: control target
= control target key end

     0   :  { %10 = vsyncpa [#allocation4], 0  ;;  %s3386_s0 = inlined_call_operand.vmem [shape: bf16[25088,256], index: 0, kind: input, shape index: {}]   ;;  %s3387_s1 = inlined_call_operand.vmem [shape: bf16[256,128], index: 1, kind: input, shape index: {}]   ;;  %s3388_s2 = inlined_call_operand.hbm [shape: bf16[25088,128], index: 2, kind: output, shape index: {0}]   ;;  %s3389_s3 = inlined_call_operand.vmem [shape: f32[392,128], index: 3, kind: output, shape index: {1}]   ;;  %s3390_s4 = inlined_call_operand.vmem [shape: f32[392,128], index: 4, kind: output, shape index: {2}]  }
   0x1   :  { %12 = vsyncpa [#allocation4 + $0x1], 0  ;;  %s2887_s15 = smov 0   ;;  %s2889_s16 = smov 0  }
   0x2   :  { %s2891_s17 = smov 0   ;;  %s2893_s18 = smov 0  }
   0x3   :  { %s2895_s19 = smov 0   ;;  %s2897_s20 = smov 0  }
   0x4 LB: > { %s2158_s21 = sadd.s32 4294967295, %s2856_s20   ;;  %s2159_s22 = sadd.s32 4294967294, %s2856_s20   ;;  %s2856_s20 = sphi %s2897_s20, %s18_s20   ;;  %s2852_s19 = sphi %s2895_s19, %s3397_s19   ;;  %s2848_s18 = sphi %s2893_s18, %s3396_s18   ;;  %s2844_s17 = sphi %s2891_s17, %s3395_s17   ;;  %s2840_s16 = sphi %s2889_s16, %s3394_s16   ;;  %s2836_s15 = sphi %s2887_s15, %s3393_s15  }
   0x5   : > { %s37_s23 = sadd.s32 1, %s2852_s19  ;;  %s102_s24 = sadd.s32 1, %s2844_s17 }
   0x6   : > { %p39_p0 = scmp.ge.s32.totalorder %s37_s23, 49  ;;  %p112_p1 = scmp.ne.s32.totalorder %s2844_s17, %s2840_s16 }
   0x7   : > { %p113_p2 = scmp.eq.s32.totalorder %s2158_s21, 48  ;;  %p118_p3 = scmp.ne.s32.totalorder %s2840_s16, %s2836_s15 }
   0x8   : > { %s3399_s23 = smov (%p39_p0, %s37_s23), 0  ;;  %p119_p5 = scmp.eq.s32.totalorder %s2159_s22, 48 }
   0x9   : > { %p2927_p4 = por %p113_p2, %p112_p1  ;;  %s97_s26 = ssub.s32 %s2852_s19, %s3399_s23 }
   0xa   : > { %p2163_p6 = scmp.ge.s32.totalorder %s2856_s20, 1  ;;  %p100_p7 = scmp.eq.s32.totalorder %s97_s26, 0 }
   0xb   : > { %p2934_p8 = por %p119_p5, %p118_p3  ;;  %p220_p9 = scmp.lt.s32.totalorder %s2856_s20, 50 }
   0xc   : > { %s2940_s28 = scalar_select %p100_p7, %s2844_s17, %s102_s24  }
   0xd   : > { %p221_p10 = pnand %p2163_p6, %p220_p9 }
   0xe   : > { %v2666_v0 = vld [vmem:[%s3387_s1] sm:$0xff] (!%p221_p10)   ;;  %v2858_v1 = vmov (!%p221_p10), 0   ;;  %s2165_s5 = sshll.u32 (!%p221_p10), %s2848_s18, 6  ;;  %v2667_v2 = vld [vmem:[%s3387_s1 + $0x8] sm:$0xff] (!%p221_p10)   ;;  %v2668_v3 = vld [vmem:[%s3387_s1 + $0x10] sm:$0xff] (!%p221_p10)   ;;  %s252_s9 = sand.u32 (!%p221_p10), 1, %s2840_s16  }
   0xf   : > { %224 = sbr.rel (%p221_p10) target bundleno = 505 (0x1f9), region = 28  ;;  %954 = vmatprep.subr.bf16.mxu0 (!%p221_p10), %v2858_v1  ;;  %2576 = vmatprep.subr.bf16.mxu1 (!%p221_p10), %v2858_v1  ;;  %p275_p11 = scmp.lt.s32.totalorder (!%p221_p10), %s2165_s5, 3135  ;;  %v2669_v4 = vld [vmem:[%s3387_s1 + $0x18] sm:$0xff] (!%p221_p10)   ;;  %v2670_v5 = vld [vmem:[%s3387_s1 + $0x20] sm:$0xff] (!%p221_p10)   ;;  %v2671_v7 = vld [vmem:[%s3387_s1 + $0x28] sm:$0xff] (!%p221_p10)  }
  0x10   : > { %955 = vmatpush1.bf16.msra.mxu0 (!%p221_p10), %v2666_v0  ;;  %2592 = vmatpush1.bf16.msra.mxu1 (!%p221_p10), %v2666_v0  ;;  %v2672_v8 = vld [vmem:[%s3387_s1 + $0x30] sm:$0xff] (!%p221_p10)   ;;  %v2673_v9 = vld [vmem:[%s3387_s1 + $0x38] sm:$0xff] (!%p221_p10)   ;;  %v2674_v11 = vld [vmem:[%s3387_s1 + $0x40] sm:$0xff] (!%p221_p10)   ;;  %s2164_s10 = sshll.u32 (!%p221_p10), %s252_s9, 8  ;;  %s2384_s11 = sshll.u32 (!%p221_p10), %s2848_s18, 12 }
  0x11   : > { %956 = vmatprep.subr.bf16.mxu0 (!%p221_p10), %v2858_v1  ;;  %2577 = vmatprep.subr.bf16.mxu1 (!%p221_p10), %v2858_v1  ;;  %v2675_v12 = vld [vmem:[%s3387_s1 + $0x48] sm:$0xff] (!%p221_p10)   ;;  %v2676_v13 = vld [vmem:[%s3387_s1 + $0x50] sm:$0xff] (!%p221_p10)   ;;  %v2677_v14 = vld [vmem:[%s3387_s1 + $0x58] sm:$0xff] (!%p221_p10)   ;;  %s3226_s21 = scalar_lea.hbm (!%p221_p10), %s3388_s2, %s2384_s11  ;;  %s3242_s22 = scalar_lea.sflag (!%p221_p10), [#allocation4], %s252_s9 }
  0x12   : > { %v2678_v15 = vld [vmem:[%s3387_s1 + $0x60] sm:$0xff] (!%p221_p10)   ;;  %v2679_v16 = vld [vmem:[%s3387_s1 + $0x68] sm:$0xff] (!%p221_p10)   ;;  %v2680_v17 = vld [vmem:[%s3387_s1 + $0x70] sm:$0xff] (!%p221_p10)   ;;  %s2859_s29 = smov (!%p221_p10), [#allocation3]  }
  0x13   : > { %v2681_v18 = vld [vmem:[%s3387_s1 + $0x78] sm:$0xff] (!%p221_p10)   ;;  %s2782_s30 = sshll.u32 (!%p221_p10), %s2859_s29, 4  ;;  %s2783_s30 = int_to_ptr.vmem [resolvable:$false] %s2782_s30 }
  0x14   : > { %957 = vmatpush1.bf16.msra.mxu0 (!%p221_p10), %v2667_v2  ;;  %2593 = vmatpush1.bf16.msra.mxu1 (!%p221_p10), %v2667_v2 }
  0x15   : > { %958 = vmatprep.subr.bf16.mxu0 (!%p221_p10), %v2858_v1  ;;  %2578 = vmatprep.subr.bf16.mxu1 (!%p221_p10), %v2858_v1 }
  0x16   : > { %s3401_s5 = smov (!%p275_p11, %s2165_s5), 3135 }
  0x17   : > { %s2319_s12 = sshll.u32 %s3401_s5, 3  ;;  %s2784_s5 = scalar_lea.vmem %s2783_s30, 8192 }
  0x18   : > { %959 = vmatpush1.bf16.msra.mxu0 %v2668_v3  ;;  %2594 = vmatpush1.bf16.msra.mxu1 %v2668_v3  ;;  %s2969_s24 = scalar_lea.vmem %s3386_s0, %s2319_s12 }
  0x19   : > { %960 = vmatprep.subr.bf16.mxu0 %v2858_v1  ;;  %2579 = vmatprep.subr.bf16.mxu1 %v2858_v1  ;;  %v2684_v6 = vld [vmem:[%s2969_s24 + $0x4] ss:$8 sps:$4 sm:$0xff]   ;;  %v2682_v19 = vld [vmem:[%s2969_s24] ss:$8 sps:$4 sm:$0xff]   ;;  %v2685_v21 = vld [vmem:[%s2969_s24 + $0x14] ss:$8 sps:$4 sm:$0xff]  }
  0x1a   : > { %986 = vmatprep.mubr.bf16.mxu0 %v2684_v6  ;;  %v2708_v10 = vld [vmem:[%s2969_s24 + $0x104] ss:$8 sps:$4 sm:$0xff]   ;;  %v2706_v20 = vld [vmem:[%s2969_s24 + $0x100] ss:$8 sps:$4 sm:$0xff]   ;;  %v2712_v22 = vld [vmem:[%s2969_s24 + $0x114] ss:$8 sps:$4 sm:$0xff]  }
  0x1b   : > { %1114 = vmatprep.mubr.bf16.mxu1 %v2708_v10  ;;  %v2687_v23 = vld [vmem:[%s2969_s24 + $0x10] ss:$8 sps:$4 sm:$0xff]   ;;  %v2688_v25 = vld [vmem:[%s2969_s24 + $0x24] ss:$8 sps:$4 sm:$0xff]   ;;  %v2690_v27 = vld [vmem:[%s2969_s24 + $0x20] ss:$8 sps:$4 sm:$0xff]  }
  0x1c   : > { %961 = vmatpush1.bf16.msra.mxu0 %v2669_v4  ;;  %2595 = vmatpush1.bf16.msra.mxu1 %v2669_v4  ;;  %v2714_v24 = vld [vmem:[%s2969_s24 + $0x110] ss:$8 sps:$4 sm:$0xff]   ;;  %v2718_v26 = vld [vmem:[%s2969_s24 + $0x124] ss:$8 sps:$4 sm:$0xff]   ;;  %v2720_v28 = vld [vmem:[%s2969_s24 + $0x120] ss:$8 sps:$4 sm:$0xff]  }
  0x1d   : > { %962 = vmatprep.subr.bf16.mxu0 %v2858_v1  ;;  %2580 = vmatprep.subr.bf16.mxu1 %v2858_v1  ;;  %v2691_v29 = vld [vmem:[%s2969_s24 + $0x34] ss:$8 sps:$4 sm:$0xff]   ;;  %v2693_v31 = vld [vmem:[%s2969_s24 + $0x30] ss:$8 sps:$4 sm:$0xff]   ;;  %v2694_v33 = vld [vmem:[%s2969_s24 + $0x44] ss:$8 sps:$4 sm:$0xff]  }
  0x1e   : > { %v2724_v30 = vld [vmem:[%s2969_s24 + $0x134] ss:$8 sps:$4 sm:$0xff]   ;;  %v2726_v32 = vld [vmem:[%s2969_s24 + $0x130] ss:$8 sps:$4 sm:$0xff]   ;;  %v2730_v34 = vld [vmem:[%s2969_s24 + $0x144] ss:$8 sps:$4 sm:$0xff]  }
  0x1f   : > { %v2696_v35 = vld [vmem:[%s2969_s24 + $0x40] ss:$8 sps:$4 sm:$0xff]   ;;  %v2697_v37 = vld [vmem:[%s2969_s24 + $0x54] ss:$8 sps:$4 sm:$0xff]   ;;  %v2699_v39 = vld [vmem:[%s2969_s24 + $0x50] ss:$8 sps:$4 sm:$0xff]  }
  0x20   : > { %963 = vmatpush1.bf16.msra.mxu0 %v2670_v5  ;;  %2596 = vmatpush1.bf16.msra.mxu1 %v2670_v5  ;;  %v2732_v36 = vld [vmem:[%s2969_s24 + $0x140] ss:$8 sps:$4 sm:$0xff]   ;;  %v2736_v38 = vld [vmem:[%s2969_s24 + $0x154] ss:$8 sps:$4 sm:$0xff]   ;;  %v2738_v40 = vld [vmem:[%s2969_s24 + $0x150] ss:$8 sps:$4 sm:$0xff]  }
  0x21   : > { %964 = vmatprep.subr.bf16.mxu0 %v2858_v1  ;;  %2581 = vmatprep.subr.bf16.mxu1 %v2858_v1  ;;  %v2700_v41 = vld [vmem:[%s2969_s24 + $0x64] ss:$8 sps:$4 sm:$0xff]   ;;  %v2702_v43 = vld [vmem:[%s2969_s24 + $0x60] ss:$8 sps:$4 sm:$0xff]   ;;  %v2703_v45 = vld [vmem:[%s2969_s24 + $0x74] ss:$8 sps:$4 sm:$0xff]  }
  0x22   : > { %v2742_v42 = vld [vmem:[%s2969_s24 + $0x164] ss:$8 sps:$4 sm:$0xff]   ;;  %v2744_v44 = vld [vmem:[%s2969_s24 + $0x160] ss:$8 sps:$4 sm:$0xff]   ;;  %v2748_v46 = vld [vmem:[%s2969_s24 + $0x174] ss:$8 sps:$4 sm:$0xff]  }
  0x23   : > { %v2705_v47 = vld [vmem:[%s2969_s24 + $0x70] ss:$8 sps:$4 sm:$0xff]   ;;  %v2709_v49 = vld [vmem:[%s2969_s24 + $0x84] ss:$8 sps:$4 sm:$0xff]   ;;  %v2711_v51 = vld [vmem:[%s2969_s24 + $0x80] ss:$8 sps:$4 sm:$0xff]  }
  0x24   : > { %965 = vmatpush1.bf16.msra.mxu0 %v2671_v7  ;;  %2597 = vmatpush1.bf16.msra.mxu1 %v2671_v7  ;;  %v2750_v48 = vld [vmem:[%s2969_s24 + $0x170] ss:$8 sps:$4 sm:$0xff]   ;;  %v2754_v50 = vld [vmem:[%s2969_s24 + $0x184] ss:$8 sps:$4 sm:$0xff]   ;;  %v2756_v52 = vld [vmem:[%s2969_s24 + $0x180] ss:$8 sps:$4 sm:$0xff]  }
  0x25   : > { %966 = vmatprep.subr.bf16.mxu0 %v2858_v1  ;;  %2582 = vmatprep.subr.bf16.mxu1 %v2858_v1  ;;  %v2715_v53 = vld [vmem:[%s2969_s24 + $0x94] ss:$8 sps:$4 sm:$0xff]   ;;  %v2717_v55 = vld [vmem:[%s2969_s24 + $0x90] ss:$8 sps:$4 sm:$0xff]   ;;  %v2721_v57 = vld [vmem:[%s2969_s24 + $0xa4] ss:$8 sps:$4 sm:$0xff]  }
  0x26   : > { %v2757_v54 = vld [vmem:[%s2969_s24 + $0x194] ss:$8 sps:$4 sm:$0xff]   ;;  %v2759_v56 = vld [vmem:[%s2969_s24 + $0x190] ss:$8 sps:$4 sm:$0xff]   ;;  %v2760_v58 = vld [vmem:[%s2969_s24 + $0x1a4] ss:$8 sps:$4 sm:$0xff]  }
  0x27   : > { %v2723_v59 = vld [vmem:[%s2969_s24 + $0xa0] ss:$8 sps:$4 sm:$0xff]   ;;  %v2727_v61 = vld [vmem:[%s2969_s24 + $0xb4] ss:$8 sps:$4 sm:$0xff]   ;;  %v2729_v63 = vld [vmem:[%s2969_s24 + $0xb0] ss:$8 sps:$4 sm:$0xff]  }
  0x28   : > { %967 = vmatpush1.bf16.msra.mxu0 %v2672_v8  ;;  %2598 = vmatpush1.bf16.msra.mxu1 %v2672_v8  ;;  %v2762_v60 = vld [vmem:[%s2969_s24 + $0x1a0] ss:$8 sps:$4 sm:$0xff]   ;;  %v2763_v62 = vld [vmem:[%s2969_s24 + $0x1b4] ss:$8 sps:$4 sm:$0xff]   ;;  %v2765_v0 = vld [vmem:[%s2969_s24 + $0x1b0] ss:$8 sps:$4 sm:$0xff]  }
  0x29   : > { %968 = vmatprep.subr.bf16.mxu0 %v2858_v1  ;;  %2583 = vmatprep.subr.bf16.mxu1 %v2858_v1  ;;  %v2766_v2 = vld [vmem:[%s2969_s24 + $0x1c4] ss:$8 sps:$4 sm:$0xff]   ;;  %v2735_v3 = vld [vmem:[%s2969_s24 + $0xc0] ss:$8 sps:$4 sm:$0xff]   ;;  %v2739_v5 = vld [vmem:[%s2969_s24 + $0xd4] ss:$8 sps:$4 sm:$0xff]  }
  0x2a   : > { %v2768_v4 = vld [vmem:[%s2969_s24 + $0x1c0] ss:$8 sps:$4 sm:$0xff]   ;;  %v2769_v6 = vld [vmem:[%s2969_s24 + $0x1d4] ss:$8 sps:$4 sm:$0xff]   ;;  %v2741_v7 = vld [vmem:[%s2969_s24 + $0xd0] ss:$8 sps:$4 sm:$0xff]  }
  0x2b   : > { %v2771_v8 = vld [vmem:[%s2969_s24 + $0x1d0] ss:$8 sps:$4 sm:$0xff]   ;;  %v2772_v10 = vld [vmem:[%s2969_s24 + $0x1e4] ss:$8 sps:$4 sm:$0xff]  }
  0x2c   : > { %969 = vmatpush1.bf16.msra.mxu0 %v2673_v9  ;;  %2599 = vmatpush1.bf16.msra.mxu1 %v2673_v9  ;;  %v2745_v9 = vld [vmem:[%s2969_s24 + $0xe4] ss:$8 sps:$4 sm:$0xff]  }
  0x2d   : > { %970 = vmatprep.subr.bf16.mxu0 %v2858_v1  ;;  %2584 = vmatprep.subr.bf16.mxu1 %v2858_v1 }
  0x30   : > { %971 = vmatpush1.bf16.msra.mxu0 %v2674_v11  ;;  %2600 = vmatpush1.bf16.msra.mxu1 %v2674_v11  ;;  %v2747_v11 = vld [vmem:[%s2969_s24 + $0xe0] ss:$8 sps:$4 sm:$0xff]  }
  0x31   : > { %972 = vmatprep.subr.bf16.mxu0 %v2858_v1  ;;  %2585 = vmatprep.subr.bf16.mxu1 %v2858_v1 }
  0x34   : > { %973 = vmatpush1.bf16.msra.mxu0 %v2675_v12  ;;  %2601 = vmatpush1.bf16.msra.mxu1 %v2675_v12  ;;  %v2774_v12 = vld [vmem:[%s2969_s24 + $0x1e0] ss:$8 sps:$4 sm:$0xff]  }
  0x35   : > { %974 = vmatprep.subr.bf16.mxu0 %v2858_v1  ;;  %2586 = vmatprep.subr.bf16.mxu1 %v2858_v1 }
  0x38   : > { %975 = vmatpush1.bf16.msra.mxu0 %v2676_v13  ;;  %2602 = vmatpush1.bf16.msra.mxu1 %v2676_v13  ;;  %v2751_v13 = vld [vmem:[%s2969_s24 + $0xf4] ss:$8 sps:$4 sm:$0xff]  }
  0x39   : > { %976 = vmatprep.subr.bf16.mxu0 %v2858_v1  ;;  %2587 = vmatprep.subr.bf16.mxu1 %v2858_v1 }
  0x3c   : > { %977 = vmatpush1.bf16.msra.mxu0 %v2677_v14  ;;  %2603 = vmatpush1.bf16.msra.mxu1 %v2677_v14  ;;  %v2775_v14 = vld [vmem:[%s2969_s24 + $0x1f4] ss:$8 sps:$4 sm:$0xff]  }
  0x3d   : > { %978 = vmatprep.subr.bf16.mxu0 %v2858_v1  ;;  %2588 = vmatprep.subr.bf16.mxu1 %v2858_v1 }
  0x40   : > { %979 = vmatpush1.bf16.msra.mxu0 %v2678_v15  ;;  %2604 = vmatpush1.bf16.msra.mxu1 %v2678_v15  ;;  %v2753_v15 = vld [vmem:[%s2969_s24 + $0xf0] ss:$8 sps:$4 sm:$0xff]  }
  0x41   : > { %980 = vmatprep.subr.bf16.mxu0 %v2858_v1  ;;  %2589 = vmatprep.subr.bf16.mxu1 %v2858_v1 }
  0x44   : > { %981 = vmatpush1.bf16.msra.mxu0 %v2679_v16  ;;  %2605 = vmatpush1.bf16.msra.mxu1 %v2679_v16  ;;  %v2777_v16 = vld [vmem:[%s2969_s24 + $0x1f0] ss:$8 sps:$4 sm:$0xff]  }
  0x45   : > { %982 = vmatprep.subr.bf16.mxu0 %v2858_v1  ;;  %2590 = vmatprep.subr.bf16.mxu1 %v2858_v1 }
  0x48   : > { %983 = vmatpush1.bf16.msra.mxu0 %v2680_v17  ;;  %2606 = vmatpush1.bf16.msra.mxu1 %v2680_v17 }
  0x49   : > { %984 = vmatprep.subr.bf16.mxu0 %v2858_v1  ;;  %2591 = vmatprep.subr.bf16.mxu1 %v2858_v1  ;;  %v2733_v1 = vld [vmem:[%s2969_s24 + $0xc4] ss:$8 sps:$4 sm:$0xff]   ;;  %s3101_s24 = scalar_lea.vmem [#allocation3], %s2164_s10 }
  0x4a   : > { %s1991_s12 = sshll.u32 %s3101_s24, 4  ;;  %s3228_s12 = int_to_ptr.vmem [resolvable:$true] %s1991_s12 }
  0x4b   : > { %s2778_s26 = scalar_lea.vmem %s3228_s12, 4096  ;;  %p2785_p1 = scmp.lt.s32.totalorder %s3228_s12, %s2783_s30 }
  0x4c   : > { %985 = vmatpush1.bf16.msra.mxu0 %v2681_v18  ;;  %2607 = vmatpush1.bf16.msra.mxu1 %v2681_v18  ;;  %p2779_p12 = scmp.ne.s32.totalorder %s3228_s12, %s2778_s26  ;;  %p2786_p2 = scmp.lt.s32.totalorder %s2784_s5, %s2778_s26 }
  0x4e   : > { %p2780_p13 = pnand %p2779_p12, %p2927_p4  ;;  %p2787_p3 = por %p2786_p2, %p2785_p1 }
  0x4f   : > { %987 = vmatmul.mubr.bf16.vlgmr.msra.gmra.mrb[0].mxu0 %v2682_v19  ;;  %1115 = vmatmul.mubr.bf16.vlgmr.msra.gmra.mrb[0].mxu1 %v2706_v20 }
  0x50   : > { %994 = vmatprep.mubr.bf16.mxu0 %v2685_v21  ;;  %1122 = vmatprep.mubr.bf16.mxu1 %v2712_v22  ;;  %p2781_p0 = pneg %p2780_p13 }
  0x52   : > { %p2788_p5 = pnand %p2787_p3, %p2781_p0 }
  0x57   : > { %995 = vmatmul.mubr.bf16.gmra.mrb[4].mxu0 %v2687_v23  ;;  %1123 = vmatmul.mubr.bf16.gmra.mrb[4].mxu1 %v2714_v24 }
  0x58   : > { %1002 = vmatprep.mubr.bf16.mxu0 %v2688_v25  ;;  %1130 = vmatprep.mubr.bf16.mxu1 %v2718_v26 }
  0x5f   : > { %1003 = vmatmul.mubr.bf16.gmra.mrb[8].mxu0 %v2690_v27  ;;  %1131 = vmatmul.mubr.bf16.gmra.mrb[8].mxu1 %v2720_v28 }
  0x60   : > { %1010 = vmatprep.mubr.bf16.mxu0 %v2691_v29  ;;  %1138 = vmatprep.mubr.bf16.mxu1 %v2724_v30 }
  0x67   : > { %1011 = vmatmul.mubr.bf16.gmra.mrb[12].mxu0 %v2693_v31  ;;  %1139 = vmatmul.mubr.bf16.gmra.mrb[12].mxu1 %v2726_v32 }
  0x68   : > { %1018 = vmatprep.mubr.bf16.mxu0 %v2694_v33  ;;  %1146 = vmatprep.mubr.bf16.mxu1 %v2730_v34 }
  0x6f   : > { %1019 = vmatmul.mubr.bf16.gmra.mrb[16].mxu0 %v2696_v35  ;;  %1147 = vmatmul.mubr.bf16.gmra.mrb[16].mxu1 %v2732_v36 }
  0x70   : > { %1026 = vmatprep.mubr.bf16.mxu0 %v2697_v37  ;;  %1154 = vmatprep.mubr.bf16.mxu1 %v2736_v38 }
  0x77   : > { %1027 = vmatmul.mubr.bf16.gmra.mrb[20].mxu0 %v2699_v39  ;;  %1155 = vmatmul.mubr.bf16.gmra.mrb[20].mxu1 %v2738_v40 }
  0x78   : > { %1034 = vmatprep.mubr.bf16.mxu0 %v2700_v41  ;;  %1162 = vmatprep.mubr.bf16.mxu1 %v2742_v42 }
  0x7f   : > { %1035 = vmatmul.mubr.bf16.gmra.mrb[24].mxu0 %v2702_v43  ;;  %1163 = vmatmul.mubr.bf16.gmra.mrb[24].mxu1 %v2744_v44 }
  0x80   : > { %1042 = vmatprep.mubr.bf16.mxu0 %v2703_v45  ;;  %1170 = vmatprep.mubr.bf16.mxu1 %v2748_v46 }
  0x87   : > { %1043 = vmatmul.mubr.bf16.gmra.mrb[28].mxu0 %v2705_v47  ;;  %1171 = vmatmul.mubr.bf16.gmra.mrb[28].mxu1 %v2750_v48 }
  0x88   : > { %1050 = vmatprep.mubr.bf16.mxu0 %v2709_v49  ;;  %1178 = vmatprep.mubr.bf16.mxu1 %v2754_v50 }
  0x8f   : > { %1051 = vmatmul.mubr.bf16.gmra.mrb[32].mxu0 %v2711_v51  ;;  %1179 = vmatmul.mubr.bf16.gmra.mrb[32].mxu1 %v2756_v52 }
  0x90   : > { %1058 = vmatprep.mubr.bf16.mxu0 %v2715_v53  ;;  %1186 = vmatprep.mubr.bf16.mxu1 %v2757_v54 }
  0x97   : > { %1059 = vmatmul.mubr.bf16.gmra.mrb[36].mxu0 %v2717_v55  ;;  %1187 = vmatmul.mubr.bf16.gmra.mrb[36].mxu1 %v2759_v56 }
  0x98   : > { %1066 = vmatprep.mubr.bf16.mxu0 %v2721_v57  ;;  %1194 = vmatprep.mubr.bf16.mxu1 %v2760_v58 }
  0x9f   : > { %1067 = vmatmul.mubr.bf16.gmra.mrb[40].mxu0 %v2723_v59  ;;  %1195 = vmatmul.mubr.bf16.gmra.mrb[40].mxu1 %v2762_v60 }
  0xa0   : > { %1074 = vmatprep.mubr.bf16.mxu0 %v2727_v61  ;;  %1202 = vmatprep.mubr.bf16.mxu1 %v2763_v62 }
  0xa7   : > { %1075 = vmatmul.mubr.bf16.gmra.mrb[44].mxu0 %v2729_v63  ;;  %1203 = vmatmul.mubr.bf16.gmra.mrb[44].mxu1 %v2765_v0 }
  0xa8   : > { %1082 = vmatprep.mubr.bf16.mxu0 %v2733_v1  ;;  %1210 = vmatprep.mubr.bf16.mxu1 %v2766_v2 }
  0xaf   : > { %1083 = vmatmul.mubr.bf16.gmra.mrb[48].mxu0 %v2735_v3  ;;  %1211 = vmatmul.mubr.bf16.gmra.mrb[48].mxu1 %v2768_v4 }
  0xb0   : > { %1090 = vmatprep.mubr.bf16.mxu0 %v2739_v5  ;;  %1218 = vmatprep.mubr.bf16.mxu1 %v2769_v6 }
  0xb7   : > { %1091 = vmatmul.mubr.bf16.gmra.mrb[52].mxu0 %v2741_v7  ;;  %1219 = vmatmul.mubr.bf16.gmra.mrb[52].mxu1 %v2771_v8 }
  0xb8   : > { %1098 = vmatprep.mubr.bf16.mxu0 %v2745_v9  ;;  %1226 = vmatprep.mubr.bf16.mxu1 %v2772_v10 }
  0xbf   : > { %1099 = vmatmul.mubr.bf16.gmra.mrb[56].mxu0 %v2747_v11  ;;  %1227 = vmatmul.mubr.bf16.gmra.mrb[56].mxu1 %v2774_v12 }
  0xc0   : > { %1106 = vmatprep.mubr.bf16.mxu0 %v2751_v13  ;;  %1234 = vmatprep.mubr.bf16.mxu1 %v2775_v14 }
  0xc7   : > { %1107 = vmatmul.mubr.bf16.gmra.mrb[60].mxu0 %v2753_v15  ;;  %1235 = vmatmul.mubr.bf16.gmra.mrb[60].mxu1 %v2777_v16 }
 0x122   : > { %v988_v17 = vpop.f32.mrb[0].mxu0  ;;  %v3095_v18 = vpop.f32.mrb[0].mxu1 }
 0x123   : > { %v990_v19 = vpop.f32.mrb[1].mxu0  ;;  %v1118_v20 = vpop.f32.mrb[1].mxu1  ;;  %v1828_v21 = vmul.f32 %v988_v17, %v988_v17 }
 0x124   : > { %v991_v22 = vpop.f32.mrb[2].mxu0  ;;  %v3097_v23 = vpop.f32.mrb[2].mxu1 }
 0x125   : > { %v2388_v24 = vpack.c.bf16 %v991_v22, %v988_v17  ;;  %v1758_v25 = vadd.f32 %v991_v22, %v988_v17  ;;  %v1829_v26 = vmul.f32 %v991_v22, %v991_v22  ;;  %v993_v27 = vpop.f32.mrb[3].mxu0  ;;  %v2468_v28 = vpack.c.bf16 %v3097_v23, %v3095_v18  ;;  %v1121_v29 = vpop.f32.mrb[3].mxu1 }
 0x127   : > { %2389 = vst [vmem:[%s3101_s24] sm:$0xff] %v2388_v24   ;;  %v1892_v30 = vadd.f32 %v1829_v26, %v1828_v21  ;;  %2560 = vst [vmem:[%s3101_s24 + $0x80] sm:$0xff] %v2468_v28  }
 0x12a   : > { %v996_v31 = vpop.f32.mrb[4].mxu0  ;;  %v3105_v32 = vpop.f32.mrb[4].mxu1 }
 0x12b   : > { %v1759_v33 = vadd.f32 %v1758_v25, %v996_v31  ;;  %v1830_v34 = vmul.f32 %v996_v31, %v996_v31  ;;  %v998_v35 = vpop.f32.mrb[5].mxu0  ;;  %v1126_v36 = vpop.f32.mrb[5].mxu1 }
 0x12c   : > { %v999_v37 = vpop.f32.mrb[6].mxu0  ;;  %v3107_v38 = vpop.f32.mrb[6].mxu1 }
 0x12d   : > { %v1893_v39 = vadd.f32 %v1892_v30, %v1830_v34  ;;  %v2393_v40 = vpack.c.bf16 %v999_v37, %v996_v31  ;;  %v1760_v41 = vadd.f32 %v1759_v33, %v999_v37  ;;  %v1831_v42 = vmul.f32 %v999_v37, %v999_v37  ;;  %v1001_v43 = vpop.f32.mrb[7].mxu0  ;;  %v1129_v44 = vpop.f32.mrb[7].mxu1 }
 0x12e   : > { %v2473_v45 = vpack.c.bf16 %v3107_v38, %v3105_v32 }
 0x12f   : > { %2545 = vst [vmem:[%s3101_s24 + $0x8] sm:$0xff] %v2393_v40   ;;  %v1894_v46 = vadd.f32 %v1893_v39, %v1831_v42 }
 0x130   : > { %2561 = vst [vmem:[%s3101_s24 + $0x88] sm:$0xff] %v2473_v45  }
 0x132   : > { %v1004_v47 = vpop.f32.mrb[8].mxu0  ;;  %v3113_v48 = vpop.f32.mrb[8].mxu1 }
 0x133   : > { %v1761_v49 = vadd.f32 %v1760_v41, %v1004_v47  ;;  %v1832_v50 = vmul.f32 %v1004_v47, %v1004_v47  ;;  %v1006_v51 = vpop.f32.mrb[9].mxu0  ;;  %v1134_v52 = vpop.f32.mrb[9].mxu1 }
 0x134   : > { %v1007_v53 = vpop.f32.mrb[10].mxu0  ;;  %v3115_v54 = vpop.f32.mrb[10].mxu1 }
 0x135   : > { %v1895_v55 = vadd.f32 %v1894_v46, %v1832_v50  ;;  %v2398_v56 = vpack.c.bf16 %v1007_v53, %v1004_v47  ;;  %v1762_v57 = vadd.f32 %v1761_v49, %v1007_v53  ;;  %v1833_v58 = vmul.f32 %v1007_v53, %v1007_v53  ;;  %v1009_v59 = vpop.f32.mrb[11].mxu0  ;;  %v1137_v60 = vpop.f32.mrb[11].mxu1 }
 0x136   : > { %v2478_v61 = vpack.c.bf16 %v3115_v54, %v3113_v48 }
 0x137   : > { %2546 = vst [vmem:[%s3101_s24 + $0x10] sm:$0xff] %v2398_v56   ;;  %v1896_v62 = vadd.f32 %v1895_v55, %v1833_v58 }
 0x138   : > { %2562 = vst [vmem:[%s3101_s24 + $0x90] sm:$0xff] %v2478_v61  }
 0x13a   : > { %v1012_v63 = vpop.f32.mrb[12].mxu0  ;;  %v3121_v0 = vpop.f32.mrb[12].mxu1 }
 0x13b   : > { %v1763_v1 = vadd.f32 %v1762_v57, %v1012_v63  ;;  %v1834_v2 = vmul.f32 %v1012_v63, %v1012_v63  ;;  %v1014_v3 = vpop.f32.mrb[13].mxu0  ;;  %v1142_v4 = vpop.f32.mrb[13].mxu1 }
 0x13c   : > { %v1015_v5 = vpop.f32.mrb[14].mxu0  ;;  %v3123_v6 = vpop.f32.mrb[14].mxu1 }
 0x13d   : > { %v1897_v7 = vadd.f32 %v1896_v62, %v1834_v2  ;;  %v2403_v8 = vpack.c.bf16 %v1015_v5, %v1012_v63  ;;  %v1764_v9 = vadd.f32 %v1763_v1, %v1015_v5  ;;  %v1835_v10 = vmul.f32 %v1015_v5, %v1015_v5  ;;  %v1017_v11 = vpop.f32.mrb[15].mxu0  ;;  %v1145_v12 = vpop.f32.mrb[15].mxu1 }
 0x13e   : > { %v2483_v13 = vpack.c.bf16 %v3123_v6, %v3121_v0 }
 0x13f   : > { %2547 = vst [vmem:[%s3101_s24 + $0x18] sm:$0xff] %v2403_v8   ;;  %v1898_v14 = vadd.f32 %v1897_v7, %v1835_v10 }
 0x140   : > { %2563 = vst [vmem:[%s3101_s24 + $0x98] sm:$0xff] %v2483_v13  }
 0x142   : > { %v1020_v15 = vpop.f32.mrb[16].mxu0  ;;  %v3129_v16 = vpop.f32.mrb[16].mxu1 }
 0x143   : > { %v1765_v17 = vadd.f32 %v1764_v9, %v1020_v15  ;;  %v1836_v19 = vmul.f32 %v1020_v15, %v1020_v15  ;;  %v1022_v20 = vpop.f32.mrb[17].mxu0  ;;  %v1150_v21 = vpop.f32.mrb[17].mxu1 }
 0x144   : > { %v1023_v22 = vpop.f32.mrb[18].mxu0  ;;  %v3131_v24 = vpop.f32.mrb[18].mxu1 }
 0x145   : > { %v1899_v25 = vadd.f32 %v1898_v14, %v1836_v19  ;;  %v2408_v26 = vpack.c.bf16 %v1023_v22, %v1020_v15  ;;  %v1766_v27 = vadd.f32 %v1765_v17, %v1023_v22  ;;  %v1837_v28 = vmul.f32 %v1023_v22, %v1023_v22  ;;  %v1025_v29 = vpop.f32.mrb[19].mxu0  ;;  %v1153_v30 = vpop.f32.mrb[19].mxu1 }
 0x146   : > { %v2488_v31 = vpack.c.bf16 %v3131_v24, %v3129_v16 }
 0x147   : > { %2548 = vst [vmem:[%s3101_s24 + $0x20] sm:$0xff] %v2408_v26   ;;  %v1900_v33 = vadd.f32 %v1899_v25, %v1837_v28 }
 0x148   : > { %2564 = vst [vmem:[%s3101_s24 + $0xa0] sm:$0xff] %v2488_v31  }
 0x14a   : > { %v1028_v34 = vpop.f32.mrb[20].mxu0  ;;  %v3137_v35 = vpop.f32.mrb[20].mxu1 }
 0x14b   : > { %v1767_v36 = vadd.f32 %v1766_v27, %v1028_v34  ;;  %v1838_v37 = vmul.f32 %v1028_v34, %v1028_v34  ;;  %v1030_v39 = vpop.f32.mrb[21].mxu0  ;;  %v1158_v40 = vpop.f32.mrb[21].mxu1 }
 0x14c   : > { %v1031_v41 = vpop.f32.mrb[22].mxu0  ;;  %v3139_v42 = vpop.f32.mrb[22].mxu1 }
 0x14d   : > { %v1901_v43 = vadd.f32 %v1900_v33, %v1838_v37  ;;  %v2413_v44 = vpack.c.bf16 %v1031_v41, %v1028_v34  ;;  %v1768_v45 = vadd.f32 %v1767_v36, %v1031_v41  ;;  %v1839_v46 = vmul.f32 %v1031_v41, %v1031_v41  ;;  %v1033_v47 = vpop.f32.mrb[23].mxu0  ;;  %v1161_v49 = vpop.f32.mrb[23].mxu1 }
 0x14e   : > { %v2493_v50 = vpack.c.bf16 %v3139_v42, %v3137_v35 }
 0x14f   : > { %2549 = vst [vmem:[%s3101_s24 + $0x28] sm:$0xff] %v2413_v44   ;;  %v1902_v51 = vadd.f32 %v1901_v43, %v1839_v46 }
 0x150   : > { %2565 = vst [vmem:[%s3101_s24 + $0xa8] sm:$0xff] %v2493_v50  }
 0x152   : > { %v1036_v52 = vpop.f32.mrb[24].mxu0  ;;  %v3145_v53 = vpop.f32.mrb[24].mxu1 }
 0x153   : > { %v1769_v55 = vadd.f32 %v1768_v45, %v1036_v52  ;;  %v1840_v56 = vmul.f32 %v1036_v52, %v1036_v52  ;;  %v1038_v57 = vpop.f32.mrb[25].mxu0  ;;  %v1166_v58 = vpop.f32.mrb[25].mxu1 }
 0x154   : > { %v1039_v59 = vpop.f32.mrb[26].mxu0  ;;  %v3147_v60 = vpop.f32.mrb[26].mxu1 }
 0x155   : > { %v1903_v61 = vadd.f32 %v1902_v51, %v1840_v56  ;;  %v2418_v62 = vpack.c.bf16 %v1039_v59, %v1036_v52  ;;  %v1770_v63 = vadd.f32 %v1769_v55, %v1039_v59  ;;  %v1841_v1 = vmul.f32 %v1039_v59, %v1039_v59  ;;  %v1041_v2 = vpop.f32.mrb[27].mxu0  ;;  %v1169_v3 = vpop.f32.mrb[27].mxu1 }
 0x156   : > { %v2498_v4 = vpack.c.bf16 %v3147_v60, %v3145_v53 }
 0x157   : > { %2550 = vst [vmem:[%s3101_s24 + $0x30] sm:$0xff] %v2418_v62   ;;  %v1904_v5 = vadd.f32 %v1903_v61, %v1841_v1 }
 0x158   : > { %2566 = vst [vmem:[%s3101_s24 + $0xb0] sm:$0xff] %v2498_v4  }
 0x15a   : > { %v1044_v7 = vpop.f32.mrb[28].mxu0  ;;  %v3153_v8 = vpop.f32.mrb[28].mxu1 }
 0x15b   : > { %v1771_v9 = vadd.f32 %v1770_v63, %v1044_v7  ;;  %v1842_v10 = vmul.f32 %v1044_v7, %v1044_v7  ;;  %v1046_v11 = vpop.f32.mrb[29].mxu0  ;;  %v1174_v12 = vpop.f32.mrb[29].mxu1 }
 0x15c   : > { %v1047_v13 = vpop.f32.mrb[30].mxu0  ;;  %v3155_v14 = vpop.f32.mrb[30].mxu1 }
 0x15d   : > { %v1905_v15 = vadd.f32 %v1904_v5, %v1842_v10  ;;  %v2423_v17 = vpack.c.bf16 %v1047_v13, %v1044_v7  ;;  %v1772_v19 = vadd.f32 %v1771_v9, %v1047_v13  ;;  %v1843_v20 = vmul.f32 %v1047_v13, %v1047_v13  ;;  %v1049_v21 = vpop.f32.mrb[31].mxu0  ;;  %v1177_v22 = vpop.f32.mrb[31].mxu1 }
 0x15e   : > { %v2503_v25 = vpack.c.bf16 %v3155_v14, %v3153_v8 }
 0x15f   : > { %2551 = vst [vmem:[%s3101_s24 + $0x38] sm:$0xff] %v2423_v17   ;;  %v1906_v26 = vadd.f32 %v1905_v15, %v1843_v20 }
 0x160   : > { %2567 = vst [vmem:[%s3101_s24 + $0xb8] sm:$0xff] %v2503_v25  }
 0x162   : > { %v1052_v27 = vpop.f32.mrb[32].mxu0  ;;  %v3161_v28 = vpop.f32.mrb[32].mxu1 }
 0x163   : > { %v1773_v29 = vadd.f32 %v1772_v19, %v1052_v27  ;;  %v1844_v30 = vmul.f32 %v1052_v27, %v1052_v27  ;;  %v1054_v31 = vpop.f32.mrb[33].mxu0  ;;  %v1182_v33 = vpop.f32.mrb[33].mxu1 }
 0x164   : > { %v1055_v34 = vpop.f32.mrb[34].mxu0  ;;  %v3163_v36 = vpop.f32.mrb[34].mxu1 }
 0x165   : > { %v1907_v37 = vadd.f32 %v1906_v26, %v1844_v30  ;;  %v2428_v39 = vpack.c.bf16 %v1055_v34, %v1052_v27  ;;  %v1774_v40 = vadd.f32 %v1773_v29, %v1055_v34  ;;  %v1845_v41 = vmul.f32 %v1055_v34, %v1055_v34  ;;  %v1057_v43 = vpop.f32.mrb[35].mxu0  ;;  %v1185_v44 = vpop.f32.mrb[35].mxu1 }
 0x166   : > { %v2508_v45 = vpack.c.bf16 %v3163_v36, %v3161_v28 }
 0x167   : > { %2552 = vst [vmem:[%s3101_s24 + $0x40] sm:$0xff] %v2428_v39   ;;  %v1908_v46 = vadd.f32 %v1907_v37, %v1845_v41 }
 0x168   : > { %2568 = vst [vmem:[%s3101_s24 + $0xc0] sm:$0xff] %v2508_v45  }
 0x16a   : > { %v1060_v47 = vpop.f32.mrb[36].mxu0  ;;  %v3169_v49 = vpop.f32.mrb[36].mxu1 }
 0x16b   : > { %v1775_v50 = vadd.f32 %v1774_v40, %v1060_v47  ;;  %v1846_v51 = vmul.f32 %v1060_v47, %v1060_v47  ;;  %v1062_v52 = vpop.f32.mrb[37].mxu0  ;;  %v1190_v55 = vpop.f32.mrb[37].mxu1 }
 0x16c   : > { %v1063_v56 = vpop.f32.mrb[38].mxu0  ;;  %v3171_v57 = vpop.f32.mrb[38].mxu1 }
 0x16d   : > { %v1909_v58 = vadd.f32 %v1908_v46, %v1846_v51  ;;  %v2433_v59 = vpack.c.bf16 %v1063_v56, %v1060_v47  ;;  %v1776_v61 = vadd.f32 %v1775_v50, %v1063_v56  ;;  %v1847_v62 = vmul.f32 %v1063_v56, %v1063_v56  ;;  %v1065_v63 = vpop.f32.mrb[39].mxu0  ;;  %v1193_v1 = vpop.f32.mrb[39].mxu1 }
 0x16e   : > { %v2513_v2 = vpack.c.bf16 %v3171_v57, %v3169_v49 }
 0x16f   : > { %2553 = vst [vmem:[%s3101_s24 + $0x48] sm:$0xff] %v2433_v59   ;;  %v1910_v3 = vadd.f32 %v1909_v58, %v1847_v62 }
 0x170   : > { %2569 = vst [vmem:[%s3101_s24 + $0xc8] sm:$0xff] %v2513_v2  }
 0x172   : > { %v1068_v4 = vpop.f32.mrb[40].mxu0  ;;  %v3177_v5 = vpop.f32.mrb[40].mxu1 }
 0x173   : > { %v1777_v7 = vadd.f32 %v1776_v61, %v1068_v4  ;;  %v1848_v9 = vmul.f32 %v1068_v4, %v1068_v4  ;;  %v1070_v10 = vpop.f32.mrb[41].mxu0  ;;  %v1198_v11 = vpop.f32.mrb[41].mxu1 }
 0x174   : > { %v1071_v12 = vpop.f32.mrb[42].mxu0  ;;  %v3179_v13 = vpop.f32.mrb[42].mxu1 }
 0x175   : > { %v1911_v15 = vadd.f32 %v1910_v3, %v1848_v9  ;;  %v2438_v17 = vpack.c.bf16 %v1071_v12, %v1068_v4  ;;  %v1778_v19 = vadd.f32 %v1777_v7, %v1071_v12  ;;  %v1849_v20 = vmul.f32 %v1071_v12, %v1071_v12  ;;  %v1073_v21 = vpop.f32.mrb[43].mxu0  ;;  %v1201_v22 = vpop.f32.mrb[43].mxu1 }
 0x176   : > { %v2518_v25 = vpack.c.bf16 %v3179_v13, %v3177_v5 }
 0x177   : > { %2554 = vst [vmem:[%s3101_s24 + $0x50] sm:$0xff] %v2438_v17   ;;  %v1912_v26 = vadd.f32 %v1911_v15, %v1849_v20 }
 0x178   : > { %2570 = vst [vmem:[%s3101_s24 + $0xd0] sm:$0xff] %v2518_v25  }
 0x17a   : > { %v1076_v27 = vpop.f32.mrb[44].mxu0  ;;  %v3185_v29 = vpop.f32.mrb[44].mxu1 }
 0x17b   : > { %v1779_v30 = vadd.f32 %v1778_v19, %v1076_v27  ;;  %v1850_v31 = vmul.f32 %v1076_v27, %v1076_v27  ;;  %v1078_v33 = vpop.f32.mrb[45].mxu0  ;;  %v1206_v34 = vpop.f32.mrb[45].mxu1 }
 0x17c   : > { %v1079_v37 = vpop.f32.mrb[46].mxu0  ;;  %v3187_v39 = vpop.f32.mrb[46].mxu1 }
 0x17d   : > { %v1913_v40 = vadd.f32 %v1912_v26, %v1850_v31  ;;  %v2443_v41 = vpack.c.bf16 %v1079_v37, %v1076_v27  ;;  %v1780_v43 = vadd.f32 %v1779_v30, %v1079_v37  ;;  %v1851_v44 = vmul.f32 %v1079_v37, %v1079_v37  ;;  %v1081_v45 = vpop.f32.mrb[47].mxu0  ;;  %v1209_v46 = vpop.f32.mrb[47].mxu1 }
 0x17e   : > { %v2523_v47 = vpack.c.bf16 %v3187_v39, %v3185_v29 }
 0x17f   : > { %2555 = vst [vmem:[%s3101_s24 + $0x58] sm:$0xff] %v2443_v41   ;;  %v1914_v50 = vadd.f32 %v1913_v40, %v1851_v44 }
 0x180   : > { %2571 = vst [vmem:[%s3101_s24 + $0xd8] sm:$0xff] %v2523_v47  }
 0x182   : > { %v1084_v51 = vpop.f32.mrb[48].mxu0  ;;  %v3193_v52 = vpop.f32.mrb[48].mxu1 }
 0x183   : > { %v1781_v55 = vadd.f32 %v1780_v43, %v1084_v51  ;;  %v1852_v56 = vmul.f32 %v1084_v51, %v1084_v51  ;;  %v1086_v58 = vpop.f32.mrb[49].mxu0  ;;  %v1214_v59 = vpop.f32.mrb[49].mxu1 }
 0x184   : > { %v1087_v61 = vpop.f32.mrb[50].mxu0  ;;  %v3195_v62 = vpop.f32.mrb[50].mxu1 }
 0x185   : > { %v1915_v63 = vadd.f32 %v1914_v50, %v1852_v56  ;;  %v2448_v1 = vpack.c.bf16 %v1087_v61, %v1084_v51  ;;  %v1782_v2 = vadd.f32 %v1781_v55, %v1087_v61  ;;  %v1853_v3 = vmul.f32 %v1087_v61, %v1087_v61  ;;  %v1089_v4 = vpop.f32.mrb[51].mxu0  ;;  %v1217_v7 = vpop.f32.mrb[51].mxu1 }
 0x186   : > { %v2528_v9 = vpack.c.bf16 %v3195_v62, %v3193_v52 }
 0x187   : > { %2556 = vst [vmem:[%s3101_s24 + $0x60] sm:$0xff] %v2448_v1   ;;  %v1916_v10 = vadd.f32 %v1915_v63, %v1853_v3 }
 0x188   : > { %2572 = vst [vmem:[%s3101_s24 + $0xe0] sm:$0xff] %v2528_v9  }
 0x18a   : > { %v1092_v11 = vpop.f32.mrb[52].mxu0  ;;  %v3201_v12 = vpop.f32.mrb[52].mxu1 }
 0x18b   : > { %v1783_v15 = vadd.f32 %v1782_v2, %v1092_v11  ;;  %v1854_v17 = vmul.f32 %v1092_v11, %v1092_v11  ;;  %v1094_v19 = vpop.f32.mrb[53].mxu0  ;;  %v1222_v20 = vpop.f32.mrb[53].mxu1 }
 0x18c   : > { %v1095_v21 = vpop.f32.mrb[54].mxu0  ;;  %v3203_v22 = vpop.f32.mrb[54].mxu1 }
 0x18d   : > { %v1917_v25 = vadd.f32 %v1916_v10, %v1854_v17  ;;  %v2453_v26 = vpack.c.bf16 %v1095_v21, %v1092_v11  ;;  %v1784_v27 = vadd.f32 %v1783_v15, %v1095_v21  ;;  %v1855_v30 = vmul.f32 %v1095_v21, %v1095_v21  ;;  %v1097_v31 = vpop.f32.mrb[55].mxu0  ;;  %v1225_v33 = vpop.f32.mrb[55].mxu1 }
 0x18e   : > { %v2533_v34 = vpack.c.bf16 %v3203_v22, %v3201_v12 }
 0x18f   : > { %2557 = vst [vmem:[%s3101_s24 + $0x68] sm:$0xff] %v2453_v26   ;;  %v1918_v37 = vadd.f32 %v1917_v25, %v1855_v30  ;;  %v1860_v30 = vmul.f32 %v3095_v18, %v3095_v18 }
 0x190   : > { %2573 = vst [vmem:[%s3101_s24 + $0xe8] sm:$0xff] %v2533_v34   ;;  %v1861_v34 = vmul.f32 %v3097_v23, %v3097_v23 }
 0x192   : > { %v1100_v40 = vpop.f32.mrb[56].mxu0  ;;  %v3209_v41 = vpop.f32.mrb[56].mxu1 }
 0x193   : > { %v1785_v43 = vadd.f32 %v1784_v27, %v1100_v40  ;;  %v1856_v44 = vmul.f32 %v1100_v40, %v1100_v40  ;;  %v1102_v45 = vpop.f32.mrb[57].mxu0  ;;  %v1230_v46 = vpop.f32.mrb[57].mxu1 }
 0x194   : > { %v1103_v47 = vpop.f32.mrb[58].mxu0  ;;  %v3211_v50 = vpop.f32.mrb[58].mxu1 }
 0x195   : > { %v1919_v51 = vadd.f32 %v1918_v37, %v1856_v44  ;;  %v2458_v55 = vpack.c.bf16 %v1103_v47, %v1100_v40  ;;  %v1786_v56 = vadd.f32 %v1785_v43, %v1103_v47  ;;  %v1857_v58 = vmul.f32 %v1103_v47, %v1103_v47  ;;  %v1105_v59 = vpop.f32.mrb[59].mxu0  ;;  %v1233_v61 = vpop.f32.mrb[59].mxu1 }
 0x196   : > { %v2538_v63 = vpack.c.bf16 %v3211_v50, %v3209_v41 }
 0x197   : > { %2558 = vst [vmem:[%s3101_s24 + $0x70] sm:$0xff] %v2458_v55   ;;  %v1920_v1 = vadd.f32 %v1919_v51, %v1857_v58 }
 0x198   : > { %2574 = vst [vmem:[%s3101_s24 + $0xf0] sm:$0xff] %v2538_v63  }
 0x19a   : > { %v1108_v2 = vpop.f32.mrb[60].mxu0  ;;  %v3217_v3 = vpop.f32.mrb[60].mxu1 }
 0x19b   : > { %v1787_v4 = vadd.f32 %v1786_v56, %v1108_v2  ;;  %v1858_v7 = vmul.f32 %v1108_v2, %v1108_v2  ;;  %v1110_v9 = vpop.f32.mrb[61].mxu0  ;;  %v1238_v10 = vpop.f32.mrb[61].mxu1 }
 0x19c   : > { %v1111_v11 = vpop.f32.mrb[62].mxu0  ;;  %v3221_v15 = vpop.f32.mrb[62].mxu1 }
 0x19d   : > { %v1921_v17 = vadd.f32 %v1920_v1, %v1858_v7  ;;  %v2463_v19 = vpack.c.bf16 %v1111_v11, %v1108_v2  ;;  %v1788_v20 = vadd.f32 %v1787_v4, %v1111_v11  ;;  %v1859_v21 = vmul.f32 %v1111_v11, %v1111_v11  ;;  %v1113_v25 = vpop.f32.mrb[63].mxu0  ;;  %v1241_v26 = vpop.f32.mrb[63].mxu1 }
 0x19e   : > { %v2543_v27 = vpack.c.bf16 %v3221_v15, %v3217_v3 }
 0x19f   : > { %2559 = vst [vmem:[%s3101_s24 + $0x78] sm:$0xff] %v2463_v19   ;;  %v1789_v31 = vadd.f32 %v1788_v20, %v3095_v18  ;;  %v1922_v33 = vadd.f32 %v1921_v17, %v1859_v21 }
 0x1a0   : > { %2575 = vst [vmem:[%s3101_s24 + $0xf8] sm:$0xff] %v2543_v27  }
 0x1a1   : > { %v1790_v37 = vadd.f32 %v1789_v31, %v3097_v23  ;;  %v1923_v40 = vadd.f32 %v1922_v33, %v1860_v30 }
 0x1a2   : > { %2791 = shalt.err (!%p2788_p5)
}
 0x1a3   : > { %s2792_s6 = scalar_lea.hbm %s3226_s21, 4096  ;;  %s2796_s9 = scalar_lea.hbm %s3388_s2, 200704 }
 0x1a4   : > { %p2793_p6 = scmp.ne.s32.totalorder %s3226_s21, %s2792_s6  ;;  %p2797_p10 = scmp.lt.u32.totalorder %s3226_s21, %s3388_s2 }
 0x1a5   : > { %p2798_p11 = scmp.lt.u32.totalorder %s2796_s9, %s2792_s6  ;;  %p2800_p13 = scmp.lt.u32.totalorder %s2792_s6, %s3226_s21 }
 0x1a6   : > { %p2794_p7 = pnand %p2793_p6, %p2927_p4 }
 0x1a7   : > { %p2799_p12 = por %p2798_p11, %p2797_p10 }
 0x1a8   : > { %p2795_p9 = pneg %p2794_p7 }
 0x1a9   : > { %p2801_p0 = por %p2800_p13, %p2799_p12 }
 0x1ab   : > { %p2802_p1 = pnand %p2801_p0, %p2795_p9 }
 0x1ad   : > { %2805 = shalt.err (!%p2802_p1)
}
 0x1ae   : > { %s2860_s11 = smov 64   ;;  %s2861_s13 = smov 4   ;;  %v1862_v18 = vmul.f32 %v3105_v32, %v3105_v32  ;;  %v1791_v23 = vadd.f32 %v1790_v37, %v3105_v32  ;;  %v1924_v43 = vadd.f32 %v1923_v40, %v1861_v34  ;;  %v1863_v44 = vmul.f32 %v3107_v38, %v3107_v38 }
 0x1af   : > { %2608 = dma.vmem_to_hbm [thread:$0]  (%p2927_p4), %s3228_s12, 4096, %s3226_s21, %s3242_s22, %s2860_s11, %s2860_s11, %s2861_s13   ;;  %v1864_v47 = vmul.f32 %v3113_v48, %v3113_v48  ;;  %v1865_v56 = vmul.f32 %v3115_v54, %v3115_v54  ;;  %v1866_v32 = vmul.f32 %v3121_v0, %v3121_v0  ;;  %v1876_v37 = vmul.f32 %v3161_v28, %v3161_v28 }
 0x1b0   : > { %v1792_v45 = vadd.f32 %v1791_v23, %v3107_v38  ;;  %v1925_v46 = vadd.f32 %v1924_v43, %v1862_v18  ;;  %v1867_v38 = vmul.f32 %v3123_v6, %v3123_v6  ;;  %v1877_v23 = vmul.f32 %v3163_v36, %v3163_v36  ;;  %p295_p4 = scmp.lt.s32.totalorder %s2848_s18, 48 }
 0x1b2   : > { %v1793_v51 = vadd.f32 %v1792_v45, %v3113_v48  ;;  %v1926_v55 = vadd.f32 %v1925_v46, %v1863_v44  ;;  %v1868_v48 = vmul.f32 %v3129_v16, %v3129_v16  ;;  %v1878_v44 = vmul.f32 %v3169_v49, %v3169_v49  ;;  %s3403_s18 = smov (!%p295_p4, %s2848_s18), 48 }
 0x1b3   : > { %v1879_v46 = vmul.f32 %v3171_v57, %v3171_v57  ;;  %s2168_s25 = sshll.u32 %s3403_s18, 3 }
 0x1b4   : > { %v1794_v58 = vadd.f32 %v1793_v51, %v3115_v54  ;;  %v1927_v59 = vadd.f32 %v1926_v55, %v1864_v47  ;;  %v1869_v54 = vmul.f32 %v3131_v24, %v3131_v24  ;;  %v1880_v51 = vmul.f32 %v3177_v5, %v3177_v5  ;;  %s301_s21 = scalar_lea.vmem %s3389_s3, %s2168_s25  ;;  %s308_s29 = scalar_lea.vmem %s3390_s4, %s2168_s25 }
 0x1b6   : > { %v1795_v61 = vadd.f32 %v1794_v58, %v3121_v0  ;;  %v1928_v63 = vadd.f32 %v1927_v59, %v1865_v56  ;;  %v1870_v0 = vmul.f32 %v3137_v35, %v3137_v35  ;;  %v1881_v56 = vmul.f32 %v3179_v13, %v3179_v13 }
 0x1b7   : > { %v1882_v59 = vmul.f32 %v3185_v29, %v3185_v29 }
 0x1b8   : > { %v1796_v1 = vadd.f32 %v1795_v61, %v3123_v6  ;;  %v1929_v2 = vadd.f32 %v1928_v63, %v1866_v32  ;;  %v1871_v6 = vmul.f32 %v3139_v42, %v3139_v42  ;;  %v1883_v61 = vmul.f32 %v3187_v39, %v3187_v39 }
 0x1ba   : > { %v1930_v4 = vadd.f32 %v1929_v2, %v1867_v38  ;;  %v1797_v7 = vadd.f32 %v1796_v1, %v3129_v16  ;;  %v1872_v16 = vmul.f32 %v3145_v53, %v3145_v53  ;;  %v1884_v38 = vmul.f32 %v3193_v52, %v3193_v52 }
 0x1bb   : > { %v1885_v2 = vmul.f32 %v3195_v62, %v3195_v62 }
 0x1bc   : > { %v1798_v9 = vadd.f32 %v1797_v7, %v3131_v24  ;;  %v1931_v10 = vadd.f32 %v1930_v4, %v1868_v48  ;;  %v1873_v24 = vmul.f32 %v3147_v60, %v3147_v60  ;;  %v1886_v4 = vmul.f32 %v3201_v12, %v3201_v12 }
 0x1be   : > { %v1799_v11 = vadd.f32 %v1798_v9, %v3137_v35  ;;  %v1932_v17 = vadd.f32 %v1931_v10, %v1869_v54  ;;  %v1874_v35 = vmul.f32 %v3153_v8, %v3153_v8  ;;  %v1887_v54 = vmul.f32 %v3203_v22, %v3203_v22 }
 0x1c0   : > { %v1800_v19 = vadd.f32 %v1799_v11, %v3139_v42  ;;  %v1933_v20 = vadd.f32 %v1932_v17, %v1870_v0  ;;  %v1875_v42 = vmul.f32 %v3155_v14, %v3155_v14  ;;  %v1889_v11 = vmul.f32 %v3211_v50, %v3211_v50 }
 0x1c2   : > { %v1801_v21 = vadd.f32 %v1800_v19, %v3145_v53  ;;  %v1934_v25 = vadd.f32 %v1933_v20, %v1871_v6  ;;  %v1891_v20 = vmul.f32 %v3221_v15, %v3221_v15 }
 0x1c4   : > { %v1802_v26 = vadd.f32 %v1801_v21, %v3147_v60  ;;  %v1935_v27 = vadd.f32 %v1934_v25, %v1872_v16 }
 0x1c6   : > { %v1803_v30 = vadd.f32 %v1802_v26, %v3153_v8  ;;  %v1936_v31 = vadd.f32 %v1935_v27, %v1873_v24 }
 0x1c8   : > { %v1804_v33 = vadd.f32 %v1803_v30, %v3155_v14  ;;  %v1937_v34 = vadd.f32 %v1936_v31, %v1874_v35 }
 0x1ca   : > { %v1805_v53 = vadd.f32 %v1804_v33, %v3161_v28  ;;  %v1938_v40 = vadd.f32 %v1937_v34, %v1875_v42 }
 0x1cc   : > { %v1939_v60 = vadd.f32 %v1938_v40, %v1876_v37  ;;  %v1806_v18 = vadd.f32 %v1805_v53, %v3163_v36 }
 0x1ce   : > { %v1940_v8 = vadd.f32 %v1939_v60, %v1877_v23  ;;  %v1807_v43 = vadd.f32 %v1806_v18, %v3169_v49 }
 0x1d0   : > { %v1941_v14 = vadd.f32 %v1940_v8, %v1878_v44  ;;  %v1808_v45 = vadd.f32 %v1807_v43, %v3171_v57 }
 0x1d2   : > { %v1942_v28 = vadd.f32 %v1941_v14, %v1879_v46  ;;  %v1809_v47 = vadd.f32 %v1808_v45, %v3177_v5 }
 0x1d4   : > { %v1943_v55 = vadd.f32 %v1942_v28, %v1880_v51  ;;  %v1810_v36 = vadd.f32 %v1809_v47, %v3179_v13 }
 0x1d6   : > { %v1944_v58 = vadd.f32 %v1943_v55, %v1881_v56  ;;  %v1811_v49 = vadd.f32 %v1810_v36, %v3185_v29 }
 0x1d8   : > { %v1945_v32 = vadd.f32 %v1944_v58, %v1882_v59  ;;  %v1812_v57 = vadd.f32 %v1811_v49, %v3187_v39 }
 0x1da   : > { %v1946_v63 = vadd.f32 %v1945_v32, %v1883_v61  ;;  %v1813_v5 = vadd.f32 %v1812_v57, %v3193_v52 }
 0x1dc   : > { %v1947_v1 = vadd.f32 %v1946_v63, %v1884_v38  ;;  %v1814_v13 = vadd.f32 %v1813_v5, %v3195_v62  ;;  %v1888_v62 = vmul.f32 %v3209_v41, %v3209_v41 }
 0x1de   : > { %v1948_v48 = vadd.f32 %v1947_v1, %v1885_v2  ;;  %v1815_v29 = vadd.f32 %v1814_v13, %v3201_v12  ;;  %v1890_v12 = vmul.f32 %v3217_v3, %v3217_v3 }
 0x1e0   : > { %v1949_v39 = vadd.f32 %v1948_v48, %v1886_v4  ;;  %v1816_v7 = vadd.f32 %v1815_v29, %v3203_v22 }
 0x1e2   : > { %v1950_v52 = vadd.f32 %v1949_v39, %v1887_v54  ;;  %v1817_v9 = vadd.f32 %v1816_v7, %v3209_v41 }
 0x1e4   : > { %v1951_v10 = vadd.f32 %v1950_v52, %v1888_v62  ;;  %v1818_v0 = vadd.f32 %v1817_v9, %v3211_v50 }
 0x1e6   : > { %v1952_v17 = vadd.f32 %v1951_v10, %v1889_v11  ;;  %v1819_v6 = vadd.f32 %v1818_v0, %v3217_v3 }
 0x1e8   : > { %v1953_v22 = vadd.f32 %v1952_v17, %v1890_v12  ;;  %v1820_v19 = vadd.f32 %v1819_v6, %v3221_v15 }
 0x1ea   : > { %v1821_v41 = vrot.slane %v1820_v19, 4  ;;  %v1954_v16 = vadd.f32 %v1953_v22, %v1891_v20 }
 0x1ec   : > { %v1822_v21 = vadd.f32 %v1821_v41, %v1820_v19  ;;  %v1955_v25 = vrot.slane %v1954_v16, 4 }
 0x1ee   : > { %v1823_v24 = vrot.slane %v1822_v21, 2  ;;  %v1956_v50 = vadd.f32 %v1955_v25, %v1954_v16 }
 0x1f0   : > { %v1824_v26 = vadd.f32 %v1823_v24, %v1822_v21  ;;  %v1957_v27 = vrot.slane %v1956_v50, 2 }
 0x1f2   : > { %v1825_v35 = vrot.slane %v1824_v26, 1  ;;  %v1958_v30 = vadd.f32 %v1957_v27, %v1956_v50 }
 0x1f4   : > { %v1826_v3 = vadd.f32 %v1825_v35, %v1824_v26  ;;  %v1959_v31 = vrot.slane %v1958_v30, 1 }
 0x1f6   : > { %1827 = vst [vmem:[%s301_s21] sm:$0xff] %v1826_v3  ;;  %v1960_v15 = vadd.f32 %v1959_v31, %v1958_v30 }
 0x1f8   : > { %1961 = vst [vmem:[%s308_s29] sm:$0xff] %v1960_v15 }
 0x1f9 PF: > { %p2614_p2 = scmp.ge.s32.totalorder %s2856_s20, 2  ;;  %s2012_s18 = sand.u32 1, %s2836_s15  }
 0x1fa   : > { %s2013_s30 = scalar_lea.sflag [#allocation4], %s2012_s18 }
 0x1fb   : > { %p2611_p3 = pnand %p2614_p2, %p2934_p8 }
 0x1fd   : > { %2831 = dma.done.wait (!%p2611_p3), %s2013_s30, 4096  }
 0x1fe   : > { %2833 = vsyncadd (!%p2611_p3), %s2013_s30, 4294963200  ;;  %s18_s20 = sadd.s32 1, %s2856_s20   ;;  %s3393_s15 = smov %s2840_s16 }
 0x1ff   : > { %p15_p5 = scmp.ge.s32.totalorder %s18_s20, 51   ;;  %s3394_s16 = smov %s2844_s17 }
 0x200   : > { %s3395_s17 = smov %s2940_s28  ;;  %s3396_s18 = smov %s2852_s19 }
 0x201   : > { %s3397_s19 = smov %s3399_s23  ;;  %17 = sbr.rel (!%p15_p5) target bundleno = 4 (0x4), region = 98 }
 0x208   :  { %2038 = vsyncpa [#allocation4], 1 }
 0x209   :  { %2040 = vsyncpa [#allocation4 + $0x1], 1 }

// kernel: _conv_bn_core.3
= control target key start
LH: loop header
LB: loop body
LE: loop exit
PB: predicated region body
PF: predicated region fallthrough
CT: control target
= control target key end

     0   :  { %8 = vsyncpa [#allocation3], 0  ;;  %s15546_s0 = inlined_call_operand.hbm [shape: bf16[25088,64], index: 0, kind: input, shape index: {}]   ;;  %s15547_s1 = inlined_call_operand.vmem [shape: f32[1,64], index: 1, kind: input, shape index: {}]   ;;  %s15548_s2 = inlined_call_operand.vmem [shape: f32[1,64], index: 2, kind: input, shape index: {}]   ;;  %s15549_s3 = inlined_call_operand.vmem [shape: bf16[25088,64], index: 3, kind: output, shape index: {}]  }
   0x1   :  { %10 = vsyncpa [#allocation3 + $0x1], 0  ;;  %s11804_s12 = smov 0   ;;  %s11806_s13 = smov 0  }
   0x2   :  { %s11808_s14 = smov 0   ;;  %s11810_s15 = smov 0  }
   0x3 LB: > { %s8115_s16 = sadd.s32 4294967295, %s11779_s15   ;;  %s11824_s17 = sadd.s32 1, %s11779_s15   ;;  %s11779_s15 = sphi %s11810_s15, %s15556_s15   ;;  %s11775_s14 = sphi %s11808_s14, %s15555_s14   ;;  %s11771_s13 = sphi %s11806_s13, %s15554_s13   ;;  %s11767_s12 = sphi %s11804_s12, %s15553_s12  }
   0x4   : > { %s20_s18 = ssub.s32 %s11779_s15, %s11824_s17  ;;  %s23_s19 = sadd.s32 1, %s11775_s14 }
   0x5   : > { %p21_p0 = scmp.eq.s32.totalorder %s20_s18, 0  ;;  %p30_p1 = scmp.ne.s32.totalorder %s11775_s14, %s11771_s13 }
   0x6   : > { %p31_p2 = scmp.eq.s32.totalorder %s11779_s15, 0  ;;  %p36_p3 = scmp.ne.s32.totalorder %s11771_s13, %s11767_s12 }
   0x7   : > { %s11834_s20 = scalar_select %p21_p0, %s11775_s14, %s23_s19  }
   0x8   : > { %p32_p4 = por %p31_p2, %p30_p1  ;;  %p37_p5 = scmp.eq.s32.totalorder %s8115_s16, 0 }
   0x9   : > { %p11662_p6 = scmp.lt.s32.totalorder %s11779_s15, 4  ;;  %s134_s22 = sand.u32 1, %s11775_s14  }
   0xa   : > { %p11839_p7 = por %p37_p5, %p36_p3  ;;  %s11654_s23 = smul.u32 3136, %s134_s22 }
   0xb   : > { %s8910_s24 = smul.u32 50176, %s11779_s15  ;;  %p11845_p8 = pnand %p11662_p6, %p32_p4 }
   0xc   : > { %s138_s29 = scalar_lea.vmem [#allocation2], %s11654_s23  ;;  %s11857_s4 = scalar_lea.sflag [#allocation3], %s134_s22 }
   0xd   : > { %s11852_s28 = scalar_lea.hbm %s15546_s0, %s8910_s24  ;;  %s145_s30 = sshll.u32 %s138_s29, 4  ;;  %s11854_s30 = int_to_ptr.vmem [resolvable:$true] %s145_s30 }
   0xe   : > { %s11715_s5 = scalar_lea.hbm %s11852_s28, 50176  ;;  %p11717_p11 = pneg %p11845_p8 }
   0xf   : > { %p11716_p10 = scmp.ne.s32.totalorder %s11852_s28, %s11715_s5  ;;  %s11720_s8 = scalar_lea.hbm %s15546_s0, 200704 }
  0x10   : > { %p11721_p0 = scmp.lt.u32.totalorder %s11852_s28, %s15546_s0  ;;  %p11722_p1 = scmp.lt.u32.totalorder %s11720_s8, %s11715_s5 }
  0x11   : > { %p11718_p12 = pnand %p11717_p11, %p11716_p10  ;;  %p11724_p3 = scmp.lt.u32.totalorder %s11715_s5, %s11852_s28 }
  0x12   : > { %p11723_p2 = por %p11722_p1, %p11721_p0 }
  0x13   : > { %p11719_p13 = pneg %p11718_p12 }
  0x14   : > { %p11725_p4 = por %p11724_p3, %p11723_p2 }
  0x16   : > { %p11726_p5 = pnand %p11725_p4, %p11719_p13 }
  0x18   : > { %11729 = shalt.err (!%p11726_p5)
}
  0x19   : > { %s11730_s11 = scalar_lea.vmem %s11854_s30, 50176  ;;  %s11781_s12 = smov [#allocation2]  }
  0x1a   : > { %p11731_p6 = scmp.ne.s32.totalorder %s11854_s30, %s11730_s11  ;;  %s11735_s18 = sshll.u32 %s11781_s12, 4  ;;  %s11736_s18 = int_to_ptr.vmem [resolvable:$false] %s11735_s18 }
  0x1b   : > { %s11737_s19 = scalar_lea.vmem %s11736_s18, 100352  ;;  %p11738_p9 = scmp.lt.s32.totalorder %s11854_s30, %s11736_s18 }
  0x1c   : > { %p11733_p10 = pnand %p11731_p6, %p11717_p11  ;;  %p11739_p0 = scmp.lt.s32.totalorder %s11737_s19, %s11730_s11 }
  0x1e   : > { %p11734_p12 = pneg %p11733_p10  ;;  %p11740_p1 = por %p11739_p0, %p11738_p9 }
  0x20   : > { %p11741_p2 = pnand %p11740_p1, %p11734_p12 }
  0x22   : > { %11744 = shalt.err (!%p11741_p2)
}
  0x23   : > { %s11782_s22 = smov 64   ;;  %s11783_s23 = smov 4  }
  0x24   : > { %11661 = dma.hbm_to_vmem [thread:$0]  (!%p11845_p8), %s11852_s28, 50176, %s11854_s30, %s11857_s4, %s11782_s22, %s11782_s22, %s11783_s23  }
  0x25   : > { %p153_p11 = scmp.lt.s32.totalorder %s11779_s15, 5  ;;  %p15552_p13 = scmp.ge.s32.totalorder %s11779_s15, 1 }
  0x27   : > { %p154_p3 = pnand %p15552_p13, %p153_p11 }
  0x28   : > { %s159_s24 = sand.u32 (!%p154_p3), 1, %s11771_s13  }
  0x29   : > { %157 = sbr.rel (%p154_p3) target bundleno = 1033 (0x409), region = 32  ;;  %s160_s27 = scalar_lea.sflag (!%p154_p3), [#allocation3], %s159_s24 }
  0x2a   : > { %s11655_s26 = smul.u32 (!%p154_p3), 3136, %s159_s24 }
  0x2c   : > { %s11889_s29 = scalar_lea.vmem (!%p154_p3), [#allocation2], %s11655_s26 }
  0x30   : > { %11762 = dma.done.wait (%p11839_p7), %s160_s27, 50176  }
  0x31   : > { %11764 = vsyncadd (%p11839_p7), %s160_s27, 4294917120  ;;  %s187_s25 = smul.u32 784, %s8115_s16  ;;  %v9696_v0 = vld [vmem:[%s11889_s29] sm:$0xff]   ;;  %vm7263_vm0 = vcmask 519168   ;;  %v11263_v4 = vld [vmem:[%s11889_s29 + $0x8] sm:$0xff]  }
  0x32   : > { %v11901_v1 = vld [vmem:[%s15547_s1] ss:$0 sm:$0xff]  ;;  %v9697_v2 = vunpack.c.l.bf16 %v9696_v0  ;;  %v9698_v3 = vunpack.c.h.bf16 %v9696_v0  ;;  %v11264_v5 = vld [vmem:[%s11889_s29 + $0x10] sm:$0xff]   ;;  %v11265_v6 = vld [vmem:[%s11889_s29 + $0x18] sm:$0xff]   ;;  %v9701_v8 = vunpack.c.l.bf16 %v11263_v4  ;;  %v9702_v9 = vunpack.c.h.bf16 %v11263_v4 }
  0x33   : > { %p188_p8 = scmp.lt.s32.totalorder %s187_s25, 3135  ;;  %v11911_v7 = vld [vmem:[%s15548_s2] ss:$0 sm:$0xff]  ;;  %v9705_v10 = vunpack.c.l.bf16 %v11264_v5  ;;  %v9706_v11 = vunpack.c.h.bf16 %v11264_v5  ;;  %v9709_v14 = vunpack.c.l.bf16 %v11265_v6  ;;  %v9710_v15 = vunpack.c.h.bf16 %v11265_v6  ;;  %v11267_v41 = vld [vmem:[%s11889_s29 + $0x28] sm:$0xff]   ;;  %v11268_v42 = vld [vmem:[%s11889_s29 + $0x30] sm:$0xff]  }
  0x34   : > { %v1768_v12 = vmul.f32 %v9697_v2, %v11901_v1  ;;  %v1769_v13 = vmul.f32 %v9698_v3, %v11901_v1  ;;  %v1770_v16 = vmul.f32 %v9701_v8, %v11901_v1  ;;  %v1771_v17 = vmul.f32 %v9702_v9, %v11901_v1  ;;  %v11266_v36 = vld [vmem:[%s11889_s29 + $0x20] sm:$0xff]   ;;  %v11269_v47 = vld [vmem:[%s11889_s29 + $0x38] sm:$0xff]  }
  0x35   : > { %s15558_s25 = smov (!%p188_p8, %s187_s25), 3135  ;;  %v1772_v18 = vmul.f32 %v9705_v10, %v11901_v1  ;;  %v1773_v19 = vmul.f32 %v9706_v11, %v11901_v1  ;;  %v1774_v22 = vmul.f32 %v9709_v14, %v11901_v1  ;;  %v1775_v23 = vmul.f32 %v9710_v15, %v11901_v1 }
  0x36   : > { %s8121_s16 = sshll.u32 %s15558_s25, 2  ;;  %v2559_v20 = vadd.f32 %v11911_v7, %v1768_v12  ;;  %v2560_v21 = vadd.f32 %v11911_v7, %v1769_v13  ;;  %v2561_v24 = vadd.f32 %v11911_v7, %v1770_v16  ;;  %v2562_v25 = vadd.f32 %v11911_v7, %v1771_v17 }
  0x37   : > { %v2563_v26 = vadd.f32 %v11911_v7, %v1772_v18  ;;  %v2564_v27 = vadd.f32 %v11911_v7, %v1773_v19  ;;  %v2565_v30 = vadd.f32 %v11911_v7, %v1774_v22  ;;  %v2566_v31 = vadd.f32 %v11911_v7, %v1775_v23  ;;  %s11933_s6 = scalar_lea.vmem %s15549_s3, %s8121_s16  ;;  %v11270_v18 = vld [vmem:[%s11889_s29 + $0x40] sm:$0xff]   ;;  %v11271_v23 = vld [vmem:[%s11889_s29 + $0x48] sm:$0xff]  }
  0x38   : > { %v3343_v28 = vmax.f32 %v2559_v20, 0.0  ;;  %v3344_v29 = vmax.f32 %v2560_v21, 0.0  ;;  %v3345_v32 = vmax.f32 %v2561_v24, 0.0  ;;  %v3346_v33 = vmax.f32 %v2562_v25, 0.0  ;;  %v11272_v24 = vld [vmem:[%s11889_s29 + $0x50] sm:$0xff]  }
  0x39   : > { %v3347_v34 = vmax.f32 %v2563_v26, 0.0  ;;  %v3348_v35 = vmax.f32 %v2564_v27, 0.0  ;;  %v3349_v39 = vmax.f32 %v2565_v30, 0.0  ;;  %v3350_v40 = vmax.f32 %v2566_v31, 0.0 }
  0x3a   : > { %v8911_v37 = vpack.c.bf16 %v3343_v28, %v3343_v28  ;;  %v8912_v38 = vpack.c.bf16 %v3344_v29, %v3344_v29  ;;  %v8913_v43 = vpack.c.bf16 %v3345_v32, %v3345_v32  ;;  %v8914_v44 = vpack.c.bf16 %v3346_v33, %v3346_v33  ;;  %v11273_v29 = vld [vmem:[%s11889_s29 + $0x58] sm:$0xff]  }
  0x3b   : > { %v8915_v45 = vpack.c.bf16 %v3347_v34, %v3347_v34  ;;  %v8916_v46 = vpack.c.bf16 %v3348_v35, %v3348_v35  ;;  %v8917_v48 = vpack.c.bf16 %v3349_v39, %v3349_v39  ;;  %v8918_v49 = vpack.c.bf16 %v3350_v40, %v3350_v40 }
  0x3c   : > { %7264 = vst.msk [vmem:[%s11933_s6] sm:$0xf] %vm7263_vm0, %v8911_v37  ;;  %7265 = vst.msk [vmem:[%s11933_s6 + $0x4] sm:$0xf] %vm7263_vm0, %v8912_v38  ;;  %v9713_v50 = vunpack.c.l.bf16 %v11266_v36  ;;  %v9714_v51 = vunpack.c.h.bf16 %v11266_v36  ;;  %v9717_v52 = vunpack.c.l.bf16 %v11267_v41  ;;  %v9718_v53 = vunpack.c.h.bf16 %v11267_v41 }
  0x3d   : > { %7266 = vst.msk [vmem:[%s11933_s6 + $0x8] sm:$0xf] %vm7263_vm0, %v8913_v43  ;;  %7267 = vst.msk [vmem:[%s11933_s6 + $0xc] sm:$0xf] %vm7263_vm0, %v8914_v44  ;;  %v9721_v54 = vunpack.c.l.bf16 %v11268_v42  ;;  %v9722_v55 = vunpack.c.h.bf16 %v11268_v42  ;;  %v9725_v58 = vunpack.c.l.bf16 %v11269_v47  ;;  %v9726_v59 = vunpack.c.h.bf16 %v11269_v47 }
  0x3e   : > { %7268 = vst.msk [vmem:[%s11933_s6 + $0x10] sm:$0xf] %vm7263_vm0, %v8915_v45  ;;  %7269 = vst.msk [vmem:[%s11933_s6 + $0x14] sm:$0xf] %vm7263_vm0, %v8916_v46  ;;  %v1776_v56 = vmul.f32 %v9713_v50, %v11901_v1  ;;  %v1777_v57 = vmul.f32 %v9714_v51, %v11901_v1  ;;  %v1778_v60 = vmul.f32 %v9717_v52, %v11901_v1  ;;  %v9729_v32 = vunpack.c.l.bf16 %v11270_v18 }
  0x3f   : > { %7270 = vst.msk [vmem:[%s11933_s6 + $0x18] sm:$0xf] %vm7263_vm0, %v8917_v48  ;;  %7271 = vst.msk [vmem:[%s11933_s6 + $0x1c] sm:$0xf] %vm7263_vm0, %v8918_v49  ;;  %v1779_v61 = vmul.f32 %v9718_v53, %v11901_v1  ;;  %v1780_v62 = vmul.f32 %v9721_v54, %v11901_v1  ;;  %v1781_v63 = vmul.f32 %v9722_v55, %v11901_v1  ;;  %v9730_v33 = vunpack.c.h.bf16 %v11270_v18 }
  0x40   : > { %v2567_v0 = vadd.f32 %v11911_v7, %v1776_v56  ;;  %v2568_v2 = vadd.f32 %v11911_v7, %v1777_v57  ;;  %v1782_v3 = vmul.f32 %v9725_v58, %v11901_v1  ;;  %v1783_v4 = vmul.f32 %v9726_v59, %v11901_v1 }
  0x41   : > { %v2569_v5 = vadd.f32 %v11911_v7, %v1778_v60  ;;  %v2570_v6 = vadd.f32 %v11911_v7, %v1779_v61  ;;  %v2571_v8 = vadd.f32 %v11911_v7, %v1780_v62  ;;  %v2572_v9 = vadd.f32 %v11911_v7, %v1781_v63  ;;  %v11274_v62 = vld [vmem:[%s11889_s29 + $0x60] sm:$0xff]  }
  0x42   : > { %v3351_v10 = vmax.f32 %v2567_v0, 0.0  ;;  %v3352_v11 = vmax.f32 %v2568_v2, 0.0  ;;  %v2573_v12 = vadd.f32 %v11911_v7, %v1782_v3  ;;  %v2574_v13 = vadd.f32 %v11911_v7, %v1783_v4  ;;  %v11275_v4 = vld [vmem:[%s11889_s29 + $0x68] sm:$0xff]  }
  0x43   : > { %v3353_v14 = vmax.f32 %v2569_v5, 0.0  ;;  %v3354_v15 = vmax.f32 %v2570_v6, 0.0  ;;  %v3355_v16 = vmax.f32 %v2571_v8, 0.0  ;;  %v3356_v17 = vmax.f32 %v2572_v9, 0.0  ;;  %v11276_v5 = vld [vmem:[%s11889_s29 + $0x70] sm:$0xff]  }
  0x44   : > { %v8919_v19 = vpack.c.bf16 %v3351_v10, %v3351_v10  ;;  %v8920_v20 = vpack.c.bf16 %v3352_v11, %v3352_v11  ;;  %v3357_v21 = vmax.f32 %v2573_v12, 0.0  ;;  %v3358_v22 = vmax.f32 %v2574_v13, 0.0  ;;  %v11277_v11 = vld [vmem:[%s11889_s29 + $0x78] sm:$0xff]  }
  0x45   : > { %v8921_v25 = vpack.c.bf16 %v3353_v14, %v3353_v14  ;;  %v8922_v26 = vpack.c.bf16 %v3354_v15, %v3354_v15  ;;  %v8923_v27 = vpack.c.bf16 %v3355_v16, %v3355_v16  ;;  %v8924_v28 = vpack.c.bf16 %v3356_v17, %v3356_v17 }
  0x46   : > { %7272 = vst.msk [vmem:[%s11933_s6 + $0x20] sm:$0xf] %vm7263_vm0, %v8919_v19  ;;  %7273 = vst.msk [vmem:[%s11933_s6 + $0x24] sm:$0xf] %vm7263_vm0, %v8920_v20  ;;  %v8925_v30 = vpack.c.bf16 %v3357_v21, %v3357_v21  ;;  %v8926_v31 = vpack.c.bf16 %v3358_v22, %v3358_v22  ;;  %v9733_v34 = vunpack.c.l.bf16 %v11271_v23  ;;  %v9734_v35 = vunpack.c.h.bf16 %v11271_v23 }
  0x47   : > { %7274 = vst.msk [vmem:[%s11933_s6 + $0x28] sm:$0xf] %vm7263_vm0, %v8921_v25  ;;  %7275 = vst.msk [vmem:[%s11933_s6 + $0x2c] sm:$0xf] %vm7263_vm0, %v8922_v26  ;;  %v9737_v36 = vunpack.c.l.bf16 %v11272_v24  ;;  %v9738_v37 = vunpack.c.h.bf16 %v11272_v24  ;;  %v1784_v38 = vmul.f32 %v9729_v32, %v11901_v1  ;;  %v1785_v39 = vmul.f32 %v9730_v33, %v11901_v1 }
  0x48   : > { %7276 = vst.msk [vmem:[%s11933_s6 + $0x30] sm:$0xf] %vm7263_vm0, %v8923_v27  ;;  %7277 = vst.msk [vmem:[%s11933_s6 + $0x34] sm:$0xf] %vm7263_vm0, %v8924_v28  ;;  %v9741_v40 = vunpack.c.l.bf16 %v11273_v29  ;;  %v9742_v41 = vunpack.c.h.bf16 %v11273_v29  ;;  %v1786_v42 = vmul.f32 %v9733_v34, %v11901_v1  ;;  %v1787_v43 = vmul.f32 %v9734_v35, %v11901_v1 }
  0x49   : > { %7278 = vst.msk [vmem:[%s11933_s6 + $0x38] sm:$0xf] %vm7263_vm0, %v8925_v30  ;;  %7279 = vst.msk [vmem:[%s11933_s6 + $0x3c] sm:$0xf] %vm7263_vm0, %v8926_v31  ;;  %v1788_v44 = vmul.f32 %v9737_v36, %v11901_v1  ;;  %v1789_v45 = vmul.f32 %v9738_v37, %v11901_v1  ;;  %v2575_v46 = vadd.f32 %v11911_v7, %v1784_v38  ;;  %v9745_v14 = vunpack.c.l.bf16 %v11274_v62 }
  0x4a   : > { %v2576_v47 = vadd.f32 %v11911_v7, %v1785_v39  ;;  %v1790_v48 = vmul.f32 %v9741_v40, %v11901_v1  ;;  %v1791_v49 = vmul.f32 %v9742_v41, %v11901_v1  ;;  %v2577_v50 = vadd.f32 %v11911_v7, %v1786_v42 }
  0x4b   : > { %v2578_v51 = vadd.f32 %v11911_v7, %v1787_v43  ;;  %v2579_v52 = vadd.f32 %v11911_v7, %v1788_v44  ;;  %v2580_v53 = vadd.f32 %v11911_v7, %v1789_v45  ;;  %v3359_v54 = vmax.f32 %v2575_v46, 0.0  ;;  %v11278_v44 = vld [vmem:[%s11889_s29 + $0x80] sm:$0xff]  }
  0x4c   : > { %v3360_v55 = vmax.f32 %v2576_v47, 0.0  ;;  %v2581_v56 = vadd.f32 %v11911_v7, %v1790_v48  ;;  %v2582_v57 = vadd.f32 %v11911_v7, %v1791_v49  ;;  %v3361_v58 = vmax.f32 %v2577_v50, 0.0  ;;  %v11279_v49 = vld [vmem:[%s11889_s29 + $0x88] sm:$0xff]   ;;  %v11280_v50 = vld [vmem:[%s11889_s29 + $0x90] sm:$0xff]  }
  0x4d   : > { %v3362_v59 = vmax.f32 %v2578_v51, 0.0  ;;  %v3363_v60 = vmax.f32 %v2579_v52, 0.0  ;;  %v3364_v61 = vmax.f32 %v2580_v53, 0.0  ;;  %v8927_v63 = vpack.c.bf16 %v3359_v54, %v3359_v54 }
  0x4e   : > { %v8928_v0 = vpack.c.bf16 %v3360_v55, %v3360_v55  ;;  %v3365_v2 = vmax.f32 %v2581_v56, 0.0  ;;  %v3366_v3 = vmax.f32 %v2582_v57, 0.0  ;;  %v8929_v6 = vpack.c.bf16 %v3361_v58, %v3361_v58  ;;  %v11281_v55 = vld [vmem:[%s11889_s29 + $0x98] sm:$0xff]  }
  0x4f   : > { %v8930_v8 = vpack.c.bf16 %v3362_v59, %v3362_v59  ;;  %v8931_v9 = vpack.c.bf16 %v3363_v60, %v3363_v60  ;;  %v8932_v10 = vpack.c.bf16 %v3364_v61, %v3364_v61  ;;  %7280 = vst.msk [vmem:[%s11933_s6 + $0x40] sm:$0xf] %vm7263_vm0, %v8927_v63  ;;  %v9746_v15 = vunpack.c.h.bf16 %v11274_v62 }
  0x50   : > { %7281 = vst.msk [vmem:[%s11933_s6 + $0x44] sm:$0xf] %vm7263_vm0, %v8928_v0  ;;  %v8933_v12 = vpack.c.bf16 %v3365_v2, %v3365_v2  ;;  %v8934_v13 = vpack.c.bf16 %v3366_v3, %v3366_v3  ;;  %7282 = vst.msk [vmem:[%s11933_s6 + $0x48] sm:$0xf] %vm7263_vm0, %v8929_v6  ;;  %v9749_v16 = vunpack.c.l.bf16 %v11275_v4  ;;  %v9750_v17 = vunpack.c.h.bf16 %v11275_v4 }
  0x51   : > { %7283 = vst.msk [vmem:[%s11933_s6 + $0x4c] sm:$0xf] %vm7263_vm0, %v8930_v8  ;;  %7284 = vst.msk [vmem:[%s11933_s6 + $0x50] sm:$0xf] %vm7263_vm0, %v8931_v9  ;;  %v9753_v18 = vunpack.c.l.bf16 %v11276_v5  ;;  %v9754_v19 = vunpack.c.h.bf16 %v11276_v5  ;;  %v1792_v20 = vmul.f32 %v9745_v14, %v11901_v1  ;;  %v1793_v21 = vmul.f32 %v9746_v15, %v11901_v1 }
  0x52   : > { %7285 = vst.msk [vmem:[%s11933_s6 + $0x54] sm:$0xf] %vm7263_vm0, %v8932_v10  ;;  %7286 = vst.msk [vmem:[%s11933_s6 + $0x58] sm:$0xf] %vm7263_vm0, %v8933_v12  ;;  %v9757_v22 = vunpack.c.l.bf16 %v11277_v11  ;;  %v9758_v23 = vunpack.c.h.bf16 %v11277_v11  ;;  %v1794_v24 = vmul.f32 %v9749_v16, %v11901_v1  ;;  %v1795_v25 = vmul.f32 %v9750_v17, %v11901_v1 }
  0x53   : > { %7287 = vst.msk [vmem:[%s11933_s6 + $0x5c] sm:$0xf] %vm7263_vm0, %v8934_v13  ;;  %v1796_v26 = vmul.f32 %v9753_v18, %v11901_v1  ;;  %v1797_v27 = vmul.f32 %v9754_v19, %v11901_v1  ;;  %v2583_v28 = vadd.f32 %v11911_v7, %v1792_v20  ;;  %v2584_v29 = vadd.f32 %v11911_v7, %v1793_v21 }
  0x54   : > { %v1798_v30 = vmul.f32 %v9757_v22, %v11901_v1  ;;  %v1799_v31 = vmul.f32 %v9758_v23, %v11901_v1  ;;  %v2585_v32 = vadd.f32 %v11911_v7, %v1794_v24  ;;  %v2586_v33 = vadd.f32 %v11911_v7, %v1795_v25 }
  0x55   : > { %v2587_v34 = vadd.f32 %v11911_v7, %v1796_v26  ;;  %v2588_v35 = vadd.f32 %v11911_v7, %v1797_v27  ;;  %v3367_v36 = vmax.f32 %v2583_v28, 0.0  ;;  %v3368_v37 = vmax.f32 %v2584_v29, 0.0  ;;  %v11282_v26 = vld [vmem:[%s11889_s29 + $0xa0] sm:$0xff]  }
  0x56   : > { %v2589_v38 = vadd.f32 %v11911_v7, %v1798_v30  ;;  %v2590_v39 = vadd.f32 %v11911_v7, %v1799_v31  ;;  %v3369_v40 = vmax.f32 %v2585_v32, 0.0  ;;  %v3370_v41 = vmax.f32 %v2586_v33, 0.0  ;;  %v11283_v31 = vld [vmem:[%s11889_s29 + $0xa8] sm:$0xff]   ;;  %v11284_v32 = vld [vmem:[%s11889_s29 + $0xb0] sm:$0xff]  }
  0x57   : > { %v3371_v42 = vmax.f32 %v2587_v34, 0.0  ;;  %v3372_v43 = vmax.f32 %v2588_v35, 0.0  ;;  %v8935_v45 = vpack.c.bf16 %v3367_v36, %v3367_v36  ;;  %v8936_v46 = vpack.c.bf16 %v3368_v37, %v3368_v37  ;;  %v11285_v37 = vld [vmem:[%s11889_s29 + $0xb8] sm:$0xff]  }
  0x58   : > { %v3373_v47 = vmax.f32 %v2589_v38, 0.0  ;;  %v3374_v48 = vmax.f32 %v2590_v39, 0.0  ;;  %v8937_v51 = vpack.c.bf16 %v3369_v40, %v3369_v40  ;;  %v8938_v52 = vpack.c.bf16 %v3370_v41, %v3370_v41 }
  0x59   : > { %v8939_v53 = vpack.c.bf16 %v3371_v42, %v3371_v42  ;;  %v8940_v54 = vpack.c.bf16 %v3372_v43, %v3372_v43  ;;  %7288 = vst.msk [vmem:[%s11933_s6 + $0x60] sm:$0xf] %vm7263_vm0, %v8935_v45  ;;  %7289 = vst.msk [vmem:[%s11933_s6 + $0x64] sm:$0xf] %vm7263_vm0, %v8936_v46  ;;  %v9761_v58 = vunpack.c.l.bf16 %v11278_v44  ;;  %v9762_v59 = vunpack.c.h.bf16 %v11278_v44 }
  0x5a   : > { %v8941_v56 = vpack.c.bf16 %v3373_v47, %v3373_v47  ;;  %v8942_v57 = vpack.c.bf16 %v3374_v48, %v3374_v48  ;;  %7290 = vst.msk [vmem:[%s11933_s6 + $0x68] sm:$0xf] %vm7263_vm0, %v8937_v51  ;;  %7291 = vst.msk [vmem:[%s11933_s6 + $0x6c] sm:$0xf] %vm7263_vm0, %v8938_v52  ;;  %v9765_v60 = vunpack.c.l.bf16 %v11279_v49  ;;  %v9766_v61 = vunpack.c.h.bf16 %v11279_v49 }
  0x5b   : > { %7292 = vst.msk [vmem:[%s11933_s6 + $0x70] sm:$0xf] %vm7263_vm0, %v8939_v53  ;;  %7293 = vst.msk [vmem:[%s11933_s6 + $0x74] sm:$0xf] %vm7263_vm0, %v8940_v54  ;;  %v9769_v62 = vunpack.c.l.bf16 %v11280_v50  ;;  %v9770_v63 = vunpack.c.h.bf16 %v11280_v50  ;;  %v1800_v0 = vmul.f32 %v9761_v58, %v11901_v1  ;;  %v1801_v2 = vmul.f32 %v9762_v59, %v11901_v1 }
  0x5c   : > { %7294 = vst.msk [vmem:[%s11933_s6 + $0x78] sm:$0xf] %vm7263_vm0, %v8941_v56  ;;  %7295 = vst.msk [vmem:[%s11933_s6 + $0x7c] sm:$0xf] %vm7263_vm0, %v8942_v57  ;;  %v9773_v3 = vunpack.c.l.bf16 %v11281_v55  ;;  %v9774_v4 = vunpack.c.h.bf16 %v11281_v55  ;;  %v1802_v5 = vmul.f32 %v9765_v60, %v11901_v1  ;;  %v1803_v6 = vmul.f32 %v9766_v61, %v11901_v1 }
  0x5d   : > { %v1804_v8 = vmul.f32 %v9769_v62, %v11901_v1  ;;  %v1805_v9 = vmul.f32 %v9770_v63, %v11901_v1  ;;  %v2591_v10 = vadd.f32 %v11911_v7, %v1800_v0  ;;  %v2592_v11 = vadd.f32 %v11911_v7, %v1801_v2 }
  0x5e   : > { %v1806_v12 = vmul.f32 %v9773_v3, %v11901_v1  ;;  %v1807_v13 = vmul.f32 %v9774_v4, %v11901_v1  ;;  %v2593_v14 = vadd.f32 %v11911_v7, %v1802_v5  ;;  %v2594_v15 = vadd.f32 %v11911_v7, %v1803_v6 }
  0x5f   : > { %v2595_v16 = vadd.f32 %v11911_v7, %v1804_v8  ;;  %v2596_v17 = vadd.f32 %v11911_v7, %v1805_v9  ;;  %v3375_v18 = vmax.f32 %v2591_v10, 0.0  ;;  %v3376_v19 = vmax.f32 %v2592_v11, 0.0  ;;  %v11286_v8 = vld [vmem:[%s11889_s29 + $0xc0] sm:$0xff]  }
  0x60   : > { %v2597_v20 = vadd.f32 %v11911_v7, %v1806_v12  ;;  %v2598_v21 = vadd.f32 %v11911_v7, %v1807_v13  ;;  %v3377_v22 = vmax.f32 %v2593_v14, 0.0  ;;  %v3378_v23 = vmax.f32 %v2594_v15, 0.0  ;;  %v11287_v13 = vld [vmem:[%s11889_s29 + $0xc8] sm:$0xff]   ;;  %v11288_v14 = vld [vmem:[%s11889_s29 + $0xd0] sm:$0xff]  }
  0x61   : > { %v3379_v24 = vmax.f32 %v2595_v16, 0.0  ;;  %v3380_v25 = vmax.f32 %v2596_v17, 0.0  ;;  %v8943_v27 = vpack.c.bf16 %v3375_v18, %v3375_v18  ;;  %v8944_v28 = vpack.c.bf16 %v3376_v19, %v3376_v19  ;;  %v11289_v19 = vld [vmem:[%s11889_s29 + $0xd8] sm:$0xff]  }
  0x62   : > { %v3381_v29 = vmax.f32 %v2597_v20, 0.0  ;;  %v3382_v30 = vmax.f32 %v2598_v21, 0.0  ;;  %v8945_v33 = vpack.c.bf16 %v3377_v22, %v3377_v22  ;;  %v8946_v34 = vpack.c.bf16 %v3378_v23, %v3378_v23 }
  0x63   : > { %v8947_v35 = vpack.c.bf16 %v3379_v24, %v3379_v24  ;;  %v8948_v36 = vpack.c.bf16 %v3380_v25, %v3380_v25  ;;  %7296 = vst.msk [vmem:[%s11933_s6 + $0x80] sm:$0xf] %vm7263_vm0, %v8943_v27  ;;  %7297 = vst.msk [vmem:[%s11933_s6 + $0x84] sm:$0xf] %vm7263_vm0, %v8944_v28  ;;  %v9777_v40 = vunpack.c.l.bf16 %v11282_v26  ;;  %v9778_v41 = vunpack.c.h.bf16 %v11282_v26 }
  0x64   : > { %v8949_v38 = vpack.c.bf16 %v3381_v29, %v3381_v29  ;;  %v8950_v39 = vpack.c.bf16 %v3382_v30, %v3382_v30  ;;  %7298 = vst.msk [vmem:[%s11933_s6 + $0x88] sm:$0xf] %vm7263_vm0, %v8945_v33  ;;  %7299 = vst.msk [vmem:[%s11933_s6 + $0x8c] sm:$0xf] %vm7263_vm0, %v8946_v34  ;;  %v9781_v42 = vunpack.c.l.bf16 %v11283_v31  ;;  %v9782_v43 = vunpack.c.h.bf16 %v11283_v31 }
  0x65   : > { %7300 = vst.msk [vmem:[%s11933_s6 + $0x90] sm:$0xf] %vm7263_vm0, %v8947_v35  ;;  %7301 = vst.msk [vmem:[%s11933_s6 + $0x94] sm:$0xf] %vm7263_vm0, %v8948_v36  ;;  %v9785_v44 = vunpack.c.l.bf16 %v11284_v32  ;;  %v9786_v45 = vunpack.c.h.bf16 %v11284_v32  ;;  %v1808_v46 = vmul.f32 %v9777_v40, %v11901_v1  ;;  %v1809_v47 = vmul.f32 %v9778_v41, %v11901_v1 }
  0x66   : > { %7302 = vst.msk [vmem:[%s11933_s6 + $0x98] sm:$0xf] %vm7263_vm0, %v8949_v38  ;;  %7303 = vst.msk [vmem:[%s11933_s6 + $0x9c] sm:$0xf] %vm7263_vm0, %v8950_v39  ;;  %v9789_v48 = vunpack.c.l.bf16 %v11285_v37  ;;  %v9790_v49 = vunpack.c.h.bf16 %v11285_v37  ;;  %v1810_v50 = vmul.f32 %v9781_v42, %v11901_v1  ;;  %v1811_v51 = vmul.f32 %v9782_v43, %v11901_v1 }
  0x67   : > { %v1812_v52 = vmul.f32 %v9785_v44, %v11901_v1  ;;  %v1813_v53 = vmul.f32 %v9786_v45, %v11901_v1  ;;  %v2599_v54 = vadd.f32 %v11911_v7, %v1808_v46  ;;  %v2600_v55 = vadd.f32 %v11911_v7, %v1809_v47 }
  0x68   : > { %v1814_v56 = vmul.f32 %v9789_v48, %v11901_v1  ;;  %v1815_v57 = vmul.f32 %v9790_v49, %v11901_v1  ;;  %v2601_v58 = vadd.f32 %v11911_v7, %v1810_v50  ;;  %v2602_v59 = vadd.f32 %v11911_v7, %v1811_v51 }
  0x69   : > { %v2603_v60 = vadd.f32 %v11911_v7, %v1812_v52  ;;  %v2604_v61 = vadd.f32 %v11911_v7, %v1813_v53  ;;  %v3383_v62 = vmax.f32 %v2599_v54, 0.0  ;;  %v3384_v63 = vmax.f32 %v2600_v55, 0.0  ;;  %v11290_v52 = vld [vmem:[%s11889_s29 + $0xe0] sm:$0xff]  }
  0x6a   : > { %v2605_v0 = vadd.f32 %v11911_v7, %v1814_v56  ;;  %v2606_v2 = vadd.f32 %v11911_v7, %v1815_v57  ;;  %v3385_v3 = vmax.f32 %v2601_v58, 0.0  ;;  %v3386_v4 = vmax.f32 %v2602_v59, 0.0  ;;  %v11291_v57 = vld [vmem:[%s11889_s29 + $0xe8] sm:$0xff]   ;;  %v11292_v58 = vld [vmem:[%s11889_s29 + $0xf0] sm:$0xff]  }
  0x6b   : > { %v3387_v5 = vmax.f32 %v2603_v60, 0.0  ;;  %v3388_v6 = vmax.f32 %v2604_v61, 0.0  ;;  %v8951_v9 = vpack.c.bf16 %v3383_v62, %v3383_v62  ;;  %v8952_v10 = vpack.c.bf16 %v3384_v63, %v3384_v63  ;;  %v11293_v63 = vld [vmem:[%s11889_s29 + $0xf8] sm:$0xff]  }
  0x6c   : > { %v3389_v11 = vmax.f32 %v2605_v0, 0.0  ;;  %v3390_v12 = vmax.f32 %v2606_v2, 0.0  ;;  %v8953_v15 = vpack.c.bf16 %v3385_v3, %v3385_v3  ;;  %v8954_v16 = vpack.c.bf16 %v3386_v4, %v3386_v4 }
  0x6d   : > { %v8955_v17 = vpack.c.bf16 %v3387_v5, %v3387_v5  ;;  %v8956_v18 = vpack.c.bf16 %v3388_v6, %v3388_v6  ;;  %7304 = vst.msk [vmem:[%s11933_s6 + $0xa0] sm:$0xf] %vm7263_vm0, %v8951_v9  ;;  %7305 = vst.msk [vmem:[%s11933_s6 + $0xa4] sm:$0xf] %vm7263_vm0, %v8952_v10  ;;  %v9793_v22 = vunpack.c.l.bf16 %v11286_v8  ;;  %v9794_v23 = vunpack.c.h.bf16 %v11286_v8 }
  0x6e   : > { %v8957_v20 = vpack.c.bf16 %v3389_v11, %v3389_v11  ;;  %v8958_v21 = vpack.c.bf16 %v3390_v12, %v3390_v12  ;;  %7306 = vst.msk [vmem:[%s11933_s6 + $0xa8] sm:$0xf] %vm7263_vm0, %v8953_v15  ;;  %7307 = vst.msk [vmem:[%s11933_s6 + $0xac] sm:$0xf] %vm7263_vm0, %v8954_v16  ;;  %v9797_v24 = vunpack.c.l.bf16 %v11287_v13  ;;  %v9798_v25 = vunpack.c.h.bf16 %v11287_v13 }
  0x6f   : > { %7308 = vst.msk [vmem:[%s11933_s6 + $0xb0] sm:$0xf] %vm7263_vm0, %v8955_v17  ;;  %7309 = vst.msk [vmem:[%s11933_s6 + $0xb4] sm:$0xf] %vm7263_vm0, %v8956_v18  ;;  %v9801_v26 = vunpack.c.l.bf16 %v11288_v14  ;;  %v9802_v27 = vunpack.c.h.bf16 %v11288_v14  ;;  %v1816_v28 = vmul.f32 %v9793_v22, %v11901_v1  ;;  %v1817_v29 = vmul.f32 %v9794_v23, %v11901_v1 }
  0x70   : > { %7310 = vst.msk [vmem:[%s11933_s6 + $0xb8] sm:$0xf] %vm7263_vm0, %v8957_v20  ;;  %7311 = vst.msk [vmem:[%s11933_s6 + $0xbc] sm:$0xf] %vm7263_vm0, %v8958_v21  ;;  %v9805_v30 = vunpack.c.l.bf16 %v11289_v19  ;;  %v9806_v31 = vunpack.c.h.bf16 %v11289_v19  ;;  %v1818_v32 = vmul.f32 %v9797_v24, %v11901_v1  ;;  %v1819_v33 = vmul.f32 %v9798_v25, %v11901_v1 }
  0x71   : > { %v1820_v34 = vmul.f32 %v9801_v26, %v11901_v1  ;;  %v1821_v35 = vmul.f32 %v9802_v27, %v11901_v1  ;;  %v2607_v36 = vadd.f32 %v11911_v7, %v1816_v28  ;;  %v2608_v37 = vadd.f32 %v11911_v7, %v1817_v29 }
  0x72   : > { %v1822_v38 = vmul.f32 %v9805_v30, %v11901_v1  ;;  %v1823_v39 = vmul.f32 %v9806_v31, %v11901_v1  ;;  %v2609_v40 = vadd.f32 %v11911_v7, %v1818_v32  ;;  %v2610_v41 = vadd.f32 %v11911_v7, %v1819_v33 }
  0x73   : > { %v2611_v42 = vadd.f32 %v11911_v7, %v1820_v34  ;;  %v2612_v43 = vadd.f32 %v11911_v7, %v1821_v35  ;;  %v3391_v44 = vmax.f32 %v2607_v36, 0.0  ;;  %v3392_v45 = vmax.f32 %v2608_v37, 0.0  ;;  %v11294_v34 = vld [vmem:[%s11889_s29 + $0x100] sm:$0xff]  }
  0x74   : > { %v2613_v46 = vadd.f32 %v11911_v7, %v1822_v38  ;;  %v2614_v47 = vadd.f32 %v11911_v7, %v1823_v39  ;;  %v3393_v48 = vmax.f32 %v2609_v40, 0.0  ;;  %v3394_v49 = vmax.f32 %v2610_v41, 0.0  ;;  %v11295_v39 = vld [vmem:[%s11889_s29 + $0x108] sm:$0xff]   ;;  %v11296_v40 = vld [vmem:[%s11889_s29 + $0x110] sm:$0xff]  }
  0x75   : > { %v3395_v50 = vmax.f32 %v2611_v42, 0.0  ;;  %v3396_v51 = vmax.f32 %v2612_v43, 0.0  ;;  %v8959_v53 = vpack.c.bf16 %v3391_v44, %v3391_v44  ;;  %v8960_v54 = vpack.c.bf16 %v3392_v45, %v3392_v45  ;;  %v11297_v45 = vld [vmem:[%s11889_s29 + $0x118] sm:$0xff]  }
  0x76   : > { %v3397_v55 = vmax.f32 %v2613_v46, 0.0  ;;  %v3398_v56 = vmax.f32 %v2614_v47, 0.0  ;;  %v8961_v59 = vpack.c.bf16 %v3393_v48, %v3393_v48  ;;  %v8962_v60 = vpack.c.bf16 %v3394_v49, %v3394_v49 }
  0x77   : > { %v8963_v61 = vpack.c.bf16 %v3395_v50, %v3395_v50  ;;  %v8964_v62 = vpack.c.bf16 %v3396_v51, %v3396_v51  ;;  %7312 = vst.msk [vmem:[%s11933_s6 + $0xc0] sm:$0xf] %vm7263_vm0, %v8959_v53  ;;  %7313 = vst.msk [vmem:[%s11933_s6 + $0xc4] sm:$0xf] %vm7263_vm0, %v8960_v54  ;;  %v9809_v3 = vunpack.c.l.bf16 %v11290_v52  ;;  %v9810_v4 = vunpack.c.h.bf16 %v11290_v52 }
  0x78   : > { %v8965_v0 = vpack.c.bf16 %v3397_v55, %v3397_v55  ;;  %v8966_v2 = vpack.c.bf16 %v3398_v56, %v3398_v56  ;;  %7314 = vst.msk [vmem:[%s11933_s6 + $0xc8] sm:$0xf] %vm7263_vm0, %v8961_v59  ;;  %7315 = vst.msk [vmem:[%s11933_s6 + $0xcc] sm:$0xf] %vm7263_vm0, %v8962_v60  ;;  %v9813_v5 = vunpack.c.l.bf16 %v11291_v57  ;;  %v9814_v6 = vunpack.c.h.bf16 %v11291_v57 }
  0x79   : > { %7316 = vst.msk [vmem:[%s11933_s6 + $0xd0] sm:$0xf] %vm7263_vm0, %v8963_v61  ;;  %7317 = vst.msk [vmem:[%s11933_s6 + $0xd4] sm:$0xf] %vm7263_vm0, %v8964_v62  ;;  %v9817_v8 = vunpack.c.l.bf16 %v11292_v58  ;;  %v9818_v9 = vunpack.c.h.bf16 %v11292_v58  ;;  %v1824_v10 = vmul.f32 %v9809_v3, %v11901_v1  ;;  %v1825_v11 = vmul.f32 %v9810_v4, %v11901_v1 }
  0x7a   : > { %7318 = vst.msk [vmem:[%s11933_s6 + $0xd8] sm:$0xf] %vm7263_vm0, %v8965_v0  ;;  %7319 = vst.msk [vmem:[%s11933_s6 + $0xdc] sm:$0xf] %vm7263_vm0, %v8966_v2  ;;  %v9821_v12 = vunpack.c.l.bf16 %v11293_v63  ;;  %v9822_v13 = vunpack.c.h.bf16 %v11293_v63  ;;  %v1826_v14 = vmul.f32 %v9813_v5, %v11901_v1  ;;  %v1827_v15 = vmul.f32 %v9814_v6, %v11901_v1 }
  0x7b   : > { %v1828_v16 = vmul.f32 %v9817_v8, %v11901_v1  ;;  %v1829_v17 = vmul.f32 %v9818_v9, %v11901_v1  ;;  %v2615_v18 = vadd.f32 %v11911_v7, %v1824_v10  ;;  %v2616_v19 = vadd.f32 %v11911_v7, %v1825_v11 }
  0x7c   : > { %v1830_v20 = vmul.f32 %v9821_v12, %v11901_v1  ;;  %v1831_v21 = vmul.f32 %v9822_v13, %v11901_v1  ;;  %v2617_v22 = vadd.f32 %v11911_v7, %v1826_v14  ;;  %v2618_v23 = vadd.f32 %v11911_v7, %v1827_v15 }
  0x7d   : > { %v2619_v24 = vadd.f32 %v11911_v7, %v1828_v16  ;;  %v2620_v25 = vadd.f32 %v11911_v7, %v1829_v17  ;;  %v3399_v26 = vmax.f32 %v2615_v18, 0.0  ;;  %v3400_v27 = vmax.f32 %v2616_v19, 0.0  ;;  %v11298_v16 = vld [vmem:[%s11889_s29 + $0x120] sm:$0xff]  }
  0x7e   : > { %v2621_v28 = vadd.f32 %v11911_v7, %v1830_v20  ;;  %v2622_v29 = vadd.f32 %v11911_v7, %v1831_v21  ;;  %v3401_v30 = vmax.f32 %v2617_v22, 0.0  ;;  %v3402_v31 = vmax.f32 %v2618_v23, 0.0  ;;  %v11299_v21 = vld [vmem:[%s11889_s29 + $0x128] sm:$0xff]   ;;  %v11300_v22 = vld [vmem:[%s11889_s29 + $0x130] sm:$0xff]  }
  0x7f   : > { %v3403_v32 = vmax.f32 %v2619_v24, 0.0  ;;  %v3404_v33 = vmax.f32 %v2620_v25, 0.0  ;;  %v8967_v35 = vpack.c.bf16 %v3399_v26, %v3399_v26  ;;  %v8968_v36 = vpack.c.bf16 %v3400_v27, %v3400_v27  ;;  %v11301_v27 = vld [vmem:[%s11889_s29 + $0x138] sm:$0xff]  }
  0x80   : > { %v3405_v37 = vmax.f32 %v2621_v28, 0.0  ;;  %v3406_v38 = vmax.f32 %v2622_v29, 0.0  ;;  %v8969_v41 = vpack.c.bf16 %v3401_v30, %v3401_v30  ;;  %v8970_v42 = vpack.c.bf16 %v3402_v31, %v3402_v31 }
  0x81   : > { %v8971_v43 = vpack.c.bf16 %v3403_v32, %v3403_v32  ;;  %v8972_v44 = vpack.c.bf16 %v3404_v33, %v3404_v33  ;;  %7320 = vst.msk [vmem:[%s11933_s6 + $0xe0] sm:$0xf] %vm7263_vm0, %v8967_v35  ;;  %7321 = vst.msk [vmem:[%s11933_s6 + $0xe4] sm:$0xf] %vm7263_vm0, %v8968_v36  ;;  %v9825_v48 = vunpack.c.l.bf16 %v11294_v34  ;;  %v9826_v49 = vunpack.c.h.bf16 %v11294_v34 }
  0x82   : > { %v8973_v46 = vpack.c.bf16 %v3405_v37, %v3405_v37  ;;  %v8974_v47 = vpack.c.bf16 %v3406_v38, %v3406_v38  ;;  %7322 = vst.msk [vmem:[%s11933_s6 + $0xe8] sm:$0xf] %vm7263_vm0, %v8969_v41  ;;  %7323 = vst.msk [vmem:[%s11933_s6 + $0xec] sm:$0xf] %vm7263_vm0, %v8970_v42  ;;  %v9829_v50 = vunpack.c.l.bf16 %v11295_v39  ;;  %v9830_v51 = vunpack.c.h.bf16 %v11295_v39 }
  0x83   : > { %7324 = vst.msk [vmem:[%s11933_s6 + $0xf0] sm:$0xf] %vm7263_vm0, %v8971_v43  ;;  %7325 = vst.msk [vmem:[%s11933_s6 + $0xf4] sm:$0xf] %vm7263_vm0, %v8972_v44  ;;  %v9833_v52 = vunpack.c.l.bf16 %v11296_v40  ;;  %v9834_v53 = vunpack.c.h.bf16 %v11296_v40  ;;  %v1832_v54 = vmul.f32 %v9825_v48, %v11901_v1  ;;  %v1833_v55 = vmul.f32 %v9826_v49, %v11901_v1 }
  0x84   : > { %7326 = vst.msk [vmem:[%s11933_s6 + $0xf8] sm:$0xf] %vm7263_vm0, %v8973_v46  ;;  %7327 = vst.msk [vmem:[%s11933_s6 + $0xfc] sm:$0xf] %vm7263_vm0, %v8974_v47  ;;  %v9837_v56 = vunpack.c.l.bf16 %v11297_v45  ;;  %v9838_v57 = vunpack.c.h.bf16 %v11297_v45  ;;  %v1834_v58 = vmul.f32 %v9829_v50, %v11901_v1  ;;  %v1835_v59 = vmul.f32 %v9830_v51, %v11901_v1 }
  0x85   : > { %v1836_v60 = vmul.f32 %v9833_v52, %v11901_v1  ;;  %v1837_v61 = vmul.f32 %v9834_v53, %v11901_v1  ;;  %v2623_v62 = vadd.f32 %v11911_v7, %v1832_v54  ;;  %v2624_v63 = vadd.f32 %v11911_v7, %v1833_v55 }
  0x86   : > { %v1838_v0 = vmul.f32 %v9837_v56, %v11901_v1  ;;  %v1839_v2 = vmul.f32 %v9838_v57, %v11901_v1  ;;  %v2625_v3 = vadd.f32 %v11911_v7, %v1834_v58  ;;  %v2626_v4 = vadd.f32 %v11911_v7, %v1835_v59  ;;  %v11302_v59 = vld [vmem:[%s11889_s29 + $0x140] sm:$0xff]  }
  0x87   : > { %v2627_v5 = vadd.f32 %v11911_v7, %v1836_v60  ;;  %v2628_v6 = vadd.f32 %v11911_v7, %v1837_v61  ;;  %v3407_v8 = vmax.f32 %v2623_v62, 0.0  ;;  %v3408_v9 = vmax.f32 %v2624_v63, 0.0 }
  0x88   : > { %v2629_v10 = vadd.f32 %v11911_v7, %v1838_v0  ;;  %v2630_v11 = vadd.f32 %v11911_v7, %v1839_v2  ;;  %v3409_v12 = vmax.f32 %v2625_v3, 0.0  ;;  %v3410_v13 = vmax.f32 %v2626_v4, 0.0  ;;  %v11303_v0 = vld [vmem:[%s11889_s29 + $0x148] sm:$0xff]   ;;  %v11304_v2 = vld [vmem:[%s11889_s29 + $0x150] sm:$0xff]  }
  0x89   : > { %v3411_v14 = vmax.f32 %v2627_v5, 0.0  ;;  %v3412_v15 = vmax.f32 %v2628_v6, 0.0  ;;  %v8975_v17 = vpack.c.bf16 %v3407_v8, %v3407_v8  ;;  %v8976_v18 = vpack.c.bf16 %v3408_v9, %v3408_v9  ;;  %v11305_v6 = vld [vmem:[%s11889_s29 + $0x158] sm:$0xff]  }
  0x8a   : > { %v3413_v19 = vmax.f32 %v2629_v10, 0.0  ;;  %v3414_v20 = vmax.f32 %v2630_v11, 0.0  ;;  %v8977_v23 = vpack.c.bf16 %v3409_v12, %v3409_v12  ;;  %v8978_v24 = vpack.c.bf16 %v3410_v13, %v3410_v13 }
  0x8b   : > { %v8979_v25 = vpack.c.bf16 %v3411_v14, %v3411_v14  ;;  %v8980_v26 = vpack.c.bf16 %v3412_v15, %v3412_v15  ;;  %7328 = vst.msk [vmem:[%s11933_s6 + $0x100] sm:$0xf] %vm7263_vm0, %v8975_v17  ;;  %7329 = vst.msk [vmem:[%s11933_s6 + $0x104] sm:$0xf] %vm7263_vm0, %v8976_v18  ;;  %v9841_v30 = vunpack.c.l.bf16 %v11298_v16  ;;  %v9842_v31 = vunpack.c.h.bf16 %v11298_v16  ;;  %v12282_v16 = vld [vmem:[%s15547_s1] ss:$0 sm:$0xff] }
  0x8c   : > { %v8981_v28 = vpack.c.bf16 %v3413_v19, %v3413_v19  ;;  %v8982_v29 = vpack.c.bf16 %v3414_v20, %v3414_v20  ;;  %7330 = vst.msk [vmem:[%s11933_s6 + $0x108] sm:$0xf] %vm7263_vm0, %v8977_v23  ;;  %7331 = vst.msk [vmem:[%s11933_s6 + $0x10c] sm:$0xf] %vm7263_vm0, %v8978_v24  ;;  %v9845_v32 = vunpack.c.l.bf16 %v11299_v21  ;;  %v9846_v33 = vunpack.c.h.bf16 %v11299_v21 }
  0x8d   : > { %7332 = vst.msk [vmem:[%s11933_s6 + $0x110] sm:$0xf] %vm7263_vm0, %v8979_v25  ;;  %7333 = vst.msk [vmem:[%s11933_s6 + $0x114] sm:$0xf] %vm7263_vm0, %v8980_v26  ;;  %v9849_v34 = vunpack.c.l.bf16 %v11300_v22  ;;  %v9850_v35 = vunpack.c.h.bf16 %v11300_v22  ;;  %v1840_v36 = vmul.f32 %v9841_v30, %v11901_v1  ;;  %v1841_v37 = vmul.f32 %v9842_v31, %v11901_v1  ;;  %v12293_v25 = vld [vmem:[%s15548_s2] ss:$0 sm:$0xff] }
  0x8e   : > { %7334 = vst.msk [vmem:[%s11933_s6 + $0x118] sm:$0xf] %vm7263_vm0, %v8981_v28  ;;  %7335 = vst.msk [vmem:[%s11933_s6 + $0x11c] sm:$0xf] %vm7263_vm0, %v8982_v29  ;;  %v9853_v38 = vunpack.c.l.bf16 %v11301_v27  ;;  %v9854_v39 = vunpack.c.h.bf16 %v11301_v27  ;;  %v1842_v40 = vmul.f32 %v9845_v32, %v11901_v1  ;;  %v1843_v41 = vmul.f32 %v9846_v33, %v11901_v1 }
  0x8f   : > { %v1844_v42 = vmul.f32 %v9849_v34, %v11901_v1  ;;  %v1845_v43 = vmul.f32 %v9850_v35, %v11901_v1  ;;  %v2631_v44 = vadd.f32 %v11911_v7, %v1840_v36  ;;  %v2632_v45 = vadd.f32 %v11911_v7, %v1841_v37 }
  0x90   : > { %v1846_v46 = vmul.f32 %v9853_v38, %v11901_v1  ;;  %v1847_v47 = vmul.f32 %v9854_v39, %v11901_v1  ;;  %v2633_v48 = vadd.f32 %v11911_v7, %v1842_v40  ;;  %v2634_v49 = vadd.f32 %v11911_v7, %v1843_v41 }
  0x91   : > { %v2635_v50 = vadd.f32 %v11911_v7, %v1844_v42  ;;  %v2636_v51 = vadd.f32 %v11911_v7, %v1845_v43  ;;  %v3415_v52 = vmax.f32 %v2631_v44, 0.0  ;;  %v3416_v53 = vmax.f32 %v2632_v45, 0.0  ;;  %v11306_v42 = vld [vmem:[%s11889_s29 + $0x160] sm:$0xff]  }
  0x92   : > { %v2637_v54 = vadd.f32 %v11911_v7, %v1846_v46  ;;  %v2638_v55 = vadd.f32 %v11911_v7, %v1847_v47  ;;  %v3417_v56 = vmax.f32 %v2633_v48, 0.0  ;;  %v3418_v1 = vmax.f32 %v2634_v49, 0.0  ;;  %v11307_v47 = vld [vmem:[%s11889_s29 + $0x168] sm:$0xff]   ;;  %v11308_v48 = vld [vmem:[%s11889_s29 + $0x170] sm:$0xff]  }
  0x93   : > { %v3419_v57 = vmax.f32 %v2635_v50, 0.0  ;;  %v3420_v58 = vmax.f32 %v2636_v51, 0.0  ;;  %v8983_v60 = vpack.c.bf16 %v3415_v52, %v3415_v52  ;;  %v8984_v61 = vpack.c.bf16 %v3416_v53, %v3416_v53  ;;  %v11309_v53 = vld [vmem:[%s11889_s29 + $0x178] sm:$0xff]  }
  0x94   : > { %v3421_v62 = vmax.f32 %v2637_v54, 0.0  ;;  %v3422_v63 = vmax.f32 %v2638_v55, 0.0  ;;  %v8985_v3 = vpack.c.bf16 %v3417_v56, %v3417_v56  ;;  %v8986_v7 = vpack.c.bf16 %v3418_v1, %v3418_v1 }
  0x95   : > { %v8987_v4 = vpack.c.bf16 %v3419_v57, %v3419_v57  ;;  %v8988_v5 = vpack.c.bf16 %v3420_v58, %v3420_v58  ;;  %7336 = vst.msk [vmem:[%s11933_s6 + $0x120] sm:$0xf] %vm7263_vm0, %v8983_v60  ;;  %7337 = vst.msk [vmem:[%s11933_s6 + $0x124] sm:$0xf] %vm7263_vm0, %v8984_v61  ;;  %v9857_v10 = vunpack.c.l.bf16 %v11302_v59  ;;  %v9858_v11 = vunpack.c.h.bf16 %v11302_v59 }
  0x96   : > { %v8989_v8 = vpack.c.bf16 %v3421_v62, %v3421_v62  ;;  %v8990_v9 = vpack.c.bf16 %v3422_v63, %v3422_v63  ;;  %7338 = vst.msk [vmem:[%s11933_s6 + $0x128] sm:$0xf] %vm7263_vm0, %v8985_v3  ;;  %7339 = vst.msk [vmem:[%s11933_s6 + $0x12c] sm:$0xf] %vm7263_vm0, %v8986_v7  ;;  %v9861_v12 = vunpack.c.l.bf16 %v11303_v0  ;;  %v9862_v13 = vunpack.c.h.bf16 %v11303_v0 }
  0x97   : > { %7340 = vst.msk [vmem:[%s11933_s6 + $0x130] sm:$0xf] %vm7263_vm0, %v8987_v4  ;;  %7341 = vst.msk [vmem:[%s11933_s6 + $0x134] sm:$0xf] %vm7263_vm0, %v8988_v5  ;;  %v9865_v14 = vunpack.c.l.bf16 %v11304_v2  ;;  %v9866_v15 = vunpack.c.h.bf16 %v11304_v2  ;;  %v1848_v17 = vmul.f32 %v12282_v16, %v9857_v10  ;;  %v1849_v18 = vmul.f32 %v12282_v16, %v9858_v11 }
  0x98   : > { %7342 = vst.msk [vmem:[%s11933_s6 + $0x138] sm:$0xf] %vm7263_vm0, %v8989_v8  ;;  %7343 = vst.msk [vmem:[%s11933_s6 + $0x13c] sm:$0xf] %vm7263_vm0, %v8990_v9  ;;  %v9869_v19 = vunpack.c.l.bf16 %v11305_v6  ;;  %v9870_v20 = vunpack.c.h.bf16 %v11305_v6  ;;  %v1850_v21 = vmul.f32 %v12282_v16, %v9861_v12  ;;  %v1851_v22 = vmul.f32 %v12282_v16, %v9862_v13 }
  0x99   : > { %v1852_v23 = vmul.f32 %v12282_v16, %v9865_v14  ;;  %v1853_v24 = vmul.f32 %v12282_v16, %v9866_v15  ;;  %v2639_v26 = vadd.f32 %v12293_v25, %v1848_v17  ;;  %v2640_v27 = vadd.f32 %v12293_v25, %v1849_v18 }
  0x9a   : > { %v1854_v28 = vmul.f32 %v12282_v16, %v9869_v19  ;;  %v1855_v29 = vmul.f32 %v12282_v16, %v9870_v20  ;;  %v2641_v30 = vadd.f32 %v12293_v25, %v1850_v21  ;;  %v2642_v31 = vadd.f32 %v12293_v25, %v1851_v22 }
  0x9b   : > { %v2643_v32 = vadd.f32 %v12293_v25, %v1852_v23  ;;  %v2644_v33 = vadd.f32 %v12293_v25, %v1853_v24  ;;  %v3423_v34 = vmax.f32 %v2639_v26, 0.0  ;;  %v3424_v35 = vmax.f32 %v2640_v27, 0.0  ;;  %v11310_v23 = vld [vmem:[%s11889_s29 + $0x180] sm:$0xff]  }
  0x9c   : > { %v2645_v36 = vadd.f32 %v12293_v25, %v1854_v28  ;;  %v2646_v37 = vadd.f32 %v12293_v25, %v1855_v29  ;;  %v3425_v38 = vmax.f32 %v2641_v30, 0.0  ;;  %v3426_v39 = vmax.f32 %v2642_v31, 0.0  ;;  %v11311_v29 = vld [vmem:[%s11889_s29 + $0x188] sm:$0xff]   ;;  %v11312_v30 = vld [vmem:[%s11889_s29 + $0x190] sm:$0xff]  }
  0x9d   : > { %v3427_v40 = vmax.f32 %v2643_v32, 0.0  ;;  %v3428_v41 = vmax.f32 %v2644_v33, 0.0  ;;  %v8991_v43 = vpack.c.bf16 %v3423_v34, %v3423_v34  ;;  %v8992_v44 = vpack.c.bf16 %v3424_v35, %v3424_v35  ;;  %v11313_v35 = vld [vmem:[%s11889_s29 + $0x198] sm:$0xff]  }
  0x9e   : > { %v3429_v45 = vmax.f32 %v2645_v36, 0.0  ;;  %v3430_v46 = vmax.f32 %v2646_v37, 0.0  ;;  %v8993_v49 = vpack.c.bf16 %v3425_v38, %v3425_v38  ;;  %v8994_v50 = vpack.c.bf16 %v3426_v39, %v3426_v39 }
  0x9f   : > { %v8995_v51 = vpack.c.bf16 %v3427_v40, %v3427_v40  ;;  %v8996_v52 = vpack.c.bf16 %v3428_v41, %v3428_v41  ;;  %7344 = vst.msk [vmem:[%s11933_s6 + $0x140] sm:$0xf] %vm7263_vm0, %v8991_v43  ;;  %7345 = vst.msk [vmem:[%s11933_s6 + $0x144] sm:$0xf] %vm7263_vm0, %v8992_v44  ;;  %v9873_v56 = vunpack.c.l.bf16 %v11306_v42  ;;  %v9874_v1 = vunpack.c.h.bf16 %v11306_v42 }
  0xa0   : > { %v8997_v54 = vpack.c.bf16 %v3429_v45, %v3429_v45  ;;  %v8998_v55 = vpack.c.bf16 %v3430_v46, %v3430_v46  ;;  %7346 = vst.msk [vmem:[%s11933_s6 + $0x148] sm:$0xf] %vm7263_vm0, %v8993_v49  ;;  %7347 = vst.msk [vmem:[%s11933_s6 + $0x14c] sm:$0xf] %vm7263_vm0, %v8994_v50  ;;  %v9877_v57 = vunpack.c.l.bf16 %v11307_v47  ;;  %v9878_v58 = vunpack.c.h.bf16 %v11307_v47 }
  0xa1   : > { %7348 = vst.msk [vmem:[%s11933_s6 + $0x150] sm:$0xf] %vm7263_vm0, %v8995_v51  ;;  %7349 = vst.msk [vmem:[%s11933_s6 + $0x154] sm:$0xf] %vm7263_vm0, %v8996_v52  ;;  %v9881_v59 = vunpack.c.l.bf16 %v11308_v48  ;;  %v9882_v60 = vunpack.c.h.bf16 %v11308_v48  ;;  %v1856_v61 = vmul.f32 %v12282_v16, %v9873_v56  ;;  %v1857_v62 = vmul.f32 %v12282_v16, %v9874_v1 }
  0xa2   : > { %7350 = vst.msk [vmem:[%s11933_s6 + $0x158] sm:$0xf] %vm7263_vm0, %v8997_v54  ;;  %7351 = vst.msk [vmem:[%s11933_s6 + $0x15c] sm:$0xf] %vm7263_vm0, %v8998_v55  ;;  %v9885_v63 = vunpack.c.l.bf16 %v11309_v53  ;;  %v9886_v0 = vunpack.c.h.bf16 %v11309_v53  ;;  %v1858_v2 = vmul.f32 %v12282_v16, %v9877_v57  ;;  %v1859_v3 = vmul.f32 %v12282_v16, %v9878_v58 }
  0xa3   : > { %v1860_v7 = vmul.f32 %v12282_v16, %v9881_v59  ;;  %v1861_v4 = vmul.f32 %v12282_v16, %v9882_v60  ;;  %v2647_v5 = vadd.f32 %v12293_v25, %v1856_v61  ;;  %v2648_v6 = vadd.f32 %v12293_v25, %v1857_v62 }
  0xa4   : > { %v1862_v8 = vmul.f32 %v12282_v16, %v9885_v63  ;;  %v1863_v9 = vmul.f32 %v12282_v16, %v9886_v0  ;;  %v2649_v10 = vadd.f32 %v12293_v25, %v1858_v2  ;;  %v2650_v11 = vadd.f32 %v12293_v25, %v1859_v3 }
  0xa5   : > { %v2651_v12 = vadd.f32 %v12293_v25, %v1860_v7  ;;  %v2652_v13 = vadd.f32 %v12293_v25, %v1861_v4  ;;  %v3431_v14 = vmax.f32 %v2647_v5, 0.0  ;;  %v3432_v15 = vmax.f32 %v2648_v6, 0.0  ;;  %v11314_v7 = vld [vmem:[%s11889_s29 + $0x1a0] sm:$0xff]  }
  0xa6   : > { %v2653_v17 = vadd.f32 %v12293_v25, %v1862_v8  ;;  %v2654_v18 = vadd.f32 %v12293_v25, %v1863_v9  ;;  %v3433_v19 = vmax.f32 %v2649_v10, 0.0  ;;  %v3434_v20 = vmax.f32 %v2650_v11, 0.0  ;;  %v11315_v9 = vld [vmem:[%s11889_s29 + $0x1a8] sm:$0xff]   ;;  %v11316_v10 = vld [vmem:[%s11889_s29 + $0x1b0] sm:$0xff]  }
  0xa7   : > { %v3435_v21 = vmax.f32 %v2651_v12, 0.0  ;;  %v3436_v22 = vmax.f32 %v2652_v13, 0.0  ;;  %v8999_v24 = vpack.c.bf16 %v3431_v14, %v3431_v14  ;;  %v9000_v26 = vpack.c.bf16 %v3432_v15, %v3432_v15  ;;  %v11317_v15 = vld [vmem:[%s11889_s29 + $0x1b8] sm:$0xff]  }
  0xa8   : > { %v3437_v27 = vmax.f32 %v2653_v17, 0.0  ;;  %v3438_v28 = vmax.f32 %v2654_v18, 0.0  ;;  %v9001_v31 = vpack.c.bf16 %v3433_v19, %v3433_v19  ;;  %v9002_v32 = vpack.c.bf16 %v3434_v20, %v3434_v20 }
  0xa9   : > { %v9003_v33 = vpack.c.bf16 %v3435_v21, %v3435_v21  ;;  %v9004_v34 = vpack.c.bf16 %v3436_v22, %v3436_v22  ;;  %7352 = vst.msk [vmem:[%s11933_s6 + $0x160] sm:$0xf] %vm7263_vm0, %v8999_v24  ;;  %7353 = vst.msk [vmem:[%s11933_s6 + $0x164] sm:$0xf] %vm7263_vm0, %v9000_v26  ;;  %v9889_v38 = vunpack.c.l.bf16 %v11310_v23  ;;  %v9890_v39 = vunpack.c.h.bf16 %v11310_v23 }
  0xaa   : > { %v9005_v36 = vpack.c.bf16 %v3437_v27, %v3437_v27  ;;  %v9006_v37 = vpack.c.bf16 %v3438_v28, %v3438_v28  ;;  %7354 = vst.msk [vmem:[%s11933_s6 + $0x168] sm:$0xf] %vm7263_vm0, %v9001_v31  ;;  %7355 = vst.msk [vmem:[%s11933_s6 + $0x16c] sm:$0xf] %vm7263_vm0, %v9002_v32  ;;  %v9893_v40 = vunpack.c.l.bf16 %v11311_v29  ;;  %v9894_v41 = vunpack.c.h.bf16 %v11311_v29 }
  0xab   : > { %7356 = vst.msk [vmem:[%s11933_s6 + $0x170] sm:$0xf] %vm7263_vm0, %v9003_v33  ;;  %7357 = vst.msk [vmem:[%s11933_s6 + $0x174] sm:$0xf] %vm7263_vm0, %v9004_v34  ;;  %v9897_v42 = vunpack.c.l.bf16 %v11312_v30  ;;  %v9898_v43 = vunpack.c.h.bf16 %v11312_v30  ;;  %v1864_v44 = vmul.f32 %v12282_v16, %v9889_v38  ;;  %v1865_v45 = vmul.f32 %v12282_v16, %v9890_v39 }
  0xac   : > { %7358 = vst.msk [vmem:[%s11933_s6 + $0x178] sm:$0xf] %vm7263_vm0, %v9005_v36  ;;  %7359 = vst.msk [vmem:[%s11933_s6 + $0x17c] sm:$0xf] %vm7263_vm0, %v9006_v37  ;;  %v9901_v46 = vunpack.c.l.bf16 %v11313_v35  ;;  %v9902_v47 = vunpack.c.h.bf16 %v11313_v35  ;;  %v1866_v48 = vmul.f32 %v12282_v16, %v9893_v40  ;;  %v1867_v49 = vmul.f32 %v12282_v16, %v9894_v41 }
  0xad   : > { %v1868_v50 = vmul.f32 %v12282_v16, %v9897_v42  ;;  %v1869_v51 = vmul.f32 %v12282_v16, %v9898_v43  ;;  %v2655_v52 = vadd.f32 %v12293_v25, %v1864_v44  ;;  %v2656_v53 = vadd.f32 %v12293_v25, %v1865_v45 }
  0xae   : > { %v1870_v54 = vmul.f32 %v12282_v16, %v9901_v46  ;;  %v1871_v55 = vmul.f32 %v12282_v16, %v9902_v47  ;;  %v2657_v56 = vadd.f32 %v12293_v25, %v1866_v48  ;;  %v2658_v1 = vadd.f32 %v12293_v25, %v1867_v49 }
  0xaf   : > { %v2659_v57 = vadd.f32 %v12293_v25, %v1868_v50  ;;  %v2660_v58 = vadd.f32 %v12293_v25, %v1869_v51  ;;  %v3439_v59 = vmax.f32 %v2655_v52, 0.0  ;;  %v3440_v60 = vmax.f32 %v2656_v53, 0.0  ;;  %v11318_v50 = vld [vmem:[%s11889_s29 + $0x1c0] sm:$0xff]  }
  0xb0   : > { %v2661_v61 = vadd.f32 %v12293_v25, %v1870_v54  ;;  %v2662_v62 = vadd.f32 %v12293_v25, %v1871_v55  ;;  %v3441_v63 = vmax.f32 %v2657_v56, 0.0  ;;  %v3442_v0 = vmax.f32 %v2658_v1, 0.0  ;;  %v11319_v55 = vld [vmem:[%s11889_s29 + $0x1c8] sm:$0xff]   ;;  %v11320_v56 = vld [vmem:[%s11889_s29 + $0x1d0] sm:$0xff]  }
  0xb1   : > { %v3443_v2 = vmax.f32 %v2659_v57, 0.0  ;;  %v3444_v3 = vmax.f32 %v2660_v58, 0.0  ;;  %v9007_v4 = vpack.c.bf16 %v3439_v59, %v3439_v59  ;;  %v9008_v5 = vpack.c.bf16 %v3440_v60, %v3440_v60  ;;  %v11321_v60 = vld [vmem:[%s11889_s29 + $0x1d8] sm:$0xff]  }
  0xb2   : > { %v3445_v6 = vmax.f32 %v2661_v61, 0.0  ;;  %v3446_v8 = vmax.f32 %v2662_v62, 0.0  ;;  %v9009_v11 = vpack.c.bf16 %v3441_v63, %v3441_v63  ;;  %v9010_v12 = vpack.c.bf16 %v3442_v0, %v3442_v0 }
  0xb3   : > { %v9011_v13 = vpack.c.bf16 %v3443_v2, %v3443_v2  ;;  %v9012_v14 = vpack.c.bf16 %v3444_v3, %v3444_v3  ;;  %7360 = vst.msk [vmem:[%s11933_s6 + $0x180] sm:$0xf] %vm7263_vm0, %v9007_v4  ;;  %7361 = vst.msk [vmem:[%s11933_s6 + $0x184] sm:$0xf] %vm7263_vm0, %v9008_v5  ;;  %v9905_v19 = vunpack.c.l.bf16 %v11314_v7  ;;  %v9906_v20 = vunpack.c.h.bf16 %v11314_v7 }
  0xb4   : > { %v9013_v17 = vpack.c.bf16 %v3445_v6, %v3445_v6  ;;  %v9014_v18 = vpack.c.bf16 %v3446_v8, %v3446_v8  ;;  %7362 = vst.msk [vmem:[%s11933_s6 + $0x188] sm:$0xf] %vm7263_vm0, %v9009_v11  ;;  %7363 = vst.msk [vmem:[%s11933_s6 + $0x18c] sm:$0xf] %vm7263_vm0, %v9010_v12  ;;  %v9909_v21 = vunpack.c.l.bf16 %v11315_v9  ;;  %v9910_v22 = vunpack.c.h.bf16 %v11315_v9 }
  0xb5   : > { %7364 = vst.msk [vmem:[%s11933_s6 + $0x190] sm:$0xf] %vm7263_vm0, %v9011_v13  ;;  %7365 = vst.msk [vmem:[%s11933_s6 + $0x194] sm:$0xf] %vm7263_vm0, %v9012_v14  ;;  %v9913_v23 = vunpack.c.l.bf16 %v11316_v10  ;;  %v9914_v24 = vunpack.c.h.bf16 %v11316_v10  ;;  %v1872_v26 = vmul.f32 %v12282_v16, %v9905_v19  ;;  %v1873_v27 = vmul.f32 %v12282_v16, %v9906_v20 }
  0xb6   : > { %7366 = vst.msk [vmem:[%s11933_s6 + $0x198] sm:$0xf] %vm7263_vm0, %v9013_v17  ;;  %7367 = vst.msk [vmem:[%s11933_s6 + $0x19c] sm:$0xf] %vm7263_vm0, %v9014_v18  ;;  %v9917_v28 = vunpack.c.l.bf16 %v11317_v15  ;;  %v9918_v29 = vunpack.c.h.bf16 %v11317_v15  ;;  %v1874_v30 = vmul.f32 %v12282_v16, %v9909_v21  ;;  %v1875_v31 = vmul.f32 %v12282_v16, %v9910_v22 }
  0xb7   : > { %v1876_v32 = vmul.f32 %v12282_v16, %v9913_v23  ;;  %v1877_v33 = vmul.f32 %v12282_v16, %v9914_v24  ;;  %v2663_v34 = vadd.f32 %v12293_v25, %v1872_v26  ;;  %v2664_v35 = vadd.f32 %v12293_v25, %v1873_v27 }
  0xb8   : > { %v1878_v36 = vmul.f32 %v12282_v16, %v9917_v28  ;;  %v1879_v37 = vmul.f32 %v12282_v16, %v9918_v29  ;;  %v2665_v38 = vadd.f32 %v12293_v25, %v1874_v30  ;;  %v2666_v39 = vadd.f32 %v12293_v25, %v1875_v31 }
  0xb9   : > { %v2667_v40 = vadd.f32 %v12293_v25, %v1876_v32  ;;  %v2668_v41 = vadd.f32 %v12293_v25, %v1877_v33  ;;  %v3447_v42 = vmax.f32 %v2663_v34, 0.0  ;;  %v3448_v43 = vmax.f32 %v2664_v35, 0.0  ;;  %v11322_v32 = vld [vmem:[%s11889_s29 + $0x1e0] sm:$0xff]  }
  0xba   : > { %v2669_v44 = vadd.f32 %v12293_v25, %v1878_v36  ;;  %v2670_v45 = vadd.f32 %v12293_v25, %v1879_v37  ;;  %v3449_v46 = vmax.f32 %v2665_v38, 0.0  ;;  %v3450_v47 = vmax.f32 %v2666_v39, 0.0  ;;  %v11323_v37 = vld [vmem:[%s11889_s29 + $0x1e8] sm:$0xff]   ;;  %v11324_v38 = vld [vmem:[%s11889_s29 + $0x1f0] sm:$0xff]  }
  0xbb   : > { %v3451_v48 = vmax.f32 %v2667_v40, 0.0  ;;  %v3452_v49 = vmax.f32 %v2668_v41, 0.0  ;;  %v9015_v51 = vpack.c.bf16 %v3447_v42, %v3447_v42  ;;  %v9016_v52 = vpack.c.bf16 %v3448_v43, %v3448_v43  ;;  %v11325_v43 = vld [vmem:[%s11889_s29 + $0x1f8] sm:$0xff]  }
  0xbc   : > { %v3453_v53 = vmax.f32 %v2669_v44, 0.0  ;;  %v3454_v54 = vmax.f32 %v2670_v45, 0.0  ;;  %v9017_v1 = vpack.c.bf16 %v3449_v46, %v3449_v46  ;;  %v9018_v57 = vpack.c.bf16 %v3450_v47, %v3450_v47 }
  0xbd   : > { %v9019_v58 = vpack.c.bf16 %v3451_v48, %v3451_v48  ;;  %v9020_v59 = vpack.c.bf16 %v3452_v49, %v3452_v49  ;;  %7368 = vst.msk [vmem:[%s11933_s6 + $0x1a0] sm:$0xf] %vm7263_vm0, %v9015_v51  ;;  %7369 = vst.msk [vmem:[%s11933_s6 + $0x1a4] sm:$0xf] %vm7263_vm0, %v9016_v52  ;;  %v9921_v63 = vunpack.c.l.bf16 %v11318_v50  ;;  %v9922_v0 = vunpack.c.h.bf16 %v11318_v50 }
  0xbe   : > { %v9021_v61 = vpack.c.bf16 %v3453_v53, %v3453_v53  ;;  %v9022_v62 = vpack.c.bf16 %v3454_v54, %v3454_v54  ;;  %7370 = vst.msk [vmem:[%s11933_s6 + $0x1a8] sm:$0xf] %vm7263_vm0, %v9017_v1  ;;  %7371 = vst.msk [vmem:[%s11933_s6 + $0x1ac] sm:$0xf] %vm7263_vm0, %v9018_v57  ;;  %v9925_v2 = vunpack.c.l.bf16 %v11319_v55  ;;  %v9926_v3 = vunpack.c.h.bf16 %v11319_v55 }
  0xbf   : > { %7372 = vst.msk [vmem:[%s11933_s6 + $0x1b0] sm:$0xf] %vm7263_vm0, %v9019_v58  ;;  %7373 = vst.msk [vmem:[%s11933_s6 + $0x1b4] sm:$0xf] %vm7263_vm0, %v9020_v59  ;;  %v9929_v7 = vunpack.c.l.bf16 %v11320_v56  ;;  %v9930_v4 = vunpack.c.h.bf16 %v11320_v56  ;;  %v1880_v5 = vmul.f32 %v12282_v16, %v9921_v63  ;;  %v1881_v6 = vmul.f32 %v12282_v16, %v9922_v0 }
  0xc0   : > { %7374 = vst.msk [vmem:[%s11933_s6 + $0x1b8] sm:$0xf] %vm7263_vm0, %v9021_v61  ;;  %7375 = vst.msk [vmem:[%s11933_s6 + $0x1bc] sm:$0xf] %vm7263_vm0, %v9022_v62  ;;  %v9933_v8 = vunpack.c.l.bf16 %v11321_v60  ;;  %v9934_v9 = vunpack.c.h.bf16 %v11321_v60  ;;  %v1882_v10 = vmul.f32 %v12282_v16, %v9925_v2  ;;  %v1883_v11 = vmul.f32 %v12282_v16, %v9926_v3 }
  0xc1   : > { %v1884_v12 = vmul.f32 %v12282_v16, %v9929_v7  ;;  %v1885_v13 = vmul.f32 %v12282_v16, %v9930_v4  ;;  %v2671_v14 = vadd.f32 %v12293_v25, %v1880_v5  ;;  %v2672_v15 = vadd.f32 %v12293_v25, %v1881_v6 }
  0xc2   : > { %v1886_v17 = vmul.f32 %v12282_v16, %v9933_v8  ;;  %v1887_v18 = vmul.f32 %v12282_v16, %v9934_v9  ;;  %v2673_v19 = vadd.f32 %v12293_v25, %v1882_v10  ;;  %v2674_v20 = vadd.f32 %v12293_v25, %v1883_v11 }
  0xc3   : > { %v2675_v21 = vadd.f32 %v12293_v25, %v1884_v12  ;;  %v2676_v22 = vadd.f32 %v12293_v25, %v1885_v13  ;;  %v3455_v23 = vmax.f32 %v2671_v14, 0.0  ;;  %v3456_v24 = vmax.f32 %v2672_v15, 0.0  ;;  %v11326_v12 = vld [vmem:[%s11889_s29 + $0x200] sm:$0xff]  }
  0xc4   : > { %v2677_v26 = vadd.f32 %v12293_v25, %v1886_v17  ;;  %v2678_v27 = vadd.f32 %v12293_v25, %v1887_v18  ;;  %v3457_v28 = vmax.f32 %v2673_v19, 0.0  ;;  %v3458_v29 = vmax.f32 %v2674_v20, 0.0  ;;  %v11327_v18 = vld [vmem:[%s11889_s29 + $0x208] sm:$0xff]   ;;  %v11328_v19 = vld [vmem:[%s11889_s29 + $0x210] sm:$0xff]  }
  0xc5   : > { %v3459_v30 = vmax.f32 %v2675_v21, 0.0  ;;  %v3460_v31 = vmax.f32 %v2676_v22, 0.0  ;;  %v9023_v33 = vpack.c.bf16 %v3455_v23, %v3455_v23  ;;  %v9024_v34 = vpack.c.bf16 %v3456_v24, %v3456_v24  ;;  %v11329_v24 = vld [vmem:[%s11889_s29 + $0x218] sm:$0xff]  }
  0xc6   : > { %v3461_v35 = vmax.f32 %v2677_v26, 0.0  ;;  %v3462_v36 = vmax.f32 %v2678_v27, 0.0  ;;  %v9025_v39 = vpack.c.bf16 %v3457_v28, %v3457_v28  ;;  %v9026_v40 = vpack.c.bf16 %v3458_v29, %v3458_v29 }
  0xc7   : > { %v9027_v41 = vpack.c.bf16 %v3459_v30, %v3459_v30  ;;  %v9028_v42 = vpack.c.bf16 %v3460_v31, %v3460_v31  ;;  %7376 = vst.msk [vmem:[%s11933_s6 + $0x1c0] sm:$0xf] %vm7263_vm0, %v9023_v33  ;;  %7377 = vst.msk [vmem:[%s11933_s6 + $0x1c4] sm:$0xf] %vm7263_vm0, %v9024_v34  ;;  %v9937_v46 = vunpack.c.l.bf16 %v11322_v32  ;;  %v9938_v47 = vunpack.c.h.bf16 %v11322_v32 }
  0xc8   : > { %v9029_v44 = vpack.c.bf16 %v3461_v35, %v3461_v35  ;;  %v9030_v45 = vpack.c.bf16 %v3462_v36, %v3462_v36  ;;  %7378 = vst.msk [vmem:[%s11933_s6 + $0x1c8] sm:$0xf] %vm7263_vm0, %v9025_v39  ;;  %7379 = vst.msk [vmem:[%s11933_s6 + $0x1cc] sm:$0xf] %vm7263_vm0, %v9026_v40  ;;  %v9941_v48 = vunpack.c.l.bf16 %v11323_v37  ;;  %v9942_v49 = vunpack.c.h.bf16 %v11323_v37 }
  0xc9   : > { %7380 = vst.msk [vmem:[%s11933_s6 + $0x1d0] sm:$0xf] %vm7263_vm0, %v9027_v41  ;;  %7381 = vst.msk [vmem:[%s11933_s6 + $0x1d4] sm:$0xf] %vm7263_vm0, %v9028_v42  ;;  %v9945_v50 = vunpack.c.l.bf16 %v11324_v38  ;;  %v9946_v51 = vunpack.c.h.bf16 %v11324_v38  ;;  %v1888_v52 = vmul.f32 %v12282_v16, %v9937_v46  ;;  %v1889_v53 = vmul.f32 %v12282_v16, %v9938_v47 }
  0xca   : > { %7382 = vst.msk [vmem:[%s11933_s6 + $0x1d8] sm:$0xf] %vm7263_vm0, %v9029_v44  ;;  %7383 = vst.msk [vmem:[%s11933_s6 + $0x1dc] sm:$0xf] %vm7263_vm0, %v9030_v45  ;;  %v9949_v54 = vunpack.c.l.bf16 %v11325_v43  ;;  %v9950_v55 = vunpack.c.h.bf16 %v11325_v43  ;;  %v1890_v56 = vmul.f32 %v12282_v16, %v9941_v48  ;;  %v1891_v1 = vmul.f32 %v12282_v16, %v9942_v49 }
  0xcb   : > { %v1892_v57 = vmul.f32 %v12282_v16, %v9945_v50  ;;  %v1893_v58 = vmul.f32 %v12282_v16, %v9946_v51  ;;  %v2679_v59 = vadd.f32 %v12293_v25, %v1888_v52  ;;  %v2680_v60 = vadd.f32 %v12293_v25, %v1889_v53 }
  0xcc   : > { %v1894_v61 = vmul.f32 %v12282_v16, %v9949_v54  ;;  %v1895_v62 = vmul.f32 %v12282_v16, %v9950_v55  ;;  %v2681_v63 = vadd.f32 %v12293_v25, %v1890_v56  ;;  %v2682_v0 = vadd.f32 %v12293_v25, %v1891_v1 }
  0xcd   : > { %v2683_v2 = vadd.f32 %v12293_v25, %v1892_v57  ;;  %v2684_v3 = vadd.f32 %v12293_v25, %v1893_v58  ;;  %v3463_v7 = vmax.f32 %v2679_v59, 0.0  ;;  %v3464_v4 = vmax.f32 %v2680_v60, 0.0  ;;  %v11330_v57 = vld [vmem:[%s11889_s29 + $0x220] sm:$0xff]  }
  0xce   : > { %v2685_v5 = vadd.f32 %v12293_v25, %v1894_v61  ;;  %v2686_v6 = vadd.f32 %v12293_v25, %v1895_v62  ;;  %v3465_v8 = vmax.f32 %v2681_v63, 0.0  ;;  %v3466_v9 = vmax.f32 %v2682_v0, 0.0  ;;  %v11331_v62 = vld [vmem:[%s11889_s29 + $0x228] sm:$0xff]   ;;  %v11332_v63 = vld [vmem:[%s11889_s29 + $0x230] sm:$0xff]  }
  0xcf   : > { %v3467_v10 = vmax.f32 %v2683_v2, 0.0  ;;  %v3468_v11 = vmax.f32 %v2684_v3, 0.0  ;;  %v9031_v13 = vpack.c.bf16 %v3463_v7, %v3463_v7  ;;  %v9032_v14 = vpack.c.bf16 %v3464_v4, %v3464_v4  ;;  %v11333_v4 = vld [vmem:[%s11889_s29 + $0x238] sm:$0xff]  }
  0xd0   : > { %v3469_v15 = vmax.f32 %v2685_v5, 0.0  ;;  %v3470_v17 = vmax.f32 %v2686_v6, 0.0  ;;  %v9033_v20 = vpack.c.bf16 %v3465_v8, %v3465_v8  ;;  %v9034_v21 = vpack.c.bf16 %v3466_v9, %v3466_v9 }
  0xd1   : > { %v9035_v22 = vpack.c.bf16 %v3467_v10, %v3467_v10  ;;  %v9036_v23 = vpack.c.bf16 %v3468_v11, %v3468_v11  ;;  %7384 = vst.msk [vmem:[%s11933_s6 + $0x1e0] sm:$0xf] %vm7263_vm0, %v9031_v13  ;;  %7385 = vst.msk [vmem:[%s11933_s6 + $0x1e4] sm:$0xf] %vm7263_vm0, %v9032_v14  ;;  %v9953_v28 = vunpack.c.l.bf16 %v11326_v12  ;;  %v9954_v29 = vunpack.c.h.bf16 %v11326_v12 }
  0xd2   : > { %v9037_v26 = vpack.c.bf16 %v3469_v15, %v3469_v15  ;;  %v9038_v27 = vpack.c.bf16 %v3470_v17, %v3470_v17  ;;  %7386 = vst.msk [vmem:[%s11933_s6 + $0x1e8] sm:$0xf] %vm7263_vm0, %v9033_v20  ;;  %7387 = vst.msk [vmem:[%s11933_s6 + $0x1ec] sm:$0xf] %vm7263_vm0, %v9034_v21  ;;  %v9957_v30 = vunpack.c.l.bf16 %v11327_v18  ;;  %v9958_v31 = vunpack.c.h.bf16 %v11327_v18 }
  0xd3   : > { %7388 = vst.msk [vmem:[%s11933_s6 + $0x1f0] sm:$0xf] %vm7263_vm0, %v9035_v22  ;;  %7389 = vst.msk [vmem:[%s11933_s6 + $0x1f4] sm:$0xf] %vm7263_vm0, %v9036_v23  ;;  %v9961_v32 = vunpack.c.l.bf16 %v11328_v19  ;;  %v9962_v33 = vunpack.c.h.bf16 %v11328_v19  ;;  %v1896_v34 = vmul.f32 %v12282_v16, %v9953_v28  ;;  %v1897_v35 = vmul.f32 %v12282_v16, %v9954_v29 }
  0xd4   : > { %7390 = vst.msk [vmem:[%s11933_s6 + $0x1f8] sm:$0xf] %vm7263_vm0, %v9037_v26  ;;  %7391 = vst.msk [vmem:[%s11933_s6 + $0x1fc] sm:$0xf] %vm7263_vm0, %v9038_v27  ;;  %v9965_v36 = vunpack.c.l.bf16 %v11329_v24  ;;  %v9966_v37 = vunpack.c.h.bf16 %v11329_v24  ;;  %v1898_v38 = vmul.f32 %v12282_v16, %v9957_v30  ;;  %v1899_v39 = vmul.f32 %v12282_v16, %v9958_v31 }
  0xd5   : > { %v1900_v40 = vmul.f32 %v12282_v16, %v9961_v32  ;;  %v1901_v41 = vmul.f32 %v12282_v16, %v9962_v33  ;;  %v2687_v42 = vadd.f32 %v12293_v25, %v1896_v34  ;;  %v2688_v43 = vadd.f32 %v12293_v25, %v1897_v35 }
  0xd6   : > { %v1902_v44 = vmul.f32 %v12282_v16, %v9965_v36  ;;  %v1903_v45 = vmul.f32 %v12282_v16, %v9966_v37  ;;  %v2689_v46 = vadd.f32 %v12293_v25, %v1898_v38  ;;  %v2690_v47 = vadd.f32 %v12293_v25, %v1899_v39 }
  0xd7   : > { %v2691_v48 = vadd.f32 %v12293_v25, %v1900_v40  ;;  %v2692_v49 = vadd.f32 %v12293_v25, %v1901_v41  ;;  %v3471_v50 = vmax.f32 %v2687_v42, 0.0  ;;  %v3472_v51 = vmax.f32 %v2688_v43, 0.0  ;;  %v11334_v40 = vld [vmem:[%s11889_s29 + $0x240] sm:$0xff]  }
  0xd8   : > { %v2693_v52 = vadd.f32 %v12293_v25, %v1902_v44  ;;  %v2694_v53 = vadd.f32 %v12293_v25, %v1903_v45  ;;  %v3473_v54 = vmax.f32 %v2689_v46, 0.0  ;;  %v3474_v55 = vmax.f32 %v2690_v47, 0.0  ;;  %v11335_v45 = vld [vmem:[%s11889_s29 + $0x248] sm:$0xff]   ;;  %v11336_v46 = vld [vmem:[%s11889_s29 + $0x250] sm:$0xff]  }
  0xd9   : > { %v3475_v56 = vmax.f32 %v2691_v48, 0.0  ;;  %v3476_v1 = vmax.f32 %v2692_v49, 0.0  ;;  %v9039_v58 = vpack.c.bf16 %v3471_v50, %v3471_v50  ;;  %v9040_v59 = vpack.c.bf16 %v3472_v51, %v3472_v51  ;;  %v11337_v51 = vld [vmem:[%s11889_s29 + $0x258] sm:$0xff]  }
  0xda   : > { %v3477_v60 = vmax.f32 %v2693_v52, 0.0  ;;  %v3478_v61 = vmax.f32 %v2694_v53, 0.0  ;;  %v9041_v0 = vpack.c.bf16 %v3473_v54, %v3473_v54  ;;  %v9042_v2 = vpack.c.bf16 %v3474_v55, %v3474_v55 }
  0xdb   : > { %v9043_v3 = vpack.c.bf16 %v3475_v56, %v3475_v56  ;;  %v9044_v7 = vpack.c.bf16 %v3476_v1, %v3476_v1  ;;  %7392 = vst.msk [vmem:[%s11933_s6 + $0x200] sm:$0xf] %vm7263_vm0, %v9039_v58  ;;  %7393 = vst.msk [vmem:[%s11933_s6 + $0x204] sm:$0xf] %vm7263_vm0, %v9040_v59  ;;  %v9969_v8 = vunpack.c.l.bf16 %v11330_v57  ;;  %v9970_v9 = vunpack.c.h.bf16 %v11330_v57 }
  0xdc   : > { %v9045_v5 = vpack.c.bf16 %v3477_v60, %v3477_v60  ;;  %v9046_v6 = vpack.c.bf16 %v3478_v61, %v3478_v61  ;;  %7394 = vst.msk [vmem:[%s11933_s6 + $0x208] sm:$0xf] %vm7263_vm0, %v9041_v0  ;;  %7395 = vst.msk [vmem:[%s11933_s6 + $0x20c] sm:$0xf] %vm7263_vm0, %v9042_v2  ;;  %v9973_v10 = vunpack.c.l.bf16 %v11331_v62  ;;  %v9974_v11 = vunpack.c.h.bf16 %v11331_v62 }
  0xdd   : > { %7396 = vst.msk [vmem:[%s11933_s6 + $0x210] sm:$0xf] %vm7263_vm0, %v9043_v3  ;;  %7397 = vst.msk [vmem:[%s11933_s6 + $0x214] sm:$0xf] %vm7263_vm0, %v9044_v7  ;;  %v9977_v12 = vunpack.c.l.bf16 %v11332_v63  ;;  %v9978_v13 = vunpack.c.h.bf16 %v11332_v63  ;;  %v1904_v14 = vmul.f32 %v12282_v16, %v9969_v8  ;;  %v1905_v15 = vmul.f32 %v12282_v16, %v9970_v9 }
  0xde   : > { %7398 = vst.msk [vmem:[%s11933_s6 + $0x218] sm:$0xf] %vm7263_vm0, %v9045_v5  ;;  %7399 = vst.msk [vmem:[%s11933_s6 + $0x21c] sm:$0xf] %vm7263_vm0, %v9046_v6  ;;  %v9981_v17 = vunpack.c.l.bf16 %v11333_v4  ;;  %v9982_v18 = vunpack.c.h.bf16 %v11333_v4  ;;  %v1906_v19 = vmul.f32 %v12282_v16, %v9973_v10  ;;  %v1907_v20 = vmul.f32 %v12282_v16, %v9974_v11 }
  0xdf   : > { %v1908_v21 = vmul.f32 %v12282_v16, %v9977_v12  ;;  %v1909_v22 = vmul.f32 %v12282_v16, %v9978_v13  ;;  %v2695_v23 = vadd.f32 %v12293_v25, %v1904_v14  ;;  %v2696_v24 = vadd.f32 %v12293_v25, %v1905_v15 }
  0xe0   : > { %v1910_v26 = vmul.f32 %v12282_v16, %v9981_v17  ;;  %v1911_v27 = vmul.f32 %v12282_v16, %v9982_v18  ;;  %v2697_v28 = vadd.f32 %v12293_v25, %v1906_v19  ;;  %v2698_v29 = vadd.f32 %v12293_v25, %v1907_v20 }
  0xe1   : > { %v2699_v30 = vadd.f32 %v12293_v25, %v1908_v21  ;;  %v2700_v31 = vadd.f32 %v12293_v25, %v1909_v22  ;;  %v3479_v32 = vmax.f32 %v2695_v23, 0.0  ;;  %v3480_v33 = vmax.f32 %v2696_v24, 0.0  ;;  %v11338_v21 = vld [vmem:[%s11889_s29 + $0x260] sm:$0xff]  }
  0xe2   : > { %v2701_v34 = vadd.f32 %v12293_v25, %v1910_v26  ;;  %v2702_v35 = vadd.f32 %v12293_v25, %v1911_v27  ;;  %v3481_v36 = vmax.f32 %v2697_v28, 0.0  ;;  %v3482_v37 = vmax.f32 %v2698_v29, 0.0  ;;  %v11339_v27 = vld [vmem:[%s11889_s29 + $0x268] sm:$0xff]   ;;  %v11340_v28 = vld [vmem:[%s11889_s29 + $0x270] sm:$0xff]  }
  0xe3   : > { %v3483_v38 = vmax.f32 %v2699_v30, 0.0  ;;  %v3484_v39 = vmax.f32 %v2700_v31, 0.0  ;;  %v9047_v41 = vpack.c.bf16 %v3479_v32, %v3479_v32  ;;  %v9048_v42 = vpack.c.bf16 %v3480_v33, %v3480_v33  ;;  %v11341_v33 = vld [vmem:[%s11889_s29 + $0x278] sm:$0xff]  }
  0xe4   : > { %v3485_v43 = vmax.f32 %v2701_v34, 0.0  ;;  %v3486_v44 = vmax.f32 %v2702_v35, 0.0  ;;  %v9049_v47 = vpack.c.bf16 %v3481_v36, %v3481_v36  ;;  %v9050_v48 = vpack.c.bf16 %v3482_v37, %v3482_v37 }
  0xe5   : > { %v9051_v49 = vpack.c.bf16 %v3483_v38, %v3483_v38  ;;  %v9052_v50 = vpack.c.bf16 %v3484_v39, %v3484_v39  ;;  %7400 = vst.msk [vmem:[%s11933_s6 + $0x220] sm:$0xf] %vm7263_vm0, %v9047_v41  ;;  %7401 = vst.msk [vmem:[%s11933_s6 + $0x224] sm:$0xf] %vm7263_vm0, %v9048_v42  ;;  %v9985_v54 = vunpack.c.l.bf16 %v11334_v40  ;;  %v9986_v55 = vunpack.c.h.bf16 %v11334_v40 }
  0xe6   : > { %v9053_v52 = vpack.c.bf16 %v3485_v43, %v3485_v43  ;;  %v9054_v53 = vpack.c.bf16 %v3486_v44, %v3486_v44  ;;  %7402 = vst.msk [vmem:[%s11933_s6 + $0x228] sm:$0xf] %vm7263_vm0, %v9049_v47  ;;  %7403 = vst.msk [vmem:[%s11933_s6 + $0x22c] sm:$0xf] %vm7263_vm0, %v9050_v48  ;;  %v9989_v56 = vunpack.c.l.bf16 %v11335_v45  ;;  %v9990_v1 = vunpack.c.h.bf16 %v11335_v45 }
  0xe7   : > { %7404 = vst.msk [vmem:[%s11933_s6 + $0x230] sm:$0xf] %vm7263_vm0, %v9051_v49  ;;  %7405 = vst.msk [vmem:[%s11933_s6 + $0x234] sm:$0xf] %vm7263_vm0, %v9052_v50  ;;  %v9993_v57 = vunpack.c.l.bf16 %v11336_v46  ;;  %v9994_v58 = vunpack.c.h.bf16 %v11336_v46  ;;  %v1912_v59 = vmul.f32 %v12282_v16, %v9985_v54  ;;  %v1913_v60 = vmul.f32 %v12282_v16, %v9986_v55 }
  0xe8   : > { %7406 = vst.msk [vmem:[%s11933_s6 + $0x238] sm:$0xf] %vm7263_vm0, %v9053_v52  ;;  %7407 = vst.msk [vmem:[%s11933_s6 + $0x23c] sm:$0xf] %vm7263_vm0, %v9054_v53  ;;  %v9997_v61 = vunpack.c.l.bf16 %v11337_v51  ;;  %v9998_v62 = vunpack.c.h.bf16 %v11337_v51  ;;  %v1914_v63 = vmul.f32 %v12282_v16, %v9989_v56  ;;  %v1915_v0 = vmul.f32 %v12282_v16, %v9990_v1 }
  0xe9   : > { %v1916_v2 = vmul.f32 %v12282_v16, %v9993_v57  ;;  %v1917_v3 = vmul.f32 %v12282_v16, %v9994_v58  ;;  %v2703_v7 = vadd.f32 %v12293_v25, %v1912_v59  ;;  %v2704_v4 = vadd.f32 %v12293_v25, %v1913_v60 }
  0xea   : > { %v1918_v5 = vmul.f32 %v12282_v16, %v9997_v61  ;;  %v1919_v6 = vmul.f32 %v12282_v16, %v9998_v62  ;;  %v2705_v8 = vadd.f32 %v12293_v25, %v1914_v63  ;;  %v2706_v9 = vadd.f32 %v12293_v25, %v1915_v0  ;;  %v11342_v0 = vld [vmem:[%s11889_s29 + $0x280] sm:$0xff]  }
  0xeb   : > { %v2707_v10 = vadd.f32 %v12293_v25, %v1916_v2  ;;  %v2708_v11 = vadd.f32 %v12293_v25, %v1917_v3  ;;  %v3487_v12 = vmax.f32 %v2703_v7, 0.0  ;;  %v3488_v13 = vmax.f32 %v2704_v4, 0.0 }
  0xec   : > { %v2709_v14 = vadd.f32 %v12293_v25, %v1918_v5  ;;  %v2710_v15 = vadd.f32 %v12293_v25, %v1919_v6  ;;  %v3489_v17 = vmax.f32 %v2705_v8, 0.0  ;;  %v3490_v18 = vmax.f32 %v2706_v9, 0.0  ;;  %v11343_v5 = vld [vmem:[%s11889_s29 + $0x288] sm:$0xff]   ;;  %v11344_v6 = vld [vmem:[%s11889_s29 + $0x290] sm:$0xff]  }
  0xed   : > { %v3491_v19 = vmax.f32 %v2707_v10, 0.0  ;;  %v3492_v20 = vmax.f32 %v2708_v11, 0.0  ;;  %v9055_v22 = vpack.c.bf16 %v3487_v12, %v3487_v12  ;;  %v9056_v23 = vpack.c.bf16 %v3488_v13, %v3488_v13  ;;  %v11345_v11 = vld [vmem:[%s11889_s29 + $0x298] sm:$0xff]  }
  0xee   : > { %v3493_v24 = vmax.f32 %v2709_v14, 0.0  ;;  %v3494_v26 = vmax.f32 %v2710_v15, 0.0  ;;  %v9057_v29 = vpack.c.bf16 %v3489_v17, %v3489_v17  ;;  %v9058_v30 = vpack.c.bf16 %v3490_v18, %v3490_v18 }
  0xef   : > { %v9059_v31 = vpack.c.bf16 %v3491_v19, %v3491_v19  ;;  %v9060_v32 = vpack.c.bf16 %v3492_v20, %v3492_v20  ;;  %7408 = vst.msk [vmem:[%s11933_s6 + $0x240] sm:$0xf] %vm7263_vm0, %v9055_v22  ;;  %7409 = vst.msk [vmem:[%s11933_s6 + $0x244] sm:$0xf] %vm7263_vm0, %v9056_v23  ;;  %v10001_v36 = vunpack.c.l.bf16 %v11338_v21  ;;  %v10002_v37 = vunpack.c.h.bf16 %v11338_v21  ;;  %v12652_v21 = vld [vmem:[%s15547_s1] ss:$0 sm:$0xff] }
  0xf0   : > { %v9061_v34 = vpack.c.bf16 %v3493_v24, %v3493_v24  ;;  %v9062_v35 = vpack.c.bf16 %v3494_v26, %v3494_v26  ;;  %7410 = vst.msk [vmem:[%s11933_s6 + $0x248] sm:$0xf] %vm7263_vm0, %v9057_v29  ;;  %7411 = vst.msk [vmem:[%s11933_s6 + $0x24c] sm:$0xf] %vm7263_vm0, %v9058_v30  ;;  %v10005_v38 = vunpack.c.l.bf16 %v11339_v27  ;;  %v10006_v39 = vunpack.c.h.bf16 %v11339_v27 }
  0xf1   : > { %7412 = vst.msk [vmem:[%s11933_s6 + $0x250] sm:$0xf] %vm7263_vm0, %v9059_v31  ;;  %7413 = vst.msk [vmem:[%s11933_s6 + $0x254] sm:$0xf] %vm7263_vm0, %v9060_v32  ;;  %v10009_v40 = vunpack.c.l.bf16 %v11340_v28  ;;  %v10010_v41 = vunpack.c.h.bf16 %v11340_v28  ;;  %v1920_v42 = vmul.f32 %v12282_v16, %v10001_v36  ;;  %v1921_v43 = vmul.f32 %v12282_v16, %v10002_v37  ;;  %v12663_v31 = vld [vmem:[%s15548_s2] ss:$0 sm:$0xff] }
  0xf2   : > { %7414 = vst.msk [vmem:[%s11933_s6 + $0x258] sm:$0xf] %vm7263_vm0, %v9061_v34  ;;  %7415 = vst.msk [vmem:[%s11933_s6 + $0x25c] sm:$0xf] %vm7263_vm0, %v9062_v35  ;;  %v10013_v44 = vunpack.c.l.bf16 %v11341_v33  ;;  %v10014_v45 = vunpack.c.h.bf16 %v11341_v33  ;;  %v1922_v46 = vmul.f32 %v12282_v16, %v10005_v38  ;;  %v1923_v47 = vmul.f32 %v12282_v16, %v10006_v39 }
  0xf3   : > { %v1924_v48 = vmul.f32 %v12282_v16, %v10009_v40  ;;  %v1925_v49 = vmul.f32 %v12282_v16, %v10010_v41  ;;  %v2711_v50 = vadd.f32 %v12293_v25, %v1920_v42  ;;  %v2712_v51 = vadd.f32 %v12293_v25, %v1921_v43 }
  0xf4   : > { %v1926_v52 = vmul.f32 %v12282_v16, %v10013_v44  ;;  %v1927_v53 = vmul.f32 %v12282_v16, %v10014_v45  ;;  %v2713_v54 = vadd.f32 %v12293_v25, %v1922_v46  ;;  %v2714_v55 = vadd.f32 %v12293_v25, %v1923_v47 }
  0xf5   : > { %v2715_v56 = vadd.f32 %v12293_v25, %v1924_v48  ;;  %v2716_v1 = vadd.f32 %v12293_v25, %v1925_v49  ;;  %v3495_v57 = vmax.f32 %v2711_v50, 0.0  ;;  %v3496_v58 = vmax.f32 %v2712_v51, 0.0  ;;  %v11346_v48 = vld [vmem:[%s11889_s29 + $0x2a0] sm:$0xff]  }
  0xf6   : > { %v2717_v59 = vadd.f32 %v12293_v25, %v1926_v52  ;;  %v2718_v60 = vadd.f32 %v12293_v25, %v1927_v53  ;;  %v3497_v61 = vmax.f32 %v2713_v54, 0.0  ;;  %v3498_v16 = vmax.f32 %v2714_v55, 0.0  ;;  %v11347_v53 = vld [vmem:[%s11889_s29 + $0x2a8] sm:$0xff]   ;;  %v11348_v54 = vld [vmem:[%s11889_s29 + $0x2b0] sm:$0xff]  }
  0xf7   : > { %v3499_v62 = vmax.f32 %v2715_v56, 0.0  ;;  %v3500_v63 = vmax.f32 %v2716_v1, 0.0  ;;  %v9063_v2 = vpack.c.bf16 %v3495_v57, %v3495_v57  ;;  %v9064_v3 = vpack.c.bf16 %v3496_v58, %v3496_v58  ;;  %v11349_v58 = vld [vmem:[%s11889_s29 + $0x2b8] sm:$0xff]  }
  0xf8   : > { %v3501_v7 = vmax.f32 %v2717_v59, 0.0  ;;  %v3502_v4 = vmax.f32 %v2718_v60, 0.0  ;;  %v9065_v8 = vpack.c.bf16 %v3497_v61, %v3497_v61  ;;  %v9066_v25 = vpack.c.bf16 %v3498_v16, %v3498_v16 }
  0xf9   : > { %v9067_v9 = vpack.c.bf16 %v3499_v62, %v3499_v62  ;;  %v9068_v10 = vpack.c.bf16 %v3500_v63, %v3500_v63  ;;  %7416 = vst.msk [vmem:[%s11933_s6 + $0x260] sm:$0xf] %vm7263_vm0, %v9063_v2  ;;  %7417 = vst.msk [vmem:[%s11933_s6 + $0x264] sm:$0xf] %vm7263_vm0, %v9064_v3  ;;  %v10017_v14 = vunpack.c.l.bf16 %v11342_v0  ;;  %v10018_v15 = vunpack.c.h.bf16 %v11342_v0 }
  0xfa   : > { %v9069_v12 = vpack.c.bf16 %v3501_v7, %v3501_v7  ;;  %v9070_v13 = vpack.c.bf16 %v3502_v4, %v3502_v4  ;;  %7418 = vst.msk [vmem:[%s11933_s6 + $0x268] sm:$0xf] %vm7263_vm0, %v9065_v8  ;;  %7419 = vst.msk [vmem:[%s11933_s6 + $0x26c] sm:$0xf] %vm7263_vm0, %v9066_v25  ;;  %v10021_v17 = vunpack.c.l.bf16 %v11343_v5  ;;  %v10022_v18 = vunpack.c.h.bf16 %v11343_v5 }
  0xfb   : > { %7420 = vst.msk [vmem:[%s11933_s6 + $0x270] sm:$0xf] %vm7263_vm0, %v9067_v9  ;;  %7421 = vst.msk [vmem:[%s11933_s6 + $0x274] sm:$0xf] %vm7263_vm0, %v9068_v10  ;;  %v10025_v19 = vunpack.c.l.bf16 %v11344_v6  ;;  %v10026_v20 = vunpack.c.h.bf16 %v11344_v6  ;;  %v1928_v22 = vmul.f32 %v12652_v21, %v10017_v14  ;;  %v1929_v23 = vmul.f32 %v12652_v21, %v10018_v15 }
  0xfc   : > { %7422 = vst.msk [vmem:[%s11933_s6 + $0x278] sm:$0xf] %vm7263_vm0, %v9069_v12  ;;  %7423 = vst.msk [vmem:[%s11933_s6 + $0x27c] sm:$0xf] %vm7263_vm0, %v9070_v13  ;;  %v10029_v24 = vunpack.c.l.bf16 %v11345_v11  ;;  %v10030_v26 = vunpack.c.h.bf16 %v11345_v11  ;;  %v1930_v27 = vmul.f32 %v12652_v21, %v10021_v17  ;;  %v1931_v28 = vmul.f32 %v12652_v21, %v10022_v18 }
  0xfd   : > { %v1932_v29 = vmul.f32 %v12652_v21, %v10025_v19  ;;  %v1933_v30 = vmul.f32 %v12652_v21, %v10026_v20  ;;  %v2719_v32 = vadd.f32 %v12663_v31, %v1928_v22  ;;  %v2720_v33 = vadd.f32 %v12663_v31, %v1929_v23 }
  0xfe   : > { %v1934_v34 = vmul.f32 %v12652_v21, %v10029_v24  ;;  %v1935_v35 = vmul.f32 %v12652_v21, %v10030_v26  ;;  %v2721_v36 = vadd.f32 %v12663_v31, %v1930_v27  ;;  %v2722_v37 = vadd.f32 %v12663_v31, %v1931_v28 }
  0xff   : > { %v2723_v38 = vadd.f32 %v12663_v31, %v1932_v29  ;;  %v2724_v39 = vadd.f32 %v12663_v31, %v1933_v30  ;;  %v3503_v40 = vmax.f32 %v2719_v32, 0.0  ;;  %v3504_v41 = vmax.f32 %v2720_v33, 0.0  ;;  %v11350_v29 = vld [vmem:[%s11889_s29 + $0x2c0] sm:$0xff]  }
 0x100   : > { %v2725_v42 = vadd.f32 %v12663_v31, %v1934_v34  ;;  %v2726_v43 = vadd.f32 %v12663_v31, %v1935_v35  ;;  %v3505_v44 = vmax.f32 %v2721_v36, 0.0  ;;  %v3506_v45 = vmax.f32 %v2722_v37, 0.0  ;;  %v11351_v35 = vld [vmem:[%s11889_s29 + $0x2c8] sm:$0xff]   ;;  %v11352_v36 = vld [vmem:[%s11889_s29 + $0x2d0] sm:$0xff]  }
 0x101   : > { %v3507_v46 = vmax.f32 %v2723_v38, 0.0  ;;  %v3508_v47 = vmax.f32 %v2724_v39, 0.0  ;;  %v9071_v49 = vpack.c.bf16 %v3503_v40, %v3503_v40  ;;  %v9072_v50 = vpack.c.bf16 %v3504_v41, %v3504_v41  ;;  %v11353_v41 = vld [vmem:[%s11889_s29 + $0x2d8] sm:$0xff]  }
 0x102   : > { %v3509_v51 = vmax.f32 %v2725_v42, 0.0  ;;  %v3510_v52 = vmax.f32 %v2726_v43, 0.0  ;;  %v9073_v55 = vpack.c.bf16 %v3505_v44, %v3505_v44  ;;  %v9074_v56 = vpack.c.bf16 %v3506_v45, %v3506_v45 }
 0x103   : > { %v9075_v1 = vpack.c.bf16 %v3507_v46, %v3507_v46  ;;  %v9076_v57 = vpack.c.bf16 %v3508_v47, %v3508_v47  ;;  %7424 = vst.msk [vmem:[%s11933_s6 + $0x280] sm:$0xf] %vm7263_vm0, %v9071_v49  ;;  %7425 = vst.msk [vmem:[%s11933_s6 + $0x284] sm:$0xf] %vm7263_vm0, %v9072_v50  ;;  %v10033_v61 = vunpack.c.l.bf16 %v11346_v48  ;;  %v10034_v16 = vunpack.c.h.bf16 %v11346_v48 }
 0x104   : > { %v9077_v59 = vpack.c.bf16 %v3509_v51, %v3509_v51  ;;  %v9078_v60 = vpack.c.bf16 %v3510_v52, %v3510_v52  ;;  %7426 = vst.msk [vmem:[%s11933_s6 + $0x288] sm:$0xf] %vm7263_vm0, %v9073_v55  ;;  %7427 = vst.msk [vmem:[%s11933_s6 + $0x28c] sm:$0xf] %vm7263_vm0, %v9074_v56  ;;  %v10037_v62 = vunpack.c.l.bf16 %v11347_v53  ;;  %v10038_v63 = vunpack.c.h.bf16 %v11347_v53 }
 0x105   : > { %7428 = vst.msk [vmem:[%s11933_s6 + $0x290] sm:$0xf] %vm7263_vm0, %v9075_v1  ;;  %7429 = vst.msk [vmem:[%s11933_s6 + $0x294] sm:$0xf] %vm7263_vm0, %v9076_v57  ;;  %v10041_v0 = vunpack.c.l.bf16 %v11348_v54  ;;  %v10042_v2 = vunpack.c.h.bf16 %v11348_v54  ;;  %v1936_v3 = vmul.f32 %v12652_v21, %v10033_v61  ;;  %v1937_v7 = vmul.f32 %v12652_v21, %v10034_v16 }
 0x106   : > { %7430 = vst.msk [vmem:[%s11933_s6 + $0x298] sm:$0xf] %vm7263_vm0, %v9077_v59  ;;  %7431 = vst.msk [vmem:[%s11933_s6 + $0x29c] sm:$0xf] %vm7263_vm0, %v9078_v60  ;;  %v10045_v4 = vunpack.c.l.bf16 %v11349_v58  ;;  %v10046_v5 = vunpack.c.h.bf16 %v11349_v58  ;;  %v1938_v6 = vmul.f32 %v12652_v21, %v10037_v62  ;;  %v1939_v8 = vmul.f32 %v12652_v21, %v10038_v63 }
 0x107   : > { %v1940_v25 = vmul.f32 %v12652_v21, %v10041_v0  ;;  %v1941_v9 = vmul.f32 %v12652_v21, %v10042_v2  ;;  %v2727_v10 = vadd.f32 %v12663_v31, %v1936_v3  ;;  %v2728_v11 = vadd.f32 %v12663_v31, %v1937_v7 }
 0x108   : > { %v1942_v12 = vmul.f32 %v12652_v21, %v10045_v4  ;;  %v1943_v13 = vmul.f32 %v12652_v21, %v10046_v5  ;;  %v2729_v14 = vadd.f32 %v12663_v31, %v1938_v6  ;;  %v2730_v15 = vadd.f32 %v12663_v31, %v1939_v8 }
 0x109   : > { %v2731_v17 = vadd.f32 %v12663_v31, %v1940_v25  ;;  %v2732_v18 = vadd.f32 %v12663_v31, %v1941_v9  ;;  %v3511_v19 = vmax.f32 %v2727_v10, 0.0  ;;  %v3512_v20 = vmax.f32 %v2728_v11, 0.0  ;;  %v11354_v25 = vld [vmem:[%s11889_s29 + $0x2e0] sm:$0xff]  }
 0x10a   : > { %v2733_v22 = vadd.f32 %v12663_v31, %v1942_v12  ;;  %v2734_v23 = vadd.f32 %v12663_v31, %v1943_v13  ;;  %v3513_v24 = vmax.f32 %v2729_v14, 0.0  ;;  %v3514_v26 = vmax.f32 %v2730_v15, 0.0  ;;  %v11355_v13 = vld [vmem:[%s11889_s29 + $0x2e8] sm:$0xff]   ;;  %v11356_v14 = vld [vmem:[%s11889_s29 + $0x2f0] sm:$0xff]  }
 0x10b   : > { %v3515_v27 = vmax.f32 %v2731_v17, 0.0  ;;  %v3516_v28 = vmax.f32 %v2732_v18, 0.0  ;;  %v9079_v30 = vpack.c.bf16 %v3511_v19, %v3511_v19  ;;  %v9080_v32 = vpack.c.bf16 %v3512_v20, %v3512_v20  ;;  %v11357_v20 = vld [vmem:[%s11889_s29 + $0x2f8] sm:$0xff]  }
 0x10c   : > { %v3517_v33 = vmax.f32 %v2733_v22, 0.0  ;;  %v3518_v34 = vmax.f32 %v2734_v23, 0.0  ;;  %v9081_v37 = vpack.c.bf16 %v3513_v24, %v3513_v24  ;;  %v9082_v38 = vpack.c.bf16 %v3514_v26, %v3514_v26 }
 0x10d   : > { %v9083_v39 = vpack.c.bf16 %v3515_v27, %v3515_v27  ;;  %v9084_v40 = vpack.c.bf16 %v3516_v28, %v3516_v28  ;;  %7432 = vst.msk [vmem:[%s11933_s6 + $0x2a0] sm:$0xf] %vm7263_vm0, %v9079_v30  ;;  %7433 = vst.msk [vmem:[%s11933_s6 + $0x2a4] sm:$0xf] %vm7263_vm0, %v9080_v32  ;;  %v10049_v44 = vunpack.c.l.bf16 %v11350_v29  ;;  %v10050_v45 = vunpack.c.h.bf16 %v11350_v29 }
 0x10e   : > { %v9085_v42 = vpack.c.bf16 %v3517_v33, %v3517_v33  ;;  %v9086_v43 = vpack.c.bf16 %v3518_v34, %v3518_v34  ;;  %7434 = vst.msk [vmem:[%s11933_s6 + $0x2a8] sm:$0xf] %vm7263_vm0, %v9081_v37  ;;  %7435 = vst.msk [vmem:[%s11933_s6 + $0x2ac] sm:$0xf] %vm7263_vm0, %v9082_v38  ;;  %v10053_v46 = vunpack.c.l.bf16 %v11351_v35  ;;  %v10054_v47 = vunpack.c.h.bf16 %v11351_v35 }
 0x10f   : > { %7436 = vst.msk [vmem:[%s11933_s6 + $0x2b0] sm:$0xf] %vm7263_vm0, %v9083_v39  ;;  %7437 = vst.msk [vmem:[%s11933_s6 + $0x2b4] sm:$0xf] %vm7263_vm0, %v9084_v40  ;;  %v10057_v48 = vunpack.c.l.bf16 %v11352_v36  ;;  %v10058_v49 = vunpack.c.h.bf16 %v11352_v36  ;;  %v1944_v50 = vmul.f32 %v12652_v21, %v10049_v44  ;;  %v1945_v51 = vmul.f32 %v12652_v21, %v10050_v45 }
 0x110   : > { %7438 = vst.msk [vmem:[%s11933_s6 + $0x2b8] sm:$0xf] %vm7263_vm0, %v9085_v42  ;;  %7439 = vst.msk [vmem:[%s11933_s6 + $0x2bc] sm:$0xf] %vm7263_vm0, %v9086_v43  ;;  %v10061_v52 = vunpack.c.l.bf16 %v11353_v41  ;;  %v10062_v53 = vunpack.c.h.bf16 %v11353_v41  ;;  %v1946_v54 = vmul.f32 %v12652_v21, %v10053_v46  ;;  %v1947_v55 = vmul.f32 %v12652_v21, %v10054_v47 }
 0x111   : > { %v1948_v56 = vmul.f32 %v12652_v21, %v10057_v48  ;;  %v1949_v1 = vmul.f32 %v12652_v21, %v10058_v49  ;;  %v2735_v57 = vadd.f32 %v12663_v31, %v1944_v50  ;;  %v2736_v58 = vadd.f32 %v12663_v31, %v1945_v51 }
 0x112   : > { %v1950_v59 = vmul.f32 %v12652_v21, %v10061_v52  ;;  %v1951_v60 = vmul.f32 %v12652_v21, %v10062_v53  ;;  %v2737_v61 = vadd.f32 %v12663_v31, %v1946_v54  ;;  %v2738_v16 = vadd.f32 %v12663_v31, %v1947_v55 }
 0x113   : > { %v2739_v62 = vadd.f32 %v12663_v31, %v1948_v56  ;;  %v2740_v63 = vadd.f32 %v12663_v31, %v1949_v1  ;;  %v3519_v0 = vmax.f32 %v2735_v57, 0.0  ;;  %v3520_v2 = vmax.f32 %v2736_v58, 0.0  ;;  %v11358_v56 = vld [vmem:[%s11889_s29 + $0x300] sm:$0xff]  }
 0x114   : > { %v2741_v3 = vadd.f32 %v12663_v31, %v1950_v59  ;;  %v2742_v7 = vadd.f32 %v12663_v31, %v1951_v60  ;;  %v3521_v4 = vmax.f32 %v2737_v61, 0.0  ;;  %v3522_v5 = vmax.f32 %v2738_v16, 0.0  ;;  %v11359_v60 = vld [vmem:[%s11889_s29 + $0x308] sm:$0xff]   ;;  %v11360_v61 = vld [vmem:[%s11889_s29 + $0x310] sm:$0xff]  }
 0x115   : > { %v3523_v6 = vmax.f32 %v2739_v62, 0.0  ;;  %v3524_v8 = vmax.f32 %v2740_v63, 0.0  ;;  %v9087_v9 = vpack.c.bf16 %v3519_v0, %v3519_v0  ;;  %v9088_v10 = vpack.c.bf16 %v3520_v2, %v3520_v2  ;;  %v11361_v2 = vld [vmem:[%s11889_s29 + $0x318] sm:$0xff]  }
 0x116   : > { %v3525_v11 = vmax.f32 %v2741_v3, 0.0  ;;  %v3526_v12 = vmax.f32 %v2742_v7, 0.0  ;;  %v9089_v15 = vpack.c.bf16 %v3521_v4, %v3521_v4  ;;  %v9090_v17 = vpack.c.bf16 %v3522_v5, %v3522_v5 }
 0x117   : > { %v9091_v18 = vpack.c.bf16 %v3523_v6, %v3523_v6  ;;  %v9092_v19 = vpack.c.bf16 %v3524_v8, %v3524_v8  ;;  %7440 = vst.msk [vmem:[%s11933_s6 + $0x2c0] sm:$0xf] %vm7263_vm0, %v9087_v9  ;;  %7441 = vst.msk [vmem:[%s11933_s6 + $0x2c4] sm:$0xf] %vm7263_vm0, %v9088_v10  ;;  %v10065_v24 = vunpack.c.l.bf16 %v11354_v25  ;;  %v10066_v26 = vunpack.c.h.bf16 %v11354_v25 }
 0x118   : > { %v9093_v22 = vpack.c.bf16 %v3525_v11, %v3525_v11  ;;  %v9094_v23 = vpack.c.bf16 %v3526_v12, %v3526_v12  ;;  %7442 = vst.msk [vmem:[%s11933_s6 + $0x2c8] sm:$0xf] %vm7263_vm0, %v9089_v15  ;;  %7443 = vst.msk [vmem:[%s11933_s6 + $0x2cc] sm:$0xf] %vm7263_vm0, %v9090_v17  ;;  %v10069_v27 = vunpack.c.l.bf16 %v11355_v13  ;;  %v10070_v28 = vunpack.c.h.bf16 %v11355_v13 }
 0x119   : > { %7444 = vst.msk [vmem:[%s11933_s6 + $0x2d0] sm:$0xf] %vm7263_vm0, %v9091_v18  ;;  %7445 = vst.msk [vmem:[%s11933_s6 + $0x2d4] sm:$0xf] %vm7263_vm0, %v9092_v19  ;;  %v10073_v29 = vunpack.c.l.bf16 %v11356_v14  ;;  %v10074_v30 = vunpack.c.h.bf16 %v11356_v14  ;;  %v1952_v32 = vmul.f32 %v12652_v21, %v10065_v24  ;;  %v1953_v33 = vmul.f32 %v12652_v21, %v10066_v26 }
 0x11a   : > { %7446 = vst.msk [vmem:[%s11933_s6 + $0x2d8] sm:$0xf] %vm7263_vm0, %v9093_v22  ;;  %7447 = vst.msk [vmem:[%s11933_s6 + $0x2dc] sm:$0xf] %vm7263_vm0, %v9094_v23  ;;  %v10077_v34 = vunpack.c.l.bf16 %v11357_v20  ;;  %v10078_v35 = vunpack.c.h.bf16 %v11357_v20  ;;  %v1954_v36 = vmul.f32 %v12652_v21, %v10069_v27  ;;  %v1955_v37 = vmul.f32 %v12652_v21, %v10070_v28 }
 0x11b   : > { %v1956_v38 = vmul.f32 %v12652_v21, %v10073_v29  ;;  %v1957_v39 = vmul.f32 %v12652_v21, %v10074_v30  ;;  %v2743_v40 = vadd.f32 %v12663_v31, %v1952_v32  ;;  %v2744_v41 = vadd.f32 %v12663_v31, %v1953_v33 }
 0x11c   : > { %v1958_v42 = vmul.f32 %v12652_v21, %v10077_v34  ;;  %v1959_v43 = vmul.f32 %v12652_v21, %v10078_v35  ;;  %v2745_v44 = vadd.f32 %v12663_v31, %v1954_v36  ;;  %v2746_v45 = vadd.f32 %v12663_v31, %v1955_v37 }
 0x11d   : > { %v2747_v46 = vadd.f32 %v12663_v31, %v1956_v38  ;;  %v2748_v47 = vadd.f32 %v12663_v31, %v1957_v39  ;;  %v3527_v48 = vmax.f32 %v2743_v40, 0.0  ;;  %v3528_v49 = vmax.f32 %v2744_v41, 0.0  ;;  %v11362_v38 = vld [vmem:[%s11889_s29 + $0x320] sm:$0xff]  }
 0x11e   : > { %v2749_v50 = vadd.f32 %v12663_v31, %v1958_v42  ;;  %v2750_v51 = vadd.f32 %v12663_v31, %v1959_v43  ;;  %v3529_v52 = vmax.f32 %v2745_v44, 0.0  ;;  %v3530_v53 = vmax.f32 %v2746_v45, 0.0  ;;  %v11363_v43 = vld [vmem:[%s11889_s29 + $0x328] sm:$0xff]   ;;  %v11364_v44 = vld [vmem:[%s11889_s29 + $0x330] sm:$0xff]  }
 0x11f   : > { %v3531_v54 = vmax.f32 %v2747_v46, 0.0  ;;  %v3532_v55 = vmax.f32 %v2748_v47, 0.0  ;;  %v9095_v1 = vpack.c.bf16 %v3527_v48, %v3527_v48  ;;  %v9096_v57 = vpack.c.bf16 %v3528_v49, %v3528_v49  ;;  %v11365_v49 = vld [vmem:[%s11889_s29 + $0x338] sm:$0xff]  }
 0x120   : > { %v3533_v58 = vmax.f32 %v2749_v50, 0.0  ;;  %v3534_v59 = vmax.f32 %v2750_v51, 0.0  ;;  %v9097_v16 = vpack.c.bf16 %v3529_v52, %v3529_v52  ;;  %v9098_v62 = vpack.c.bf16 %v3530_v53, %v3530_v53 }
 0x121   : > { %v9099_v63 = vpack.c.bf16 %v3531_v54, %v3531_v54  ;;  %v9100_v0 = vpack.c.bf16 %v3532_v55, %v3532_v55  ;;  %7448 = vst.msk [vmem:[%s11933_s6 + $0x2e0] sm:$0xf] %vm7263_vm0, %v9095_v1  ;;  %7449 = vst.msk [vmem:[%s11933_s6 + $0x2e4] sm:$0xf] %vm7263_vm0, %v9096_v57  ;;  %v10081_v4 = vunpack.c.l.bf16 %v11358_v56  ;;  %v10082_v5 = vunpack.c.h.bf16 %v11358_v56 }
 0x122   : > { %v9101_v3 = vpack.c.bf16 %v3533_v58, %v3533_v58  ;;  %v9102_v7 = vpack.c.bf16 %v3534_v59, %v3534_v59  ;;  %7450 = vst.msk [vmem:[%s11933_s6 + $0x2e8] sm:$0xf] %vm7263_vm0, %v9097_v16  ;;  %7451 = vst.msk [vmem:[%s11933_s6 + $0x2ec] sm:$0xf] %vm7263_vm0, %v9098_v62  ;;  %v10085_v6 = vunpack.c.l.bf16 %v11359_v60  ;;  %v10086_v8 = vunpack.c.h.bf16 %v11359_v60 }
 0x123   : > { %7452 = vst.msk [vmem:[%s11933_s6 + $0x2f0] sm:$0xf] %vm7263_vm0, %v9099_v63  ;;  %7453 = vst.msk [vmem:[%s11933_s6 + $0x2f4] sm:$0xf] %vm7263_vm0, %v9100_v0  ;;  %v10089_v25 = vunpack.c.l.bf16 %v11360_v61  ;;  %v10090_v9 = vunpack.c.h.bf16 %v11360_v61  ;;  %v1960_v10 = vmul.f32 %v12652_v21, %v10081_v4  ;;  %v1961_v11 = vmul.f32 %v12652_v21, %v10082_v5 }
 0x124   : > { %7454 = vst.msk [vmem:[%s11933_s6 + $0x2f8] sm:$0xf] %vm7263_vm0, %v9101_v3  ;;  %7455 = vst.msk [vmem:[%s11933_s6 + $0x2fc] sm:$0xf] %vm7263_vm0, %v9102_v7  ;;  %v10093_v12 = vunpack.c.l.bf16 %v11361_v2  ;;  %v10094_v13 = vunpack.c.h.bf16 %v11361_v2  ;;  %v1962_v14 = vmul.f32 %v12652_v21, %v10085_v6  ;;  %v1963_v15 = vmul.f32 %v12652_v21, %v10086_v8 }
 0x125   : > { %v1964_v17 = vmul.f32 %v12652_v21, %v10089_v25  ;;  %v1965_v18 = vmul.f32 %v12652_v21, %v10090_v9  ;;  %v2751_v19 = vadd.f32 %v12663_v31, %v1960_v10  ;;  %v2752_v20 = vadd.f32 %v12663_v31, %v1961_v11 }
 0x126   : > { %v1966_v22 = vmul.f32 %v12652_v21, %v10093_v12  ;;  %v1967_v23 = vmul.f32 %v12652_v21, %v10094_v13  ;;  %v2753_v24 = vadd.f32 %v12663_v31, %v1962_v14  ;;  %v2754_v26 = vadd.f32 %v12663_v31, %v1963_v15 }
 0x127   : > { %v2755_v27 = vadd.f32 %v12663_v31, %v1964_v17  ;;  %v2756_v28 = vadd.f32 %v12663_v31, %v1965_v18  ;;  %v3535_v29 = vmax.f32 %v2751_v19, 0.0  ;;  %v3536_v30 = vmax.f32 %v2752_v20, 0.0  ;;  %v11366_v17 = vld [vmem:[%s11889_s29 + $0x340] sm:$0xff]  }
 0x128   : > { %v2757_v32 = vadd.f32 %v12663_v31, %v1966_v22  ;;  %v2758_v33 = vadd.f32 %v12663_v31, %v1967_v23  ;;  %v3537_v34 = vmax.f32 %v2753_v24, 0.0  ;;  %v3538_v35 = vmax.f32 %v2754_v26, 0.0  ;;  %v11367_v23 = vld [vmem:[%s11889_s29 + $0x348] sm:$0xff]   ;;  %v11368_v24 = vld [vmem:[%s11889_s29 + $0x350] sm:$0xff]  }
 0x129   : > { %v3539_v36 = vmax.f32 %v2755_v27, 0.0  ;;  %v3540_v37 = vmax.f32 %v2756_v28, 0.0  ;;  %v9103_v39 = vpack.c.bf16 %v3535_v29, %v3535_v29  ;;  %v9104_v40 = vpack.c.bf16 %v3536_v30, %v3536_v30  ;;  %v11369_v30 = vld [vmem:[%s11889_s29 + $0x358] sm:$0xff]  }
 0x12a   : > { %v3541_v41 = vmax.f32 %v2757_v32, 0.0  ;;  %v3542_v42 = vmax.f32 %v2758_v33, 0.0  ;;  %v9105_v45 = vpack.c.bf16 %v3537_v34, %v3537_v34  ;;  %v9106_v46 = vpack.c.bf16 %v3538_v35, %v3538_v35 }
 0x12b   : > { %v9107_v47 = vpack.c.bf16 %v3539_v36, %v3539_v36  ;;  %v9108_v48 = vpack.c.bf16 %v3540_v37, %v3540_v37  ;;  %7456 = vst.msk [vmem:[%s11933_s6 + $0x300] sm:$0xf] %vm7263_vm0, %v9103_v39  ;;  %7457 = vst.msk [vmem:[%s11933_s6 + $0x304] sm:$0xf] %vm7263_vm0, %v9104_v40  ;;  %v10097_v52 = vunpack.c.l.bf16 %v11362_v38  ;;  %v10098_v53 = vunpack.c.h.bf16 %v11362_v38 }
 0x12c   : > { %v9109_v50 = vpack.c.bf16 %v3541_v41, %v3541_v41  ;;  %v9110_v51 = vpack.c.bf16 %v3542_v42, %v3542_v42  ;;  %7458 = vst.msk [vmem:[%s11933_s6 + $0x308] sm:$0xf] %vm7263_vm0, %v9105_v45  ;;  %7459 = vst.msk [vmem:[%s11933_s6 + $0x30c] sm:$0xf] %vm7263_vm0, %v9106_v46  ;;  %v10101_v54 = vunpack.c.l.bf16 %v11363_v43  ;;  %v10102_v55 = vunpack.c.h.bf16 %v11363_v43 }
 0x12d   : > { %7460 = vst.msk [vmem:[%s11933_s6 + $0x310] sm:$0xf] %vm7263_vm0, %v9107_v47  ;;  %7461 = vst.msk [vmem:[%s11933_s6 + $0x314] sm:$0xf] %vm7263_vm0, %v9108_v48  ;;  %v10105_v56 = vunpack.c.l.bf16 %v11364_v44  ;;  %v10106_v1 = vunpack.c.h.bf16 %v11364_v44  ;;  %v1968_v57 = vmul.f32 %v12652_v21, %v10097_v52  ;;  %v1969_v58 = vmul.f32 %v12652_v21, %v10098_v53 }
 0x12e   : > { %7462 = vst.msk [vmem:[%s11933_s6 + $0x318] sm:$0xf] %vm7263_vm0, %v9109_v50  ;;  %7463 = vst.msk [vmem:[%s11933_s6 + $0x31c] sm:$0xf] %vm7263_vm0, %v9110_v51  ;;  %v10109_v59 = vunpack.c.l.bf16 %v11365_v49  ;;  %v10110_v60 = vunpack.c.h.bf16 %v11365_v49  ;;  %v1970_v61 = vmul.f32 %v12652_v21, %v10101_v54  ;;  %v1971_v16 = vmul.f32 %v12652_v21, %v10102_v55 }
 0x12f   : > { %v1972_v62 = vmul.f32 %v12652_v21, %v10105_v56  ;;  %v1973_v63 = vmul.f32 %v12652_v21, %v10106_v1  ;;  %v2759_v0 = vadd.f32 %v12663_v31, %v1968_v57  ;;  %v2760_v2 = vadd.f32 %v12663_v31, %v1969_v58 }
 0x130   : > { %v1974_v3 = vmul.f32 %v12652_v21, %v10109_v59  ;;  %v1975_v7 = vmul.f32 %v12652_v21, %v10110_v60  ;;  %v2761_v4 = vadd.f32 %v12663_v31, %v1970_v61  ;;  %v2762_v5 = vadd.f32 %v12663_v31, %v1971_v16 }
 0x131   : > { %v2763_v6 = vadd.f32 %v12663_v31, %v1972_v62  ;;  %v2764_v8 = vadd.f32 %v12663_v31, %v1973_v63  ;;  %v3543_v25 = vmax.f32 %v2759_v0, 0.0  ;;  %v3544_v9 = vmax.f32 %v2760_v2, 0.0  ;;  %v11370_v62 = vld [vmem:[%s11889_s29 + $0x360] sm:$0xff]  }
 0x132   : > { %v2765_v10 = vadd.f32 %v12663_v31, %v1974_v3  ;;  %v2766_v11 = vadd.f32 %v12663_v31, %v1975_v7  ;;  %v3545_v12 = vmax.f32 %v2761_v4, 0.0  ;;  %v3546_v13 = vmax.f32 %v2762_v5, 0.0  ;;  %v11371_v7 = vld [vmem:[%s11889_s29 + $0x368] sm:$0xff]   ;;  %v11372_v4 = vld [vmem:[%s11889_s29 + $0x370] sm:$0xff]  }
 0x133   : > { %v3547_v14 = vmax.f32 %v2763_v6, 0.0  ;;  %v3548_v15 = vmax.f32 %v2764_v8, 0.0  ;;  %v9111_v18 = vpack.c.bf16 %v3543_v25, %v3543_v25  ;;  %v9112_v19 = vpack.c.bf16 %v3544_v9, %v3544_v9  ;;  %v11373_v9 = vld [vmem:[%s11889_s29 + $0x378] sm:$0xff]  }
 0x134   : > { %v3549_v20 = vmax.f32 %v2765_v10, 0.0  ;;  %v3550_v22 = vmax.f32 %v2766_v11, 0.0  ;;  %v9113_v26 = vpack.c.bf16 %v3545_v12, %v3545_v12  ;;  %v9114_v27 = vpack.c.bf16 %v3546_v13, %v3546_v13 }
 0x135   : > { %v9115_v28 = vpack.c.bf16 %v3547_v14, %v3547_v14  ;;  %v9116_v29 = vpack.c.bf16 %v3548_v15, %v3548_v15  ;;  %7464 = vst.msk [vmem:[%s11933_s6 + $0x320] sm:$0xf] %vm7263_vm0, %v9111_v18  ;;  %7465 = vst.msk [vmem:[%s11933_s6 + $0x324] sm:$0xf] %vm7263_vm0, %v9112_v19  ;;  %v10113_v34 = vunpack.c.l.bf16 %v11366_v17  ;;  %v10114_v35 = vunpack.c.h.bf16 %v11366_v17 }
 0x136   : > { %v9117_v32 = vpack.c.bf16 %v3549_v20, %v3549_v20  ;;  %v9118_v33 = vpack.c.bf16 %v3550_v22, %v3550_v22  ;;  %7466 = vst.msk [vmem:[%s11933_s6 + $0x328] sm:$0xf] %vm7263_vm0, %v9113_v26  ;;  %7467 = vst.msk [vmem:[%s11933_s6 + $0x32c] sm:$0xf] %vm7263_vm0, %v9114_v27  ;;  %v10117_v36 = vunpack.c.l.bf16 %v11367_v23  ;;  %v10118_v37 = vunpack.c.h.bf16 %v11367_v23 }
 0x137   : > { %7468 = vst.msk [vmem:[%s11933_s6 + $0x330] sm:$0xf] %vm7263_vm0, %v9115_v28  ;;  %7469 = vst.msk [vmem:[%s11933_s6 + $0x334] sm:$0xf] %vm7263_vm0, %v9116_v29  ;;  %v10121_v38 = vunpack.c.l.bf16 %v11368_v24  ;;  %v10122_v39 = vunpack.c.h.bf16 %v11368_v24  ;;  %v1976_v40 = vmul.f32 %v12652_v21, %v10113_v34  ;;  %v1977_v41 = vmul.f32 %v12652_v21, %v10114_v35 }
 0x138   : > { %7470 = vst.msk [vmem:[%s11933_s6 + $0x338] sm:$0xf] %vm7263_vm0, %v9117_v32  ;;  %7471 = vst.msk [vmem:[%s11933_s6 + $0x33c] sm:$0xf] %vm7263_vm0, %v9118_v33  ;;  %v10125_v42 = vunpack.c.l.bf16 %v11369_v30  ;;  %v10126_v43 = vunpack.c.h.bf16 %v11369_v30  ;;  %v1978_v44 = vmul.f32 %v12652_v21, %v10117_v36  ;;  %v1979_v45 = vmul.f32 %v12652_v21, %v10118_v37 }
 0x139   : > { %v1980_v46 = vmul.f32 %v12652_v21, %v10121_v38  ;;  %v1981_v47 = vmul.f32 %v12652_v21, %v10122_v39  ;;  %v2767_v48 = vadd.f32 %v12663_v31, %v1976_v40  ;;  %v2768_v49 = vadd.f32 %v12663_v31, %v1977_v41 }
 0x13a   : > { %v1982_v50 = vmul.f32 %v12652_v21, %v10125_v42  ;;  %v1983_v51 = vmul.f32 %v12652_v21, %v10126_v43  ;;  %v2769_v52 = vadd.f32 %v12663_v31, %v1978_v44  ;;  %v2770_v53 = vadd.f32 %v12663_v31, %v1979_v45 }
 0x13b   : > { %v2771_v54 = vadd.f32 %v12663_v31, %v1980_v46  ;;  %v2772_v55 = vadd.f32 %v12663_v31, %v1981_v47  ;;  %v3551_v56 = vmax.f32 %v2767_v48, 0.0  ;;  %v3552_v1 = vmax.f32 %v2768_v49, 0.0  ;;  %v11374_v46 = vld [vmem:[%s11889_s29 + $0x380] sm:$0xff]  }
 0x13c   : > { %v2773_v57 = vadd.f32 %v12663_v31, %v1982_v50  ;;  %v2774_v58 = vadd.f32 %v12663_v31, %v1983_v51  ;;  %v3553_v59 = vmax.f32 %v2769_v52, 0.0  ;;  %v3554_v60 = vmax.f32 %v2770_v53, 0.0  ;;  %v11375_v51 = vld [vmem:[%s11889_s29 + $0x388] sm:$0xff]   ;;  %v11376_v52 = vld [vmem:[%s11889_s29 + $0x390] sm:$0xff]  }
 0x13d   : > { %v3555_v61 = vmax.f32 %v2771_v54, 0.0  ;;  %v3556_v16 = vmax.f32 %v2772_v55, 0.0  ;;  %v9119_v63 = vpack.c.bf16 %v3551_v56, %v3551_v56  ;;  %v9120_v0 = vpack.c.bf16 %v3552_v1, %v3552_v1  ;;  %v11377_v1 = vld [vmem:[%s11889_s29 + $0x398] sm:$0xff]  }
 0x13e   : > { %v3557_v2 = vmax.f32 %v2773_v57, 0.0  ;;  %v3558_v3 = vmax.f32 %v2774_v58, 0.0  ;;  %v9121_v5 = vpack.c.bf16 %v3553_v59, %v3553_v59  ;;  %v9122_v6 = vpack.c.bf16 %v3554_v60, %v3554_v60 }
 0x13f   : > { %v9123_v8 = vpack.c.bf16 %v3555_v61, %v3555_v61  ;;  %v9124_v25 = vpack.c.bf16 %v3556_v16, %v3556_v16  ;;  %7472 = vst.msk [vmem:[%s11933_s6 + $0x340] sm:$0xf] %vm7263_vm0, %v9119_v63  ;;  %7473 = vst.msk [vmem:[%s11933_s6 + $0x344] sm:$0xf] %vm7263_vm0, %v9120_v0  ;;  %v10129_v12 = vunpack.c.l.bf16 %v11370_v62  ;;  %v10130_v13 = vunpack.c.h.bf16 %v11370_v62 }
 0x140   : > { %v9125_v10 = vpack.c.bf16 %v3557_v2, %v3557_v2  ;;  %v9126_v11 = vpack.c.bf16 %v3558_v3, %v3558_v3  ;;  %7474 = vst.msk [vmem:[%s11933_s6 + $0x348] sm:$0xf] %vm7263_vm0, %v9121_v5  ;;  %7475 = vst.msk [vmem:[%s11933_s6 + $0x34c] sm:$0xf] %vm7263_vm0, %v9122_v6  ;;  %v10133_v14 = vunpack.c.l.bf16 %v11371_v7  ;;  %v10134_v15 = vunpack.c.h.bf16 %v11371_v7 }
 0x141   : > { %7476 = vst.msk [vmem:[%s11933_s6 + $0x350] sm:$0xf] %vm7263_vm0, %v9123_v8  ;;  %7477 = vst.msk [vmem:[%s11933_s6 + $0x354] sm:$0xf] %vm7263_vm0, %v9124_v25  ;;  %v10137_v17 = vunpack.c.l.bf16 %v11372_v4  ;;  %v10138_v18 = vunpack.c.h.bf16 %v11372_v4  ;;  %v1984_v19 = vmul.f32 %v12652_v21, %v10129_v12  ;;  %v1985_v20 = vmul.f32 %v12652_v21, %v10130_v13 }
 0x142   : > { %7478 = vst.msk [vmem:[%s11933_s6 + $0x358] sm:$0xf] %vm7263_vm0, %v9125_v10  ;;  %7479 = vst.msk [vmem:[%s11933_s6 + $0x35c] sm:$0xf] %vm7263_vm0, %v9126_v11  ;;  %v10141_v22 = vunpack.c.l.bf16 %v11373_v9  ;;  %v10142_v23 = vunpack.c.h.bf16 %v11373_v9  ;;  %v1986_v24 = vmul.f32 %v12652_v21, %v10133_v14  ;;  %v1987_v26 = vmul.f32 %v12652_v21, %v10134_v15 }
 0x143   : > { %v1988_v27 = vmul.f32 %v12652_v21, %v10137_v17  ;;  %v1989_v28 = vmul.f32 %v12652_v21, %v10138_v18  ;;  %v2775_v29 = vadd.f32 %v12663_v31, %v1984_v19  ;;  %v2776_v30 = vadd.f32 %v12663_v31, %v1985_v20 }
 0x144   : > { %v1990_v32 = vmul.f32 %v12652_v21, %v10141_v22  ;;  %v1991_v33 = vmul.f32 %v12652_v21, %v10142_v23  ;;  %v2777_v34 = vadd.f32 %v12663_v31, %v1986_v24  ;;  %v2778_v35 = vadd.f32 %v12663_v31, %v1987_v26 }
 0x145   : > { %v2779_v36 = vadd.f32 %v12663_v31, %v1988_v27  ;;  %v2780_v37 = vadd.f32 %v12663_v31, %v1989_v28  ;;  %v3559_v38 = vmax.f32 %v2775_v29, 0.0  ;;  %v3560_v39 = vmax.f32 %v2776_v30, 0.0  ;;  %v11378_v27 = vld [vmem:[%s11889_s29 + $0x3a0] sm:$0xff]  }
 0x146   : > { %v2781_v40 = vadd.f32 %v12663_v31, %v1990_v32  ;;  %v2782_v41 = vadd.f32 %v12663_v31, %v1991_v33  ;;  %v3561_v42 = vmax.f32 %v2777_v34, 0.0  ;;  %v3562_v43 = vmax.f32 %v2778_v35, 0.0  ;;  %v11379_v33 = vld [vmem:[%s11889_s29 + $0x3a8] sm:$0xff]   ;;  %v11380_v34 = vld [vmem:[%s11889_s29 + $0x3b0] sm:$0xff]  }
 0x147   : > { %v3563_v44 = vmax.f32 %v2779_v36, 0.0  ;;  %v3564_v45 = vmax.f32 %v2780_v37, 0.0  ;;  %v9127_v47 = vpack.c.bf16 %v3559_v38, %v3559_v38  ;;  %v9128_v48 = vpack.c.bf16 %v3560_v39, %v3560_v39  ;;  %v11381_v39 = vld [vmem:[%s11889_s29 + $0x3b8] sm:$0xff]  }
 0x148   : > { %v3565_v49 = vmax.f32 %v2781_v40, 0.0  ;;  %v3566_v50 = vmax.f32 %v2782_v41, 0.0  ;;  %v9129_v53 = vpack.c.bf16 %v3561_v42, %v3561_v42  ;;  %v9130_v54 = vpack.c.bf16 %v3562_v43, %v3562_v43 }
 0x149   : > { %v9131_v55 = vpack.c.bf16 %v3563_v44, %v3563_v44  ;;  %v9132_v56 = vpack.c.bf16 %v3564_v45, %v3564_v45  ;;  %7480 = vst.msk [vmem:[%s11933_s6 + $0x360] sm:$0xf] %vm7263_vm0, %v9127_v47  ;;  %7481 = vst.msk [vmem:[%s11933_s6 + $0x364] sm:$0xf] %vm7263_vm0, %v9128_v48  ;;  %v10145_v59 = vunpack.c.l.bf16 %v11374_v46  ;;  %v10146_v60 = vunpack.c.h.bf16 %v11374_v46 }
 0x14a   : > { %v9133_v57 = vpack.c.bf16 %v3565_v49, %v3565_v49  ;;  %v9134_v58 = vpack.c.bf16 %v3566_v50, %v3566_v50  ;;  %7482 = vst.msk [vmem:[%s11933_s6 + $0x368] sm:$0xf] %vm7263_vm0, %v9129_v53  ;;  %7483 = vst.msk [vmem:[%s11933_s6 + $0x36c] sm:$0xf] %vm7263_vm0, %v9130_v54  ;;  %v10149_v61 = vunpack.c.l.bf16 %v11375_v51  ;;  %v10150_v16 = vunpack.c.h.bf16 %v11375_v51 }
 0x14b   : > { %7484 = vst.msk [vmem:[%s11933_s6 + $0x370] sm:$0xf] %vm7263_vm0, %v9131_v55  ;;  %7485 = vst.msk [vmem:[%s11933_s6 + $0x374] sm:$0xf] %vm7263_vm0, %v9132_v56  ;;  %v10153_v62 = vunpack.c.l.bf16 %v11376_v52  ;;  %v10154_v63 = vunpack.c.h.bf16 %v11376_v52  ;;  %v1992_v0 = vmul.f32 %v12652_v21, %v10145_v59  ;;  %v1993_v2 = vmul.f32 %v12652_v21, %v10146_v60 }
 0x14c   : > { %7486 = vst.msk [vmem:[%s11933_s6 + $0x378] sm:$0xf] %vm7263_vm0, %v9133_v57  ;;  %7487 = vst.msk [vmem:[%s11933_s6 + $0x37c] sm:$0xf] %vm7263_vm0, %v9134_v58  ;;  %v10157_v3 = vunpack.c.l.bf16 %v11377_v1  ;;  %v10158_v7 = vunpack.c.h.bf16 %v11377_v1  ;;  %v1994_v4 = vmul.f32 %v12652_v21, %v10149_v61  ;;  %v1995_v5 = vmul.f32 %v12652_v21, %v10150_v16 }
 0x14d   : > { %v1996_v6 = vmul.f32 %v12652_v21, %v10153_v62  ;;  %v1997_v8 = vmul.f32 %v12652_v21, %v10154_v63  ;;  %v2783_v25 = vadd.f32 %v12663_v31, %v1992_v0  ;;  %v2784_v9 = vadd.f32 %v12663_v31, %v1993_v2 }
 0x14e   : > { %v1998_v10 = vmul.f32 %v12652_v21, %v10157_v3  ;;  %v1999_v11 = vmul.f32 %v12652_v21, %v10158_v7  ;;  %v2785_v12 = vadd.f32 %v12663_v31, %v1994_v4  ;;  %v2786_v13 = vadd.f32 %v12663_v31, %v1995_v5  ;;  %v11382_v5 = vld [vmem:[%s11889_s29 + $0x3c0] sm:$0xff]  }
 0x14f   : > { %v2787_v14 = vadd.f32 %v12663_v31, %v1996_v6  ;;  %v2788_v15 = vadd.f32 %v12663_v31, %v1997_v8  ;;  %v3567_v17 = vmax.f32 %v2783_v25, 0.0  ;;  %v3568_v18 = vmax.f32 %v2784_v9, 0.0 }
 0x150   : > { %v2789_v19 = vadd.f32 %v12663_v31, %v1998_v10  ;;  %v2790_v20 = vadd.f32 %v12663_v31, %v1999_v11  ;;  %v3569_v22 = vmax.f32 %v2785_v12, 0.0  ;;  %v3570_v23 = vmax.f32 %v2786_v13, 0.0  ;;  %v11383_v10 = vld [vmem:[%s11889_s29 + $0x3c8] sm:$0xff]   ;;  %v11384_v11 = vld [vmem:[%s11889_s29 + $0x3d0] sm:$0xff]  }
 0x151   : > { %v3571_v24 = vmax.f32 %v2787_v14, 0.0  ;;  %v3572_v26 = vmax.f32 %v2788_v15, 0.0  ;;  %v9135_v28 = vpack.c.bf16 %v3567_v17, %v3567_v17  ;;  %v9136_v29 = vpack.c.bf16 %v3568_v18, %v3568_v18  ;;  %v11385_v15 = vld [vmem:[%s11889_s29 + $0x3d8] sm:$0xff]  }
 0x152   : > { %v3573_v30 = vmax.f32 %v2789_v19, 0.0  ;;  %v3574_v32 = vmax.f32 %v2790_v20, 0.0  ;;  %v9137_v35 = vpack.c.bf16 %v3569_v22, %v3569_v22  ;;  %v9138_v36 = vpack.c.bf16 %v3570_v23, %v3570_v23 }
 0x153   : > { %v9139_v37 = vpack.c.bf16 %v3571_v24, %v3571_v24  ;;  %v9140_v38 = vpack.c.bf16 %v3572_v26, %v3572_v26  ;;  %7488 = vst.msk [vmem:[%s11933_s6 + $0x380] sm:$0xf] %vm7263_vm0, %v9135_v28  ;;  %7489 = vst.msk [vmem:[%s11933_s6 + $0x384] sm:$0xf] %vm7263_vm0, %v9136_v29  ;;  %v10161_v42 = vunpack.c.l.bf16 %v11378_v27  ;;  %v10162_v43 = vunpack.c.h.bf16 %v11378_v27  ;;  %v13022_v27 = vld [vmem:[%s15547_s1] ss:$0 sm:$0xff] }
 0x154   : > { %v9141_v40 = vpack.c.bf16 %v3573_v30, %v3573_v30  ;;  %v9142_v41 = vpack.c.bf16 %v3574_v32, %v3574_v32  ;;  %7490 = vst.msk [vmem:[%s11933_s6 + $0x388] sm:$0xf] %vm7263_vm0, %v9137_v35  ;;  %7491 = vst.msk [vmem:[%s11933_s6 + $0x38c] sm:$0xf] %vm7263_vm0, %v9138_v36  ;;  %v10165_v44 = vunpack.c.l.bf16 %v11379_v33  ;;  %v10166_v45 = vunpack.c.h.bf16 %v11379_v33 }
 0x155   : > { %7492 = vst.msk [vmem:[%s11933_s6 + $0x390] sm:$0xf] %vm7263_vm0, %v9139_v37  ;;  %7493 = vst.msk [vmem:[%s11933_s6 + $0x394] sm:$0xf] %vm7263_vm0, %v9140_v38  ;;  %v10169_v46 = vunpack.c.l.bf16 %v11380_v34  ;;  %v10170_v47 = vunpack.c.h.bf16 %v11380_v34  ;;  %v2000_v48 = vmul.f32 %v12652_v21, %v10161_v42  ;;  %v2001_v49 = vmul.f32 %v12652_v21, %v10162_v43  ;;  %v13033_v37 = vld [vmem:[%s15548_s2] ss:$0 sm:$0xff] }
 0x156   : > { %7494 = vst.msk [vmem:[%s11933_s6 + $0x398] sm:$0xf] %vm7263_vm0, %v9141_v40  ;;  %7495 = vst.msk [vmem:[%s11933_s6 + $0x39c] sm:$0xf] %vm7263_vm0, %v9142_v41  ;;  %v10173_v50 = vunpack.c.l.bf16 %v11381_v39  ;;  %v10174_v51 = vunpack.c.h.bf16 %v11381_v39  ;;  %v2002_v52 = vmul.f32 %v12652_v21, %v10165_v44  ;;  %v2003_v53 = vmul.f32 %v12652_v21, %v10166_v45 }
 0x157   : > { %v2004_v54 = vmul.f32 %v12652_v21, %v10169_v46  ;;  %v2005_v55 = vmul.f32 %v12652_v21, %v10170_v47  ;;  %v2791_v56 = vadd.f32 %v12663_v31, %v2000_v48  ;;  %v2792_v1 = vadd.f32 %v12663_v31, %v2001_v49 }
 0x158   : > { %v2006_v57 = vmul.f32 %v12652_v21, %v10173_v50  ;;  %v2007_v58 = vmul.f32 %v12652_v21, %v10174_v51  ;;  %v2793_v59 = vadd.f32 %v12663_v31, %v2002_v52  ;;  %v2794_v60 = vadd.f32 %v12663_v31, %v2003_v53 }
 0x159   : > { %v2795_v61 = vadd.f32 %v12663_v31, %v2004_v54  ;;  %v2796_v16 = vadd.f32 %v12663_v31, %v2005_v55  ;;  %v3575_v62 = vmax.f32 %v2791_v56, 0.0  ;;  %v3576_v63 = vmax.f32 %v2792_v1, 0.0  ;;  %v11386_v54 = vld [vmem:[%s11889_s29 + $0x3e0] sm:$0xff]  }
 0x15a   : > { %v2797_v0 = vadd.f32 %v12663_v31, %v2006_v57  ;;  %v2798_v2 = vadd.f32 %v12663_v31, %v2007_v58  ;;  %v3577_v3 = vmax.f32 %v2793_v59, 0.0  ;;  %v3578_v21 = vmax.f32 %v2794_v60, 0.0  ;;  %v11387_v58 = vld [vmem:[%s11889_s29 + $0x3e8] sm:$0xff]   ;;  %v11388_v59 = vld [vmem:[%s11889_s29 + $0x3f0] sm:$0xff]  }
 0x15b   : > { %v3579_v7 = vmax.f32 %v2795_v61, 0.0  ;;  %v3580_v4 = vmax.f32 %v2796_v16, 0.0  ;;  %v9143_v6 = vpack.c.bf16 %v3575_v62, %v3575_v62  ;;  %v9144_v8 = vpack.c.bf16 %v3576_v63, %v3576_v63  ;;  %v11389_v63 = vld [vmem:[%s11889_s29 + $0x3f8] sm:$0xff]  }
 0x15c   : > { %v3581_v25 = vmax.f32 %v2797_v0, 0.0  ;;  %v3582_v9 = vmax.f32 %v2798_v2, 0.0  ;;  %v9145_v12 = vpack.c.bf16 %v3577_v3, %v3577_v3  ;;  %v9146_v31 = vpack.c.bf16 %v3578_v21, %v3578_v21 }
 0x15d   : > { %v9147_v13 = vpack.c.bf16 %v3579_v7, %v3579_v7  ;;  %v9148_v14 = vpack.c.bf16 %v3580_v4, %v3580_v4  ;;  %7496 = vst.msk [vmem:[%s11933_s6 + $0x3a0] sm:$0xf] %vm7263_vm0, %v9143_v6  ;;  %7497 = vst.msk [vmem:[%s11933_s6 + $0x3a4] sm:$0xf] %vm7263_vm0, %v9144_v8  ;;  %v10177_v19 = vunpack.c.l.bf16 %v11382_v5  ;;  %v10178_v20 = vunpack.c.h.bf16 %v11382_v5 }
 0x15e   : > { %v9149_v17 = vpack.c.bf16 %v3581_v25, %v3581_v25  ;;  %v9150_v18 = vpack.c.bf16 %v3582_v9, %v3582_v9  ;;  %7498 = vst.msk [vmem:[%s11933_s6 + $0x3a8] sm:$0xf] %vm7263_vm0, %v9145_v12  ;;  %7499 = vst.msk [vmem:[%s11933_s6 + $0x3ac] sm:$0xf] %vm7263_vm0, %v9146_v31  ;;  %v10181_v22 = vunpack.c.l.bf16 %v11383_v10  ;;  %v10182_v23 = vunpack.c.h.bf16 %v11383_v10 }
 0x15f   : > { %7500 = vst.msk [vmem:[%s11933_s6 + $0x3b0] sm:$0xf] %vm7263_vm0, %v9147_v13  ;;  %7501 = vst.msk [vmem:[%s11933_s6 + $0x3b4] sm:$0xf] %vm7263_vm0, %v9148_v14  ;;  %v10185_v24 = vunpack.c.l.bf16 %v11384_v11  ;;  %v10186_v26 = vunpack.c.h.bf16 %v11384_v11  ;;  %v2008_v28 = vmul.f32 %v13022_v27, %v10177_v19  ;;  %v2009_v29 = vmul.f32 %v13022_v27, %v10178_v20 }
 0x160   : > { %7502 = vst.msk [vmem:[%s11933_s6 + $0x3b8] sm:$0xf] %vm7263_vm0, %v9149_v17  ;;  %7503 = vst.msk [vmem:[%s11933_s6 + $0x3bc] sm:$0xf] %vm7263_vm0, %v9150_v18  ;;  %v10189_v30 = vunpack.c.l.bf16 %v11385_v15  ;;  %v10190_v32 = vunpack.c.h.bf16 %v11385_v15  ;;  %v2010_v33 = vmul.f32 %v13022_v27, %v10181_v22  ;;  %v2011_v34 = vmul.f32 %v13022_v27, %v10182_v23 }
 0x161   : > { %v2012_v35 = vmul.f32 %v13022_v27, %v10185_v24  ;;  %v2013_v36 = vmul.f32 %v13022_v27, %v10186_v26  ;;  %v2799_v38 = vadd.f32 %v13033_v37, %v2008_v28  ;;  %v2800_v39 = vadd.f32 %v13033_v37, %v2009_v29 }
 0x162   : > { %v2014_v40 = vmul.f32 %v13022_v27, %v10189_v30  ;;  %v2015_v41 = vmul.f32 %v13022_v27, %v10190_v32  ;;  %v2801_v42 = vadd.f32 %v13033_v37, %v2010_v33  ;;  %v2802_v43 = vadd.f32 %v13033_v37, %v2011_v34 }
 0x163   : > { %v2803_v44 = vadd.f32 %v13033_v37, %v2012_v35  ;;  %v2804_v45 = vadd.f32 %v13033_v37, %v2013_v36  ;;  %v3583_v46 = vmax.f32 %v2799_v38, 0.0  ;;  %v3584_v47 = vmax.f32 %v2800_v39, 0.0  ;;  %v11390_v35 = vld [vmem:[%s11889_s29 + $0x400] sm:$0xff]  }
 0x164   : > { %v2805_v48 = vadd.f32 %v13033_v37, %v2014_v40  ;;  %v2806_v49 = vadd.f32 %v13033_v37, %v2015_v41  ;;  %v3585_v50 = vmax.f32 %v2801_v42, 0.0  ;;  %v3586_v51 = vmax.f32 %v2802_v43, 0.0  ;;  %v11391_v41 = vld [vmem:[%s11889_s29 + $0x408] sm:$0xff]   ;;  %v11392_v42 = vld [vmem:[%s11889_s29 + $0x410] sm:$0xff]  }
 0x165   : > { %v3587_v52 = vmax.f32 %v2803_v44, 0.0  ;;  %v3588_v53 = vmax.f32 %v2804_v45, 0.0  ;;  %v9151_v55 = vpack.c.bf16 %v3583_v46, %v3583_v46  ;;  %v9152_v56 = vpack.c.bf16 %v3584_v47, %v3584_v47  ;;  %v11393_v47 = vld [vmem:[%s11889_s29 + $0x418] sm:$0xff]  }
 0x166   : > { %v3589_v1 = vmax.f32 %v2805_v48, 0.0  ;;  %v3590_v57 = vmax.f32 %v2806_v49, 0.0  ;;  %v9153_v60 = vpack.c.bf16 %v3585_v50, %v3585_v50  ;;  %v9154_v61 = vpack.c.bf16 %v3586_v51, %v3586_v51 }
 0x167   : > { %v9155_v16 = vpack.c.bf16 %v3587_v52, %v3587_v52  ;;  %v9156_v62 = vpack.c.bf16 %v3588_v53, %v3588_v53  ;;  %7504 = vst.msk [vmem:[%s11933_s6 + $0x3c0] sm:$0xf] %vm7263_vm0, %v9151_v55  ;;  %7505 = vst.msk [vmem:[%s11933_s6 + $0x3c4] sm:$0xf] %vm7263_vm0, %v9152_v56  ;;  %v10193_v3 = vunpack.c.l.bf16 %v11386_v54  ;;  %v10194_v21 = vunpack.c.h.bf16 %v11386_v54 }
 0x168   : > { %v9157_v0 = vpack.c.bf16 %v3589_v1, %v3589_v1  ;;  %v9158_v2 = vpack.c.bf16 %v3590_v57, %v3590_v57  ;;  %7506 = vst.msk [vmem:[%s11933_s6 + $0x3c8] sm:$0xf] %vm7263_vm0, %v9153_v60  ;;  %7507 = vst.msk [vmem:[%s11933_s6 + $0x3cc] sm:$0xf] %vm7263_vm0, %v9154_v61  ;;  %v10197_v7 = vunpack.c.l.bf16 %v11387_v58  ;;  %v10198_v4 = vunpack.c.h.bf16 %v11387_v58 }
 0x169   : > { %7508 = vst.msk [vmem:[%s11933_s6 + $0x3d0] sm:$0xf] %vm7263_vm0, %v9155_v16  ;;  %7509 = vst.msk [vmem:[%s11933_s6 + $0x3d4] sm:$0xf] %vm7263_vm0, %v9156_v62  ;;  %v10201_v5 = vunpack.c.l.bf16 %v11388_v59  ;;  %v10202_v6 = vunpack.c.h.bf16 %v11388_v59  ;;  %v2016_v8 = vmul.f32 %v13022_v27, %v10193_v3  ;;  %v2017_v25 = vmul.f32 %v13022_v27, %v10194_v21 }
 0x16a   : > { %7510 = vst.msk [vmem:[%s11933_s6 + $0x3d8] sm:$0xf] %vm7263_vm0, %v9157_v0  ;;  %7511 = vst.msk [vmem:[%s11933_s6 + $0x3dc] sm:$0xf] %vm7263_vm0, %v9158_v2  ;;  %v10205_v9 = vunpack.c.l.bf16 %v11389_v63  ;;  %v10206_v10 = vunpack.c.h.bf16 %v11389_v63  ;;  %v2018_v11 = vmul.f32 %v13022_v27, %v10197_v7  ;;  %v2019_v12 = vmul.f32 %v13022_v27, %v10198_v4 }
 0x16b   : > { %v2020_v31 = vmul.f32 %v13022_v27, %v10201_v5  ;;  %v2021_v13 = vmul.f32 %v13022_v27, %v10202_v6  ;;  %v2807_v14 = vadd.f32 %v13033_v37, %v2016_v8  ;;  %v2808_v15 = vadd.f32 %v13033_v37, %v2017_v25 }
 0x16c   : > { %v2022_v17 = vmul.f32 %v13022_v27, %v10205_v9  ;;  %v2023_v18 = vmul.f32 %v13022_v27, %v10206_v10  ;;  %v2809_v19 = vadd.f32 %v13033_v37, %v2018_v11  ;;  %v2810_v20 = vadd.f32 %v13033_v37, %v2019_v12 }
 0x16d   : > { %v2811_v22 = vadd.f32 %v13033_v37, %v2020_v31  ;;  %v2812_v23 = vadd.f32 %v13033_v37, %v2021_v13  ;;  %v3591_v24 = vmax.f32 %v2807_v14, 0.0  ;;  %v3592_v26 = vmax.f32 %v2808_v15, 0.0  ;;  %v11394_v31 = vld [vmem:[%s11889_s29 + $0x420] sm:$0xff]  }
 0x16e   : > { %v2813_v28 = vadd.f32 %v13033_v37, %v2022_v17  ;;  %v2814_v29 = vadd.f32 %v13033_v37, %v2023_v18  ;;  %v3593_v30 = vmax.f32 %v2809_v19, 0.0  ;;  %v3594_v32 = vmax.f32 %v2810_v20, 0.0  ;;  %v11395_v18 = vld [vmem:[%s11889_s29 + $0x428] sm:$0xff]   ;;  %v11396_v19 = vld [vmem:[%s11889_s29 + $0x430] sm:$0xff]  }
 0x16f   : > { %v3595_v33 = vmax.f32 %v2811_v22, 0.0  ;;  %v3596_v34 = vmax.f32 %v2812_v23, 0.0  ;;  %v9159_v36 = vpack.c.bf16 %v3591_v24, %v3591_v24  ;;  %v9160_v38 = vpack.c.bf16 %v3592_v26, %v3592_v26  ;;  %v11397_v26 = vld [vmem:[%s11889_s29 + $0x438] sm:$0xff]  }
 0x170   : > { %v3597_v39 = vmax.f32 %v2813_v28, 0.0  ;;  %v3598_v40 = vmax.f32 %v2814_v29, 0.0  ;;  %v9161_v43 = vpack.c.bf16 %v3593_v30, %v3593_v30  ;;  %v9162_v44 = vpack.c.bf16 %v3594_v32, %v3594_v32 }
 0x171   : > { %v9163_v45 = vpack.c.bf16 %v3595_v33, %v3595_v33  ;;  %v9164_v46 = vpack.c.bf16 %v3596_v34, %v3596_v34  ;;  %7512 = vst.msk [vmem:[%s11933_s6 + $0x3e0] sm:$0xf] %vm7263_vm0, %v9159_v36  ;;  %7513 = vst.msk [vmem:[%s11933_s6 + $0x3e4] sm:$0xf] %vm7263_vm0, %v9160_v38  ;;  %v10209_v50 = vunpack.c.l.bf16 %v11390_v35  ;;  %v10210_v51 = vunpack.c.h.bf16 %v11390_v35 }
 0x172   : > { %v9165_v48 = vpack.c.bf16 %v3597_v39, %v3597_v39  ;;  %v9166_v49 = vpack.c.bf16 %v3598_v40, %v3598_v40  ;;  %7514 = vst.msk [vmem:[%s11933_s6 + $0x3e8] sm:$0xf] %vm7263_vm0, %v9161_v43  ;;  %7515 = vst.msk [vmem:[%s11933_s6 + $0x3ec] sm:$0xf] %vm7263_vm0, %v9162_v44  ;;  %v10213_v52 = vunpack.c.l.bf16 %v11391_v41  ;;  %v10214_v53 = vunpack.c.h.bf16 %v11391_v41 }
 0x173   : > { %7516 = vst.msk [vmem:[%s11933_s6 + $0x3f0] sm:$0xf] %vm7263_vm0, %v9163_v45  ;;  %7517 = vst.msk [vmem:[%s11933_s6 + $0x3f4] sm:$0xf] %vm7263_vm0, %v9164_v46  ;;  %v10217_v54 = vunpack.c.l.bf16 %v11392_v42  ;;  %v10218_v55 = vunpack.c.h.bf16 %v11392_v42  ;;  %v2024_v56 = vmul.f32 %v13022_v27, %v10209_v50  ;;  %v2025_v1 = vmul.f32 %v13022_v27, %v10210_v51 }
 0x174   : > { %7518 = vst.msk [vmem:[%s11933_s6 + $0x3f8] sm:$0xf] %vm7263_vm0, %v9165_v48  ;;  %7519 = vst.msk [vmem:[%s11933_s6 + $0x3fc] sm:$0xf] %vm7263_vm0, %v9166_v49  ;;  %v10221_v57 = vunpack.c.l.bf16 %v11393_v47  ;;  %v10222_v58 = vunpack.c.h.bf16 %v11393_v47  ;;  %v2026_v59 = vmul.f32 %v13022_v27, %v10213_v52  ;;  %v2027_v60 = vmul.f32 %v13022_v27, %v10214_v53 }
 0x175   : > { %v2028_v61 = vmul.f32 %v13022_v27, %v10217_v54  ;;  %v2029_v16 = vmul.f32 %v13022_v27, %v10218_v55  ;;  %v2815_v62 = vadd.f32 %v13033_v37, %v2024_v56  ;;  %v2816_v63 = vadd.f32 %v13033_v37, %v2025_v1 }
 0x176   : > { %v2030_v0 = vmul.f32 %v13022_v27, %v10221_v57  ;;  %v2031_v2 = vmul.f32 %v13022_v27, %v10222_v58  ;;  %v2817_v3 = vadd.f32 %v13033_v37, %v2026_v59  ;;  %v2818_v21 = vadd.f32 %v13033_v37, %v2027_v60 }
 0x177   : > { %v2819_v7 = vadd.f32 %v13033_v37, %v2028_v61  ;;  %v2820_v4 = vadd.f32 %v13033_v37, %v2029_v16  ;;  %v3599_v5 = vmax.f32 %v2815_v62, 0.0  ;;  %v3600_v6 = vmax.f32 %v2816_v63, 0.0  ;;  %v11398_v61 = vld [vmem:[%s11889_s29 + $0x440] sm:$0xff]  }
 0x178   : > { %v2821_v8 = vadd.f32 %v13033_v37, %v2030_v0  ;;  %v2822_v25 = vadd.f32 %v13033_v37, %v2031_v2  ;;  %v3601_v9 = vmax.f32 %v2817_v3, 0.0  ;;  %v3602_v10 = vmax.f32 %v2818_v21, 0.0  ;;  %v11399_v2 = vld [vmem:[%s11889_s29 + $0x448] sm:$0xff]   ;;  %v11400_v3 = vld [vmem:[%s11889_s29 + $0x450] sm:$0xff]  }
 0x179   : > { %v3603_v11 = vmax.f32 %v2819_v7, 0.0  ;;  %v3604_v12 = vmax.f32 %v2820_v4, 0.0  ;;  %v9167_v13 = vpack.c.bf16 %v3599_v5, %v3599_v5  ;;  %v9168_v14 = vpack.c.bf16 %v3600_v6, %v3600_v6  ;;  %v11401_v6 = vld [vmem:[%s11889_s29 + $0x458] sm:$0xff]  }
 0x17a   : > { %v3605_v15 = vmax.f32 %v2821_v8, 0.0  ;;  %v3606_v17 = vmax.f32 %v2822_v25, 0.0  ;;  %v9169_v20 = vpack.c.bf16 %v3601_v9, %v3601_v9  ;;  %v9170_v22 = vpack.c.bf16 %v3602_v10, %v3602_v10 }
 0x17b   : > { %v9171_v23 = vpack.c.bf16 %v3603_v11, %v3603_v11  ;;  %v9172_v24 = vpack.c.bf16 %v3604_v12, %v3604_v12  ;;  %7520 = vst.msk [vmem:[%s11933_s6 + $0x400] sm:$0xf] %vm7263_vm0, %v9167_v13  ;;  %7521 = vst.msk [vmem:[%s11933_s6 + $0x404] sm:$0xf] %vm7263_vm0, %v9168_v14  ;;  %v10225_v30 = vunpack.c.l.bf16 %v11394_v31  ;;  %v10226_v32 = vunpack.c.h.bf16 %v11394_v31 }
 0x17c   : > { %v9173_v28 = vpack.c.bf16 %v3605_v15, %v3605_v15  ;;  %v9174_v29 = vpack.c.bf16 %v3606_v17, %v3606_v17  ;;  %7522 = vst.msk [vmem:[%s11933_s6 + $0x408] sm:$0xf] %vm7263_vm0, %v9169_v20  ;;  %7523 = vst.msk [vmem:[%s11933_s6 + $0x40c] sm:$0xf] %vm7263_vm0, %v9170_v22  ;;  %v10229_v33 = vunpack.c.l.bf16 %v11395_v18  ;;  %v10230_v34 = vunpack.c.h.bf16 %v11395_v18 }
 0x17d   : > { %7524 = vst.msk [vmem:[%s11933_s6 + $0x410] sm:$0xf] %vm7263_vm0, %v9171_v23  ;;  %7525 = vst.msk [vmem:[%s11933_s6 + $0x414] sm:$0xf] %vm7263_vm0, %v9172_v24  ;;  %v10233_v35 = vunpack.c.l.bf16 %v11396_v19  ;;  %v10234_v36 = vunpack.c.h.bf16 %v11396_v19  ;;  %v2032_v38 = vmul.f32 %v13022_v27, %v10225_v30  ;;  %v2033_v39 = vmul.f32 %v13022_v27, %v10226_v32 }
 0x17e   : > { %7526 = vst.msk [vmem:[%s11933_s6 + $0x418] sm:$0xf] %vm7263_vm0, %v9173_v28  ;;  %7527 = vst.msk [vmem:[%s11933_s6 + $0x41c] sm:$0xf] %vm7263_vm0, %v9174_v29  ;;  %v10237_v40 = vunpack.c.l.bf16 %v11397_v26  ;;  %v10238_v41 = vunpack.c.h.bf16 %v11397_v26  ;;  %v2034_v42 = vmul.f32 %v13022_v27, %v10229_v33  ;;  %v2035_v43 = vmul.f32 %v13022_v27, %v10230_v34 }
 0x17f   : > { %v2036_v44 = vmul.f32 %v13022_v27, %v10233_v35  ;;  %v2037_v45 = vmul.f32 %v13022_v27, %v10234_v36  ;;  %v2823_v46 = vadd.f32 %v13033_v37, %v2032_v38  ;;  %v2824_v47 = vadd.f32 %v13033_v37, %v2033_v39 }
 0x180   : > { %v2038_v48 = vmul.f32 %v13022_v27, %v10237_v40  ;;  %v2039_v49 = vmul.f32 %v13022_v27, %v10238_v41  ;;  %v2825_v50 = vadd.f32 %v13033_v37, %v2034_v42  ;;  %v2826_v51 = vadd.f32 %v13033_v37, %v2035_v43 }
 0x181   : > { %v2827_v52 = vadd.f32 %v13033_v37, %v2036_v44  ;;  %v2828_v53 = vadd.f32 %v13033_v37, %v2037_v45  ;;  %v3607_v54 = vmax.f32 %v2823_v46, 0.0  ;;  %v3608_v55 = vmax.f32 %v2824_v47, 0.0  ;;  %v11402_v44 = vld [vmem:[%s11889_s29 + $0x460] sm:$0xff]  }
 0x182   : > { %v2829_v56 = vadd.f32 %v13033_v37, %v2038_v48  ;;  %v2830_v1 = vadd.f32 %v13033_v37, %v2039_v49  ;;  %v3609_v57 = vmax.f32 %v2825_v50, 0.0  ;;  %v3610_v58 = vmax.f32 %v2826_v51, 0.0  ;;  %v11403_v49 = vld [vmem:[%s11889_s29 + $0x468] sm:$0xff]   ;;  %v11404_v50 = vld [vmem:[%s11889_s29 + $0x470] sm:$0xff]  }
 0x183   : > { %v3611_v59 = vmax.f32 %v2827_v52, 0.0  ;;  %v3612_v60 = vmax.f32 %v2828_v53, 0.0  ;;  %v9175_v16 = vpack.c.bf16 %v3607_v54, %v3607_v54  ;;  %v9176_v62 = vpack.c.bf16 %v3608_v55, %v3608_v55  ;;  %v11405_v55 = vld [vmem:[%s11889_s29 + $0x478] sm:$0xff]  }
 0x184   : > { %v3613_v63 = vmax.f32 %v2829_v56, 0.0  ;;  %v3614_v0 = vmax.f32 %v2830_v1, 0.0  ;;  %v9177_v21 = vpack.c.bf16 %v3609_v57, %v3609_v57  ;;  %v9178_v7 = vpack.c.bf16 %v3610_v58, %v3610_v58 }
 0x185   : > { %v9179_v4 = vpack.c.bf16 %v3611_v59, %v3611_v59  ;;  %v9180_v5 = vpack.c.bf16 %v3612_v60, %v3612_v60  ;;  %7528 = vst.msk [vmem:[%s11933_s6 + $0x420] sm:$0xf] %vm7263_vm0, %v9175_v16  ;;  %7529 = vst.msk [vmem:[%s11933_s6 + $0x424] sm:$0xf] %vm7263_vm0, %v9176_v62  ;;  %v10241_v9 = vunpack.c.l.bf16 %v11398_v61  ;;  %v10242_v10 = vunpack.c.h.bf16 %v11398_v61 }
 0x186   : > { %v9181_v8 = vpack.c.bf16 %v3613_v63, %v3613_v63  ;;  %v9182_v25 = vpack.c.bf16 %v3614_v0, %v3614_v0  ;;  %7530 = vst.msk [vmem:[%s11933_s6 + $0x428] sm:$0xf] %vm7263_vm0, %v9177_v21  ;;  %7531 = vst.msk [vmem:[%s11933_s6 + $0x42c] sm:$0xf] %vm7263_vm0, %v9178_v7  ;;  %v10245_v11 = vunpack.c.l.bf16 %v11399_v2  ;;  %v10246_v12 = vunpack.c.h.bf16 %v11399_v2 }
 0x187   : > { %7532 = vst.msk [vmem:[%s11933_s6 + $0x430] sm:$0xf] %vm7263_vm0, %v9179_v4  ;;  %7533 = vst.msk [vmem:[%s11933_s6 + $0x434] sm:$0xf] %vm7263_vm0, %v9180_v5  ;;  %v10249_v31 = vunpack.c.l.bf16 %v11400_v3  ;;  %v10250_v13 = vunpack.c.h.bf16 %v11400_v3  ;;  %v2040_v14 = vmul.f32 %v13022_v27, %v10241_v9  ;;  %v2041_v15 = vmul.f32 %v13022_v27, %v10242_v10 }
 0x188   : > { %7534 = vst.msk [vmem:[%s11933_s6 + $0x438] sm:$0xf] %vm7263_vm0, %v9181_v8  ;;  %7535 = vst.msk [vmem:[%s11933_s6 + $0x43c] sm:$0xf] %vm7263_vm0, %v9182_v25  ;;  %v10253_v17 = vunpack.c.l.bf16 %v11401_v6  ;;  %v10254_v18 = vunpack.c.h.bf16 %v11401_v6  ;;  %v2042_v19 = vmul.f32 %v13022_v27, %v10245_v11  ;;  %v2043_v20 = vmul.f32 %v13022_v27, %v10246_v12 }
 0x189   : > { %v2044_v22 = vmul.f32 %v13022_v27, %v10249_v31  ;;  %v2045_v23 = vmul.f32 %v13022_v27, %v10250_v13  ;;  %v2831_v24 = vadd.f32 %v13033_v37, %v2040_v14  ;;  %v2832_v26 = vadd.f32 %v13033_v37, %v2041_v15 }
 0x18a   : > { %v2046_v28 = vmul.f32 %v13022_v27, %v10253_v17  ;;  %v2047_v29 = vmul.f32 %v13022_v27, %v10254_v18  ;;  %v2833_v30 = vadd.f32 %v13033_v37, %v2042_v19  ;;  %v2834_v32 = vadd.f32 %v13033_v37, %v2043_v20 }
 0x18b   : > { %v2835_v33 = vadd.f32 %v13033_v37, %v2044_v22  ;;  %v2836_v34 = vadd.f32 %v13033_v37, %v2045_v23  ;;  %v3615_v35 = vmax.f32 %v2831_v24, 0.0  ;;  %v3616_v36 = vmax.f32 %v2832_v26, 0.0  ;;  %v11406_v22 = vld [vmem:[%s11889_s29 + $0x480] sm:$0xff]  }
 0x18c   : > { %v2837_v38 = vadd.f32 %v13033_v37, %v2046_v28  ;;  %v2838_v39 = vadd.f32 %v13033_v37, %v2047_v29  ;;  %v3617_v40 = vmax.f32 %v2833_v30, 0.0  ;;  %v3618_v41 = vmax.f32 %v2834_v32, 0.0  ;;  %v11407_v29 = vld [vmem:[%s11889_s29 + $0x488] sm:$0xff]   ;;  %v11408_v30 = vld [vmem:[%s11889_s29 + $0x490] sm:$0xff]  }
 0x18d   : > { %v3619_v42 = vmax.f32 %v2835_v33, 0.0  ;;  %v3620_v43 = vmax.f32 %v2836_v34, 0.0  ;;  %v9183_v45 = vpack.c.bf16 %v3615_v35, %v3615_v35  ;;  %v9184_v46 = vpack.c.bf16 %v3616_v36, %v3616_v36  ;;  %v11409_v36 = vld [vmem:[%s11889_s29 + $0x498] sm:$0xff]  }
 0x18e   : > { %v3621_v47 = vmax.f32 %v2837_v38, 0.0  ;;  %v3622_v48 = vmax.f32 %v2838_v39, 0.0  ;;  %v9185_v51 = vpack.c.bf16 %v3617_v40, %v3617_v40  ;;  %v9186_v52 = vpack.c.bf16 %v3618_v41, %v3618_v41 }
 0x18f   : > { %v9187_v53 = vpack.c.bf16 %v3619_v42, %v3619_v42  ;;  %v9188_v54 = vpack.c.bf16 %v3620_v43, %v3620_v43  ;;  %7536 = vst.msk [vmem:[%s11933_s6 + $0x440] sm:$0xf] %vm7263_vm0, %v9183_v45  ;;  %7537 = vst.msk [vmem:[%s11933_s6 + $0x444] sm:$0xf] %vm7263_vm0, %v9184_v46  ;;  %v10257_v57 = vunpack.c.l.bf16 %v11402_v44  ;;  %v10258_v58 = vunpack.c.h.bf16 %v11402_v44 }
 0x190   : > { %v9189_v56 = vpack.c.bf16 %v3621_v47, %v3621_v47  ;;  %v9190_v1 = vpack.c.bf16 %v3622_v48, %v3622_v48  ;;  %7538 = vst.msk [vmem:[%s11933_s6 + $0x448] sm:$0xf] %vm7263_vm0, %v9185_v51  ;;  %7539 = vst.msk [vmem:[%s11933_s6 + $0x44c] sm:$0xf] %vm7263_vm0, %v9186_v52  ;;  %v10261_v59 = vunpack.c.l.bf16 %v11403_v49  ;;  %v10262_v60 = vunpack.c.h.bf16 %v11403_v49 }
 0x191   : > { %7540 = vst.msk [vmem:[%s11933_s6 + $0x450] sm:$0xf] %vm7263_vm0, %v9187_v53  ;;  %7541 = vst.msk [vmem:[%s11933_s6 + $0x454] sm:$0xf] %vm7263_vm0, %v9188_v54  ;;  %v10265_v61 = vunpack.c.l.bf16 %v11404_v50  ;;  %v10266_v16 = vunpack.c.h.bf16 %v11404_v50  ;;  %v2048_v62 = vmul.f32 %v13022_v27, %v10257_v57  ;;  %v2049_v63 = vmul.f32 %v13022_v27, %v10258_v58 }
 0x192   : > { %7542 = vst.msk [vmem:[%s11933_s6 + $0x458] sm:$0xf] %vm7263_vm0, %v9189_v56  ;;  %7543 = vst.msk [vmem:[%s11933_s6 + $0x45c] sm:$0xf] %vm7263_vm0, %v9190_v1  ;;  %v10269_v0 = vunpack.c.l.bf16 %v11405_v55  ;;  %v10270_v2 = vunpack.c.h.bf16 %v11405_v55  ;;  %v2050_v3 = vmul.f32 %v13022_v27, %v10261_v59  ;;  %v2051_v21 = vmul.f32 %v13022_v27, %v10262_v60 }
 0x193   : > { %v2052_v7 = vmul.f32 %v13022_v27, %v10265_v61  ;;  %v2053_v4 = vmul.f32 %v13022_v27, %v10266_v16  ;;  %v2839_v5 = vadd.f32 %v13033_v37, %v2048_v62  ;;  %v2840_v6 = vadd.f32 %v13033_v37, %v2049_v63 }
 0x194   : > { %v2054_v8 = vmul.f32 %v13022_v27, %v10269_v0  ;;  %v2055_v25 = vmul.f32 %v13022_v27, %v10270_v2  ;;  %v2841_v9 = vadd.f32 %v13033_v37, %v2050_v3  ;;  %v2842_v10 = vadd.f32 %v13033_v37, %v2051_v21 }
 0x195   : > { %v2843_v11 = vadd.f32 %v13033_v37, %v2052_v7  ;;  %v2844_v12 = vadd.f32 %v13033_v37, %v2053_v4  ;;  %v3623_v31 = vmax.f32 %v2839_v5, 0.0  ;;  %v3624_v13 = vmax.f32 %v2840_v6, 0.0  ;;  %v11410_v7 = vld [vmem:[%s11889_s29 + $0x4a0] sm:$0xff]  }
 0x196   : > { %v2845_v14 = vadd.f32 %v13033_v37, %v2054_v8  ;;  %v2846_v15 = vadd.f32 %v13033_v37, %v2055_v25  ;;  %v3625_v17 = vmax.f32 %v2841_v9, 0.0  ;;  %v3626_v18 = vmax.f32 %v2842_v10, 0.0  ;;  %v11411_v25 = vld [vmem:[%s11889_s29 + $0x4a8] sm:$0xff]   ;;  %v11412_v9 = vld [vmem:[%s11889_s29 + $0x4b0] sm:$0xff]  }
 0x197   : > { %v3627_v19 = vmax.f32 %v2843_v11, 0.0  ;;  %v3628_v20 = vmax.f32 %v2844_v12, 0.0  ;;  %v9191_v23 = vpack.c.bf16 %v3623_v31, %v3623_v31  ;;  %v9192_v24 = vpack.c.bf16 %v3624_v13, %v3624_v13  ;;  %v11413_v13 = vld [vmem:[%s11889_s29 + $0x4b8] sm:$0xff]  }
 0x198   : > { %v3629_v26 = vmax.f32 %v2845_v14, 0.0  ;;  %v3630_v28 = vmax.f32 %v2846_v15, 0.0  ;;  %v9193_v32 = vpack.c.bf16 %v3625_v17, %v3625_v17  ;;  %v9194_v33 = vpack.c.bf16 %v3626_v18, %v3626_v18 }
 0x199   : > { %v9195_v34 = vpack.c.bf16 %v3627_v19, %v3627_v19  ;;  %v9196_v35 = vpack.c.bf16 %v3628_v20, %v3628_v20  ;;  %7544 = vst.msk [vmem:[%s11933_s6 + $0x460] sm:$0xf] %vm7263_vm0, %v9191_v23  ;;  %7545 = vst.msk [vmem:[%s11933_s6 + $0x464] sm:$0xf] %vm7263_vm0, %v9192_v24  ;;  %v10273_v40 = vunpack.c.l.bf16 %v11406_v22  ;;  %v10274_v41 = vunpack.c.h.bf16 %v11406_v22 }
 0x19a   : > { %v9197_v38 = vpack.c.bf16 %v3629_v26, %v3629_v26  ;;  %v9198_v39 = vpack.c.bf16 %v3630_v28, %v3630_v28  ;;  %7546 = vst.msk [vmem:[%s11933_s6 + $0x468] sm:$0xf] %vm7263_vm0, %v9193_v32  ;;  %7547 = vst.msk [vmem:[%s11933_s6 + $0x46c] sm:$0xf] %vm7263_vm0, %v9194_v33  ;;  %v10277_v42 = vunpack.c.l.bf16 %v11407_v29  ;;  %v10278_v43 = vunpack.c.h.bf16 %v11407_v29 }
 0x19b   : > { %7548 = vst.msk [vmem:[%s11933_s6 + $0x470] sm:$0xf] %vm7263_vm0, %v9195_v34  ;;  %7549 = vst.msk [vmem:[%s11933_s6 + $0x474] sm:$0xf] %vm7263_vm0, %v9196_v35  ;;  %v10281_v44 = vunpack.c.l.bf16 %v11408_v30  ;;  %v10282_v45 = vunpack.c.h.bf16 %v11408_v30  ;;  %v2056_v46 = vmul.f32 %v13022_v27, %v10273_v40  ;;  %v2057_v47 = vmul.f32 %v13022_v27, %v10274_v41 }
 0x19c   : > { %7550 = vst.msk [vmem:[%s11933_s6 + $0x478] sm:$0xf] %vm7263_vm0, %v9197_v38  ;;  %7551 = vst.msk [vmem:[%s11933_s6 + $0x47c] sm:$0xf] %vm7263_vm0, %v9198_v39  ;;  %v10285_v48 = vunpack.c.l.bf16 %v11409_v36  ;;  %v10286_v49 = vunpack.c.h.bf16 %v11409_v36  ;;  %v2058_v50 = vmul.f32 %v13022_v27, %v10277_v42  ;;  %v2059_v51 = vmul.f32 %v13022_v27, %v10278_v43 }
 0x19d   : > { %v2060_v52 = vmul.f32 %v13022_v27, %v10281_v44  ;;  %v2061_v53 = vmul.f32 %v13022_v27, %v10282_v45  ;;  %v2847_v54 = vadd.f32 %v13033_v37, %v2056_v46  ;;  %v2848_v55 = vadd.f32 %v13033_v37, %v2057_v47 }
 0x19e   : > { %v2062_v56 = vmul.f32 %v13022_v27, %v10285_v48  ;;  %v2063_v1 = vmul.f32 %v13022_v27, %v10286_v49  ;;  %v2849_v57 = vadd.f32 %v13033_v37, %v2058_v50  ;;  %v2850_v58 = vadd.f32 %v13033_v37, %v2059_v51 }
 0x19f   : > { %v2851_v59 = vadd.f32 %v13033_v37, %v2060_v52  ;;  %v2852_v60 = vadd.f32 %v13033_v37, %v2061_v53  ;;  %v3631_v61 = vmax.f32 %v2847_v54, 0.0  ;;  %v3632_v16 = vmax.f32 %v2848_v55, 0.0  ;;  %v11414_v52 = vld [vmem:[%s11889_s29 + $0x4c0] sm:$0xff]  }
 0x1a0   : > { %v2853_v62 = vadd.f32 %v13033_v37, %v2062_v56  ;;  %v2854_v63 = vadd.f32 %v13033_v37, %v2063_v1  ;;  %v3633_v0 = vmax.f32 %v2849_v57, 0.0  ;;  %v3634_v2 = vmax.f32 %v2850_v58, 0.0  ;;  %v11415_v1 = vld [vmem:[%s11889_s29 + $0x4c8] sm:$0xff]   ;;  %v11416_v57 = vld [vmem:[%s11889_s29 + $0x4d0] sm:$0xff]  }
 0x1a1   : > { %v3635_v3 = vmax.f32 %v2851_v59, 0.0  ;;  %v3636_v21 = vmax.f32 %v2852_v60, 0.0  ;;  %v9199_v4 = vpack.c.bf16 %v3631_v61, %v3631_v61  ;;  %v9200_v5 = vpack.c.bf16 %v3632_v16, %v3632_v16  ;;  %v11417_v16 = vld [vmem:[%s11889_s29 + $0x4d8] sm:$0xff]  }
 0x1a2   : > { %v3637_v6 = vmax.f32 %v2853_v62, 0.0  ;;  %v3638_v8 = vmax.f32 %v2854_v63, 0.0  ;;  %v9201_v10 = vpack.c.bf16 %v3633_v0, %v3633_v0  ;;  %v9202_v11 = vpack.c.bf16 %v3634_v2, %v3634_v2 }
 0x1a3   : > { %v9203_v12 = vpack.c.bf16 %v3635_v3, %v3635_v3  ;;  %v9204_v31 = vpack.c.bf16 %v3636_v21, %v3636_v21  ;;  %7552 = vst.msk [vmem:[%s11933_s6 + $0x480] sm:$0xf] %vm7263_vm0, %v9199_v4  ;;  %7553 = vst.msk [vmem:[%s11933_s6 + $0x484] sm:$0xf] %vm7263_vm0, %v9200_v5  ;;  %v10289_v17 = vunpack.c.l.bf16 %v11410_v7  ;;  %v10290_v18 = vunpack.c.h.bf16 %v11410_v7 }
 0x1a4   : > { %v9205_v14 = vpack.c.bf16 %v3637_v6, %v3637_v6  ;;  %v9206_v15 = vpack.c.bf16 %v3638_v8, %v3638_v8  ;;  %7554 = vst.msk [vmem:[%s11933_s6 + $0x488] sm:$0xf] %vm7263_vm0, %v9201_v10  ;;  %7555 = vst.msk [vmem:[%s11933_s6 + $0x48c] sm:$0xf] %vm7263_vm0, %v9202_v11  ;;  %v10293_v19 = vunpack.c.l.bf16 %v11411_v25  ;;  %v10294_v20 = vunpack.c.h.bf16 %v11411_v25 }
 0x1a5   : > { %7556 = vst.msk [vmem:[%s11933_s6 + $0x490] sm:$0xf] %vm7263_vm0, %v9203_v12  ;;  %7557 = vst.msk [vmem:[%s11933_s6 + $0x494] sm:$0xf] %vm7263_vm0, %v9204_v31  ;;  %v10297_v22 = vunpack.c.l.bf16 %v11412_v9  ;;  %v10298_v23 = vunpack.c.h.bf16 %v11412_v9  ;;  %v2064_v24 = vmul.f32 %v13022_v27, %v10289_v17  ;;  %v2065_v26 = vmul.f32 %v13022_v27, %v10290_v18 }
 0x1a6   : > { %7558 = vst.msk [vmem:[%s11933_s6 + $0x498] sm:$0xf] %vm7263_vm0, %v9205_v14  ;;  %7559 = vst.msk [vmem:[%s11933_s6 + $0x49c] sm:$0xf] %vm7263_vm0, %v9206_v15  ;;  %v10301_v28 = vunpack.c.l.bf16 %v11413_v13  ;;  %v10302_v29 = vunpack.c.h.bf16 %v11413_v13  ;;  %v2066_v30 = vmul.f32 %v13022_v27, %v10293_v19  ;;  %v2067_v32 = vmul.f32 %v13022_v27, %v10294_v20 }
 0x1a7   : > { %v2068_v33 = vmul.f32 %v13022_v27, %v10297_v22  ;;  %v2069_v34 = vmul.f32 %v13022_v27, %v10298_v23  ;;  %v2855_v35 = vadd.f32 %v13033_v37, %v2064_v24  ;;  %v2856_v36 = vadd.f32 %v13033_v37, %v2065_v26 }
 0x1a8   : > { %v2070_v38 = vmul.f32 %v13022_v27, %v10301_v28  ;;  %v2071_v39 = vmul.f32 %v13022_v27, %v10302_v29  ;;  %v2857_v40 = vadd.f32 %v13033_v37, %v2066_v30  ;;  %v2858_v41 = vadd.f32 %v13033_v37, %v2067_v32 }
 0x1a9   : > { %v2859_v42 = vadd.f32 %v13033_v37, %v2068_v33  ;;  %v2860_v43 = vadd.f32 %v13033_v37, %v2069_v34  ;;  %v3639_v44 = vmax.f32 %v2855_v35, 0.0  ;;  %v3640_v45 = vmax.f32 %v2856_v36, 0.0  ;;  %v11418_v33 = vld [vmem:[%s11889_s29 + $0x4e0] sm:$0xff]  }
 0x1aa   : > { %v2861_v46 = vadd.f32 %v13033_v37, %v2070_v38  ;;  %v2862_v47 = vadd.f32 %v13033_v37, %v2071_v39  ;;  %v3641_v48 = vmax.f32 %v2857_v40, 0.0  ;;  %v3642_v49 = vmax.f32 %v2858_v41, 0.0  ;;  %v11419_v39 = vld [vmem:[%s11889_s29 + $0x4e8] sm:$0xff]   ;;  %v11420_v40 = vld [vmem:[%s11889_s29 + $0x4f0] sm:$0xff]  }
 0x1ab   : > { %v3643_v50 = vmax.f32 %v2859_v42, 0.0  ;;  %v3644_v51 = vmax.f32 %v2860_v43, 0.0  ;;  %v9207_v53 = vpack.c.bf16 %v3639_v44, %v3639_v44  ;;  %v9208_v54 = vpack.c.bf16 %v3640_v45, %v3640_v45  ;;  %v11421_v45 = vld [vmem:[%s11889_s29 + $0x4f8] sm:$0xff]  }
 0x1ac   : > { %v3645_v55 = vmax.f32 %v2861_v46, 0.0  ;;  %v3646_v56 = vmax.f32 %v2862_v47, 0.0  ;;  %v9209_v58 = vpack.c.bf16 %v3641_v48, %v3641_v48  ;;  %v9210_v59 = vpack.c.bf16 %v3642_v49, %v3642_v49 }
 0x1ad   : > { %v9211_v60 = vpack.c.bf16 %v3643_v50, %v3643_v50  ;;  %v9212_v61 = vpack.c.bf16 %v3644_v51, %v3644_v51  ;;  %7560 = vst.msk [vmem:[%s11933_s6 + $0x4a0] sm:$0xf] %vm7263_vm0, %v9207_v53  ;;  %7561 = vst.msk [vmem:[%s11933_s6 + $0x4a4] sm:$0xf] %vm7263_vm0, %v9208_v54  ;;  %v10305_v0 = vunpack.c.l.bf16 %v11414_v52  ;;  %v10306_v2 = vunpack.c.h.bf16 %v11414_v52 }
 0x1ae   : > { %v9213_v62 = vpack.c.bf16 %v3645_v55, %v3645_v55  ;;  %v9214_v63 = vpack.c.bf16 %v3646_v56, %v3646_v56  ;;  %7562 = vst.msk [vmem:[%s11933_s6 + $0x4a8] sm:$0xf] %vm7263_vm0, %v9209_v58  ;;  %7563 = vst.msk [vmem:[%s11933_s6 + $0x4ac] sm:$0xf] %vm7263_vm0, %v9210_v59  ;;  %v10309_v3 = vunpack.c.l.bf16 %v11415_v1  ;;  %v10310_v21 = vunpack.c.h.bf16 %v11415_v1 }
 0x1af   : > { %7564 = vst.msk [vmem:[%s11933_s6 + $0x4b0] sm:$0xf] %vm7263_vm0, %v9211_v60  ;;  %7565 = vst.msk [vmem:[%s11933_s6 + $0x4b4] sm:$0xf] %vm7263_vm0, %v9212_v61  ;;  %v10313_v7 = vunpack.c.l.bf16 %v11416_v57  ;;  %v10314_v4 = vunpack.c.h.bf16 %v11416_v57  ;;  %v2072_v5 = vmul.f32 %v13022_v27, %v10305_v0  ;;  %v2073_v6 = vmul.f32 %v13022_v27, %v10306_v2 }
 0x1b0   : > { %7566 = vst.msk [vmem:[%s11933_s6 + $0x4b8] sm:$0xf] %vm7263_vm0, %v9213_v62  ;;  %7567 = vst.msk [vmem:[%s11933_s6 + $0x4bc] sm:$0xf] %vm7263_vm0, %v9214_v63  ;;  %v10317_v8 = vunpack.c.l.bf16 %v11417_v16  ;;  %v10318_v25 = vunpack.c.h.bf16 %v11417_v16  ;;  %v2074_v9 = vmul.f32 %v13022_v27, %v10309_v3  ;;  %v2075_v10 = vmul.f32 %v13022_v27, %v10310_v21 }
 0x1b1   : > { %v2076_v11 = vmul.f32 %v13022_v27, %v10313_v7  ;;  %v2077_v12 = vmul.f32 %v13022_v27, %v10314_v4  ;;  %v2863_v31 = vadd.f32 %v13033_v37, %v2072_v5  ;;  %v2864_v13 = vadd.f32 %v13033_v37, %v2073_v6 }
 0x1b2   : > { %v2078_v14 = vmul.f32 %v13022_v27, %v10317_v8  ;;  %v2079_v15 = vmul.f32 %v13022_v27, %v10318_v25  ;;  %v2865_v17 = vadd.f32 %v13033_v37, %v2074_v9  ;;  %v2866_v18 = vadd.f32 %v13033_v37, %v2075_v10  ;;  %v11422_v10 = vld [vmem:[%s11889_s29 + $0x500] sm:$0xff]  }
 0x1b3   : > { %v2867_v19 = vadd.f32 %v13033_v37, %v2076_v11  ;;  %v2868_v20 = vadd.f32 %v13033_v37, %v2077_v12  ;;  %v3647_v22 = vmax.f32 %v2863_v31, 0.0  ;;  %v3648_v23 = vmax.f32 %v2864_v13, 0.0 }
 0x1b4   : > { %v2869_v24 = vadd.f32 %v13033_v37, %v2078_v14  ;;  %v2870_v26 = vadd.f32 %v13033_v37, %v2079_v15  ;;  %v3649_v28 = vmax.f32 %v2865_v17, 0.0  ;;  %v3650_v29 = vmax.f32 %v2866_v18, 0.0  ;;  %v11423_v14 = vld [vmem:[%s11889_s29 + $0x508] sm:$0xff]   ;;  %v11424_v15 = vld [vmem:[%s11889_s29 + $0x510] sm:$0xff]  }
 0x1b5   : > { %v3651_v30 = vmax.f32 %v2867_v19, 0.0  ;;  %v3652_v32 = vmax.f32 %v2868_v20, 0.0  ;;  %v9215_v34 = vpack.c.bf16 %v3647_v22, %v3647_v22  ;;  %v9216_v35 = vpack.c.bf16 %v3648_v23, %v3648_v23  ;;  %v11425_v20 = vld [vmem:[%s11889_s29 + $0x518] sm:$0xff]  }
 0x1b6   : > { %v3653_v36 = vmax.f32 %v2869_v24, 0.0  ;;  %v3654_v38 = vmax.f32 %v2870_v26, 0.0  ;;  %v9217_v41 = vpack.c.bf16 %v3649_v28, %v3649_v28  ;;  %v9218_v42 = vpack.c.bf16 %v3650_v29, %v3650_v29 }
 0x1b7   : > { %v9219_v43 = vpack.c.bf16 %v3651_v30, %v3651_v30  ;;  %v9220_v44 = vpack.c.bf16 %v3652_v32, %v3652_v32  ;;  %7568 = vst.msk [vmem:[%s11933_s6 + $0x4c0] sm:$0xf] %vm7263_vm0, %v9215_v34  ;;  %7569 = vst.msk [vmem:[%s11933_s6 + $0x4c4] sm:$0xf] %vm7263_vm0, %v9216_v35  ;;  %v10321_v48 = vunpack.c.l.bf16 %v11418_v33  ;;  %v10322_v49 = vunpack.c.h.bf16 %v11418_v33  ;;  %v13392_v33 = vld [vmem:[%s15547_s1] ss:$0 sm:$0xff] }
 0x1b8   : > { %v9221_v46 = vpack.c.bf16 %v3653_v36, %v3653_v36  ;;  %v9222_v47 = vpack.c.bf16 %v3654_v38, %v3654_v38  ;;  %7570 = vst.msk [vmem:[%s11933_s6 + $0x4c8] sm:$0xf] %vm7263_vm0, %v9217_v41  ;;  %7571 = vst.msk [vmem:[%s11933_s6 + $0x4cc] sm:$0xf] %vm7263_vm0, %v9218_v42  ;;  %v10325_v50 = vunpack.c.l.bf16 %v11419_v39  ;;  %v10326_v51 = vunpack.c.h.bf16 %v11419_v39 }
 0x1b9   : > { %7572 = vst.msk [vmem:[%s11933_s6 + $0x4d0] sm:$0xf] %vm7263_vm0, %v9219_v43  ;;  %7573 = vst.msk [vmem:[%s11933_s6 + $0x4d4] sm:$0xf] %vm7263_vm0, %v9220_v44  ;;  %v10329_v52 = vunpack.c.l.bf16 %v11420_v40  ;;  %v10330_v53 = vunpack.c.h.bf16 %v11420_v40  ;;  %v2080_v54 = vmul.f32 %v13022_v27, %v10321_v48  ;;  %v2081_v55 = vmul.f32 %v13022_v27, %v10322_v49  ;;  %v13403_v43 = vld [vmem:[%s15548_s2] ss:$0 sm:$0xff] }
 0x1ba   : > { %7574 = vst.msk [vmem:[%s11933_s6 + $0x4d8] sm:$0xf] %vm7263_vm0, %v9221_v46  ;;  %7575 = vst.msk [vmem:[%s11933_s6 + $0x4dc] sm:$0xf] %vm7263_vm0, %v9222_v47  ;;  %v10333_v56 = vunpack.c.l.bf16 %v11421_v45  ;;  %v10334_v1 = vunpack.c.h.bf16 %v11421_v45  ;;  %v2082_v57 = vmul.f32 %v13022_v27, %v10325_v50  ;;  %v2083_v58 = vmul.f32 %v13022_v27, %v10326_v51 }
 0x1bb   : > { %v2084_v59 = vmul.f32 %v13022_v27, %v10329_v52  ;;  %v2085_v60 = vmul.f32 %v13022_v27, %v10330_v53  ;;  %v2871_v61 = vadd.f32 %v13033_v37, %v2080_v54  ;;  %v2872_v16 = vadd.f32 %v13033_v37, %v2081_v55 }
 0x1bc   : > { %v2086_v62 = vmul.f32 %v13022_v27, %v10333_v56  ;;  %v2087_v63 = vmul.f32 %v13022_v27, %v10334_v1  ;;  %v2873_v0 = vadd.f32 %v13033_v37, %v2082_v57  ;;  %v2874_v2 = vadd.f32 %v13033_v37, %v2083_v58 }
 0x1bd   : > { %v2875_v3 = vadd.f32 %v13033_v37, %v2084_v59  ;;  %v2876_v21 = vadd.f32 %v13033_v37, %v2085_v60  ;;  %v3655_v7 = vmax.f32 %v2871_v61, 0.0  ;;  %v3656_v4 = vmax.f32 %v2872_v16, 0.0  ;;  %v11426_v59 = vld [vmem:[%s11889_s29 + $0x520] sm:$0xff]  }
 0x1be   : > { %v2877_v5 = vadd.f32 %v13033_v37, %v2086_v62  ;;  %v2878_v6 = vadd.f32 %v13033_v37, %v2087_v63  ;;  %v3657_v8 = vmax.f32 %v2873_v0, 0.0  ;;  %v3658_v27 = vmax.f32 %v2874_v2, 0.0  ;;  %v11427_v63 = vld [vmem:[%s11889_s29 + $0x528] sm:$0xff]   ;;  %v11428_v0 = vld [vmem:[%s11889_s29 + $0x530] sm:$0xff]  }
 0x1bf   : > { %v3659_v25 = vmax.f32 %v2875_v3, 0.0  ;;  %v3660_v9 = vmax.f32 %v2876_v21, 0.0  ;;  %v9223_v11 = vpack.c.bf16 %v3655_v7, %v3655_v7  ;;  %v9224_v12 = vpack.c.bf16 %v3656_v4, %v3656_v4  ;;  %v11429_v4 = vld [vmem:[%s11889_s29 + $0x538] sm:$0xff]  }
 0x1c0   : > { %v3661_v31 = vmax.f32 %v2877_v5, 0.0  ;;  %v3662_v13 = vmax.f32 %v2878_v6, 0.0  ;;  %v9225_v17 = vpack.c.bf16 %v3657_v8, %v3657_v8  ;;  %v9226_v37 = vpack.c.bf16 %v3658_v27, %v3658_v27 }
 0x1c1   : > { %v9227_v18 = vpack.c.bf16 %v3659_v25, %v3659_v25  ;;  %v9228_v19 = vpack.c.bf16 %v3660_v9, %v3660_v9  ;;  %7576 = vst.msk [vmem:[%s11933_s6 + $0x4e0] sm:$0xf] %vm7263_vm0, %v9223_v11  ;;  %7577 = vst.msk [vmem:[%s11933_s6 + $0x4e4] sm:$0xf] %vm7263_vm0, %v9224_v12  ;;  %v10337_v24 = vunpack.c.l.bf16 %v11422_v10  ;;  %v10338_v26 = vunpack.c.h.bf16 %v11422_v10 }
 0x1c2   : > { %v9229_v22 = vpack.c.bf16 %v3661_v31, %v3661_v31  ;;  %v9230_v23 = vpack.c.bf16 %v3662_v13, %v3662_v13  ;;  %7578 = vst.msk [vmem:[%s11933_s6 + $0x4e8] sm:$0xf] %vm7263_vm0, %v9225_v17  ;;  %7579 = vst.msk [vmem:[%s11933_s6 + $0x4ec] sm:$0xf] %vm7263_vm0, %v9226_v37  ;;  %v10341_v28 = vunpack.c.l.bf16 %v11423_v14  ;;  %v10342_v29 = vunpack.c.h.bf16 %v11423_v14 }
 0x1c3   : > { %7580 = vst.msk [vmem:[%s11933_s6 + $0x4f0] sm:$0xf] %vm7263_vm0, %v9227_v18  ;;  %7581 = vst.msk [vmem:[%s11933_s6 + $0x4f4] sm:$0xf] %vm7263_vm0, %v9228_v19  ;;  %v10345_v30 = vunpack.c.l.bf16 %v11424_v15  ;;  %v10346_v32 = vunpack.c.h.bf16 %v11424_v15  ;;  %v2088_v34 = vmul.f32 %v13392_v33, %v10337_v24  ;;  %v2089_v35 = vmul.f32 %v13392_v33, %v10338_v26 }
 0x1c4   : > { %7582 = vst.msk [vmem:[%s11933_s6 + $0x4f8] sm:$0xf] %vm7263_vm0, %v9229_v22  ;;  %7583 = vst.msk [vmem:[%s11933_s6 + $0x4fc] sm:$0xf] %vm7263_vm0, %v9230_v23  ;;  %v10349_v36 = vunpack.c.l.bf16 %v11425_v20  ;;  %v10350_v38 = vunpack.c.h.bf16 %v11425_v20  ;;  %v2090_v39 = vmul.f32 %v13392_v33, %v10341_v28  ;;  %v2091_v40 = vmul.f32 %v13392_v33, %v10342_v29 }
 0x1c5   : > { %v2092_v41 = vmul.f32 %v13392_v33, %v10345_v30  ;;  %v2093_v42 = vmul.f32 %v13392_v33, %v10346_v32  ;;  %v2879_v44 = vadd.f32 %v13403_v43, %v2088_v34  ;;  %v2880_v45 = vadd.f32 %v13403_v43, %v2089_v35 }
 0x1c6   : > { %v2094_v46 = vmul.f32 %v13392_v33, %v10349_v36  ;;  %v2095_v47 = vmul.f32 %v13392_v33, %v10350_v38  ;;  %v2881_v48 = vadd.f32 %v13403_v43, %v2090_v39  ;;  %v2882_v49 = vadd.f32 %v13403_v43, %v2091_v40 }
 0x1c7   : > { %v2883_v50 = vadd.f32 %v13403_v43, %v2092_v41  ;;  %v2884_v51 = vadd.f32 %v13403_v43, %v2093_v42  ;;  %v3663_v52 = vmax.f32 %v2879_v44, 0.0  ;;  %v3664_v53 = vmax.f32 %v2880_v45, 0.0  ;;  %v11430_v41 = vld [vmem:[%s11889_s29 + $0x540] sm:$0xff]  }
 0x1c8   : > { %v2885_v54 = vadd.f32 %v13403_v43, %v2094_v46  ;;  %v2886_v55 = vadd.f32 %v13403_v43, %v2095_v47  ;;  %v3665_v56 = vmax.f32 %v2881_v48, 0.0  ;;  %v3666_v1 = vmax.f32 %v2882_v49, 0.0  ;;  %v11431_v47 = vld [vmem:[%s11889_s29 + $0x548] sm:$0xff]   ;;  %v11432_v48 = vld [vmem:[%s11889_s29 + $0x550] sm:$0xff]  }
 0x1c9   : > { %v3667_v57 = vmax.f32 %v2883_v50, 0.0  ;;  %v3668_v58 = vmax.f32 %v2884_v51, 0.0  ;;  %v9231_v60 = vpack.c.bf16 %v3663_v52, %v3663_v52  ;;  %v9232_v61 = vpack.c.bf16 %v3664_v53, %v3664_v53  ;;  %v11433_v53 = vld [vmem:[%s11889_s29 + $0x558] sm:$0xff]  }
 0x1ca   : > { %v3669_v16 = vmax.f32 %v2885_v54, 0.0  ;;  %v3670_v62 = vmax.f32 %v2886_v55, 0.0  ;;  %v9233_v2 = vpack.c.bf16 %v3665_v56, %v3665_v56  ;;  %v9234_v3 = vpack.c.bf16 %v3666_v1, %v3666_v1 }
 0x1cb   : > { %v9235_v21 = vpack.c.bf16 %v3667_v57, %v3667_v57  ;;  %v9236_v7 = vpack.c.bf16 %v3668_v58, %v3668_v58  ;;  %7584 = vst.msk [vmem:[%s11933_s6 + $0x500] sm:$0xf] %vm7263_vm0, %v9231_v60  ;;  %7585 = vst.msk [vmem:[%s11933_s6 + $0x504] sm:$0xf] %vm7263_vm0, %v9232_v61  ;;  %v10353_v8 = vunpack.c.l.bf16 %v11426_v59  ;;  %v10354_v27 = vunpack.c.h.bf16 %v11426_v59 }
 0x1cc   : > { %v9237_v5 = vpack.c.bf16 %v3669_v16, %v3669_v16  ;;  %v9238_v6 = vpack.c.bf16 %v3670_v62, %v3670_v62  ;;  %7586 = vst.msk [vmem:[%s11933_s6 + $0x508] sm:$0xf] %vm7263_vm0, %v9233_v2  ;;  %7587 = vst.msk [vmem:[%s11933_s6 + $0x50c] sm:$0xf] %vm7263_vm0, %v9234_v3  ;;  %v10357_v25 = vunpack.c.l.bf16 %v11427_v63  ;;  %v10358_v9 = vunpack.c.h.bf16 %v11427_v63 }
 0x1cd   : > { %7588 = vst.msk [vmem:[%s11933_s6 + $0x510] sm:$0xf] %vm7263_vm0, %v9235_v21  ;;  %7589 = vst.msk [vmem:[%s11933_s6 + $0x514] sm:$0xf] %vm7263_vm0, %v9236_v7  ;;  %v10361_v10 = vunpack.c.l.bf16 %v11428_v0  ;;  %v10362_v11 = vunpack.c.h.bf16 %v11428_v0  ;;  %v2096_v12 = vmul.f32 %v13392_v33, %v10353_v8  ;;  %v2097_v31 = vmul.f32 %v13392_v33, %v10354_v27 }
 0x1ce   : > { %7590 = vst.msk [vmem:[%s11933_s6 + $0x518] sm:$0xf] %vm7263_vm0, %v9237_v5  ;;  %7591 = vst.msk [vmem:[%s11933_s6 + $0x51c] sm:$0xf] %vm7263_vm0, %v9238_v6  ;;  %v10365_v13 = vunpack.c.l.bf16 %v11429_v4  ;;  %v10366_v14 = vunpack.c.h.bf16 %v11429_v4  ;;  %v2098_v15 = vmul.f32 %v13392_v33, %v10357_v25  ;;  %v2099_v17 = vmul.f32 %v13392_v33, %v10358_v9 }
 0x1cf   : > { %v2100_v37 = vmul.f32 %v13392_v33, %v10361_v10  ;;  %v2101_v18 = vmul.f32 %v13392_v33, %v10362_v11  ;;  %v2887_v19 = vadd.f32 %v13403_v43, %v2096_v12  ;;  %v2888_v20 = vadd.f32 %v13403_v43, %v2097_v31 }
 0x1d0   : > { %v2102_v22 = vmul.f32 %v13392_v33, %v10365_v13  ;;  %v2103_v23 = vmul.f32 %v13392_v33, %v10366_v14  ;;  %v2889_v24 = vadd.f32 %v13403_v43, %v2098_v15  ;;  %v2890_v26 = vadd.f32 %v13403_v43, %v2099_v17 }
 0x1d1   : > { %v2891_v28 = vadd.f32 %v13403_v43, %v2100_v37  ;;  %v2892_v29 = vadd.f32 %v13403_v43, %v2101_v18  ;;  %v3671_v30 = vmax.f32 %v2887_v19, 0.0  ;;  %v3672_v32 = vmax.f32 %v2888_v20, 0.0  ;;  %v11434_v37 = vld [vmem:[%s11889_s29 + $0x560] sm:$0xff]  }
 0x1d2   : > { %v2893_v34 = vadd.f32 %v13403_v43, %v2102_v22  ;;  %v2894_v35 = vadd.f32 %v13403_v43, %v2103_v23  ;;  %v3673_v36 = vmax.f32 %v2889_v24, 0.0  ;;  %v3674_v38 = vmax.f32 %v2890_v26, 0.0  ;;  %v11435_v23 = vld [vmem:[%s11889_s29 + $0x568] sm:$0xff]   ;;  %v11436_v24 = vld [vmem:[%s11889_s29 + $0x570] sm:$0xff]  }
 0x1d3   : > { %v3675_v39 = vmax.f32 %v2891_v28, 0.0  ;;  %v3676_v40 = vmax.f32 %v2892_v29, 0.0  ;;  %v9239_v42 = vpack.c.bf16 %v3671_v30, %v3671_v30  ;;  %v9240_v44 = vpack.c.bf16 %v3672_v32, %v3672_v32  ;;  %v11437_v32 = vld [vmem:[%s11889_s29 + $0x578] sm:$0xff]  }
 0x1d4   : > { %v3677_v45 = vmax.f32 %v2893_v34, 0.0  ;;  %v3678_v46 = vmax.f32 %v2894_v35, 0.0  ;;  %v9241_v49 = vpack.c.bf16 %v3673_v36, %v3673_v36  ;;  %v9242_v50 = vpack.c.bf16 %v3674_v38, %v3674_v38 }
 0x1d5   : > { %v9243_v51 = vpack.c.bf16 %v3675_v39, %v3675_v39  ;;  %v9244_v52 = vpack.c.bf16 %v3676_v40, %v3676_v40  ;;  %7592 = vst.msk [vmem:[%s11933_s6 + $0x520] sm:$0xf] %vm7263_vm0, %v9239_v42  ;;  %7593 = vst.msk [vmem:[%s11933_s6 + $0x524] sm:$0xf] %vm7263_vm0, %v9240_v44  ;;  %v10369_v56 = vunpack.c.l.bf16 %v11430_v41  ;;  %v10370_v1 = vunpack.c.h.bf16 %v11430_v41 }
 0x1d6   : > { %v9245_v54 = vpack.c.bf16 %v3677_v45, %v3677_v45  ;;  %v9246_v55 = vpack.c.bf16 %v3678_v46, %v3678_v46  ;;  %7594 = vst.msk [vmem:[%s11933_s6 + $0x528] sm:$0xf] %vm7263_vm0, %v9241_v49  ;;  %7595 = vst.msk [vmem:[%s11933_s6 + $0x52c] sm:$0xf] %vm7263_vm0, %v9242_v50  ;;  %v10373_v57 = vunpack.c.l.bf16 %v11431_v47  ;;  %v10374_v58 = vunpack.c.h.bf16 %v11431_v47 }
 0x1d7   : > { %7596 = vst.msk [vmem:[%s11933_s6 + $0x530] sm:$0xf] %vm7263_vm0, %v9243_v51  ;;  %7597 = vst.msk [vmem:[%s11933_s6 + $0x534] sm:$0xf] %vm7263_vm0, %v9244_v52  ;;  %v10377_v59 = vunpack.c.l.bf16 %v11432_v48  ;;  %v10378_v60 = vunpack.c.h.bf16 %v11432_v48  ;;  %v2104_v61 = vmul.f32 %v13392_v33, %v10369_v56  ;;  %v2105_v16 = vmul.f32 %v13392_v33, %v10370_v1 }
 0x1d8   : > { %7598 = vst.msk [vmem:[%s11933_s6 + $0x538] sm:$0xf] %vm7263_vm0, %v9245_v54  ;;  %7599 = vst.msk [vmem:[%s11933_s6 + $0x53c] sm:$0xf] %vm7263_vm0, %v9246_v55  ;;  %v10381_v62 = vunpack.c.l.bf16 %v11433_v53  ;;  %v10382_v63 = vunpack.c.h.bf16 %v11433_v53  ;;  %v2106_v0 = vmul.f32 %v13392_v33, %v10373_v57  ;;  %v2107_v2 = vmul.f32 %v13392_v33, %v10374_v58 }
 0x1d9   : > { %v2108_v3 = vmul.f32 %v13392_v33, %v10377_v59  ;;  %v2109_v21 = vmul.f32 %v13392_v33, %v10378_v60  ;;  %v2895_v7 = vadd.f32 %v13403_v43, %v2104_v61  ;;  %v2896_v4 = vadd.f32 %v13403_v43, %v2105_v16 }
 0x1da   : > { %v2110_v5 = vmul.f32 %v13392_v33, %v10381_v62  ;;  %v2111_v6 = vmul.f32 %v13392_v33, %v10382_v63  ;;  %v2897_v8 = vadd.f32 %v13403_v43, %v2106_v0  ;;  %v2898_v27 = vadd.f32 %v13403_v43, %v2107_v2 }
 0x1db   : > { %v2899_v25 = vadd.f32 %v13403_v43, %v2108_v3  ;;  %v2900_v9 = vadd.f32 %v13403_v43, %v2109_v21  ;;  %v3679_v10 = vmax.f32 %v2895_v7, 0.0  ;;  %v3680_v11 = vmax.f32 %v2896_v4, 0.0  ;;  %v11438_v3 = vld [vmem:[%s11889_s29 + $0x580] sm:$0xff]  }
 0x1dc   : > { %v2901_v12 = vadd.f32 %v13403_v43, %v2110_v5  ;;  %v2902_v31 = vadd.f32 %v13403_v43, %v2111_v6  ;;  %v3681_v13 = vmax.f32 %v2897_v8, 0.0  ;;  %v3682_v14 = vmax.f32 %v2898_v27, 0.0  ;;  %v11439_v6 = vld [vmem:[%s11889_s29 + $0x588] sm:$0xff]   ;;  %v11440_v8 = vld [vmem:[%s11889_s29 + $0x590] sm:$0xff]  }
 0x1dd   : > { %v3683_v15 = vmax.f32 %v2899_v25, 0.0  ;;  %v3684_v17 = vmax.f32 %v2900_v9, 0.0  ;;  %v9247_v18 = vpack.c.bf16 %v3679_v10, %v3679_v10  ;;  %v9248_v19 = vpack.c.bf16 %v3680_v11, %v3680_v11  ;;  %v11441_v11 = vld [vmem:[%s11889_s29 + $0x598] sm:$0xff]  }
 0x1de   : > { %v3685_v20 = vmax.f32 %v2901_v12, 0.0  ;;  %v3686_v22 = vmax.f32 %v2902_v31, 0.0  ;;  %v9249_v26 = vpack.c.bf16 %v3681_v13, %v3681_v13  ;;  %v9250_v28 = vpack.c.bf16 %v3682_v14, %v3682_v14 }
 0x1df   : > { %v9251_v29 = vpack.c.bf16 %v3683_v15, %v3683_v15  ;;  %v9252_v30 = vpack.c.bf16 %v3684_v17, %v3684_v17  ;;  %7600 = vst.msk [vmem:[%s11933_s6 + $0x540] sm:$0xf] %vm7263_vm0, %v9247_v18  ;;  %7601 = vst.msk [vmem:[%s11933_s6 + $0x544] sm:$0xf] %vm7263_vm0, %v9248_v19  ;;  %v10385_v36 = vunpack.c.l.bf16 %v11434_v37  ;;  %v10386_v38 = vunpack.c.h.bf16 %v11434_v37 }
 0x1e0   : > { %v9253_v34 = vpack.c.bf16 %v3685_v20, %v3685_v20  ;;  %v9254_v35 = vpack.c.bf16 %v3686_v22, %v3686_v22  ;;  %7602 = vst.msk [vmem:[%s11933_s6 + $0x548] sm:$0xf] %vm7263_vm0, %v9249_v26  ;;  %7603 = vst.msk [vmem:[%s11933_s6 + $0x54c] sm:$0xf] %vm7263_vm0, %v9250_v28  ;;  %v10389_v39 = vunpack.c.l.bf16 %v11435_v23  ;;  %v10390_v40 = vunpack.c.h.bf16 %v11435_v23 }
 0x1e1   : > { %7604 = vst.msk [vmem:[%s11933_s6 + $0x550] sm:$0xf] %vm7263_vm0, %v9251_v29  ;;  %7605 = vst.msk [vmem:[%s11933_s6 + $0x554] sm:$0xf] %vm7263_vm0, %v9252_v30  ;;  %v10393_v41 = vunpack.c.l.bf16 %v11436_v24  ;;  %v10394_v42 = vunpack.c.h.bf16 %v11436_v24  ;;  %v2112_v44 = vmul.f32 %v13392_v33, %v10385_v36  ;;  %v2113_v45 = vmul.f32 %v13392_v33, %v10386_v38 }
 0x1e2   : > { %7606 = vst.msk [vmem:[%s11933_s6 + $0x558] sm:$0xf] %vm7263_vm0, %v9253_v34  ;;  %7607 = vst.msk [vmem:[%s11933_s6 + $0x55c] sm:$0xf] %vm7263_vm0, %v9254_v35  ;;  %v10397_v46 = vunpack.c.l.bf16 %v11437_v32  ;;  %v10398_v47 = vunpack.c.h.bf16 %v11437_v32  ;;  %v2114_v48 = vmul.f32 %v13392_v33, %v10389_v39  ;;  %v2115_v49 = vmul.f32 %v13392_v33, %v10390_v40 }
 0x1e3   : > { %v2116_v50 = vmul.f32 %v13392_v33, %v10393_v41  ;;  %v2117_v51 = vmul.f32 %v13392_v33, %v10394_v42  ;;  %v2903_v52 = vadd.f32 %v13403_v43, %v2112_v44  ;;  %v2904_v53 = vadd.f32 %v13403_v43, %v2113_v45 }
 0x1e4   : > { %v2118_v54 = vmul.f32 %v13392_v33, %v10397_v46  ;;  %v2119_v55 = vmul.f32 %v13392_v33, %v10398_v47  ;;  %v2905_v56 = vadd.f32 %v13403_v43, %v2114_v48  ;;  %v2906_v1 = vadd.f32 %v13403_v43, %v2115_v49 }
 0x1e5   : > { %v2907_v57 = vadd.f32 %v13403_v43, %v2116_v50  ;;  %v2908_v58 = vadd.f32 %v13403_v43, %v2117_v51  ;;  %v3687_v59 = vmax.f32 %v2903_v52, 0.0  ;;  %v3688_v60 = vmax.f32 %v2904_v53, 0.0  ;;  %v11442_v50 = vld [vmem:[%s11889_s29 + $0x5a0] sm:$0xff]  }
 0x1e6   : > { %v2909_v61 = vadd.f32 %v13403_v43, %v2118_v54  ;;  %v2910_v16 = vadd.f32 %v13403_v43, %v2119_v55  ;;  %v3689_v62 = vmax.f32 %v2905_v56, 0.0  ;;  %v3690_v63 = vmax.f32 %v2906_v1, 0.0  ;;  %v11443_v55 = vld [vmem:[%s11889_s29 + $0x5a8] sm:$0xff]   ;;  %v11444_v56 = vld [vmem:[%s11889_s29 + $0x5b0] sm:$0xff]  }
 0x1e7   : > { %v3691_v0 = vmax.f32 %v2907_v57, 0.0  ;;  %v3692_v2 = vmax.f32 %v2908_v58, 0.0  ;;  %v9255_v21 = vpack.c.bf16 %v3687_v59, %v3687_v59  ;;  %v9256_v7 = vpack.c.bf16 %v3688_v60, %v3688_v60  ;;  %v11445_v60 = vld [vmem:[%s11889_s29 + $0x5b8] sm:$0xff]  }
 0x1e8   : > { %v3693_v4 = vmax.f32 %v2909_v61, 0.0  ;;  %v3694_v5 = vmax.f32 %v2910_v16, 0.0  ;;  %v9257_v27 = vpack.c.bf16 %v3689_v62, %v3689_v62  ;;  %v9258_v25 = vpack.c.bf16 %v3690_v63, %v3690_v63 }
 0x1e9   : > { %v9259_v9 = vpack.c.bf16 %v3691_v0, %v3691_v0  ;;  %v9260_v10 = vpack.c.bf16 %v3692_v2, %v3692_v2  ;;  %7608 = vst.msk [vmem:[%s11933_s6 + $0x560] sm:$0xf] %vm7263_vm0, %v9255_v21  ;;  %7609 = vst.msk [vmem:[%s11933_s6 + $0x564] sm:$0xf] %vm7263_vm0, %v9256_v7  ;;  %v10401_v13 = vunpack.c.l.bf16 %v11438_v3  ;;  %v10402_v14 = vunpack.c.h.bf16 %v11438_v3 }
 0x1ea   : > { %v9261_v12 = vpack.c.bf16 %v3693_v4, %v3693_v4  ;;  %v9262_v31 = vpack.c.bf16 %v3694_v5, %v3694_v5  ;;  %7610 = vst.msk [vmem:[%s11933_s6 + $0x568] sm:$0xf] %vm7263_vm0, %v9257_v27  ;;  %7611 = vst.msk [vmem:[%s11933_s6 + $0x56c] sm:$0xf] %vm7263_vm0, %v9258_v25  ;;  %v10405_v15 = vunpack.c.l.bf16 %v11439_v6  ;;  %v10406_v17 = vunpack.c.h.bf16 %v11439_v6 }
 0x1eb   : > { %7612 = vst.msk [vmem:[%s11933_s6 + $0x570] sm:$0xf] %vm7263_vm0, %v9259_v9  ;;  %7613 = vst.msk [vmem:[%s11933_s6 + $0x574] sm:$0xf] %vm7263_vm0, %v9260_v10  ;;  %v10409_v37 = vunpack.c.l.bf16 %v11440_v8  ;;  %v10410_v18 = vunpack.c.h.bf16 %v11440_v8  ;;  %v2120_v19 = vmul.f32 %v13392_v33, %v10401_v13  ;;  %v2121_v20 = vmul.f32 %v13392_v33, %v10402_v14 }
 0x1ec   : > { %7614 = vst.msk [vmem:[%s11933_s6 + $0x578] sm:$0xf] %vm7263_vm0, %v9261_v12  ;;  %7615 = vst.msk [vmem:[%s11933_s6 + $0x57c] sm:$0xf] %vm7263_vm0, %v9262_v31  ;;  %v10413_v22 = vunpack.c.l.bf16 %v11441_v11  ;;  %v10414_v23 = vunpack.c.h.bf16 %v11441_v11  ;;  %v2122_v24 = vmul.f32 %v13392_v33, %v10405_v15  ;;  %v2123_v26 = vmul.f32 %v13392_v33, %v10406_v17 }
 0x1ed   : > { %v2124_v28 = vmul.f32 %v13392_v33, %v10409_v37  ;;  %v2125_v29 = vmul.f32 %v13392_v33, %v10410_v18  ;;  %v2911_v30 = vadd.f32 %v13403_v43, %v2120_v19  ;;  %v2912_v32 = vadd.f32 %v13403_v43, %v2121_v20 }
 0x1ee   : > { %v2126_v34 = vmul.f32 %v13392_v33, %v10413_v22  ;;  %v2127_v35 = vmul.f32 %v13392_v33, %v10414_v23  ;;  %v2913_v36 = vadd.f32 %v13403_v43, %v2122_v24  ;;  %v2914_v38 = vadd.f32 %v13403_v43, %v2123_v26 }
 0x1ef   : > { %v2915_v39 = vadd.f32 %v13403_v43, %v2124_v28  ;;  %v2916_v40 = vadd.f32 %v13403_v43, %v2125_v29  ;;  %v3695_v41 = vmax.f32 %v2911_v30, 0.0  ;;  %v3696_v42 = vmax.f32 %v2912_v32, 0.0  ;;  %v11446_v28 = vld [vmem:[%s11889_s29 + $0x5c0] sm:$0xff]  }
 0x1f0   : > { %v2917_v44 = vadd.f32 %v13403_v43, %v2126_v34  ;;  %v2918_v45 = vadd.f32 %v13403_v43, %v2127_v35  ;;  %v3697_v46 = vmax.f32 %v2913_v36, 0.0  ;;  %v3698_v47 = vmax.f32 %v2914_v38, 0.0  ;;  %v11447_v35 = vld [vmem:[%s11889_s29 + $0x5c8] sm:$0xff]   ;;  %v11448_v36 = vld [vmem:[%s11889_s29 + $0x5d0] sm:$0xff]  }
 0x1f1   : > { %v3699_v48 = vmax.f32 %v2915_v39, 0.0  ;;  %v3700_v49 = vmax.f32 %v2916_v40, 0.0  ;;  %v9263_v51 = vpack.c.bf16 %v3695_v41, %v3695_v41  ;;  %v9264_v52 = vpack.c.bf16 %v3696_v42, %v3696_v42  ;;  %v11449_v42 = vld [vmem:[%s11889_s29 + $0x5d8] sm:$0xff]  }
 0x1f2   : > { %v3701_v53 = vmax.f32 %v2917_v44, 0.0  ;;  %v3702_v54 = vmax.f32 %v2918_v45, 0.0  ;;  %v9265_v1 = vpack.c.bf16 %v3697_v46, %v3697_v46  ;;  %v9266_v57 = vpack.c.bf16 %v3698_v47, %v3698_v47 }
 0x1f3   : > { %v9267_v58 = vpack.c.bf16 %v3699_v48, %v3699_v48  ;;  %v9268_v59 = vpack.c.bf16 %v3700_v49, %v3700_v49  ;;  %7616 = vst.msk [vmem:[%s11933_s6 + $0x580] sm:$0xf] %vm7263_vm0, %v9263_v51  ;;  %7617 = vst.msk [vmem:[%s11933_s6 + $0x584] sm:$0xf] %vm7263_vm0, %v9264_v52  ;;  %v10417_v62 = vunpack.c.l.bf16 %v11442_v50  ;;  %v10418_v63 = vunpack.c.h.bf16 %v11442_v50 }
 0x1f4   : > { %v9269_v61 = vpack.c.bf16 %v3701_v53, %v3701_v53  ;;  %v9270_v16 = vpack.c.bf16 %v3702_v54, %v3702_v54  ;;  %7618 = vst.msk [vmem:[%s11933_s6 + $0x588] sm:$0xf] %vm7263_vm0, %v9265_v1  ;;  %7619 = vst.msk [vmem:[%s11933_s6 + $0x58c] sm:$0xf] %vm7263_vm0, %v9266_v57  ;;  %v10421_v0 = vunpack.c.l.bf16 %v11443_v55  ;;  %v10422_v2 = vunpack.c.h.bf16 %v11443_v55 }
 0x1f5   : > { %7620 = vst.msk [vmem:[%s11933_s6 + $0x590] sm:$0xf] %vm7263_vm0, %v9267_v58  ;;  %7621 = vst.msk [vmem:[%s11933_s6 + $0x594] sm:$0xf] %vm7263_vm0, %v9268_v59  ;;  %v10425_v3 = vunpack.c.l.bf16 %v11444_v56  ;;  %v10426_v21 = vunpack.c.h.bf16 %v11444_v56  ;;  %v2128_v7 = vmul.f32 %v13392_v33, %v10417_v62  ;;  %v2129_v4 = vmul.f32 %v13392_v33, %v10418_v63 }
 0x1f6   : > { %7622 = vst.msk [vmem:[%s11933_s6 + $0x598] sm:$0xf] %vm7263_vm0, %v9269_v61  ;;  %7623 = vst.msk [vmem:[%s11933_s6 + $0x59c] sm:$0xf] %vm7263_vm0, %v9270_v16  ;;  %v10429_v5 = vunpack.c.l.bf16 %v11445_v60  ;;  %v10430_v6 = vunpack.c.h.bf16 %v11445_v60  ;;  %v2130_v8 = vmul.f32 %v13392_v33, %v10421_v0  ;;  %v2131_v27 = vmul.f32 %v13392_v33, %v10422_v2 }
 0x1f7   : > { %v2132_v25 = vmul.f32 %v13392_v33, %v10425_v3  ;;  %v2133_v9 = vmul.f32 %v13392_v33, %v10426_v21  ;;  %v2919_v10 = vadd.f32 %v13403_v43, %v2128_v7  ;;  %v2920_v11 = vadd.f32 %v13403_v43, %v2129_v4 }
 0x1f8   : > { %v2134_v12 = vmul.f32 %v13392_v33, %v10429_v5  ;;  %v2135_v31 = vmul.f32 %v13392_v33, %v10430_v6  ;;  %v2921_v13 = vadd.f32 %v13403_v43, %v2130_v8  ;;  %v2922_v14 = vadd.f32 %v13403_v43, %v2131_v27 }
 0x1f9   : > { %v2923_v15 = vadd.f32 %v13403_v43, %v2132_v25  ;;  %v2924_v17 = vadd.f32 %v13403_v43, %v2133_v9  ;;  %v3703_v37 = vmax.f32 %v2919_v10, 0.0  ;;  %v3704_v18 = vmax.f32 %v2920_v11, 0.0  ;;  %v11450_v25 = vld [vmem:[%s11889_s29 + $0x5e0] sm:$0xff]  }
 0x1fa   : > { %v2925_v19 = vadd.f32 %v13403_v43, %v2134_v12  ;;  %v2926_v20 = vadd.f32 %v13403_v43, %v2135_v31  ;;  %v3705_v22 = vmax.f32 %v2921_v13, 0.0  ;;  %v3706_v23 = vmax.f32 %v2922_v14, 0.0  ;;  %v11451_v31 = vld [vmem:[%s11889_s29 + $0x5e8] sm:$0xff]   ;;  %v11452_v13 = vld [vmem:[%s11889_s29 + $0x5f0] sm:$0xff]  }
 0x1fb   : > { %v3707_v24 = vmax.f32 %v2923_v15, 0.0  ;;  %v3708_v26 = vmax.f32 %v2924_v17, 0.0  ;;  %v9271_v29 = vpack.c.bf16 %v3703_v37, %v3703_v37  ;;  %v9272_v30 = vpack.c.bf16 %v3704_v18, %v3704_v18  ;;  %v11453_v18 = vld [vmem:[%s11889_s29 + $0x5f8] sm:$0xff]  }
 0x1fc   : > { %v3709_v32 = vmax.f32 %v2925_v19, 0.0  ;;  %v3710_v34 = vmax.f32 %v2926_v20, 0.0  ;;  %v9273_v38 = vpack.c.bf16 %v3705_v22, %v3705_v22  ;;  %v9274_v39 = vpack.c.bf16 %v3706_v23, %v3706_v23 }
 0x1fd   : > { %v9275_v40 = vpack.c.bf16 %v3707_v24, %v3707_v24  ;;  %v9276_v41 = vpack.c.bf16 %v3708_v26, %v3708_v26  ;;  %7624 = vst.msk [vmem:[%s11933_s6 + $0x5a0] sm:$0xf] %vm7263_vm0, %v9271_v29  ;;  %7625 = vst.msk [vmem:[%s11933_s6 + $0x5a4] sm:$0xf] %vm7263_vm0, %v9272_v30  ;;  %v10433_v46 = vunpack.c.l.bf16 %v11446_v28  ;;  %v10434_v47 = vunpack.c.h.bf16 %v11446_v28 }
 0x1fe   : > { %v9277_v44 = vpack.c.bf16 %v3709_v32, %v3709_v32  ;;  %v9278_v45 = vpack.c.bf16 %v3710_v34, %v3710_v34  ;;  %7626 = vst.msk [vmem:[%s11933_s6 + $0x5a8] sm:$0xf] %vm7263_vm0, %v9273_v38  ;;  %7627 = vst.msk [vmem:[%s11933_s6 + $0x5ac] sm:$0xf] %vm7263_vm0, %v9274_v39  ;;  %v10437_v48 = vunpack.c.l.bf16 %v11447_v35  ;;  %v10438_v49 = vunpack.c.h.bf16 %v11447_v35 }
 0x1ff   : > { %7628 = vst.msk [vmem:[%s11933_s6 + $0x5b0] sm:$0xf] %vm7263_vm0, %v9275_v40  ;;  %7629 = vst.msk [vmem:[%s11933_s6 + $0x5b4] sm:$0xf] %vm7263_vm0, %v9276_v41  ;;  %v10441_v50 = vunpack.c.l.bf16 %v11448_v36  ;;  %v10442_v51 = vunpack.c.h.bf16 %v11448_v36  ;;  %v2136_v52 = vmul.f32 %v13392_v33, %v10433_v46  ;;  %v2137_v53 = vmul.f32 %v13392_v33, %v10434_v47 }
 0x200   : > { %7630 = vst.msk [vmem:[%s11933_s6 + $0x5b8] sm:$0xf] %vm7263_vm0, %v9277_v44  ;;  %7631 = vst.msk [vmem:[%s11933_s6 + $0x5bc] sm:$0xf] %vm7263_vm0, %v9278_v45  ;;  %v10445_v54 = vunpack.c.l.bf16 %v11449_v42  ;;  %v10446_v55 = vunpack.c.h.bf16 %v11449_v42  ;;  %v2138_v56 = vmul.f32 %v13392_v33, %v10437_v48  ;;  %v2139_v1 = vmul.f32 %v13392_v33, %v10438_v49 }
 0x201   : > { %v2140_v57 = vmul.f32 %v13392_v33, %v10441_v50  ;;  %v2141_v58 = vmul.f32 %v13392_v33, %v10442_v51  ;;  %v2927_v59 = vadd.f32 %v13403_v43, %v2136_v52  ;;  %v2928_v60 = vadd.f32 %v13403_v43, %v2137_v53 }
 0x202   : > { %v2142_v61 = vmul.f32 %v13392_v33, %v10445_v54  ;;  %v2143_v16 = vmul.f32 %v13392_v33, %v10446_v55  ;;  %v2929_v62 = vadd.f32 %v13403_v43, %v2138_v56  ;;  %v2930_v63 = vadd.f32 %v13403_v43, %v2139_v1 }
 0x203   : > { %v2931_v0 = vadd.f32 %v13403_v43, %v2140_v57  ;;  %v2932_v2 = vadd.f32 %v13403_v43, %v2141_v58  ;;  %v3711_v3 = vmax.f32 %v2927_v59, 0.0  ;;  %v3712_v21 = vmax.f32 %v2928_v60, 0.0  ;;  %v11454_v57 = vld [vmem:[%s11889_s29 + $0x600] sm:$0xff]  }
 0x204   : > { %v2933_v7 = vadd.f32 %v13403_v43, %v2142_v61  ;;  %v2934_v4 = vadd.f32 %v13403_v43, %v2143_v16  ;;  %v3713_v5 = vmax.f32 %v2929_v62, 0.0  ;;  %v3714_v6 = vmax.f32 %v2930_v63, 0.0  ;;  %v11455_v16 = vld [vmem:[%s11889_s29 + $0x608] sm:$0xff]   ;;  %v11456_v62 = vld [vmem:[%s11889_s29 + $0x610] sm:$0xff]  }
 0x205   : > { %v3715_v8 = vmax.f32 %v2931_v0, 0.0  ;;  %v3716_v27 = vmax.f32 %v2932_v2, 0.0  ;;  %v9279_v9 = vpack.c.bf16 %v3711_v3, %v3711_v3  ;;  %v9280_v10 = vpack.c.bf16 %v3712_v21, %v3712_v21  ;;  %v11457_v21 = vld [vmem:[%s11889_s29 + $0x618] sm:$0xff]  }
 0x206   : > { %v3717_v11 = vmax.f32 %v2933_v7, 0.0  ;;  %v3718_v12 = vmax.f32 %v2934_v4, 0.0  ;;  %v9281_v14 = vpack.c.bf16 %v3713_v5, %v3713_v5  ;;  %v9282_v15 = vpack.c.bf16 %v3714_v6, %v3714_v6 }
 0x207   : > { %v9283_v17 = vpack.c.bf16 %v3715_v8, %v3715_v8  ;;  %v9284_v37 = vpack.c.bf16 %v3716_v27, %v3716_v27  ;;  %7632 = vst.msk [vmem:[%s11933_s6 + $0x5c0] sm:$0xf] %vm7263_vm0, %v9279_v9  ;;  %7633 = vst.msk [vmem:[%s11933_s6 + $0x5c4] sm:$0xf] %vm7263_vm0, %v9280_v10  ;;  %v10449_v22 = vunpack.c.l.bf16 %v11450_v25  ;;  %v10450_v23 = vunpack.c.h.bf16 %v11450_v25 }
 0x208   : > { %v9285_v19 = vpack.c.bf16 %v3717_v11, %v3717_v11  ;;  %v9286_v20 = vpack.c.bf16 %v3718_v12, %v3718_v12  ;;  %7634 = vst.msk [vmem:[%s11933_s6 + $0x5c8] sm:$0xf] %vm7263_vm0, %v9281_v14  ;;  %7635 = vst.msk [vmem:[%s11933_s6 + $0x5cc] sm:$0xf] %vm7263_vm0, %v9282_v15  ;;  %v10453_v24 = vunpack.c.l.bf16 %v11451_v31  ;;  %v10454_v26 = vunpack.c.h.bf16 %v11451_v31 }
 0x209   : > { %7636 = vst.msk [vmem:[%s11933_s6 + $0x5d0] sm:$0xf] %vm7263_vm0, %v9283_v17  ;;  %7637 = vst.msk [vmem:[%s11933_s6 + $0x5d4] sm:$0xf] %vm7263_vm0, %v9284_v37  ;;  %v10457_v28 = vunpack.c.l.bf16 %v11452_v13  ;;  %v10458_v29 = vunpack.c.h.bf16 %v11452_v13  ;;  %v2144_v30 = vmul.f32 %v13392_v33, %v10449_v22  ;;  %v2145_v32 = vmul.f32 %v13392_v33, %v10450_v23 }
 0x20a   : > { %7638 = vst.msk [vmem:[%s11933_s6 + $0x5d8] sm:$0xf] %vm7263_vm0, %v9285_v19  ;;  %7639 = vst.msk [vmem:[%s11933_s6 + $0x5dc] sm:$0xf] %vm7263_vm0, %v9286_v20  ;;  %v10461_v34 = vunpack.c.l.bf16 %v11453_v18  ;;  %v10462_v35 = vunpack.c.h.bf16 %v11453_v18  ;;  %v2146_v36 = vmul.f32 %v13392_v33, %v10453_v24  ;;  %v2147_v38 = vmul.f32 %v13392_v33, %v10454_v26 }
 0x20b   : > { %v2148_v39 = vmul.f32 %v13392_v33, %v10457_v28  ;;  %v2149_v40 = vmul.f32 %v13392_v33, %v10458_v29  ;;  %v2935_v41 = vadd.f32 %v13403_v43, %v2144_v30  ;;  %v2936_v42 = vadd.f32 %v13403_v43, %v2145_v32 }
 0x20c   : > { %v2150_v44 = vmul.f32 %v13392_v33, %v10461_v34  ;;  %v2151_v45 = vmul.f32 %v13392_v33, %v10462_v35  ;;  %v2937_v46 = vadd.f32 %v13403_v43, %v2146_v36  ;;  %v2938_v47 = vadd.f32 %v13403_v43, %v2147_v38 }
 0x20d   : > { %v2939_v48 = vadd.f32 %v13403_v43, %v2148_v39  ;;  %v2940_v49 = vadd.f32 %v13403_v43, %v2149_v40  ;;  %v3719_v50 = vmax.f32 %v2935_v41, 0.0  ;;  %v3720_v51 = vmax.f32 %v2936_v42, 0.0  ;;  %v11458_v39 = vld [vmem:[%s11889_s29 + $0x620] sm:$0xff]  }
 0x20e   : > { %v2941_v52 = vadd.f32 %v13403_v43, %v2150_v44  ;;  %v2942_v53 = vadd.f32 %v13403_v43, %v2151_v45  ;;  %v3721_v54 = vmax.f32 %v2937_v46, 0.0  ;;  %v3722_v55 = vmax.f32 %v2938_v47, 0.0  ;;  %v11459_v45 = vld [vmem:[%s11889_s29 + $0x628] sm:$0xff]   ;;  %v11460_v46 = vld [vmem:[%s11889_s29 + $0x630] sm:$0xff]  }
 0x20f   : > { %v3723_v56 = vmax.f32 %v2939_v48, 0.0  ;;  %v3724_v1 = vmax.f32 %v2940_v49, 0.0  ;;  %v9287_v58 = vpack.c.bf16 %v3719_v50, %v3719_v50  ;;  %v9288_v59 = vpack.c.bf16 %v3720_v51, %v3720_v51  ;;  %v11461_v51 = vld [vmem:[%s11889_s29 + $0x638] sm:$0xff]  }
 0x210   : > { %v3725_v60 = vmax.f32 %v2941_v52, 0.0  ;;  %v3726_v61 = vmax.f32 %v2942_v53, 0.0  ;;  %v9289_v63 = vpack.c.bf16 %v3721_v54, %v3721_v54  ;;  %v9290_v0 = vpack.c.bf16 %v3722_v55, %v3722_v55 }
 0x211   : > { %v9291_v2 = vpack.c.bf16 %v3723_v56, %v3723_v56  ;;  %v9292_v3 = vpack.c.bf16 %v3724_v1, %v3724_v1  ;;  %7640 = vst.msk [vmem:[%s11933_s6 + $0x5e0] sm:$0xf] %vm7263_vm0, %v9287_v58  ;;  %7641 = vst.msk [vmem:[%s11933_s6 + $0x5e4] sm:$0xf] %vm7263_vm0, %v9288_v59  ;;  %v10465_v5 = vunpack.c.l.bf16 %v11454_v57  ;;  %v10466_v6 = vunpack.c.h.bf16 %v11454_v57 }
 0x212   : > { %v9293_v7 = vpack.c.bf16 %v3725_v60, %v3725_v60  ;;  %v9294_v4 = vpack.c.bf16 %v3726_v61, %v3726_v61  ;;  %7642 = vst.msk [vmem:[%s11933_s6 + $0x5e8] sm:$0xf] %vm7263_vm0, %v9289_v63  ;;  %7643 = vst.msk [vmem:[%s11933_s6 + $0x5ec] sm:$0xf] %vm7263_vm0, %v9290_v0  ;;  %v10469_v8 = vunpack.c.l.bf16 %v11455_v16  ;;  %v10470_v27 = vunpack.c.h.bf16 %v11455_v16 }
 0x213   : > { %7644 = vst.msk [vmem:[%s11933_s6 + $0x5f0] sm:$0xf] %vm7263_vm0, %v9291_v2  ;;  %7645 = vst.msk [vmem:[%s11933_s6 + $0x5f4] sm:$0xf] %vm7263_vm0, %v9292_v3  ;;  %v10473_v25 = vunpack.c.l.bf16 %v11456_v62  ;;  %v10474_v9 = vunpack.c.h.bf16 %v11456_v62  ;;  %v2152_v10 = vmul.f32 %v13392_v33, %v10465_v5  ;;  %v2153_v11 = vmul.f32 %v13392_v33, %v10466_v6 }
 0x214   : > { %7646 = vst.msk [vmem:[%s11933_s6 + $0x5f8] sm:$0xf] %vm7263_vm0, %v9293_v7  ;;  %7647 = vst.msk [vmem:[%s11933_s6 + $0x5fc] sm:$0xf] %vm7263_vm0, %v9294_v4  ;;  %v10477_v12 = vunpack.c.l.bf16 %v11457_v21  ;;  %v10478_v31 = vunpack.c.h.bf16 %v11457_v21  ;;  %v2154_v13 = vmul.f32 %v13392_v33, %v10469_v8  ;;  %v2155_v14 = vmul.f32 %v13392_v33, %v10470_v27 }
 0x215   : > { %v2156_v15 = vmul.f32 %v13392_v33, %v10473_v25  ;;  %v2157_v17 = vmul.f32 %v13392_v33, %v10474_v9  ;;  %v2943_v37 = vadd.f32 %v13403_v43, %v2152_v10  ;;  %v2944_v18 = vadd.f32 %v13403_v43, %v2153_v11 }
 0x216   : > { %v2158_v19 = vmul.f32 %v13392_v33, %v10477_v12  ;;  %v2159_v20 = vmul.f32 %v13392_v33, %v10478_v31  ;;  %v2945_v22 = vadd.f32 %v13403_v43, %v2154_v13  ;;  %v2946_v23 = vadd.f32 %v13403_v43, %v2155_v14  ;;  %v11462_v14 = vld [vmem:[%s11889_s29 + $0x640] sm:$0xff]  }
 0x217   : > { %v2947_v24 = vadd.f32 %v13403_v43, %v2156_v15  ;;  %v2948_v26 = vadd.f32 %v13403_v43, %v2157_v17  ;;  %v3727_v28 = vmax.f32 %v2943_v37, 0.0  ;;  %v3728_v29 = vmax.f32 %v2944_v18, 0.0 }
 0x218   : > { %v2949_v30 = vadd.f32 %v13403_v43, %v2158_v19  ;;  %v2950_v32 = vadd.f32 %v13403_v43, %v2159_v20  ;;  %v3729_v34 = vmax.f32 %v2945_v22, 0.0  ;;  %v3730_v35 = vmax.f32 %v2946_v23, 0.0  ;;  %v11463_v19 = vld [vmem:[%s11889_s29 + $0x648] sm:$0xff]   ;;  %v11464_v20 = vld [vmem:[%s11889_s29 + $0x650] sm:$0xff]  }
 0x219   : > { %v3731_v36 = vmax.f32 %v2947_v24, 0.0  ;;  %v3732_v38 = vmax.f32 %v2948_v26, 0.0  ;;  %v9295_v40 = vpack.c.bf16 %v3727_v28, %v3727_v28  ;;  %v9296_v41 = vpack.c.bf16 %v3728_v29, %v3728_v29  ;;  %v11465_v26 = vld [vmem:[%s11889_s29 + $0x658] sm:$0xff]  }
 0x21a   : > { %v3733_v42 = vmax.f32 %v2949_v30, 0.0  ;;  %v3734_v44 = vmax.f32 %v2950_v32, 0.0  ;;  %v9297_v47 = vpack.c.bf16 %v3729_v34, %v3729_v34  ;;  %v9298_v48 = vpack.c.bf16 %v3730_v35, %v3730_v35 }
 0x21b   : > { %v9299_v49 = vpack.c.bf16 %v3731_v36, %v3731_v36  ;;  %v9300_v50 = vpack.c.bf16 %v3732_v38, %v3732_v38  ;;  %7648 = vst.msk [vmem:[%s11933_s6 + $0x600] sm:$0xf] %vm7263_vm0, %v9295_v40  ;;  %7649 = vst.msk [vmem:[%s11933_s6 + $0x604] sm:$0xf] %vm7263_vm0, %v9296_v41  ;;  %v10481_v54 = vunpack.c.l.bf16 %v11458_v39  ;;  %v10482_v55 = vunpack.c.h.bf16 %v11458_v39  ;;  %v13762_v39 = vld [vmem:[%s15547_s1] ss:$0 sm:$0xff] }
 0x21c   : > { %v9301_v52 = vpack.c.bf16 %v3733_v42, %v3733_v42  ;;  %v9302_v53 = vpack.c.bf16 %v3734_v44, %v3734_v44  ;;  %7650 = vst.msk [vmem:[%s11933_s6 + $0x608] sm:$0xf] %vm7263_vm0, %v9297_v47  ;;  %7651 = vst.msk [vmem:[%s11933_s6 + $0x60c] sm:$0xf] %vm7263_vm0, %v9298_v48  ;;  %v10485_v56 = vunpack.c.l.bf16 %v11459_v45  ;;  %v10486_v1 = vunpack.c.h.bf16 %v11459_v45 }
 0x21d   : > { %7652 = vst.msk [vmem:[%s11933_s6 + $0x610] sm:$0xf] %vm7263_vm0, %v9299_v49  ;;  %7653 = vst.msk [vmem:[%s11933_s6 + $0x614] sm:$0xf] %vm7263_vm0, %v9300_v50  ;;  %v10489_v57 = vunpack.c.l.bf16 %v11460_v46  ;;  %v10490_v58 = vunpack.c.h.bf16 %v11460_v46  ;;  %v2160_v59 = vmul.f32 %v13392_v33, %v10481_v54  ;;  %v2161_v60 = vmul.f32 %v13392_v33, %v10482_v55  ;;  %v13773_v49 = vld [vmem:[%s15548_s2] ss:$0 sm:$0xff] }
 0x21e   : > { %7654 = vst.msk [vmem:[%s11933_s6 + $0x618] sm:$0xf] %vm7263_vm0, %v9301_v52  ;;  %7655 = vst.msk [vmem:[%s11933_s6 + $0x61c] sm:$0xf] %vm7263_vm0, %v9302_v53  ;;  %v10493_v61 = vunpack.c.l.bf16 %v11461_v51  ;;  %v10494_v16 = vunpack.c.h.bf16 %v11461_v51  ;;  %v2162_v62 = vmul.f32 %v13392_v33, %v10485_v56  ;;  %v2163_v63 = vmul.f32 %v13392_v33, %v10486_v1 }
 0x21f   : > { %v2164_v0 = vmul.f32 %v13392_v33, %v10489_v57  ;;  %v2165_v2 = vmul.f32 %v13392_v33, %v10490_v58  ;;  %v2951_v3 = vadd.f32 %v13403_v43, %v2160_v59  ;;  %v2952_v21 = vadd.f32 %v13403_v43, %v2161_v60 }
 0x220   : > { %v2166_v7 = vmul.f32 %v13392_v33, %v10493_v61  ;;  %v2167_v4 = vmul.f32 %v13392_v33, %v10494_v16  ;;  %v2953_v5 = vadd.f32 %v13403_v43, %v2162_v62  ;;  %v2954_v6 = vadd.f32 %v13403_v43, %v2163_v63 }
 0x221   : > { %v2955_v8 = vadd.f32 %v13403_v43, %v2164_v0  ;;  %v2956_v27 = vadd.f32 %v13403_v43, %v2165_v2  ;;  %v3735_v25 = vmax.f32 %v2951_v3, 0.0  ;;  %v3736_v9 = vmax.f32 %v2952_v21, 0.0  ;;  %v11466_v0 = vld [vmem:[%s11889_s29 + $0x660] sm:$0xff]  }
 0x222   : > { %v2957_v10 = vadd.f32 %v13403_v43, %v2166_v7  ;;  %v2958_v11 = vadd.f32 %v13403_v43, %v2167_v4  ;;  %v3737_v12 = vmax.f32 %v2953_v5, 0.0  ;;  %v3738_v33 = vmax.f32 %v2954_v6, 0.0  ;;  %v11467_v4 = vld [vmem:[%s11889_s29 + $0x668] sm:$0xff]   ;;  %v11468_v5 = vld [vmem:[%s11889_s29 + $0x670] sm:$0xff]  }
 0x223   : > { %v3739_v31 = vmax.f32 %v2955_v8, 0.0  ;;  %v3740_v13 = vmax.f32 %v2956_v27, 0.0  ;;  %v9303_v15 = vpack.c.bf16 %v3735_v25, %v3735_v25  ;;  %v9304_v17 = vpack.c.bf16 %v3736_v9, %v3736_v9  ;;  %v11469_v9 = vld [vmem:[%s11889_s29 + $0x678] sm:$0xff]  }
 0x224   : > { %v3741_v37 = vmax.f32 %v2957_v10, 0.0  ;;  %v3742_v18 = vmax.f32 %v2958_v11, 0.0  ;;  %v9305_v22 = vpack.c.bf16 %v3737_v12, %v3737_v12  ;;  %v9306_v43 = vpack.c.bf16 %v3738_v33, %v3738_v33 }
 0x225   : > { %v9307_v23 = vpack.c.bf16 %v3739_v31, %v3739_v31  ;;  %v9308_v24 = vpack.c.bf16 %v3740_v13, %v3740_v13  ;;  %7656 = vst.msk [vmem:[%s11933_s6 + $0x620] sm:$0xf] %vm7263_vm0, %v9303_v15  ;;  %7657 = vst.msk [vmem:[%s11933_s6 + $0x624] sm:$0xf] %vm7263_vm0, %v9304_v17  ;;  %v10497_v30 = vunpack.c.l.bf16 %v11462_v14  ;;  %v10498_v32 = vunpack.c.h.bf16 %v11462_v14 }
 0x226   : > { %v9309_v28 = vpack.c.bf16 %v3741_v37, %v3741_v37  ;;  %v9310_v29 = vpack.c.bf16 %v3742_v18, %v3742_v18  ;;  %7658 = vst.msk [vmem:[%s11933_s6 + $0x628] sm:$0xf] %vm7263_vm0, %v9305_v22  ;;  %7659 = vst.msk [vmem:[%s11933_s6 + $0x62c] sm:$0xf] %vm7263_vm0, %v9306_v43  ;;  %v10501_v34 = vunpack.c.l.bf16 %v11463_v19  ;;  %v10502_v35 = vunpack.c.h.bf16 %v11463_v19 }
 0x227   : > { %7660 = vst.msk [vmem:[%s11933_s6 + $0x630] sm:$0xf] %vm7263_vm0, %v9307_v23  ;;  %7661 = vst.msk [vmem:[%s11933_s6 + $0x634] sm:$0xf] %vm7263_vm0, %v9308_v24  ;;  %v10505_v36 = vunpack.c.l.bf16 %v11464_v20  ;;  %v10506_v38 = vunpack.c.h.bf16 %v11464_v20  ;;  %v2168_v40 = vmul.f32 %v13762_v39, %v10497_v30  ;;  %v2169_v41 = vmul.f32 %v13762_v39, %v10498_v32 }
 0x228   : > { %7662 = vst.msk [vmem:[%s11933_s6 + $0x638] sm:$0xf] %vm7263_vm0, %v9309_v28  ;;  %7663 = vst.msk [vmem:[%s11933_s6 + $0x63c] sm:$0xf] %vm7263_vm0, %v9310_v29  ;;  %v10509_v42 = vunpack.c.l.bf16 %v11465_v26  ;;  %v10510_v44 = vunpack.c.h.bf16 %v11465_v26  ;;  %v2170_v45 = vmul.f32 %v13762_v39, %v10501_v34  ;;  %v2171_v46 = vmul.f32 %v13762_v39, %v10502_v35 }
 0x229   : > { %v2172_v47 = vmul.f32 %v13762_v39, %v10505_v36  ;;  %v2173_v48 = vmul.f32 %v13762_v39, %v10506_v38  ;;  %v2959_v50 = vadd.f32 %v13773_v49, %v2168_v40  ;;  %v2960_v51 = vadd.f32 %v13773_v49, %v2169_v41 }
 0x22a   : > { %v2174_v52 = vmul.f32 %v13762_v39, %v10509_v42  ;;  %v2175_v53 = vmul.f32 %v13762_v39, %v10510_v44  ;;  %v2961_v54 = vadd.f32 %v13773_v49, %v2170_v45  ;;  %v2962_v55 = vadd.f32 %v13773_v49, %v2171_v46 }
 0x22b   : > { %v2963_v56 = vadd.f32 %v13773_v49, %v2172_v47  ;;  %v2964_v1 = vadd.f32 %v13773_v49, %v2173_v48  ;;  %v3743_v57 = vmax.f32 %v2959_v50, 0.0  ;;  %v3744_v58 = vmax.f32 %v2960_v51, 0.0  ;;  %v11470_v47 = vld [vmem:[%s11889_s29 + $0x680] sm:$0xff]  }
 0x22c   : > { %v2965_v59 = vadd.f32 %v13773_v49, %v2174_v52  ;;  %v2966_v60 = vadd.f32 %v13773_v49, %v2175_v53  ;;  %v3745_v61 = vmax.f32 %v2961_v54, 0.0  ;;  %v3746_v16 = vmax.f32 %v2962_v55, 0.0  ;;  %v11471_v53 = vld [vmem:[%s11889_s29 + $0x688] sm:$0xff]   ;;  %v11472_v54 = vld [vmem:[%s11889_s29 + $0x690] sm:$0xff]  }
 0x22d   : > { %v3747_v62 = vmax.f32 %v2963_v56, 0.0  ;;  %v3748_v63 = vmax.f32 %v2964_v1, 0.0  ;;  %v9311_v2 = vpack.c.bf16 %v3743_v57, %v3743_v57  ;;  %v9312_v3 = vpack.c.bf16 %v3744_v58, %v3744_v58  ;;  %v11473_v58 = vld [vmem:[%s11889_s29 + $0x698] sm:$0xff]  }
 0x22e   : > { %v3749_v21 = vmax.f32 %v2965_v59, 0.0  ;;  %v3750_v7 = vmax.f32 %v2966_v60, 0.0  ;;  %v9313_v6 = vpack.c.bf16 %v3745_v61, %v3745_v61  ;;  %v9314_v8 = vpack.c.bf16 %v3746_v16, %v3746_v16 }
 0x22f   : > { %v9315_v27 = vpack.c.bf16 %v3747_v62, %v3747_v62  ;;  %v9316_v25 = vpack.c.bf16 %v3748_v63, %v3748_v63  ;;  %7664 = vst.msk [vmem:[%s11933_s6 + $0x640] sm:$0xf] %vm7263_vm0, %v9311_v2  ;;  %7665 = vst.msk [vmem:[%s11933_s6 + $0x644] sm:$0xf] %vm7263_vm0, %v9312_v3  ;;  %v10513_v12 = vunpack.c.l.bf16 %v11466_v0  ;;  %v10514_v33 = vunpack.c.h.bf16 %v11466_v0 }
 0x230   : > { %v9317_v10 = vpack.c.bf16 %v3749_v21, %v3749_v21  ;;  %v9318_v11 = vpack.c.bf16 %v3750_v7, %v3750_v7  ;;  %7666 = vst.msk [vmem:[%s11933_s6 + $0x648] sm:$0xf] %vm7263_vm0, %v9313_v6  ;;  %7667 = vst.msk [vmem:[%s11933_s6 + $0x64c] sm:$0xf] %vm7263_vm0, %v9314_v8  ;;  %v10517_v31 = vunpack.c.l.bf16 %v11467_v4  ;;  %v10518_v13 = vunpack.c.h.bf16 %v11467_v4 }
 0x231   : > { %7668 = vst.msk [vmem:[%s11933_s6 + $0x650] sm:$0xf] %vm7263_vm0, %v9315_v27  ;;  %7669 = vst.msk [vmem:[%s11933_s6 + $0x654] sm:$0xf] %vm7263_vm0, %v9316_v25  ;;  %v10521_v14 = vunpack.c.l.bf16 %v11468_v5  ;;  %v10522_v15 = vunpack.c.h.bf16 %v11468_v5  ;;  %v2176_v17 = vmul.f32 %v13762_v39, %v10513_v12  ;;  %v2177_v37 = vmul.f32 %v13762_v39, %v10514_v33 }
 0x232   : > { %7670 = vst.msk [vmem:[%s11933_s6 + $0x658] sm:$0xf] %vm7263_vm0, %v9317_v10  ;;  %7671 = vst.msk [vmem:[%s11933_s6 + $0x65c] sm:$0xf] %vm7263_vm0, %v9318_v11  ;;  %v10525_v18 = vunpack.c.l.bf16 %v11469_v9  ;;  %v10526_v19 = vunpack.c.h.bf16 %v11469_v9  ;;  %v2178_v20 = vmul.f32 %v13762_v39, %v10517_v31  ;;  %v2179_v22 = vmul.f32 %v13762_v39, %v10518_v13 }
 0x233   : > { %v2180_v43 = vmul.f32 %v13762_v39, %v10521_v14  ;;  %v2181_v23 = vmul.f32 %v13762_v39, %v10522_v15  ;;  %v2967_v24 = vadd.f32 %v13773_v49, %v2176_v17  ;;  %v2968_v26 = vadd.f32 %v13773_v49, %v2177_v37 }
 0x234   : > { %v2182_v28 = vmul.f32 %v13762_v39, %v10525_v18  ;;  %v2183_v29 = vmul.f32 %v13762_v39, %v10526_v19  ;;  %v2969_v30 = vadd.f32 %v13773_v49, %v2178_v20  ;;  %v2970_v32 = vadd.f32 %v13773_v49, %v2179_v22 }
 0x235   : > { %v2971_v34 = vadd.f32 %v13773_v49, %v2180_v43  ;;  %v2972_v35 = vadd.f32 %v13773_v49, %v2181_v23  ;;  %v3751_v36 = vmax.f32 %v2967_v24, 0.0  ;;  %v3752_v38 = vmax.f32 %v2968_v26, 0.0  ;;  %v11474_v43 = vld [vmem:[%s11889_s29 + $0x6a0] sm:$0xff]  }
 0x236   : > { %v2973_v40 = vadd.f32 %v13773_v49, %v2182_v28  ;;  %v2974_v41 = vadd.f32 %v13773_v49, %v2183_v29  ;;  %v3753_v42 = vmax.f32 %v2969_v30, 0.0  ;;  %v3754_v44 = vmax.f32 %v2970_v32, 0.0  ;;  %v11475_v29 = vld [vmem:[%s11889_s29 + $0x6a8] sm:$0xff]   ;;  %v11476_v30 = vld [vmem:[%s11889_s29 + $0x6b0] sm:$0xff]  }
 0x237   : > { %v3755_v45 = vmax.f32 %v2971_v34, 0.0  ;;  %v3756_v46 = vmax.f32 %v2972_v35, 0.0  ;;  %v9319_v48 = vpack.c.bf16 %v3751_v36, %v3751_v36  ;;  %v9320_v50 = vpack.c.bf16 %v3752_v38, %v3752_v38  ;;  %v11477_v38 = vld [vmem:[%s11889_s29 + $0x6b8] sm:$0xff]  }
 0x238   : > { %v3757_v51 = vmax.f32 %v2973_v40, 0.0  ;;  %v3758_v52 = vmax.f32 %v2974_v41, 0.0  ;;  %v9321_v55 = vpack.c.bf16 %v3753_v42, %v3753_v42  ;;  %v9322_v56 = vpack.c.bf16 %v3754_v44, %v3754_v44 }
 0x239   : > { %v9323_v1 = vpack.c.bf16 %v3755_v45, %v3755_v45  ;;  %v9324_v57 = vpack.c.bf16 %v3756_v46, %v3756_v46  ;;  %7672 = vst.msk [vmem:[%s11933_s6 + $0x660] sm:$0xf] %vm7263_vm0, %v9319_v48  ;;  %7673 = vst.msk [vmem:[%s11933_s6 + $0x664] sm:$0xf] %vm7263_vm0, %v9320_v50  ;;  %v10529_v61 = vunpack.c.l.bf16 %v11470_v47  ;;  %v10530_v16 = vunpack.c.h.bf16 %v11470_v47 }
 0x23a   : > { %v9325_v59 = vpack.c.bf16 %v3757_v51, %v3757_v51  ;;  %v9326_v60 = vpack.c.bf16 %v3758_v52, %v3758_v52  ;;  %7674 = vst.msk [vmem:[%s11933_s6 + $0x668] sm:$0xf] %vm7263_vm0, %v9321_v55  ;;  %7675 = vst.msk [vmem:[%s11933_s6 + $0x66c] sm:$0xf] %vm7263_vm0, %v9322_v56  ;;  %v10533_v62 = vunpack.c.l.bf16 %v11471_v53  ;;  %v10534_v63 = vunpack.c.h.bf16 %v11471_v53 }
 0x23b   : > { %7676 = vst.msk [vmem:[%s11933_s6 + $0x670] sm:$0xf] %vm7263_vm0, %v9323_v1  ;;  %7677 = vst.msk [vmem:[%s11933_s6 + $0x674] sm:$0xf] %vm7263_vm0, %v9324_v57  ;;  %v10537_v0 = vunpack.c.l.bf16 %v11472_v54  ;;  %v10538_v2 = vunpack.c.h.bf16 %v11472_v54  ;;  %v2184_v3 = vmul.f32 %v13762_v39, %v10529_v61  ;;  %v2185_v21 = vmul.f32 %v13762_v39, %v10530_v16 }
 0x23c   : > { %7678 = vst.msk [vmem:[%s11933_s6 + $0x678] sm:$0xf] %vm7263_vm0, %v9325_v59  ;;  %7679 = vst.msk [vmem:[%s11933_s6 + $0x67c] sm:$0xf] %vm7263_vm0, %v9326_v60  ;;  %v10541_v7 = vunpack.c.l.bf16 %v11473_v58  ;;  %v10542_v4 = vunpack.c.h.bf16 %v11473_v58  ;;  %v2186_v5 = vmul.f32 %v13762_v39, %v10533_v62  ;;  %v2187_v6 = vmul.f32 %v13762_v39, %v10534_v63 }
 0x23d   : > { %v2188_v8 = vmul.f32 %v13762_v39, %v10537_v0  ;;  %v2189_v27 = vmul.f32 %v13762_v39, %v10538_v2  ;;  %v2975_v25 = vadd.f32 %v13773_v49, %v2184_v3  ;;  %v2976_v9 = vadd.f32 %v13773_v49, %v2185_v21 }
 0x23e   : > { %v2190_v10 = vmul.f32 %v13762_v39, %v10541_v7  ;;  %v2191_v11 = vmul.f32 %v13762_v39, %v10542_v4  ;;  %v2977_v12 = vadd.f32 %v13773_v49, %v2186_v5  ;;  %v2978_v33 = vadd.f32 %v13773_v49, %v2187_v6 }
 0x23f   : > { %v2979_v31 = vadd.f32 %v13773_v49, %v2188_v8  ;;  %v2980_v13 = vadd.f32 %v13773_v49, %v2189_v27  ;;  %v3759_v14 = vmax.f32 %v2975_v25, 0.0  ;;  %v3760_v15 = vmax.f32 %v2976_v9, 0.0  ;;  %v11478_v8 = vld [vmem:[%s11889_s29 + $0x6c0] sm:$0xff]  }
 0x240   : > { %v2981_v17 = vadd.f32 %v13773_v49, %v2190_v10  ;;  %v2982_v37 = vadd.f32 %v13773_v49, %v2191_v11  ;;  %v3761_v18 = vmax.f32 %v2977_v12, 0.0  ;;  %v3762_v19 = vmax.f32 %v2978_v33, 0.0  ;;  %v11479_v11 = vld [vmem:[%s11889_s29 + $0x6c8] sm:$0xff]   ;;  %v11480_v12 = vld [vmem:[%s11889_s29 + $0x6d0] sm:$0xff]  }
 0x241   : > { %v3763_v20 = vmax.f32 %v2979_v31, 0.0  ;;  %v3764_v22 = vmax.f32 %v2980_v13, 0.0  ;;  %v9327_v23 = vpack.c.bf16 %v3759_v14, %v3759_v14  ;;  %v9328_v24 = vpack.c.bf16 %v3760_v15, %v3760_v15  ;;  %v11481_v15 = vld [vmem:[%s11889_s29 + $0x6d8] sm:$0xff]  }
 0x242   : > { %v3765_v26 = vmax.f32 %v2981_v17, 0.0  ;;  %v3766_v28 = vmax.f32 %v2982_v37, 0.0  ;;  %v9329_v32 = vpack.c.bf16 %v3761_v18, %v3761_v18  ;;  %v9330_v34 = vpack.c.bf16 %v3762_v19, %v3762_v19 }
 0x243   : > { %v9331_v35 = vpack.c.bf16 %v3763_v20, %v3763_v20  ;;  %v9332_v36 = vpack.c.bf16 %v3764_v22, %v3764_v22  ;;  %7680 = vst.msk [vmem:[%s11933_s6 + $0x680] sm:$0xf] %vm7263_vm0, %v9327_v23  ;;  %7681 = vst.msk [vmem:[%s11933_s6 + $0x684] sm:$0xf] %vm7263_vm0, %v9328_v24  ;;  %v10545_v42 = vunpack.c.l.bf16 %v11474_v43  ;;  %v10546_v44 = vunpack.c.h.bf16 %v11474_v43 }
 0x244   : > { %v9333_v40 = vpack.c.bf16 %v3765_v26, %v3765_v26  ;;  %v9334_v41 = vpack.c.bf16 %v3766_v28, %v3766_v28  ;;  %7682 = vst.msk [vmem:[%s11933_s6 + $0x688] sm:$0xf] %vm7263_vm0, %v9329_v32  ;;  %7683 = vst.msk [vmem:[%s11933_s6 + $0x68c] sm:$0xf] %vm7263_vm0, %v9330_v34  ;;  %v10549_v45 = vunpack.c.l.bf16 %v11475_v29  ;;  %v10550_v46 = vunpack.c.h.bf16 %v11475_v29 }
 0x245   : > { %7684 = vst.msk [vmem:[%s11933_s6 + $0x690] sm:$0xf] %vm7263_vm0, %v9331_v35  ;;  %7685 = vst.msk [vmem:[%s11933_s6 + $0x694] sm:$0xf] %vm7263_vm0, %v9332_v36  ;;  %v10553_v47 = vunpack.c.l.bf16 %v11476_v30  ;;  %v10554_v48 = vunpack.c.h.bf16 %v11476_v30  ;;  %v2192_v50 = vmul.f32 %v13762_v39, %v10545_v42  ;;  %v2193_v51 = vmul.f32 %v13762_v39, %v10546_v44 }
 0x246   : > { %7686 = vst.msk [vmem:[%s11933_s6 + $0x698] sm:$0xf] %vm7263_vm0, %v9333_v40  ;;  %7687 = vst.msk [vmem:[%s11933_s6 + $0x69c] sm:$0xf] %vm7263_vm0, %v9334_v41  ;;  %v10557_v52 = vunpack.c.l.bf16 %v11477_v38  ;;  %v10558_v53 = vunpack.c.h.bf16 %v11477_v38  ;;  %v2194_v54 = vmul.f32 %v13762_v39, %v10549_v45  ;;  %v2195_v55 = vmul.f32 %v13762_v39, %v10550_v46 }
 0x247   : > { %v2196_v56 = vmul.f32 %v13762_v39, %v10553_v47  ;;  %v2197_v1 = vmul.f32 %v13762_v39, %v10554_v48  ;;  %v2983_v57 = vadd.f32 %v13773_v49, %v2192_v50  ;;  %v2984_v58 = vadd.f32 %v13773_v49, %v2193_v51 }
 0x248   : > { %v2198_v59 = vmul.f32 %v13762_v39, %v10557_v52  ;;  %v2199_v60 = vmul.f32 %v13762_v39, %v10558_v53  ;;  %v2985_v61 = vadd.f32 %v13773_v49, %v2194_v54  ;;  %v2986_v16 = vadd.f32 %v13773_v49, %v2195_v55 }
 0x249   : > { %v2987_v62 = vadd.f32 %v13773_v49, %v2196_v56  ;;  %v2988_v63 = vadd.f32 %v13773_v49, %v2197_v1  ;;  %v3767_v0 = vmax.f32 %v2983_v57, 0.0  ;;  %v3768_v2 = vmax.f32 %v2984_v58, 0.0  ;;  %v11482_v56 = vld [vmem:[%s11889_s29 + $0x6e0] sm:$0xff]  }
 0x24a   : > { %v2989_v3 = vadd.f32 %v13773_v49, %v2198_v59  ;;  %v2990_v21 = vadd.f32 %v13773_v49, %v2199_v60  ;;  %v3769_v7 = vmax.f32 %v2985_v61, 0.0  ;;  %v3770_v4 = vmax.f32 %v2986_v16, 0.0  ;;  %v11483_v60 = vld [vmem:[%s11889_s29 + $0x6e8] sm:$0xff]   ;;  %v11484_v61 = vld [vmem:[%s11889_s29 + $0x6f0] sm:$0xff]  }
 0x24b   : > { %v3771_v5 = vmax.f32 %v2987_v62, 0.0  ;;  %v3772_v6 = vmax.f32 %v2988_v63, 0.0  ;;  %v9335_v27 = vpack.c.bf16 %v3767_v0, %v3767_v0  ;;  %v9336_v25 = vpack.c.bf16 %v3768_v2, %v3768_v2  ;;  %v11485_v2 = vld [vmem:[%s11889_s29 + $0x6f8] sm:$0xff]  }
 0x24c   : > { %v3773_v9 = vmax.f32 %v2989_v3, 0.0  ;;  %v3774_v10 = vmax.f32 %v2990_v21, 0.0  ;;  %v9337_v33 = vpack.c.bf16 %v3769_v7, %v3769_v7  ;;  %v9338_v31 = vpack.c.bf16 %v3770_v4, %v3770_v4 }
 0x24d   : > { %v9339_v13 = vpack.c.bf16 %v3771_v5, %v3771_v5  ;;  %v9340_v14 = vpack.c.bf16 %v3772_v6, %v3772_v6  ;;  %7688 = vst.msk [vmem:[%s11933_s6 + $0x6a0] sm:$0xf] %vm7263_vm0, %v9335_v27  ;;  %7689 = vst.msk [vmem:[%s11933_s6 + $0x6a4] sm:$0xf] %vm7263_vm0, %v9336_v25  ;;  %v10561_v18 = vunpack.c.l.bf16 %v11478_v8  ;;  %v10562_v19 = vunpack.c.h.bf16 %v11478_v8 }
 0x24e   : > { %v9341_v17 = vpack.c.bf16 %v3773_v9, %v3773_v9  ;;  %v9342_v37 = vpack.c.bf16 %v3774_v10, %v3774_v10  ;;  %7690 = vst.msk [vmem:[%s11933_s6 + $0x6a8] sm:$0xf] %vm7263_vm0, %v9337_v33  ;;  %7691 = vst.msk [vmem:[%s11933_s6 + $0x6ac] sm:$0xf] %vm7263_vm0, %v9338_v31  ;;  %v10565_v20 = vunpack.c.l.bf16 %v11479_v11  ;;  %v10566_v22 = vunpack.c.h.bf16 %v11479_v11 }
 0x24f   : > { %7692 = vst.msk [vmem:[%s11933_s6 + $0x6b0] sm:$0xf] %vm7263_vm0, %v9339_v13  ;;  %7693 = vst.msk [vmem:[%s11933_s6 + $0x6b4] sm:$0xf] %vm7263_vm0, %v9340_v14  ;;  %v10569_v43 = vunpack.c.l.bf16 %v11480_v12  ;;  %v10570_v23 = vunpack.c.h.bf16 %v11480_v12  ;;  %v2200_v24 = vmul.f32 %v13762_v39, %v10561_v18  ;;  %v2201_v26 = vmul.f32 %v13762_v39, %v10562_v19 }
 0x250   : > { %7694 = vst.msk [vmem:[%s11933_s6 + $0x6b8] sm:$0xf] %vm7263_vm0, %v9341_v17  ;;  %7695 = vst.msk [vmem:[%s11933_s6 + $0x6bc] sm:$0xf] %vm7263_vm0, %v9342_v37  ;;  %v10573_v28 = vunpack.c.l.bf16 %v11481_v15  ;;  %v10574_v29 = vunpack.c.h.bf16 %v11481_v15  ;;  %v2202_v30 = vmul.f32 %v13762_v39, %v10565_v20  ;;  %v2203_v32 = vmul.f32 %v13762_v39, %v10566_v22 }
 0x251   : > { %v2204_v34 = vmul.f32 %v13762_v39, %v10569_v43  ;;  %v2205_v35 = vmul.f32 %v13762_v39, %v10570_v23  ;;  %v2991_v36 = vadd.f32 %v13773_v49, %v2200_v24  ;;  %v2992_v38 = vadd.f32 %v13773_v49, %v2201_v26 }
 0x252   : > { %v2206_v40 = vmul.f32 %v13762_v39, %v10573_v28  ;;  %v2207_v41 = vmul.f32 %v13762_v39, %v10574_v29  ;;  %v2993_v42 = vadd.f32 %v13773_v49, %v2202_v30  ;;  %v2994_v44 = vadd.f32 %v13773_v49, %v2203_v32 }
 0x253   : > { %v2995_v45 = vadd.f32 %v13773_v49, %v2204_v34  ;;  %v2996_v46 = vadd.f32 %v13773_v49, %v2205_v35  ;;  %v3775_v47 = vmax.f32 %v2991_v36, 0.0  ;;  %v3776_v48 = vmax.f32 %v2992_v38, 0.0  ;;  %v11486_v34 = vld [vmem:[%s11889_s29 + $0x700] sm:$0xff]  }
 0x254   : > { %v2997_v50 = vadd.f32 %v13773_v49, %v2206_v40  ;;  %v2998_v51 = vadd.f32 %v13773_v49, %v2207_v41  ;;  %v3777_v52 = vmax.f32 %v2993_v42, 0.0  ;;  %v3778_v53 = vmax.f32 %v2994_v44, 0.0  ;;  %v11487_v41 = vld [vmem:[%s11889_s29 + $0x708] sm:$0xff]   ;;  %v11488_v42 = vld [vmem:[%s11889_s29 + $0x710] sm:$0xff]  }
 0x255   : > { %v3779_v54 = vmax.f32 %v2995_v45, 0.0  ;;  %v3780_v55 = vmax.f32 %v2996_v46, 0.0  ;;  %v9343_v1 = vpack.c.bf16 %v3775_v47, %v3775_v47  ;;  %v9344_v57 = vpack.c.bf16 %v3776_v48, %v3776_v48  ;;  %v11489_v48 = vld [vmem:[%s11889_s29 + $0x718] sm:$0xff]  }
 0x256   : > { %v3781_v58 = vmax.f32 %v2997_v50, 0.0  ;;  %v3782_v59 = vmax.f32 %v2998_v51, 0.0  ;;  %v9345_v16 = vpack.c.bf16 %v3777_v52, %v3777_v52  ;;  %v9346_v62 = vpack.c.bf16 %v3778_v53, %v3778_v53 }
 0x257   : > { %v9347_v63 = vpack.c.bf16 %v3779_v54, %v3779_v54  ;;  %v9348_v0 = vpack.c.bf16 %v3780_v55, %v3780_v55  ;;  %7696 = vst.msk [vmem:[%s11933_s6 + $0x6c0] sm:$0xf] %vm7263_vm0, %v9343_v1  ;;  %7697 = vst.msk [vmem:[%s11933_s6 + $0x6c4] sm:$0xf] %vm7263_vm0, %v9344_v57  ;;  %v10577_v7 = vunpack.c.l.bf16 %v11482_v56  ;;  %v10578_v4 = vunpack.c.h.bf16 %v11482_v56 }
 0x258   : > { %v9349_v3 = vpack.c.bf16 %v3781_v58, %v3781_v58  ;;  %v9350_v21 = vpack.c.bf16 %v3782_v59, %v3782_v59  ;;  %7698 = vst.msk [vmem:[%s11933_s6 + $0x6c8] sm:$0xf] %vm7263_vm0, %v9345_v16  ;;  %7699 = vst.msk [vmem:[%s11933_s6 + $0x6cc] sm:$0xf] %vm7263_vm0, %v9346_v62  ;;  %v10581_v5 = vunpack.c.l.bf16 %v11483_v60  ;;  %v10582_v6 = vunpack.c.h.bf16 %v11483_v60 }
 0x259   : > { %7700 = vst.msk [vmem:[%s11933_s6 + $0x6d0] sm:$0xf] %vm7263_vm0, %v9347_v63  ;;  %7701 = vst.msk [vmem:[%s11933_s6 + $0x6d4] sm:$0xf] %vm7263_vm0, %v9348_v0  ;;  %v10585_v8 = vunpack.c.l.bf16 %v11484_v61  ;;  %v10586_v27 = vunpack.c.h.bf16 %v11484_v61  ;;  %v2208_v25 = vmul.f32 %v13762_v39, %v10577_v7  ;;  %v2209_v9 = vmul.f32 %v13762_v39, %v10578_v4 }
 0x25a   : > { %7702 = vst.msk [vmem:[%s11933_s6 + $0x6d8] sm:$0xf] %vm7263_vm0, %v9349_v3  ;;  %7703 = vst.msk [vmem:[%s11933_s6 + $0x6dc] sm:$0xf] %vm7263_vm0, %v9350_v21  ;;  %v10589_v10 = vunpack.c.l.bf16 %v11485_v2  ;;  %v10590_v11 = vunpack.c.h.bf16 %v11485_v2  ;;  %v2210_v12 = vmul.f32 %v13762_v39, %v10581_v5  ;;  %v2211_v33 = vmul.f32 %v13762_v39, %v10582_v6 }
 0x25b   : > { %v2212_v31 = vmul.f32 %v13762_v39, %v10585_v8  ;;  %v2213_v13 = vmul.f32 %v13762_v39, %v10586_v27  ;;  %v2999_v14 = vadd.f32 %v13773_v49, %v2208_v25  ;;  %v3000_v15 = vadd.f32 %v13773_v49, %v2209_v9 }
 0x25c   : > { %v2214_v17 = vmul.f32 %v13762_v39, %v10589_v10  ;;  %v2215_v37 = vmul.f32 %v13762_v39, %v10590_v11  ;;  %v3001_v18 = vadd.f32 %v13773_v49, %v2210_v12  ;;  %v3002_v19 = vadd.f32 %v13773_v49, %v2211_v33 }
 0x25d   : > { %v3003_v20 = vadd.f32 %v13773_v49, %v2212_v31  ;;  %v3004_v22 = vadd.f32 %v13773_v49, %v2213_v13  ;;  %v3783_v43 = vmax.f32 %v2999_v14, 0.0  ;;  %v3784_v23 = vmax.f32 %v3000_v15, 0.0  ;;  %v11490_v31 = vld [vmem:[%s11889_s29 + $0x720] sm:$0xff]  }
 0x25e   : > { %v3005_v24 = vadd.f32 %v13773_v49, %v2214_v17  ;;  %v3006_v26 = vadd.f32 %v13773_v49, %v2215_v37  ;;  %v3785_v28 = vmax.f32 %v3001_v18, 0.0  ;;  %v3786_v29 = vmax.f32 %v3002_v19, 0.0  ;;  %v11491_v37 = vld [vmem:[%s11889_s29 + $0x728] sm:$0xff]   ;;  %v11492_v18 = vld [vmem:[%s11889_s29 + $0x730] sm:$0xff]  }
 0x25f   : > { %v3787_v30 = vmax.f32 %v3003_v20, 0.0  ;;  %v3788_v32 = vmax.f32 %v3004_v22, 0.0  ;;  %v9351_v35 = vpack.c.bf16 %v3783_v43, %v3783_v43  ;;  %v9352_v36 = vpack.c.bf16 %v3784_v23, %v3784_v23  ;;  %v11493_v23 = vld [vmem:[%s11889_s29 + $0x738] sm:$0xff]  }
 0x260   : > { %v3789_v38 = vmax.f32 %v3005_v24, 0.0  ;;  %v3790_v40 = vmax.f32 %v3006_v26, 0.0  ;;  %v9353_v44 = vpack.c.bf16 %v3785_v28, %v3785_v28  ;;  %v9354_v45 = vpack.c.bf16 %v3786_v29, %v3786_v29 }
 0x261   : > { %v9355_v46 = vpack.c.bf16 %v3787_v30, %v3787_v30  ;;  %v9356_v47 = vpack.c.bf16 %v3788_v32, %v3788_v32  ;;  %7704 = vst.msk [vmem:[%s11933_s6 + $0x6e0] sm:$0xf] %vm7263_vm0, %v9351_v35  ;;  %7705 = vst.msk [vmem:[%s11933_s6 + $0x6e4] sm:$0xf] %vm7263_vm0, %v9352_v36  ;;  %v10593_v52 = vunpack.c.l.bf16 %v11486_v34  ;;  %v10594_v53 = vunpack.c.h.bf16 %v11486_v34 }
 0x262   : > { %v9357_v50 = vpack.c.bf16 %v3789_v38, %v3789_v38  ;;  %v9358_v51 = vpack.c.bf16 %v3790_v40, %v3790_v40  ;;  %7706 = vst.msk [vmem:[%s11933_s6 + $0x6e8] sm:$0xf] %vm7263_vm0, %v9353_v44  ;;  %7707 = vst.msk [vmem:[%s11933_s6 + $0x6ec] sm:$0xf] %vm7263_vm0, %v9354_v45  ;;  %v10597_v54 = vunpack.c.l.bf16 %v11487_v41  ;;  %v10598_v55 = vunpack.c.h.bf16 %v11487_v41 }
 0x263   : > { %7708 = vst.msk [vmem:[%s11933_s6 + $0x6f0] sm:$0xf] %vm7263_vm0, %v9355_v46  ;;  %7709 = vst.msk [vmem:[%s11933_s6 + $0x6f4] sm:$0xf] %vm7263_vm0, %v9356_v47  ;;  %v10601_v56 = vunpack.c.l.bf16 %v11488_v42  ;;  %v10602_v1 = vunpack.c.h.bf16 %v11488_v42  ;;  %v2216_v57 = vmul.f32 %v13762_v39, %v10593_v52  ;;  %v2217_v58 = vmul.f32 %v13762_v39, %v10594_v53 }
 0x264   : > { %7710 = vst.msk [vmem:[%s11933_s6 + $0x6f8] sm:$0xf] %vm7263_vm0, %v9357_v50  ;;  %7711 = vst.msk [vmem:[%s11933_s6 + $0x6fc] sm:$0xf] %vm7263_vm0, %v9358_v51  ;;  %v10605_v59 = vunpack.c.l.bf16 %v11489_v48  ;;  %v10606_v60 = vunpack.c.h.bf16 %v11489_v48  ;;  %v2218_v61 = vmul.f32 %v13762_v39, %v10597_v54  ;;  %v2219_v16 = vmul.f32 %v13762_v39, %v10598_v55 }
 0x265   : > { %v2220_v62 = vmul.f32 %v13762_v39, %v10601_v56  ;;  %v2221_v63 = vmul.f32 %v13762_v39, %v10602_v1  ;;  %v3007_v0 = vadd.f32 %v13773_v49, %v2216_v57  ;;  %v3008_v2 = vadd.f32 %v13773_v49, %v2217_v58 }
 0x266   : > { %v2222_v3 = vmul.f32 %v13762_v39, %v10605_v59  ;;  %v2223_v21 = vmul.f32 %v13762_v39, %v10606_v60  ;;  %v3009_v7 = vadd.f32 %v13773_v49, %v2218_v61  ;;  %v3010_v4 = vadd.f32 %v13773_v49, %v2219_v16 }
 0x267   : > { %v3011_v5 = vadd.f32 %v13773_v49, %v2220_v62  ;;  %v3012_v6 = vadd.f32 %v13773_v49, %v2221_v63  ;;  %v3791_v8 = vmax.f32 %v3007_v0, 0.0  ;;  %v3792_v27 = vmax.f32 %v3008_v2, 0.0  ;;  %v11494_v62 = vld [vmem:[%s11889_s29 + $0x740] sm:$0xff]  }
 0x268   : > { %v3013_v25 = vadd.f32 %v13773_v49, %v2222_v3  ;;  %v3014_v9 = vadd.f32 %v13773_v49, %v2223_v21  ;;  %v3793_v10 = vmax.f32 %v3009_v7, 0.0  ;;  %v3794_v11 = vmax.f32 %v3010_v4, 0.0  ;;  %v11495_v21 = vld [vmem:[%s11889_s29 + $0x748] sm:$0xff]   ;;  %v11496_v7 = vld [vmem:[%s11889_s29 + $0x750] sm:$0xff]  }
 0x269   : > { %v3795_v12 = vmax.f32 %v3011_v5, 0.0  ;;  %v3796_v33 = vmax.f32 %v3012_v6, 0.0  ;;  %v9359_v13 = vpack.c.bf16 %v3791_v8, %v3791_v8  ;;  %v9360_v14 = vpack.c.bf16 %v3792_v27, %v3792_v27  ;;  %v11497_v27 = vld [vmem:[%s11889_s29 + $0x758] sm:$0xff]  }
 0x26a   : > { %v3797_v15 = vmax.f32 %v3013_v25, 0.0  ;;  %v3798_v17 = vmax.f32 %v3014_v9, 0.0  ;;  %v9361_v19 = vpack.c.bf16 %v3793_v10, %v3793_v10  ;;  %v9362_v20 = vpack.c.bf16 %v3794_v11, %v3794_v11 }
 0x26b   : > { %v9363_v22 = vpack.c.bf16 %v3795_v12, %v3795_v12  ;;  %v9364_v43 = vpack.c.bf16 %v3796_v33, %v3796_v33  ;;  %7712 = vst.msk [vmem:[%s11933_s6 + $0x700] sm:$0xf] %vm7263_vm0, %v9359_v13  ;;  %7713 = vst.msk [vmem:[%s11933_s6 + $0x704] sm:$0xf] %vm7263_vm0, %v9360_v14  ;;  %v10609_v28 = vunpack.c.l.bf16 %v11490_v31  ;;  %v10610_v29 = vunpack.c.h.bf16 %v11490_v31 }
 0x26c   : > { %v9365_v24 = vpack.c.bf16 %v3797_v15, %v3797_v15  ;;  %v9366_v26 = vpack.c.bf16 %v3798_v17, %v3798_v17  ;;  %7714 = vst.msk [vmem:[%s11933_s6 + $0x708] sm:$0xf] %vm7263_vm0, %v9361_v19  ;;  %7715 = vst.msk [vmem:[%s11933_s6 + $0x70c] sm:$0xf] %vm7263_vm0, %v9362_v20  ;;  %v10613_v30 = vunpack.c.l.bf16 %v11491_v37  ;;  %v10614_v32 = vunpack.c.h.bf16 %v11491_v37 }
 0x26d   : > { %7716 = vst.msk [vmem:[%s11933_s6 + $0x710] sm:$0xf] %vm7263_vm0, %v9363_v22  ;;  %7717 = vst.msk [vmem:[%s11933_s6 + $0x714] sm:$0xf] %vm7263_vm0, %v9364_v43  ;;  %v10617_v34 = vunpack.c.l.bf16 %v11492_v18  ;;  %v10618_v35 = vunpack.c.h.bf16 %v11492_v18  ;;  %v2224_v36 = vmul.f32 %v13762_v39, %v10609_v28  ;;  %v2225_v38 = vmul.f32 %v13762_v39, %v10610_v29 }
 0x26e   : > { %7718 = vst.msk [vmem:[%s11933_s6 + $0x718] sm:$0xf] %vm7263_vm0, %v9365_v24  ;;  %7719 = vst.msk [vmem:[%s11933_s6 + $0x71c] sm:$0xf] %vm7263_vm0, %v9366_v26  ;;  %v10621_v40 = vunpack.c.l.bf16 %v11493_v23  ;;  %v10622_v41 = vunpack.c.h.bf16 %v11493_v23  ;;  %v2226_v42 = vmul.f32 %v13762_v39, %v10613_v30  ;;  %v2227_v44 = vmul.f32 %v13762_v39, %v10614_v32 }
 0x26f   : > { %v2228_v45 = vmul.f32 %v13762_v39, %v10617_v34  ;;  %v2229_v46 = vmul.f32 %v13762_v39, %v10618_v35  ;;  %v3015_v47 = vadd.f32 %v13773_v49, %v2224_v36  ;;  %v3016_v48 = vadd.f32 %v13773_v49, %v2225_v38 }
 0x270   : > { %v2230_v50 = vmul.f32 %v13762_v39, %v10621_v40  ;;  %v2231_v51 = vmul.f32 %v13762_v39, %v10622_v41  ;;  %v3017_v52 = vadd.f32 %v13773_v49, %v2226_v42  ;;  %v3018_v53 = vadd.f32 %v13773_v49, %v2227_v44 }
 0x271   : > { %v3019_v54 = vadd.f32 %v13773_v49, %v2228_v45  ;;  %v3020_v55 = vadd.f32 %v13773_v49, %v2229_v46  ;;  %v3799_v56 = vmax.f32 %v3015_v47, 0.0  ;;  %v3800_v1 = vmax.f32 %v3016_v48, 0.0  ;;  %v11498_v45 = vld [vmem:[%s11889_s29 + $0x760] sm:$0xff]  }
 0x272   : > { %v3021_v57 = vadd.f32 %v13773_v49, %v2230_v50  ;;  %v3022_v58 = vadd.f32 %v13773_v49, %v2231_v51  ;;  %v3801_v59 = vmax.f32 %v3017_v52, 0.0  ;;  %v3802_v60 = vmax.f32 %v3018_v53, 0.0  ;;  %v11499_v51 = vld [vmem:[%s11889_s29 + $0x768] sm:$0xff]   ;;  %v11500_v52 = vld [vmem:[%s11889_s29 + $0x770] sm:$0xff]  }
 0x273   : > { %v3803_v61 = vmax.f32 %v3019_v54, 0.0  ;;  %v3804_v16 = vmax.f32 %v3020_v55, 0.0  ;;  %v9367_v63 = vpack.c.bf16 %v3799_v56, %v3799_v56  ;;  %v9368_v0 = vpack.c.bf16 %v3800_v1, %v3800_v1  ;;  %v11501_v1 = vld [vmem:[%s11889_s29 + $0x778] sm:$0xff]  }
 0x274   : > { %v3805_v2 = vmax.f32 %v3021_v57, 0.0  ;;  %v3806_v3 = vmax.f32 %v3022_v58, 0.0  ;;  %v9369_v4 = vpack.c.bf16 %v3801_v59, %v3801_v59  ;;  %v9370_v5 = vpack.c.bf16 %v3802_v60, %v3802_v60 }
 0x275   : > { %v9371_v6 = vpack.c.bf16 %v3803_v61, %v3803_v61  ;;  %v9372_v8 = vpack.c.bf16 %v3804_v16, %v3804_v16  ;;  %7720 = vst.msk [vmem:[%s11933_s6 + $0x720] sm:$0xf] %vm7263_vm0, %v9367_v63  ;;  %7721 = vst.msk [vmem:[%s11933_s6 + $0x724] sm:$0xf] %vm7263_vm0, %v9368_v0  ;;  %v10625_v10 = vunpack.c.l.bf16 %v11494_v62  ;;  %v10626_v11 = vunpack.c.h.bf16 %v11494_v62 }
 0x276   : > { %v9373_v25 = vpack.c.bf16 %v3805_v2, %v3805_v2  ;;  %v9374_v9 = vpack.c.bf16 %v3806_v3, %v3806_v3  ;;  %7722 = vst.msk [vmem:[%s11933_s6 + $0x728] sm:$0xf] %vm7263_vm0, %v9369_v4  ;;  %7723 = vst.msk [vmem:[%s11933_s6 + $0x72c] sm:$0xf] %vm7263_vm0, %v9370_v5  ;;  %v10629_v12 = vunpack.c.l.bf16 %v11495_v21  ;;  %v10630_v33 = vunpack.c.h.bf16 %v11495_v21 }
 0x277   : > { %7724 = vst.msk [vmem:[%s11933_s6 + $0x730] sm:$0xf] %vm7263_vm0, %v9371_v6  ;;  %7725 = vst.msk [vmem:[%s11933_s6 + $0x734] sm:$0xf] %vm7263_vm0, %v9372_v8  ;;  %v10633_v31 = vunpack.c.l.bf16 %v11496_v7  ;;  %v10634_v13 = vunpack.c.h.bf16 %v11496_v7  ;;  %v2232_v14 = vmul.f32 %v13762_v39, %v10625_v10  ;;  %v2233_v15 = vmul.f32 %v13762_v39, %v10626_v11 }
 0x278   : > { %7726 = vst.msk [vmem:[%s11933_s6 + $0x738] sm:$0xf] %vm7263_vm0, %v9373_v25  ;;  %7727 = vst.msk [vmem:[%s11933_s6 + $0x73c] sm:$0xf] %vm7263_vm0, %v9374_v9  ;;  %v10637_v17 = vunpack.c.l.bf16 %v11497_v27  ;;  %v10638_v37 = vunpack.c.h.bf16 %v11497_v27  ;;  %v2234_v18 = vmul.f32 %v13762_v39, %v10629_v12  ;;  %v2235_v19 = vmul.f32 %v13762_v39, %v10630_v33 }
 0x279   : > { %v2236_v20 = vmul.f32 %v13762_v39, %v10633_v31  ;;  %v2237_v22 = vmul.f32 %v13762_v39, %v10634_v13  ;;  %v3023_v43 = vadd.f32 %v13773_v49, %v2232_v14  ;;  %v3024_v23 = vadd.f32 %v13773_v49, %v2233_v15 }
 0x27a   : > { %v2238_v24 = vmul.f32 %v13762_v39, %v10637_v17  ;;  %v2239_v26 = vmul.f32 %v13762_v39, %v10638_v37  ;;  %v3025_v28 = vadd.f32 %v13773_v49, %v2234_v18  ;;  %v3026_v29 = vadd.f32 %v13773_v49, %v2235_v19  ;;  %v11502_v19 = vld [vmem:[%s11889_s29 + $0x780] sm:$0xff]  }
 0x27b   : > { %v3027_v30 = vadd.f32 %v13773_v49, %v2236_v20  ;;  %v3028_v32 = vadd.f32 %v13773_v49, %v2237_v22  ;;  %v3807_v34 = vmax.f32 %v3023_v43, 0.0  ;;  %v3808_v35 = vmax.f32 %v3024_v23, 0.0 }
 0x27c   : > { %v3029_v36 = vadd.f32 %v13773_v49, %v2238_v24  ;;  %v3030_v38 = vadd.f32 %v13773_v49, %v2239_v26  ;;  %v3809_v40 = vmax.f32 %v3025_v28, 0.0  ;;  %v3810_v41 = vmax.f32 %v3026_v29, 0.0  ;;  %v11503_v24 = vld [vmem:[%s11889_s29 + $0x788] sm:$0xff]   ;;  %v11504_v26 = vld [vmem:[%s11889_s29 + $0x790] sm:$0xff]  }
 0x27d   : > { %v3811_v42 = vmax.f32 %v3027_v30, 0.0  ;;  %v3812_v44 = vmax.f32 %v3028_v32, 0.0  ;;  %v9375_v46 = vpack.c.bf16 %v3807_v34, %v3807_v34  ;;  %v9376_v47 = vpack.c.bf16 %v3808_v35, %v3808_v35  ;;  %v11505_v32 = vld [vmem:[%s11889_s29 + $0x798] sm:$0xff]  }
 0x27e   : > { %v3813_v48 = vmax.f32 %v3029_v36, 0.0  ;;  %v3814_v50 = vmax.f32 %v3030_v38, 0.0  ;;  %v9377_v53 = vpack.c.bf16 %v3809_v40, %v3809_v40  ;;  %v9378_v54 = vpack.c.bf16 %v3810_v41, %v3810_v41 }
 0x27f   : > { %v9379_v55 = vpack.c.bf16 %v3811_v42, %v3811_v42  ;;  %v9380_v56 = vpack.c.bf16 %v3812_v44, %v3812_v44  ;;  %7728 = vst.msk [vmem:[%s11933_s6 + $0x740] sm:$0xf] %vm7263_vm0, %v9375_v46  ;;  %7729 = vst.msk [vmem:[%s11933_s6 + $0x744] sm:$0xf] %vm7263_vm0, %v9376_v47  ;;  %v10641_v59 = vunpack.c.l.bf16 %v11498_v45  ;;  %v10642_v60 = vunpack.c.h.bf16 %v11498_v45  ;;  %v14132_v45 = vld [vmem:[%s15547_s1] ss:$0 sm:$0xff] }
 0x280   : > { %v9381_v57 = vpack.c.bf16 %v3813_v48, %v3813_v48  ;;  %v9382_v58 = vpack.c.bf16 %v3814_v50, %v3814_v50  ;;  %7730 = vst.msk [vmem:[%s11933_s6 + $0x748] sm:$0xf] %vm7263_vm0, %v9377_v53  ;;  %7731 = vst.msk [vmem:[%s11933_s6 + $0x74c] sm:$0xf] %vm7263_vm0, %v9378_v54  ;;  %v10645_v61 = vunpack.c.l.bf16 %v11499_v51  ;;  %v10646_v16 = vunpack.c.h.bf16 %v11499_v51 }
 0x281   : > { %7732 = vst.msk [vmem:[%s11933_s6 + $0x750] sm:$0xf] %vm7263_vm0, %v9379_v55  ;;  %7733 = vst.msk [vmem:[%s11933_s6 + $0x754] sm:$0xf] %vm7263_vm0, %v9380_v56  ;;  %v10649_v62 = vunpack.c.l.bf16 %v11500_v52  ;;  %v10650_v63 = vunpack.c.h.bf16 %v11500_v52  ;;  %v2240_v0 = vmul.f32 %v13762_v39, %v10641_v59  ;;  %v2241_v2 = vmul.f32 %v13762_v39, %v10642_v60  ;;  %v14143_v55 = vld [vmem:[%s15548_s2] ss:$0 sm:$0xff] }
 0x282   : > { %7734 = vst.msk [vmem:[%s11933_s6 + $0x758] sm:$0xf] %vm7263_vm0, %v9381_v57  ;;  %7735 = vst.msk [vmem:[%s11933_s6 + $0x75c] sm:$0xf] %vm7263_vm0, %v9382_v58  ;;  %v10653_v3 = vunpack.c.l.bf16 %v11501_v1  ;;  %v10654_v21 = vunpack.c.h.bf16 %v11501_v1  ;;  %v2242_v7 = vmul.f32 %v13762_v39, %v10645_v61  ;;  %v2243_v4 = vmul.f32 %v13762_v39, %v10646_v16 }
 0x283   : > { %v2244_v5 = vmul.f32 %v13762_v39, %v10649_v62  ;;  %v2245_v6 = vmul.f32 %v13762_v39, %v10650_v63  ;;  %v3031_v8 = vadd.f32 %v13773_v49, %v2240_v0  ;;  %v3032_v27 = vadd.f32 %v13773_v49, %v2241_v2 }
 0x284   : > { %v2246_v25 = vmul.f32 %v13762_v39, %v10653_v3  ;;  %v2247_v9 = vmul.f32 %v13762_v39, %v10654_v21  ;;  %v3033_v10 = vadd.f32 %v13773_v49, %v2242_v7  ;;  %v3034_v11 = vadd.f32 %v13773_v49, %v2243_v4 }
 0x285   : > { %v3035_v12 = vadd.f32 %v13773_v49, %v2244_v5  ;;  %v3036_v33 = vadd.f32 %v13773_v49, %v2245_v6  ;;  %v3815_v31 = vmax.f32 %v3031_v8, 0.0  ;;  %v3816_v13 = vmax.f32 %v3032_v27, 0.0  ;;  %v11506_v5 = vld [vmem:[%s11889_s29 + $0x7a0] sm:$0xff]  }
 0x286   : > { %v3037_v14 = vadd.f32 %v13773_v49, %v2246_v25  ;;  %v3038_v15 = vadd.f32 %v13773_v49, %v2247_v9  ;;  %v3817_v17 = vmax.f32 %v3033_v10, 0.0  ;;  %v3818_v39 = vmax.f32 %v3034_v11, 0.0  ;;  %v11507_v9 = vld [vmem:[%s11889_s29 + $0x7a8] sm:$0xff]   ;;  %v11508_v10 = vld [vmem:[%s11889_s29 + $0x7b0] sm:$0xff]  }
 0x287   : > { %v3819_v37 = vmax.f32 %v3035_v12, 0.0  ;;  %v3820_v18 = vmax.f32 %v3036_v33, 0.0  ;;  %v9383_v20 = vpack.c.bf16 %v3815_v31, %v3815_v31  ;;  %v9384_v22 = vpack.c.bf16 %v3816_v13, %v3816_v13  ;;  %v11509_v13 = vld [vmem:[%s11889_s29 + $0x7b8] sm:$0xff]  }
 0x288   : > { %v3821_v43 = vmax.f32 %v3037_v14, 0.0  ;;  %v3822_v23 = vmax.f32 %v3038_v15, 0.0  ;;  %v9385_v28 = vpack.c.bf16 %v3817_v17, %v3817_v17  ;;  %v9386_v49 = vpack.c.bf16 %v3818_v39, %v3818_v39 }
 0x289   : > { %v9387_v29 = vpack.c.bf16 %v3819_v37, %v3819_v37  ;;  %v9388_v30 = vpack.c.bf16 %v3820_v18, %v3820_v18  ;;  %7736 = vst.msk [vmem:[%s11933_s6 + $0x760] sm:$0xf] %vm7263_vm0, %v9383_v20  ;;  %7737 = vst.msk [vmem:[%s11933_s6 + $0x764] sm:$0xf] %vm7263_vm0, %v9384_v22  ;;  %v10657_v36 = vunpack.c.l.bf16 %v11502_v19  ;;  %v10658_v38 = vunpack.c.h.bf16 %v11502_v19 }
 0x28a   : > { %v9389_v34 = vpack.c.bf16 %v3821_v43, %v3821_v43  ;;  %v9390_v35 = vpack.c.bf16 %v3822_v23, %v3822_v23  ;;  %7738 = vst.msk [vmem:[%s11933_s6 + $0x768] sm:$0xf] %vm7263_vm0, %v9385_v28  ;;  %7739 = vst.msk [vmem:[%s11933_s6 + $0x76c] sm:$0xf] %vm7263_vm0, %v9386_v49  ;;  %v10661_v40 = vunpack.c.l.bf16 %v11503_v24  ;;  %v10662_v41 = vunpack.c.h.bf16 %v11503_v24 }
 0x28b   : > { %7740 = vst.msk [vmem:[%s11933_s6 + $0x770] sm:$0xf] %vm7263_vm0, %v9387_v29  ;;  %7741 = vst.msk [vmem:[%s11933_s6 + $0x774] sm:$0xf] %vm7263_vm0, %v9388_v30  ;;  %v10665_v42 = vunpack.c.l.bf16 %v11504_v26  ;;  %v10666_v44 = vunpack.c.h.bf16 %v11504_v26  ;;  %v2248_v46 = vmul.f32 %v14132_v45, %v10657_v36  ;;  %v2249_v47 = vmul.f32 %v14132_v45, %v10658_v38 }
 0x28c   : > { %7742 = vst.msk [vmem:[%s11933_s6 + $0x778] sm:$0xf] %vm7263_vm0, %v9389_v34  ;;  %7743 = vst.msk [vmem:[%s11933_s6 + $0x77c] sm:$0xf] %vm7263_vm0, %v9390_v35  ;;  %v10669_v48 = vunpack.c.l.bf16 %v11505_v32  ;;  %v10670_v50 = vunpack.c.h.bf16 %v11505_v32  ;;  %v2250_v51 = vmul.f32 %v14132_v45, %v10661_v40  ;;  %v2251_v52 = vmul.f32 %v14132_v45, %v10662_v41 }
 0x28d   : > { %v2252_v53 = vmul.f32 %v14132_v45, %v10665_v42  ;;  %v2253_v54 = vmul.f32 %v14132_v45, %v10666_v44  ;;  %v3039_v56 = vadd.f32 %v14143_v55, %v2248_v46  ;;  %v3040_v1 = vadd.f32 %v14143_v55, %v2249_v47 }
 0x28e   : > { %v2254_v57 = vmul.f32 %v14132_v45, %v10669_v48  ;;  %v2255_v58 = vmul.f32 %v14132_v45, %v10670_v50  ;;  %v3041_v59 = vadd.f32 %v14143_v55, %v2250_v51  ;;  %v3042_v60 = vadd.f32 %v14143_v55, %v2251_v52 }
 0x28f   : > { %v3043_v61 = vadd.f32 %v14143_v55, %v2252_v53  ;;  %v3044_v16 = vadd.f32 %v14143_v55, %v2253_v54  ;;  %v3823_v62 = vmax.f32 %v3039_v56, 0.0  ;;  %v3824_v63 = vmax.f32 %v3040_v1, 0.0  ;;  %v11510_v53 = vld [vmem:[%s11889_s29 + $0x7c0] sm:$0xff]  }
 0x290   : > { %v3045_v0 = vadd.f32 %v14143_v55, %v2254_v57  ;;  %v3046_v2 = vadd.f32 %v14143_v55, %v2255_v58  ;;  %v3825_v3 = vmax.f32 %v3041_v59, 0.0  ;;  %v3826_v21 = vmax.f32 %v3042_v60, 0.0  ;;  %v11511_v58 = vld [vmem:[%s11889_s29 + $0x7c8] sm:$0xff]   ;;  %v11512_v59 = vld [vmem:[%s11889_s29 + $0x7d0] sm:$0xff]  }
 0x291   : > { %v3827_v7 = vmax.f32 %v3043_v61, 0.0  ;;  %v3828_v4 = vmax.f32 %v3044_v16, 0.0  ;;  %v9391_v6 = vpack.c.bf16 %v3823_v62, %v3823_v62  ;;  %v9392_v8 = vpack.c.bf16 %v3824_v63, %v3824_v63  ;;  %v11513_v63 = vld [vmem:[%s11889_s29 + $0x7d8] sm:$0xff]  }
 0x292   : > { %v3829_v27 = vmax.f32 %v3045_v0, 0.0  ;;  %v3830_v25 = vmax.f32 %v3046_v2, 0.0  ;;  %v9393_v11 = vpack.c.bf16 %v3825_v3, %v3825_v3  ;;  %v9394_v12 = vpack.c.bf16 %v3826_v21, %v3826_v21 }
 0x293   : > { %v9395_v33 = vpack.c.bf16 %v3827_v7, %v3827_v7  ;;  %v9396_v31 = vpack.c.bf16 %v3828_v4, %v3828_v4  ;;  %7744 = vst.msk [vmem:[%s11933_s6 + $0x780] sm:$0xf] %vm7263_vm0, %v9391_v6  ;;  %7745 = vst.msk [vmem:[%s11933_s6 + $0x784] sm:$0xf] %vm7263_vm0, %v9392_v8  ;;  %v10673_v17 = vunpack.c.l.bf16 %v11506_v5  ;;  %v10674_v39 = vunpack.c.h.bf16 %v11506_v5 }
 0x294   : > { %v9397_v14 = vpack.c.bf16 %v3829_v27, %v3829_v27  ;;  %v9398_v15 = vpack.c.bf16 %v3830_v25, %v3830_v25  ;;  %7746 = vst.msk [vmem:[%s11933_s6 + $0x788] sm:$0xf] %vm7263_vm0, %v9393_v11  ;;  %7747 = vst.msk [vmem:[%s11933_s6 + $0x78c] sm:$0xf] %vm7263_vm0, %v9394_v12  ;;  %v10677_v37 = vunpack.c.l.bf16 %v11507_v9  ;;  %v10678_v18 = vunpack.c.h.bf16 %v11507_v9 }
 0x295   : > { %7748 = vst.msk [vmem:[%s11933_s6 + $0x790] sm:$0xf] %vm7263_vm0, %v9395_v33  ;;  %7749 = vst.msk [vmem:[%s11933_s6 + $0x794] sm:$0xf] %vm7263_vm0, %v9396_v31  ;;  %v10681_v19 = vunpack.c.l.bf16 %v11508_v10  ;;  %v10682_v20 = vunpack.c.h.bf16 %v11508_v10  ;;  %v2256_v22 = vmul.f32 %v14132_v45, %v10673_v17  ;;  %v2257_v43 = vmul.f32 %v14132_v45, %v10674_v39 }
 0x296   : > { %7750 = vst.msk [vmem:[%s11933_s6 + $0x798] sm:$0xf] %vm7263_vm0, %v9397_v14  ;;  %7751 = vst.msk [vmem:[%s11933_s6 + $0x79c] sm:$0xf] %vm7263_vm0, %v9398_v15  ;;  %v10685_v23 = vunpack.c.l.bf16 %v11509_v13  ;;  %v10686_v24 = vunpack.c.h.bf16 %v11509_v13  ;;  %v2258_v26 = vmul.f32 %v14132_v45, %v10677_v37  ;;  %v2259_v28 = vmul.f32 %v14132_v45, %v10678_v18 }
 0x297   : > { %v2260_v49 = vmul.f32 %v14132_v45, %v10681_v19  ;;  %v2261_v29 = vmul.f32 %v14132_v45, %v10682_v20  ;;  %v3047_v30 = vadd.f32 %v14143_v55, %v2256_v22  ;;  %v3048_v32 = vadd.f32 %v14143_v55, %v2257_v43 }
 0x298   : > { %v2262_v34 = vmul.f32 %v14132_v45, %v10685_v23  ;;  %v2263_v35 = vmul.f32 %v14132_v45, %v10686_v24  ;;  %v3049_v36 = vadd.f32 %v14143_v55, %v2258_v26  ;;  %v3050_v38 = vadd.f32 %v14143_v55, %v2259_v28 }
 0x299   : > { %v3051_v40 = vadd.f32 %v14143_v55, %v2260_v49  ;;  %v3052_v41 = vadd.f32 %v14143_v55, %v2261_v29  ;;  %v3831_v42 = vmax.f32 %v3047_v30, 0.0  ;;  %v3832_v44 = vmax.f32 %v3048_v32, 0.0  ;;  %v11514_v49 = vld [vmem:[%s11889_s29 + $0x7e0] sm:$0xff]  }
 0x29a   : > { %v3053_v46 = vadd.f32 %v14143_v55, %v2262_v34  ;;  %v3054_v47 = vadd.f32 %v14143_v55, %v2263_v35  ;;  %v3833_v48 = vmax.f32 %v3049_v36, 0.0  ;;  %v3834_v50 = vmax.f32 %v3050_v38, 0.0  ;;  %v11515_v35 = vld [vmem:[%s11889_s29 + $0x7e8] sm:$0xff]   ;;  %v11516_v36 = vld [vmem:[%s11889_s29 + $0x7f0] sm:$0xff]  }
 0x29b   : > { %v3835_v51 = vmax.f32 %v3051_v40, 0.0  ;;  %v3836_v52 = vmax.f32 %v3052_v41, 0.0  ;;  %v9399_v54 = vpack.c.bf16 %v3831_v42, %v3831_v42  ;;  %v9400_v56 = vpack.c.bf16 %v3832_v44, %v3832_v44  ;;  %v11517_v44 = vld [vmem:[%s11889_s29 + $0x7f8] sm:$0xff]  }
 0x29c   : > { %v3837_v1 = vmax.f32 %v3053_v46, 0.0  ;;  %v3838_v57 = vmax.f32 %v3054_v47, 0.0  ;;  %v9401_v60 = vpack.c.bf16 %v3833_v48, %v3833_v48  ;;  %v9402_v61 = vpack.c.bf16 %v3834_v50, %v3834_v50 }
 0x29d   : > { %v9403_v16 = vpack.c.bf16 %v3835_v51, %v3835_v51  ;;  %v9404_v62 = vpack.c.bf16 %v3836_v52, %v3836_v52  ;;  %7752 = vst.msk [vmem:[%s11933_s6 + $0x7a0] sm:$0xf] %vm7263_vm0, %v9399_v54  ;;  %7753 = vst.msk [vmem:[%s11933_s6 + $0x7a4] sm:$0xf] %vm7263_vm0, %v9400_v56  ;;  %v10689_v3 = vunpack.c.l.bf16 %v11510_v53  ;;  %v10690_v21 = vunpack.c.h.bf16 %v11510_v53 }
 0x29e   : > { %v9405_v0 = vpack.c.bf16 %v3837_v1, %v3837_v1  ;;  %v9406_v2 = vpack.c.bf16 %v3838_v57, %v3838_v57  ;;  %7754 = vst.msk [vmem:[%s11933_s6 + $0x7a8] sm:$0xf] %vm7263_vm0, %v9401_v60  ;;  %7755 = vst.msk [vmem:[%s11933_s6 + $0x7ac] sm:$0xf] %vm7263_vm0, %v9402_v61  ;;  %v10693_v7 = vunpack.c.l.bf16 %v11511_v58  ;;  %v10694_v4 = vunpack.c.h.bf16 %v11511_v58 }
 0x29f   : > { %7756 = vst.msk [vmem:[%s11933_s6 + $0x7b0] sm:$0xf] %vm7263_vm0, %v9403_v16  ;;  %7757 = vst.msk [vmem:[%s11933_s6 + $0x7b4] sm:$0xf] %vm7263_vm0, %v9404_v62  ;;  %v10697_v5 = vunpack.c.l.bf16 %v11512_v59  ;;  %v10698_v6 = vunpack.c.h.bf16 %v11512_v59  ;;  %v2264_v8 = vmul.f32 %v14132_v45, %v10689_v3  ;;  %v2265_v27 = vmul.f32 %v14132_v45, %v10690_v21 }
 0x2a0   : > { %7758 = vst.msk [vmem:[%s11933_s6 + $0x7b8] sm:$0xf] %vm7263_vm0, %v9405_v0  ;;  %7759 = vst.msk [vmem:[%s11933_s6 + $0x7bc] sm:$0xf] %vm7263_vm0, %v9406_v2  ;;  %v10701_v25 = vunpack.c.l.bf16 %v11513_v63  ;;  %v10702_v9 = vunpack.c.h.bf16 %v11513_v63  ;;  %v2266_v10 = vmul.f32 %v14132_v45, %v10693_v7  ;;  %v2267_v11 = vmul.f32 %v14132_v45, %v10694_v4 }
 0x2a1   : > { %v2268_v12 = vmul.f32 %v14132_v45, %v10697_v5  ;;  %v2269_v33 = vmul.f32 %v14132_v45, %v10698_v6  ;;  %v3055_v31 = vadd.f32 %v14143_v55, %v2264_v8  ;;  %v3056_v13 = vadd.f32 %v14143_v55, %v2265_v27 }
 0x2a2   : > { %v2270_v14 = vmul.f32 %v14132_v45, %v10701_v25  ;;  %v2271_v15 = vmul.f32 %v14132_v45, %v10702_v9  ;;  %v3057_v17 = vadd.f32 %v14143_v55, %v2266_v10  ;;  %v3058_v39 = vadd.f32 %v14143_v55, %v2267_v11 }
 0x2a3   : > { %v3059_v37 = vadd.f32 %v14143_v55, %v2268_v12  ;;  %v3060_v18 = vadd.f32 %v14143_v55, %v2269_v33  ;;  %v3839_v19 = vmax.f32 %v3055_v31, 0.0  ;;  %v3840_v20 = vmax.f32 %v3056_v13, 0.0  ;;  %v11518_v12 = vld [vmem:[%s11889_s29 + $0x800] sm:$0xff]  }
 0x2a4   : > { %v3061_v22 = vadd.f32 %v14143_v55, %v2270_v14  ;;  %v3062_v43 = vadd.f32 %v14143_v55, %v2271_v15  ;;  %v3841_v23 = vmax.f32 %v3057_v17, 0.0  ;;  %v3842_v24 = vmax.f32 %v3058_v39, 0.0  ;;  %v11519_v15 = vld [vmem:[%s11889_s29 + $0x808] sm:$0xff]   ;;  %v11520_v17 = vld [vmem:[%s11889_s29 + $0x810] sm:$0xff]  }
 0x2a5   : > { %v3843_v26 = vmax.f32 %v3059_v37, 0.0  ;;  %v3844_v28 = vmax.f32 %v3060_v18, 0.0  ;;  %v9407_v29 = vpack.c.bf16 %v3839_v19, %v3839_v19  ;;  %v9408_v30 = vpack.c.bf16 %v3840_v20, %v3840_v20  ;;  %v11521_v20 = vld [vmem:[%s11889_s29 + $0x818] sm:$0xff]  }
 0x2a6   : > { %v3845_v32 = vmax.f32 %v3061_v22, 0.0  ;;  %v3846_v34 = vmax.f32 %v3062_v43, 0.0  ;;  %v9409_v38 = vpack.c.bf16 %v3841_v23, %v3841_v23  ;;  %v9410_v40 = vpack.c.bf16 %v3842_v24, %v3842_v24 }
 0x2a7   : > { %v9411_v41 = vpack.c.bf16 %v3843_v26, %v3843_v26  ;;  %v9412_v42 = vpack.c.bf16 %v3844_v28, %v3844_v28  ;;  %7760 = vst.msk [vmem:[%s11933_s6 + $0x7c0] sm:$0xf] %vm7263_vm0, %v9407_v29  ;;  %7761 = vst.msk [vmem:[%s11933_s6 + $0x7c4] sm:$0xf] %vm7263_vm0, %v9408_v30  ;;  %v10705_v48 = vunpack.c.l.bf16 %v11514_v49  ;;  %v10706_v50 = vunpack.c.h.bf16 %v11514_v49 }
 0x2a8   : > { %v9413_v46 = vpack.c.bf16 %v3845_v32, %v3845_v32  ;;  %v9414_v47 = vpack.c.bf16 %v3846_v34, %v3846_v34  ;;  %7762 = vst.msk [vmem:[%s11933_s6 + $0x7c8] sm:$0xf] %vm7263_vm0, %v9409_v38  ;;  %7763 = vst.msk [vmem:[%s11933_s6 + $0x7cc] sm:$0xf] %vm7263_vm0, %v9410_v40  ;;  %v10709_v51 = vunpack.c.l.bf16 %v11515_v35  ;;  %v10710_v52 = vunpack.c.h.bf16 %v11515_v35 }
 0x2a9   : > { %7764 = vst.msk [vmem:[%s11933_s6 + $0x7d0] sm:$0xf] %vm7263_vm0, %v9411_v41  ;;  %7765 = vst.msk [vmem:[%s11933_s6 + $0x7d4] sm:$0xf] %vm7263_vm0, %v9412_v42  ;;  %v10713_v53 = vunpack.c.l.bf16 %v11516_v36  ;;  %v10714_v54 = vunpack.c.h.bf16 %v11516_v36  ;;  %v2272_v56 = vmul.f32 %v14132_v45, %v10705_v48  ;;  %v2273_v1 = vmul.f32 %v14132_v45, %v10706_v50 }
 0x2aa   : > { %7766 = vst.msk [vmem:[%s11933_s6 + $0x7d8] sm:$0xf] %vm7263_vm0, %v9413_v46  ;;  %7767 = vst.msk [vmem:[%s11933_s6 + $0x7dc] sm:$0xf] %vm7263_vm0, %v9414_v47  ;;  %v10717_v57 = vunpack.c.l.bf16 %v11517_v44  ;;  %v10718_v58 = vunpack.c.h.bf16 %v11517_v44  ;;  %v2274_v59 = vmul.f32 %v14132_v45, %v10709_v51  ;;  %v2275_v60 = vmul.f32 %v14132_v45, %v10710_v52 }
 0x2ab   : > { %v2276_v61 = vmul.f32 %v14132_v45, %v10713_v53  ;;  %v2277_v16 = vmul.f32 %v14132_v45, %v10714_v54  ;;  %v3063_v62 = vadd.f32 %v14143_v55, %v2272_v56  ;;  %v3064_v63 = vadd.f32 %v14143_v55, %v2273_v1 }
 0x2ac   : > { %v2278_v0 = vmul.f32 %v14132_v45, %v10717_v57  ;;  %v2279_v2 = vmul.f32 %v14132_v45, %v10718_v58  ;;  %v3065_v3 = vadd.f32 %v14143_v55, %v2274_v59  ;;  %v3066_v21 = vadd.f32 %v14143_v55, %v2275_v60 }
 0x2ad   : > { %v3067_v7 = vadd.f32 %v14143_v55, %v2276_v61  ;;  %v3068_v4 = vadd.f32 %v14143_v55, %v2277_v16  ;;  %v3847_v5 = vmax.f32 %v3063_v62, 0.0  ;;  %v3848_v6 = vmax.f32 %v3064_v63, 0.0  ;;  %v11522_v61 = vld [vmem:[%s11889_s29 + $0x820] sm:$0xff]  }
 0x2ae   : > { %v3069_v8 = vadd.f32 %v14143_v55, %v2278_v0  ;;  %v3070_v27 = vadd.f32 %v14143_v55, %v2279_v2  ;;  %v3849_v25 = vmax.f32 %v3065_v3, 0.0  ;;  %v3850_v9 = vmax.f32 %v3066_v21, 0.0  ;;  %v11523_v2 = vld [vmem:[%s11889_s29 + $0x828] sm:$0xff]   ;;  %v11524_v3 = vld [vmem:[%s11889_s29 + $0x830] sm:$0xff]  }
 0x2af   : > { %v3851_v10 = vmax.f32 %v3067_v7, 0.0  ;;  %v3852_v11 = vmax.f32 %v3068_v4, 0.0  ;;  %v9415_v33 = vpack.c.bf16 %v3847_v5, %v3847_v5  ;;  %v9416_v31 = vpack.c.bf16 %v3848_v6, %v3848_v6  ;;  %v11525_v6 = vld [vmem:[%s11889_s29 + $0x838] sm:$0xff]  }
 0x2b0   : > { %v3853_v13 = vmax.f32 %v3069_v8, 0.0  ;;  %v3854_v14 = vmax.f32 %v3070_v27, 0.0  ;;  %v9417_v39 = vpack.c.bf16 %v3849_v25, %v3849_v25  ;;  %v9418_v37 = vpack.c.bf16 %v3850_v9, %v3850_v9 }
 0x2b1   : > { %v9419_v18 = vpack.c.bf16 %v3851_v10, %v3851_v10  ;;  %v9420_v19 = vpack.c.bf16 %v3852_v11, %v3852_v11  ;;  %7768 = vst.msk [vmem:[%s11933_s6 + $0x7e0] sm:$0xf] %vm7263_vm0, %v9415_v33  ;;  %7769 = vst.msk [vmem:[%s11933_s6 + $0x7e4] sm:$0xf] %vm7263_vm0, %v9416_v31  ;;  %v10721_v23 = vunpack.c.l.bf16 %v11518_v12  ;;  %v10722_v24 = vunpack.c.h.bf16 %v11518_v12 }
 0x2b2   : > { %v9421_v22 = vpack.c.bf16 %v3853_v13, %v3853_v13  ;;  %v9422_v43 = vpack.c.bf16 %v3854_v14, %v3854_v14  ;;  %7770 = vst.msk [vmem:[%s11933_s6 + $0x7e8] sm:$0xf] %vm7263_vm0, %v9417_v39  ;;  %7771 = vst.msk [vmem:[%s11933_s6 + $0x7ec] sm:$0xf] %vm7263_vm0, %v9418_v37  ;;  %v10725_v26 = vunpack.c.l.bf16 %v11519_v15  ;;  %v10726_v28 = vunpack.c.h.bf16 %v11519_v15 }
 0x2b3   : > { %7772 = vst.msk [vmem:[%s11933_s6 + $0x7f0] sm:$0xf] %vm7263_vm0, %v9419_v18  ;;  %7773 = vst.msk [vmem:[%s11933_s6 + $0x7f4] sm:$0xf] %vm7263_vm0, %v9420_v19  ;;  %v10729_v49 = vunpack.c.l.bf16 %v11520_v17  ;;  %v10730_v29 = vunpack.c.h.bf16 %v11520_v17  ;;  %v2280_v30 = vmul.f32 %v14132_v45, %v10721_v23  ;;  %v2281_v32 = vmul.f32 %v14132_v45, %v10722_v24 }
 0x2b4   : > { %7774 = vst.msk [vmem:[%s11933_s6 + $0x7f8] sm:$0xf] %vm7263_vm0, %v9421_v22  ;;  %7775 = vst.msk [vmem:[%s11933_s6 + $0x7fc] sm:$0xf] %vm7263_vm0, %v9422_v43  ;;  %v10733_v34 = vunpack.c.l.bf16 %v11521_v20  ;;  %v10734_v35 = vunpack.c.h.bf16 %v11521_v20  ;;  %v2282_v36 = vmul.f32 %v14132_v45, %v10725_v26  ;;  %v2283_v38 = vmul.f32 %v14132_v45, %v10726_v28 }
 0x2b5   : > { %v2284_v40 = vmul.f32 %v14132_v45, %v10729_v49  ;;  %v2285_v41 = vmul.f32 %v14132_v45, %v10730_v29  ;;  %v3071_v42 = vadd.f32 %v14143_v55, %v2280_v30  ;;  %v3072_v44 = vadd.f32 %v14143_v55, %v2281_v32 }
 0x2b6   : > { %v2286_v46 = vmul.f32 %v14132_v45, %v10733_v34  ;;  %v2287_v47 = vmul.f32 %v14132_v45, %v10734_v35  ;;  %v3073_v48 = vadd.f32 %v14143_v55, %v2282_v36  ;;  %v3074_v50 = vadd.f32 %v14143_v55, %v2283_v38 }
 0x2b7   : > { %v3075_v51 = vadd.f32 %v14143_v55, %v2284_v40  ;;  %v3076_v52 = vadd.f32 %v14143_v55, %v2285_v41  ;;  %v3855_v53 = vmax.f32 %v3071_v42, 0.0  ;;  %v3856_v54 = vmax.f32 %v3072_v44, 0.0  ;;  %v11526_v40 = vld [vmem:[%s11889_s29 + $0x840] sm:$0xff]  }
 0x2b8   : > { %v3077_v56 = vadd.f32 %v14143_v55, %v2286_v46  ;;  %v3078_v1 = vadd.f32 %v14143_v55, %v2287_v47  ;;  %v3857_v57 = vmax.f32 %v3073_v48, 0.0  ;;  %v3858_v58 = vmax.f32 %v3074_v50, 0.0  ;;  %v11527_v47 = vld [vmem:[%s11889_s29 + $0x848] sm:$0xff]   ;;  %v11528_v48 = vld [vmem:[%s11889_s29 + $0x850] sm:$0xff]  }
 0x2b9   : > { %v3859_v59 = vmax.f32 %v3075_v51, 0.0  ;;  %v3860_v60 = vmax.f32 %v3076_v52, 0.0  ;;  %v9423_v16 = vpack.c.bf16 %v3855_v53, %v3855_v53  ;;  %v9424_v62 = vpack.c.bf16 %v3856_v54, %v3856_v54  ;;  %v11529_v54 = vld [vmem:[%s11889_s29 + $0x858] sm:$0xff]  }
 0x2ba   : > { %v3861_v63 = vmax.f32 %v3077_v56, 0.0  ;;  %v3862_v0 = vmax.f32 %v3078_v1, 0.0  ;;  %v9425_v21 = vpack.c.bf16 %v3857_v57, %v3857_v57  ;;  %v9426_v7 = vpack.c.bf16 %v3858_v58, %v3858_v58 }
 0x2bb   : > { %v9427_v4 = vpack.c.bf16 %v3859_v59, %v3859_v59  ;;  %v9428_v5 = vpack.c.bf16 %v3860_v60, %v3860_v60  ;;  %7776 = vst.msk [vmem:[%s11933_s6 + $0x800] sm:$0xf] %vm7263_vm0, %v9423_v16  ;;  %7777 = vst.msk [vmem:[%s11933_s6 + $0x804] sm:$0xf] %vm7263_vm0, %v9424_v62  ;;  %v10737_v25 = vunpack.c.l.bf16 %v11522_v61  ;;  %v10738_v9 = vunpack.c.h.bf16 %v11522_v61 }
 0x2bc   : > { %v9429_v8 = vpack.c.bf16 %v3861_v63, %v3861_v63  ;;  %v9430_v27 = vpack.c.bf16 %v3862_v0, %v3862_v0  ;;  %7778 = vst.msk [vmem:[%s11933_s6 + $0x808] sm:$0xf] %vm7263_vm0, %v9425_v21  ;;  %7779 = vst.msk [vmem:[%s11933_s6 + $0x80c] sm:$0xf] %vm7263_vm0, %v9426_v7  ;;  %v10741_v10 = vunpack.c.l.bf16 %v11523_v2  ;;  %v10742_v11 = vunpack.c.h.bf16 %v11523_v2 }
 0x2bd   : > { %7780 = vst.msk [vmem:[%s11933_s6 + $0x810] sm:$0xf] %vm7263_vm0, %v9427_v4  ;;  %7781 = vst.msk [vmem:[%s11933_s6 + $0x814] sm:$0xf] %vm7263_vm0, %v9428_v5  ;;  %v10745_v12 = vunpack.c.l.bf16 %v11524_v3  ;;  %v10746_v33 = vunpack.c.h.bf16 %v11524_v3  ;;  %v2288_v31 = vmul.f32 %v14132_v45, %v10737_v25  ;;  %v2289_v13 = vmul.f32 %v14132_v45, %v10738_v9 }
 0x2be   : > { %7782 = vst.msk [vmem:[%s11933_s6 + $0x818] sm:$0xf] %vm7263_vm0, %v9429_v8  ;;  %7783 = vst.msk [vmem:[%s11933_s6 + $0x81c] sm:$0xf] %vm7263_vm0, %v9430_v27  ;;  %v10749_v14 = vunpack.c.l.bf16 %v11525_v6  ;;  %v10750_v15 = vunpack.c.h.bf16 %v11525_v6  ;;  %v2290_v17 = vmul.f32 %v14132_v45, %v10741_v10  ;;  %v2291_v39 = vmul.f32 %v14132_v45, %v10742_v11 }
 0x2bf   : > { %v2292_v37 = vmul.f32 %v14132_v45, %v10745_v12  ;;  %v2293_v18 = vmul.f32 %v14132_v45, %v10746_v33  ;;  %v3079_v19 = vadd.f32 %v14143_v55, %v2288_v31  ;;  %v3080_v20 = vadd.f32 %v14143_v55, %v2289_v13 }
 0x2c0   : > { %v2294_v22 = vmul.f32 %v14132_v45, %v10749_v14  ;;  %v2295_v43 = vmul.f32 %v14132_v45, %v10750_v15  ;;  %v3081_v23 = vadd.f32 %v14143_v55, %v2290_v17  ;;  %v3082_v24 = vadd.f32 %v14143_v55, %v2291_v39 }
 0x2c1   : > { %v3083_v26 = vadd.f32 %v14143_v55, %v2292_v37  ;;  %v3084_v28 = vadd.f32 %v14143_v55, %v2293_v18  ;;  %v3863_v49 = vmax.f32 %v3079_v19, 0.0  ;;  %v3864_v29 = vmax.f32 %v3080_v20, 0.0  ;;  %v11530_v37 = vld [vmem:[%s11889_s29 + $0x860] sm:$0xff]  }
 0x2c2   : > { %v3085_v30 = vadd.f32 %v14143_v55, %v2294_v22  ;;  %v3086_v32 = vadd.f32 %v14143_v55, %v2295_v43  ;;  %v3865_v34 = vmax.f32 %v3081_v23, 0.0  ;;  %v3866_v35 = vmax.f32 %v3082_v24, 0.0  ;;  %v11531_v43 = vld [vmem:[%s11889_s29 + $0x868] sm:$0xff]   ;;  %v11532_v23 = vld [vmem:[%s11889_s29 + $0x870] sm:$0xff]  }
 0x2c3   : > { %v3867_v36 = vmax.f32 %v3083_v26, 0.0  ;;  %v3868_v38 = vmax.f32 %v3084_v28, 0.0  ;;  %v9431_v41 = vpack.c.bf16 %v3863_v49, %v3863_v49  ;;  %v9432_v42 = vpack.c.bf16 %v3864_v29, %v3864_v29  ;;  %v11533_v29 = vld [vmem:[%s11889_s29 + $0x878] sm:$0xff]  }
 0x2c4   : > { %v3869_v44 = vmax.f32 %v3085_v30, 0.0  ;;  %v3870_v46 = vmax.f32 %v3086_v32, 0.0  ;;  %v9433_v50 = vpack.c.bf16 %v3865_v34, %v3865_v34  ;;  %v9434_v51 = vpack.c.bf16 %v3866_v35, %v3866_v35 }
 0x2c5   : > { %v9435_v52 = vpack.c.bf16 %v3867_v36, %v3867_v36  ;;  %v9436_v53 = vpack.c.bf16 %v3868_v38, %v3868_v38  ;;  %7784 = vst.msk [vmem:[%s11933_s6 + $0x820] sm:$0xf] %vm7263_vm0, %v9431_v41  ;;  %7785 = vst.msk [vmem:[%s11933_s6 + $0x824] sm:$0xf] %vm7263_vm0, %v9432_v42  ;;  %v10753_v57 = vunpack.c.l.bf16 %v11526_v40  ;;  %v10754_v58 = vunpack.c.h.bf16 %v11526_v40 }
 0x2c6   : > { %v9437_v56 = vpack.c.bf16 %v3869_v44, %v3869_v44  ;;  %v9438_v1 = vpack.c.bf16 %v3870_v46, %v3870_v46  ;;  %7786 = vst.msk [vmem:[%s11933_s6 + $0x828] sm:$0xf] %vm7263_vm0, %v9433_v50  ;;  %7787 = vst.msk [vmem:[%s11933_s6 + $0x82c] sm:$0xf] %vm7263_vm0, %v9434_v51  ;;  %v10757_v59 = vunpack.c.l.bf16 %v11527_v47  ;;  %v10758_v60 = vunpack.c.h.bf16 %v11527_v47 }
 0x2c7   : > { %7788 = vst.msk [vmem:[%s11933_s6 + $0x830] sm:$0xf] %vm7263_vm0, %v9435_v52  ;;  %7789 = vst.msk [vmem:[%s11933_s6 + $0x834] sm:$0xf] %vm7263_vm0, %v9436_v53  ;;  %v10761_v61 = vunpack.c.l.bf16 %v11528_v48  ;;  %v10762_v16 = vunpack.c.h.bf16 %v11528_v48  ;;  %v2296_v62 = vmul.f32 %v14132_v45, %v10753_v57  ;;  %v2297_v63 = vmul.f32 %v14132_v45, %v10754_v58 }
 0x2c8   : > { %7790 = vst.msk [vmem:[%s11933_s6 + $0x838] sm:$0xf] %vm7263_vm0, %v9437_v56  ;;  %7791 = vst.msk [vmem:[%s11933_s6 + $0x83c] sm:$0xf] %vm7263_vm0, %v9438_v1  ;;  %v10765_v0 = vunpack.c.l.bf16 %v11529_v54  ;;  %v10766_v2 = vunpack.c.h.bf16 %v11529_v54  ;;  %v2298_v3 = vmul.f32 %v14132_v45, %v10757_v59  ;;  %v2299_v21 = vmul.f32 %v14132_v45, %v10758_v60 }
 0x2c9   : > { %v2300_v7 = vmul.f32 %v14132_v45, %v10761_v61  ;;  %v2301_v4 = vmul.f32 %v14132_v45, %v10762_v16  ;;  %v3087_v5 = vadd.f32 %v14143_v55, %v2296_v62  ;;  %v3088_v6 = vadd.f32 %v14143_v55, %v2297_v63 }
 0x2ca   : > { %v2302_v8 = vmul.f32 %v14132_v45, %v10765_v0  ;;  %v2303_v27 = vmul.f32 %v14132_v45, %v10766_v2  ;;  %v3089_v25 = vadd.f32 %v14143_v55, %v2298_v3  ;;  %v3090_v9 = vadd.f32 %v14143_v55, %v2299_v21 }
 0x2cb   : > { %v3091_v10 = vadd.f32 %v14143_v55, %v2300_v7  ;;  %v3092_v11 = vadd.f32 %v14143_v55, %v2301_v4  ;;  %v3871_v12 = vmax.f32 %v3087_v5, 0.0  ;;  %v3872_v33 = vmax.f32 %v3088_v6, 0.0  ;;  %v11534_v7 = vld [vmem:[%s11889_s29 + $0x880] sm:$0xff]  }
 0x2cc   : > { %v3093_v31 = vadd.f32 %v14143_v55, %v2302_v8  ;;  %v3094_v13 = vadd.f32 %v14143_v55, %v2303_v27  ;;  %v3873_v14 = vmax.f32 %v3089_v25, 0.0  ;;  %v3874_v15 = vmax.f32 %v3090_v9, 0.0  ;;  %v11535_v27 = vld [vmem:[%s11889_s29 + $0x888] sm:$0xff]   ;;  %v11536_v25 = vld [vmem:[%s11889_s29 + $0x890] sm:$0xff]  }
 0x2cd   : > { %v3875_v17 = vmax.f32 %v3091_v10, 0.0  ;;  %v3876_v39 = vmax.f32 %v3092_v11, 0.0  ;;  %v9439_v18 = vpack.c.bf16 %v3871_v12, %v3871_v12  ;;  %v9440_v19 = vpack.c.bf16 %v3872_v33, %v3872_v33  ;;  %v11537_v33 = vld [vmem:[%s11889_s29 + $0x898] sm:$0xff]  }
 0x2ce   : > { %v3877_v20 = vmax.f32 %v3093_v31, 0.0  ;;  %v3878_v22 = vmax.f32 %v3094_v13, 0.0  ;;  %v9441_v24 = vpack.c.bf16 %v3873_v14, %v3873_v14  ;;  %v9442_v26 = vpack.c.bf16 %v3874_v15, %v3874_v15 }
 0x2cf   : > { %v9443_v28 = vpack.c.bf16 %v3875_v17, %v3875_v17  ;;  %v9444_v49 = vpack.c.bf16 %v3876_v39, %v3876_v39  ;;  %7792 = vst.msk [vmem:[%s11933_s6 + $0x840] sm:$0xf] %vm7263_vm0, %v9439_v18  ;;  %7793 = vst.msk [vmem:[%s11933_s6 + $0x844] sm:$0xf] %vm7263_vm0, %v9440_v19  ;;  %v10769_v34 = vunpack.c.l.bf16 %v11530_v37  ;;  %v10770_v35 = vunpack.c.h.bf16 %v11530_v37 }
 0x2d0   : > { %v9445_v30 = vpack.c.bf16 %v3877_v20, %v3877_v20  ;;  %v9446_v32 = vpack.c.bf16 %v3878_v22, %v3878_v22  ;;  %7794 = vst.msk [vmem:[%s11933_s6 + $0x848] sm:$0xf] %vm7263_vm0, %v9441_v24  ;;  %7795 = vst.msk [vmem:[%s11933_s6 + $0x84c] sm:$0xf] %vm7263_vm0, %v9442_v26  ;;  %v10773_v36 = vunpack.c.l.bf16 %v11531_v43  ;;  %v10774_v38 = vunpack.c.h.bf16 %v11531_v43 }
 0x2d1   : > { %7796 = vst.msk [vmem:[%s11933_s6 + $0x850] sm:$0xf] %vm7263_vm0, %v9443_v28  ;;  %7797 = vst.msk [vmem:[%s11933_s6 + $0x854] sm:$0xf] %vm7263_vm0, %v9444_v49  ;;  %v10777_v40 = vunpack.c.l.bf16 %v11532_v23  ;;  %v10778_v41 = vunpack.c.h.bf16 %v11532_v23  ;;  %v2304_v42 = vmul.f32 %v14132_v45, %v10769_v34  ;;  %v2305_v44 = vmul.f32 %v14132_v45, %v10770_v35 }
 0x2d2   : > { %7798 = vst.msk [vmem:[%s11933_s6 + $0x858] sm:$0xf] %vm7263_vm0, %v9445_v30  ;;  %7799 = vst.msk [vmem:[%s11933_s6 + $0x85c] sm:$0xf] %vm7263_vm0, %v9446_v32  ;;  %v10781_v46 = vunpack.c.l.bf16 %v11533_v29  ;;  %v10782_v47 = vunpack.c.h.bf16 %v11533_v29  ;;  %v2306_v48 = vmul.f32 %v14132_v45, %v10773_v36  ;;  %v2307_v50 = vmul.f32 %v14132_v45, %v10774_v38 }
 0x2d3   : > { %v2308_v51 = vmul.f32 %v14132_v45, %v10777_v40  ;;  %v2309_v52 = vmul.f32 %v14132_v45, %v10778_v41  ;;  %v3095_v53 = vadd.f32 %v14143_v55, %v2304_v42  ;;  %v3096_v54 = vadd.f32 %v14143_v55, %v2305_v44 }
 0x2d4   : > { %v2310_v56 = vmul.f32 %v14132_v45, %v10781_v46  ;;  %v2311_v1 = vmul.f32 %v14132_v45, %v10782_v47  ;;  %v3097_v57 = vadd.f32 %v14143_v55, %v2306_v48  ;;  %v3098_v58 = vadd.f32 %v14143_v55, %v2307_v50 }
 0x2d5   : > { %v3099_v59 = vadd.f32 %v14143_v55, %v2308_v51  ;;  %v3100_v60 = vadd.f32 %v14143_v55, %v2309_v52  ;;  %v3879_v61 = vmax.f32 %v3095_v53, 0.0  ;;  %v3880_v16 = vmax.f32 %v3096_v54, 0.0  ;;  %v11538_v51 = vld [vmem:[%s11889_s29 + $0x8a0] sm:$0xff]  }
 0x2d6   : > { %v3101_v62 = vadd.f32 %v14143_v55, %v2310_v56  ;;  %v3102_v63 = vadd.f32 %v14143_v55, %v2311_v1  ;;  %v3881_v0 = vmax.f32 %v3097_v57, 0.0  ;;  %v3882_v2 = vmax.f32 %v3098_v58, 0.0  ;;  %v11539_v1 = vld [vmem:[%s11889_s29 + $0x8a8] sm:$0xff]   ;;  %v11540_v57 = vld [vmem:[%s11889_s29 + $0x8b0] sm:$0xff]  }
 0x2d7   : > { %v3883_v3 = vmax.f32 %v3099_v59, 0.0  ;;  %v3884_v21 = vmax.f32 %v3100_v60, 0.0  ;;  %v9447_v4 = vpack.c.bf16 %v3879_v61, %v3879_v61  ;;  %v9448_v5 = vpack.c.bf16 %v3880_v16, %v3880_v16  ;;  %v11541_v16 = vld [vmem:[%s11889_s29 + $0x8b8] sm:$0xff]  }
 0x2d8   : > { %v3885_v6 = vmax.f32 %v3101_v62, 0.0  ;;  %v3886_v8 = vmax.f32 %v3102_v63, 0.0  ;;  %v9449_v9 = vpack.c.bf16 %v3881_v0, %v3881_v0  ;;  %v9450_v10 = vpack.c.bf16 %v3882_v2, %v3882_v2 }
 0x2d9   : > { %v9451_v11 = vpack.c.bf16 %v3883_v3, %v3883_v3  ;;  %v9452_v12 = vpack.c.bf16 %v3884_v21, %v3884_v21  ;;  %7800 = vst.msk [vmem:[%s11933_s6 + $0x860] sm:$0xf] %vm7263_vm0, %v9447_v4  ;;  %7801 = vst.msk [vmem:[%s11933_s6 + $0x864] sm:$0xf] %vm7263_vm0, %v9448_v5  ;;  %v10785_v14 = vunpack.c.l.bf16 %v11534_v7  ;;  %v10786_v15 = vunpack.c.h.bf16 %v11534_v7 }
 0x2da   : > { %v9453_v31 = vpack.c.bf16 %v3885_v6, %v3885_v6  ;;  %v9454_v13 = vpack.c.bf16 %v3886_v8, %v3886_v8  ;;  %7802 = vst.msk [vmem:[%s11933_s6 + $0x868] sm:$0xf] %vm7263_vm0, %v9449_v9  ;;  %7803 = vst.msk [vmem:[%s11933_s6 + $0x86c] sm:$0xf] %vm7263_vm0, %v9450_v10  ;;  %v10789_v17 = vunpack.c.l.bf16 %v11535_v27  ;;  %v10790_v39 = vunpack.c.h.bf16 %v11535_v27 }
 0x2db   : > { %7804 = vst.msk [vmem:[%s11933_s6 + $0x870] sm:$0xf] %vm7263_vm0, %v9451_v11  ;;  %7805 = vst.msk [vmem:[%s11933_s6 + $0x874] sm:$0xf] %vm7263_vm0, %v9452_v12  ;;  %v10793_v37 = vunpack.c.l.bf16 %v11536_v25  ;;  %v10794_v18 = vunpack.c.h.bf16 %v11536_v25  ;;  %v2312_v19 = vmul.f32 %v14132_v45, %v10785_v14  ;;  %v2313_v20 = vmul.f32 %v14132_v45, %v10786_v15 }
 0x2dc   : > { %7806 = vst.msk [vmem:[%s11933_s6 + $0x878] sm:$0xf] %vm7263_vm0, %v9453_v31  ;;  %7807 = vst.msk [vmem:[%s11933_s6 + $0x87c] sm:$0xf] %vm7263_vm0, %v9454_v13  ;;  %v10797_v22 = vunpack.c.l.bf16 %v11537_v33  ;;  %v10798_v43 = vunpack.c.h.bf16 %v11537_v33  ;;  %v2314_v23 = vmul.f32 %v14132_v45, %v10789_v17  ;;  %v2315_v24 = vmul.f32 %v14132_v45, %v10790_v39 }
 0x2dd   : > { %v2316_v26 = vmul.f32 %v14132_v45, %v10793_v37  ;;  %v2317_v28 = vmul.f32 %v14132_v45, %v10794_v18  ;;  %v3103_v49 = vadd.f32 %v14143_v55, %v2312_v19  ;;  %v3104_v29 = vadd.f32 %v14143_v55, %v2313_v20 }
 0x2de   : > { %v2318_v30 = vmul.f32 %v14132_v45, %v10797_v22  ;;  %v2319_v32 = vmul.f32 %v14132_v45, %v10798_v43  ;;  %v3105_v34 = vadd.f32 %v14143_v55, %v2314_v23  ;;  %v3106_v35 = vadd.f32 %v14143_v55, %v2315_v24  ;;  %v11542_v24 = vld [vmem:[%s11889_s29 + $0x8c0] sm:$0xff]  }
 0x2df   : > { %v3107_v36 = vadd.f32 %v14143_v55, %v2316_v26  ;;  %v3108_v38 = vadd.f32 %v14143_v55, %v2317_v28  ;;  %v3887_v40 = vmax.f32 %v3103_v49, 0.0  ;;  %v3888_v41 = vmax.f32 %v3104_v29, 0.0 }
 0x2e0   : > { %v3109_v42 = vadd.f32 %v14143_v55, %v2318_v30  ;;  %v3110_v44 = vadd.f32 %v14143_v55, %v2319_v32  ;;  %v3889_v46 = vmax.f32 %v3105_v34, 0.0  ;;  %v3890_v47 = vmax.f32 %v3106_v35, 0.0  ;;  %v11543_v30 = vld [vmem:[%s11889_s29 + $0x8c8] sm:$0xff]   ;;  %v11544_v32 = vld [vmem:[%s11889_s29 + $0x8d0] sm:$0xff]  }
 0x2e1   : > { %v3891_v48 = vmax.f32 %v3107_v36, 0.0  ;;  %v3892_v50 = vmax.f32 %v3108_v38, 0.0  ;;  %v9455_v52 = vpack.c.bf16 %v3887_v40, %v3887_v40  ;;  %v9456_v53 = vpack.c.bf16 %v3888_v41, %v3888_v41  ;;  %v11545_v38 = vld [vmem:[%s11889_s29 + $0x8d8] sm:$0xff]  }
 0x2e2   : > { %v3893_v54 = vmax.f32 %v3109_v42, 0.0  ;;  %v3894_v56 = vmax.f32 %v3110_v44, 0.0  ;;  %v9457_v58 = vpack.c.bf16 %v3889_v46, %v3889_v46  ;;  %v9458_v59 = vpack.c.bf16 %v3890_v47, %v3890_v47 }
 0x2e3   : > { %v9459_v60 = vpack.c.bf16 %v3891_v48, %v3891_v48  ;;  %v9460_v61 = vpack.c.bf16 %v3892_v50, %v3892_v50  ;;  %7808 = vst.msk [vmem:[%s11933_s6 + $0x880] sm:$0xf] %vm7263_vm0, %v9455_v52  ;;  %7809 = vst.msk [vmem:[%s11933_s6 + $0x884] sm:$0xf] %vm7263_vm0, %v9456_v53  ;;  %v10801_v0 = vunpack.c.l.bf16 %v11538_v51  ;;  %v10802_v2 = vunpack.c.h.bf16 %v11538_v51  ;;  %v14502_v51 = vld [vmem:[%s15547_s1] ss:$0 sm:$0xff] }
 0x2e4   : > { %v9461_v62 = vpack.c.bf16 %v3893_v54, %v3893_v54  ;;  %v9462_v63 = vpack.c.bf16 %v3894_v56, %v3894_v56  ;;  %7810 = vst.msk [vmem:[%s11933_s6 + $0x888] sm:$0xf] %vm7263_vm0, %v9457_v58  ;;  %7811 = vst.msk [vmem:[%s11933_s6 + $0x88c] sm:$0xf] %vm7263_vm0, %v9458_v59  ;;  %v10805_v3 = vunpack.c.l.bf16 %v11539_v1  ;;  %v10806_v21 = vunpack.c.h.bf16 %v11539_v1 }
 0x2e5   : > { %7812 = vst.msk [vmem:[%s11933_s6 + $0x890] sm:$0xf] %vm7263_vm0, %v9459_v60  ;;  %7813 = vst.msk [vmem:[%s11933_s6 + $0x894] sm:$0xf] %vm7263_vm0, %v9460_v61  ;;  %v10809_v7 = vunpack.c.l.bf16 %v11540_v57  ;;  %v10810_v4 = vunpack.c.h.bf16 %v11540_v57  ;;  %v2320_v5 = vmul.f32 %v14132_v45, %v10801_v0  ;;  %v2321_v6 = vmul.f32 %v14132_v45, %v10802_v2  ;;  %v14513_v60 = vld [vmem:[%s15548_s2] ss:$0 sm:$0xff] }
 0x2e6   : > { %7814 = vst.msk [vmem:[%s11933_s6 + $0x898] sm:$0xf] %vm7263_vm0, %v9461_v62  ;;  %7815 = vst.msk [vmem:[%s11933_s6 + $0x89c] sm:$0xf] %vm7263_vm0, %v9462_v63  ;;  %v10813_v8 = vunpack.c.l.bf16 %v11541_v16  ;;  %v10814_v27 = vunpack.c.h.bf16 %v11541_v16  ;;  %v2322_v25 = vmul.f32 %v14132_v45, %v10805_v3  ;;  %v2323_v9 = vmul.f32 %v14132_v45, %v10806_v21 }
 0x2e7   : > { %v2324_v10 = vmul.f32 %v14132_v45, %v10809_v7  ;;  %v2325_v11 = vmul.f32 %v14132_v45, %v10810_v4  ;;  %v3111_v12 = vadd.f32 %v14143_v55, %v2320_v5  ;;  %v3112_v33 = vadd.f32 %v14143_v55, %v2321_v6 }
 0x2e8   : > { %v2326_v31 = vmul.f32 %v14132_v45, %v10813_v8  ;;  %v2327_v13 = vmul.f32 %v14132_v45, %v10814_v27  ;;  %v3113_v14 = vadd.f32 %v14143_v55, %v2322_v25  ;;  %v3114_v15 = vadd.f32 %v14143_v55, %v2323_v9 }
 0x2e9   : > { %v3115_v17 = vadd.f32 %v14143_v55, %v2324_v10  ;;  %v3116_v39 = vadd.f32 %v14143_v55, %v2325_v11  ;;  %v3895_v37 = vmax.f32 %v3111_v12, 0.0  ;;  %v3896_v18 = vmax.f32 %v3112_v33, 0.0  ;;  %v11546_v10 = vld [vmem:[%s11889_s29 + $0x8e0] sm:$0xff]  }
 0x2ea   : > { %v3117_v19 = vadd.f32 %v14143_v55, %v2326_v31  ;;  %v3118_v20 = vadd.f32 %v14143_v55, %v2327_v13  ;;  %v3897_v22 = vmax.f32 %v3113_v14, 0.0  ;;  %v3898_v45 = vmax.f32 %v3114_v15, 0.0  ;;  %v11547_v13 = vld [vmem:[%s11889_s29 + $0x8e8] sm:$0xff]   ;;  %v11548_v14 = vld [vmem:[%s11889_s29 + $0x8f0] sm:$0xff]  }
 0x2eb   : > { %v3899_v43 = vmax.f32 %v3115_v17, 0.0  ;;  %v3900_v23 = vmax.f32 %v3116_v39, 0.0  ;;  %v9463_v26 = vpack.c.bf16 %v3895_v37, %v3895_v37  ;;  %v9464_v28 = vpack.c.bf16 %v3896_v18, %v3896_v18  ;;  %v11549_v18 = vld [vmem:[%s11889_s29 + $0x8f8] sm:$0xff]  }
 0x2ec   : > { %v3901_v49 = vmax.f32 %v3117_v19, 0.0  ;;  %v3902_v29 = vmax.f32 %v3118_v20, 0.0  ;;  %v9465_v34 = vpack.c.bf16 %v3897_v22, %v3897_v22  ;;  %v9466_v55 = vpack.c.bf16 %v3898_v45, %v3898_v45 }
 0x2ed   : > { %v9467_v35 = vpack.c.bf16 %v3899_v43, %v3899_v43  ;;  %v9468_v36 = vpack.c.bf16 %v3900_v23, %v3900_v23  ;;  %7816 = vst.msk [vmem:[%s11933_s6 + $0x8a0] sm:$0xf] %vm7263_vm0, %v9463_v26  ;;  %7817 = vst.msk [vmem:[%s11933_s6 + $0x8a4] sm:$0xf] %vm7263_vm0, %v9464_v28  ;;  %v10817_v42 = vunpack.c.l.bf16 %v11542_v24  ;;  %v10818_v44 = vunpack.c.h.bf16 %v11542_v24 }
 0x2ee   : > { %v9469_v40 = vpack.c.bf16 %v3901_v49, %v3901_v49  ;;  %v9470_v41 = vpack.c.bf16 %v3902_v29, %v3902_v29  ;;  %7818 = vst.msk [vmem:[%s11933_s6 + $0x8a8] sm:$0xf] %vm7263_vm0, %v9465_v34  ;;  %7819 = vst.msk [vmem:[%s11933_s6 + $0x8ac] sm:$0xf] %vm7263_vm0, %v9466_v55  ;;  %v10821_v46 = vunpack.c.l.bf16 %v11543_v30  ;;  %v10822_v47 = vunpack.c.h.bf16 %v11543_v30 }
 0x2ef   : > { %7820 = vst.msk [vmem:[%s11933_s6 + $0x8b0] sm:$0xf] %vm7263_vm0, %v9467_v35  ;;  %7821 = vst.msk [vmem:[%s11933_s6 + $0x8b4] sm:$0xf] %vm7263_vm0, %v9468_v36  ;;  %v10825_v48 = vunpack.c.l.bf16 %v11544_v32  ;;  %v10826_v50 = vunpack.c.h.bf16 %v11544_v32  ;;  %v2328_v52 = vmul.f32 %v14502_v51, %v10817_v42  ;;  %v2329_v53 = vmul.f32 %v14502_v51, %v10818_v44 }
 0x2f0   : > { %7822 = vst.msk [vmem:[%s11933_s6 + $0x8b8] sm:$0xf] %vm7263_vm0, %v9469_v40  ;;  %7823 = vst.msk [vmem:[%s11933_s6 + $0x8bc] sm:$0xf] %vm7263_vm0, %v9470_v41  ;;  %v10829_v54 = vunpack.c.l.bf16 %v11545_v38  ;;  %v10830_v56 = vunpack.c.h.bf16 %v11545_v38  ;;  %v2330_v1 = vmul.f32 %v14502_v51, %v10821_v46  ;;  %v2331_v57 = vmul.f32 %v14502_v51, %v10822_v47 }
 0x2f1   : > { %v2332_v58 = vmul.f32 %v14502_v51, %v10825_v48  ;;  %v2333_v59 = vmul.f32 %v14502_v51, %v10826_v50  ;;  %v3119_v61 = vadd.f32 %v14513_v60, %v2328_v52  ;;  %v3120_v16 = vadd.f32 %v14513_v60, %v2329_v53 }
 0x2f2   : > { %v2334_v62 = vmul.f32 %v14502_v51, %v10829_v54  ;;  %v2335_v63 = vmul.f32 %v14502_v51, %v10830_v56  ;;  %v3121_v0 = vadd.f32 %v14513_v60, %v2330_v1  ;;  %v3122_v2 = vadd.f32 %v14513_v60, %v2331_v57 }
 0x2f3   : > { %v3123_v3 = vadd.f32 %v14513_v60, %v2332_v58  ;;  %v3124_v21 = vadd.f32 %v14513_v60, %v2333_v59  ;;  %v3903_v7 = vmax.f32 %v3119_v61, 0.0  ;;  %v3904_v4 = vmax.f32 %v3120_v16, 0.0  ;;  %v11550_v58 = vld [vmem:[%s11889_s29 + $0x900] sm:$0xff]  }
 0x2f4   : > { %v3125_v5 = vadd.f32 %v14513_v60, %v2334_v62  ;;  %v3126_v6 = vadd.f32 %v14513_v60, %v2335_v63  ;;  %v3905_v8 = vmax.f32 %v3121_v0, 0.0  ;;  %v3906_v27 = vmax.f32 %v3122_v2, 0.0  ;;  %v11551_v63 = vld [vmem:[%s11889_s29 + $0x908] sm:$0xff]   ;;  %v11552_v0 = vld [vmem:[%s11889_s29 + $0x910] sm:$0xff]  }
 0x2f5   : > { %v3907_v25 = vmax.f32 %v3123_v3, 0.0  ;;  %v3908_v9 = vmax.f32 %v3124_v21, 0.0  ;;  %v9471_v11 = vpack.c.bf16 %v3903_v7, %v3903_v7  ;;  %v9472_v12 = vpack.c.bf16 %v3904_v4, %v3904_v4  ;;  %v11553_v4 = vld [vmem:[%s11889_s29 + $0x918] sm:$0xff]  }
 0x2f6   : > { %v3909_v33 = vmax.f32 %v3125_v5, 0.0  ;;  %v3910_v31 = vmax.f32 %v3126_v6, 0.0  ;;  %v9473_v15 = vpack.c.bf16 %v3905_v8, %v3905_v8  ;;  %v9474_v17 = vpack.c.bf16 %v3906_v27, %v3906_v27 }
 0x2f7   : > { %v9475_v39 = vpack.c.bf16 %v3907_v25, %v3907_v25  ;;  %v9476_v37 = vpack.c.bf16 %v3908_v9, %v3908_v9  ;;  %7824 = vst.msk [vmem:[%s11933_s6 + $0x8c0] sm:$0xf] %vm7263_vm0, %v9471_v11  ;;  %7825 = vst.msk [vmem:[%s11933_s6 + $0x8c4] sm:$0xf] %vm7263_vm0, %v9472_v12  ;;  %v10833_v22 = vunpack.c.l.bf16 %v11546_v10  ;;  %v10834_v45 = vunpack.c.h.bf16 %v11546_v10 }
 0x2f8   : > { %v9477_v19 = vpack.c.bf16 %v3909_v33, %v3909_v33  ;;  %v9478_v20 = vpack.c.bf16 %v3910_v31, %v3910_v31  ;;  %7826 = vst.msk [vmem:[%s11933_s6 + $0x8c8] sm:$0xf] %vm7263_vm0, %v9473_v15  ;;  %7827 = vst.msk [vmem:[%s11933_s6 + $0x8cc] sm:$0xf] %vm7263_vm0, %v9474_v17  ;;  %v10837_v43 = vunpack.c.l.bf16 %v11547_v13  ;;  %v10838_v23 = vunpack.c.h.bf16 %v11547_v13 }
 0x2f9   : > { %7828 = vst.msk [vmem:[%s11933_s6 + $0x8d0] sm:$0xf] %vm7263_vm0, %v9475_v39  ;;  %7829 = vst.msk [vmem:[%s11933_s6 + $0x8d4] sm:$0xf] %vm7263_vm0, %v9476_v37  ;;  %v10841_v24 = vunpack.c.l.bf16 %v11548_v14  ;;  %v10842_v26 = vunpack.c.h.bf16 %v11548_v14  ;;  %v2336_v28 = vmul.f32 %v14502_v51, %v10833_v22  ;;  %v2337_v49 = vmul.f32 %v14502_v51, %v10834_v45 }
 0x2fa   : > { %7830 = vst.msk [vmem:[%s11933_s6 + $0x8d8] sm:$0xf] %vm7263_vm0, %v9477_v19  ;;  %7831 = vst.msk [vmem:[%s11933_s6 + $0x8dc] sm:$0xf] %vm7263_vm0, %v9478_v20  ;;  %v10845_v29 = vunpack.c.l.bf16 %v11549_v18  ;;  %v10846_v30 = vunpack.c.h.bf16 %v11549_v18  ;;  %v2338_v32 = vmul.f32 %v14502_v51, %v10837_v43  ;;  %v2339_v34 = vmul.f32 %v14502_v51, %v10838_v23 }
 0x2fb   : > { %v2340_v55 = vmul.f32 %v14502_v51, %v10841_v24  ;;  %v2341_v35 = vmul.f32 %v14502_v51, %v10842_v26  ;;  %v3127_v36 = vadd.f32 %v14513_v60, %v2336_v28  ;;  %v3128_v38 = vadd.f32 %v14513_v60, %v2337_v49 }
 0x2fc   : > { %v2342_v40 = vmul.f32 %v14502_v51, %v10845_v29  ;;  %v2343_v41 = vmul.f32 %v14502_v51, %v10846_v30  ;;  %v3129_v42 = vadd.f32 %v14513_v60, %v2338_v32  ;;  %v3130_v44 = vadd.f32 %v14513_v60, %v2339_v34 }
 0x2fd   : > { %v3131_v46 = vadd.f32 %v14513_v60, %v2340_v55  ;;  %v3132_v47 = vadd.f32 %v14513_v60, %v2341_v35  ;;  %v3911_v48 = vmax.f32 %v3127_v36, 0.0  ;;  %v3912_v50 = vmax.f32 %v3128_v38, 0.0  ;;  %v11554_v55 = vld [vmem:[%s11889_s29 + $0x920] sm:$0xff]  }
 0x2fe   : > { %v3133_v52 = vadd.f32 %v14513_v60, %v2342_v40  ;;  %v3134_v53 = vadd.f32 %v14513_v60, %v2343_v41  ;;  %v3913_v54 = vmax.f32 %v3129_v42, 0.0  ;;  %v3914_v56 = vmax.f32 %v3130_v44, 0.0  ;;  %v11555_v41 = vld [vmem:[%s11889_s29 + $0x928] sm:$0xff]   ;;  %v11556_v42 = vld [vmem:[%s11889_s29 + $0x930] sm:$0xff]  }
 0x2ff   : > { %v3915_v1 = vmax.f32 %v3131_v46, 0.0  ;;  %v3916_v57 = vmax.f32 %v3132_v47, 0.0  ;;  %v9479_v59 = vpack.c.bf16 %v3911_v48, %v3911_v48  ;;  %v9480_v61 = vpack.c.bf16 %v3912_v50, %v3912_v50  ;;  %v11557_v50 = vld [vmem:[%s11889_s29 + $0x938] sm:$0xff]  }
 0x300   : > { %v3917_v16 = vmax.f32 %v3133_v52, 0.0  ;;  %v3918_v62 = vmax.f32 %v3134_v53, 0.0  ;;  %v9481_v2 = vpack.c.bf16 %v3913_v54, %v3913_v54  ;;  %v9482_v3 = vpack.c.bf16 %v3914_v56, %v3914_v56 }
 0x301   : > { %v9483_v21 = vpack.c.bf16 %v3915_v1, %v3915_v1  ;;  %v9484_v7 = vpack.c.bf16 %v3916_v57, %v3916_v57  ;;  %7832 = vst.msk [vmem:[%s11933_s6 + $0x8e0] sm:$0xf] %vm7263_vm0, %v9479_v59  ;;  %7833 = vst.msk [vmem:[%s11933_s6 + $0x8e4] sm:$0xf] %vm7263_vm0, %v9480_v61  ;;  %v10849_v8 = vunpack.c.l.bf16 %v11550_v58  ;;  %v10850_v27 = vunpack.c.h.bf16 %v11550_v58 }
 0x302   : > { %v9485_v5 = vpack.c.bf16 %v3917_v16, %v3917_v16  ;;  %v9486_v6 = vpack.c.bf16 %v3918_v62, %v3918_v62  ;;  %7834 = vst.msk [vmem:[%s11933_s6 + $0x8e8] sm:$0xf] %vm7263_vm0, %v9481_v2  ;;  %7835 = vst.msk [vmem:[%s11933_s6 + $0x8ec] sm:$0xf] %vm7263_vm0, %v9482_v3  ;;  %v10853_v25 = vunpack.c.l.bf16 %v11551_v63  ;;  %v10854_v9 = vunpack.c.h.bf16 %v11551_v63 }
 0x303   : > { %7836 = vst.msk [vmem:[%s11933_s6 + $0x8f0] sm:$0xf] %vm7263_vm0, %v9483_v21  ;;  %7837 = vst.msk [vmem:[%s11933_s6 + $0x8f4] sm:$0xf] %vm7263_vm0, %v9484_v7  ;;  %v10857_v10 = vunpack.c.l.bf16 %v11552_v0  ;;  %v10858_v11 = vunpack.c.h.bf16 %v11552_v0  ;;  %v2344_v12 = vmul.f32 %v14502_v51, %v10849_v8  ;;  %v2345_v33 = vmul.f32 %v14502_v51, %v10850_v27 }
 0x304   : > { %7838 = vst.msk [vmem:[%s11933_s6 + $0x8f8] sm:$0xf] %vm7263_vm0, %v9485_v5  ;;  %7839 = vst.msk [vmem:[%s11933_s6 + $0x8fc] sm:$0xf] %vm7263_vm0, %v9486_v6  ;;  %v10861_v31 = vunpack.c.l.bf16 %v11553_v4  ;;  %v10862_v13 = vunpack.c.h.bf16 %v11553_v4  ;;  %v2346_v14 = vmul.f32 %v14502_v51, %v10853_v25  ;;  %v2347_v15 = vmul.f32 %v14502_v51, %v10854_v9 }
 0x305   : > { %v2348_v17 = vmul.f32 %v14502_v51, %v10857_v10  ;;  %v2349_v39 = vmul.f32 %v14502_v51, %v10858_v11  ;;  %v3135_v37 = vadd.f32 %v14513_v60, %v2344_v12  ;;  %v3136_v18 = vadd.f32 %v14513_v60, %v2345_v33 }
 0x306   : > { %v2350_v19 = vmul.f32 %v14502_v51, %v10861_v31  ;;  %v2351_v20 = vmul.f32 %v14502_v51, %v10862_v13  ;;  %v3137_v22 = vadd.f32 %v14513_v60, %v2346_v14  ;;  %v3138_v45 = vadd.f32 %v14513_v60, %v2347_v15 }
 0x307   : > { %v3139_v43 = vadd.f32 %v14513_v60, %v2348_v17  ;;  %v3140_v23 = vadd.f32 %v14513_v60, %v2349_v39  ;;  %v3919_v24 = vmax.f32 %v3135_v37, 0.0  ;;  %v3920_v26 = vmax.f32 %v3136_v18, 0.0  ;;  %v11558_v17 = vld [vmem:[%s11889_s29 + $0x940] sm:$0xff]  }
 0x308   : > { %v3141_v28 = vadd.f32 %v14513_v60, %v2350_v19  ;;  %v3142_v49 = vadd.f32 %v14513_v60, %v2351_v20  ;;  %v3921_v29 = vmax.f32 %v3137_v22, 0.0  ;;  %v3922_v30 = vmax.f32 %v3138_v45, 0.0  ;;  %v11559_v20 = vld [vmem:[%s11889_s29 + $0x948] sm:$0xff]   ;;  %v11560_v22 = vld [vmem:[%s11889_s29 + $0x950] sm:$0xff]  }
 0x309   : > { %v3923_v32 = vmax.f32 %v3139_v43, 0.0  ;;  %v3924_v34 = vmax.f32 %v3140_v23, 0.0  ;;  %v9487_v35 = vpack.c.bf16 %v3919_v24, %v3919_v24  ;;  %v9488_v36 = vpack.c.bf16 %v3920_v26, %v3920_v26  ;;  %v11561_v26 = vld [vmem:[%s11889_s29 + $0x958] sm:$0xff]  }
 0x30a   : > { %v3925_v38 = vmax.f32 %v3141_v28, 0.0  ;;  %v3926_v40 = vmax.f32 %v3142_v49, 0.0  ;;  %v9489_v44 = vpack.c.bf16 %v3921_v29, %v3921_v29  ;;  %v9490_v46 = vpack.c.bf16 %v3922_v30, %v3922_v30 }
 0x30b   : > { %v9491_v47 = vpack.c.bf16 %v3923_v32, %v3923_v32  ;;  %v9492_v48 = vpack.c.bf16 %v3924_v34, %v3924_v34  ;;  %7840 = vst.msk [vmem:[%s11933_s6 + $0x900] sm:$0xf] %vm7263_vm0, %v9487_v35  ;;  %7841 = vst.msk [vmem:[%s11933_s6 + $0x904] sm:$0xf] %vm7263_vm0, %v9488_v36  ;;  %v10865_v54 = vunpack.c.l.bf16 %v11554_v55  ;;  %v10866_v56 = vunpack.c.h.bf16 %v11554_v55 }
 0x30c   : > { %v9493_v52 = vpack.c.bf16 %v3925_v38, %v3925_v38  ;;  %v9494_v53 = vpack.c.bf16 %v3926_v40, %v3926_v40  ;;  %7842 = vst.msk [vmem:[%s11933_s6 + $0x908] sm:$0xf] %vm7263_vm0, %v9489_v44  ;;  %7843 = vst.msk [vmem:[%s11933_s6 + $0x90c] sm:$0xf] %vm7263_vm0, %v9490_v46  ;;  %v10869_v1 = vunpack.c.l.bf16 %v11555_v41  ;;  %v10870_v57 = vunpack.c.h.bf16 %v11555_v41 }
 0x30d   : > { %7844 = vst.msk [vmem:[%s11933_s6 + $0x910] sm:$0xf] %vm7263_vm0, %v9491_v47  ;;  %7845 = vst.msk [vmem:[%s11933_s6 + $0x914] sm:$0xf] %vm7263_vm0, %v9492_v48  ;;  %v10873_v58 = vunpack.c.l.bf16 %v11556_v42  ;;  %v10874_v59 = vunpack.c.h.bf16 %v11556_v42  ;;  %v2352_v61 = vmul.f32 %v14502_v51, %v10865_v54  ;;  %v2353_v16 = vmul.f32 %v14502_v51, %v10866_v56 }
 0x30e   : > { %7846 = vst.msk [vmem:[%s11933_s6 + $0x918] sm:$0xf] %vm7263_vm0, %v9493_v52  ;;  %7847 = vst.msk [vmem:[%s11933_s6 + $0x91c] sm:$0xf] %vm7263_vm0, %v9494_v53  ;;  %v10877_v62 = vunpack.c.l.bf16 %v11557_v50  ;;  %v10878_v63 = vunpack.c.h.bf16 %v11557_v50  ;;  %v2354_v0 = vmul.f32 %v14502_v51, %v10869_v1  ;;  %v2355_v2 = vmul.f32 %v14502_v51, %v10870_v57 }
 0x30f   : > { %v2356_v3 = vmul.f32 %v14502_v51, %v10873_v58  ;;  %v2357_v21 = vmul.f32 %v14502_v51, %v10874_v59  ;;  %v3143_v7 = vadd.f32 %v14513_v60, %v2352_v61  ;;  %v3144_v4 = vadd.f32 %v14513_v60, %v2353_v16 }
 0x310   : > { %v2358_v5 = vmul.f32 %v14502_v51, %v10877_v62  ;;  %v2359_v6 = vmul.f32 %v14502_v51, %v10878_v63  ;;  %v3145_v8 = vadd.f32 %v14513_v60, %v2354_v0  ;;  %v3146_v27 = vadd.f32 %v14513_v60, %v2355_v2 }
 0x311   : > { %v3147_v25 = vadd.f32 %v14513_v60, %v2356_v3  ;;  %v3148_v9 = vadd.f32 %v14513_v60, %v2357_v21  ;;  %v3927_v10 = vmax.f32 %v3143_v7, 0.0  ;;  %v3928_v11 = vmax.f32 %v3144_v4, 0.0  ;;  %v11562_v3 = vld [vmem:[%s11889_s29 + $0x960] sm:$0xff]  }
 0x312   : > { %v3149_v12 = vadd.f32 %v14513_v60, %v2358_v5  ;;  %v3150_v33 = vadd.f32 %v14513_v60, %v2359_v6  ;;  %v3929_v31 = vmax.f32 %v3145_v8, 0.0  ;;  %v3930_v13 = vmax.f32 %v3146_v27, 0.0  ;;  %v11563_v6 = vld [vmem:[%s11889_s29 + $0x968] sm:$0xff]   ;;  %v11564_v8 = vld [vmem:[%s11889_s29 + $0x970] sm:$0xff]  }
 0x313   : > { %v3931_v14 = vmax.f32 %v3147_v25, 0.0  ;;  %v3932_v15 = vmax.f32 %v3148_v9, 0.0  ;;  %v9495_v39 = vpack.c.bf16 %v3927_v10, %v3927_v10  ;;  %v9496_v37 = vpack.c.bf16 %v3928_v11, %v3928_v11  ;;  %v11565_v11 = vld [vmem:[%s11889_s29 + $0x978] sm:$0xff]  }
 0x314   : > { %v3933_v18 = vmax.f32 %v3149_v12, 0.0  ;;  %v3934_v19 = vmax.f32 %v3150_v33, 0.0  ;;  %v9497_v45 = vpack.c.bf16 %v3929_v31, %v3929_v31  ;;  %v9498_v43 = vpack.c.bf16 %v3930_v13, %v3930_v13 }
 0x315   : > { %v9499_v23 = vpack.c.bf16 %v3931_v14, %v3931_v14  ;;  %v9500_v24 = vpack.c.bf16 %v3932_v15, %v3932_v15  ;;  %7848 = vst.msk [vmem:[%s11933_s6 + $0x920] sm:$0xf] %vm7263_vm0, %v9495_v39  ;;  %7849 = vst.msk [vmem:[%s11933_s6 + $0x924] sm:$0xf] %vm7263_vm0, %v9496_v37  ;;  %v10881_v29 = vunpack.c.l.bf16 %v11558_v17  ;;  %v10882_v30 = vunpack.c.h.bf16 %v11558_v17 }
 0x316   : > { %v9501_v28 = vpack.c.bf16 %v3933_v18, %v3933_v18  ;;  %v9502_v49 = vpack.c.bf16 %v3934_v19, %v3934_v19  ;;  %7850 = vst.msk [vmem:[%s11933_s6 + $0x928] sm:$0xf] %vm7263_vm0, %v9497_v45  ;;  %7851 = vst.msk [vmem:[%s11933_s6 + $0x92c] sm:$0xf] %vm7263_vm0, %v9498_v43  ;;  %v10885_v32 = vunpack.c.l.bf16 %v11559_v20  ;;  %v10886_v34 = vunpack.c.h.bf16 %v11559_v20 }
 0x317   : > { %7852 = vst.msk [vmem:[%s11933_s6 + $0x930] sm:$0xf] %vm7263_vm0, %v9499_v23  ;;  %7853 = vst.msk [vmem:[%s11933_s6 + $0x934] sm:$0xf] %vm7263_vm0, %v9500_v24  ;;  %v10889_v55 = vunpack.c.l.bf16 %v11560_v22  ;;  %v10890_v35 = vunpack.c.h.bf16 %v11560_v22  ;;  %v2360_v36 = vmul.f32 %v14502_v51, %v10881_v29  ;;  %v2361_v38 = vmul.f32 %v14502_v51, %v10882_v30 }
 0x318   : > { %7854 = vst.msk [vmem:[%s11933_s6 + $0x938] sm:$0xf] %vm7263_vm0, %v9501_v28  ;;  %7855 = vst.msk [vmem:[%s11933_s6 + $0x93c] sm:$0xf] %vm7263_vm0, %v9502_v49  ;;  %v10893_v40 = vunpack.c.l.bf16 %v11561_v26  ;;  %v10894_v41 = vunpack.c.h.bf16 %v11561_v26  ;;  %v2362_v42 = vmul.f32 %v14502_v51, %v10885_v32  ;;  %v2363_v44 = vmul.f32 %v14502_v51, %v10886_v34 }
 0x319   : > { %v2364_v46 = vmul.f32 %v14502_v51, %v10889_v55  ;;  %v2365_v47 = vmul.f32 %v14502_v51, %v10890_v35  ;;  %v3151_v48 = vadd.f32 %v14513_v60, %v2360_v36  ;;  %v3152_v50 = vadd.f32 %v14513_v60, %v2361_v38 }
 0x31a   : > { %v2366_v52 = vmul.f32 %v14502_v51, %v10893_v40  ;;  %v2367_v53 = vmul.f32 %v14502_v51, %v10894_v41  ;;  %v3153_v54 = vadd.f32 %v14513_v60, %v2362_v42  ;;  %v3154_v56 = vadd.f32 %v14513_v60, %v2363_v44 }
 0x31b   : > { %v3155_v1 = vadd.f32 %v14513_v60, %v2364_v46  ;;  %v3156_v57 = vadd.f32 %v14513_v60, %v2365_v47  ;;  %v3935_v58 = vmax.f32 %v3151_v48, 0.0  ;;  %v3936_v59 = vmax.f32 %v3152_v50, 0.0  ;;  %v11566_v46 = vld [vmem:[%s11889_s29 + $0x980] sm:$0xff]  }
 0x31c   : > { %v3157_v61 = vadd.f32 %v14513_v60, %v2366_v52  ;;  %v3158_v16 = vadd.f32 %v14513_v60, %v2367_v53  ;;  %v3937_v62 = vmax.f32 %v3153_v54, 0.0  ;;  %v3938_v63 = vmax.f32 %v3154_v56, 0.0  ;;  %v11567_v53 = vld [vmem:[%s11889_s29 + $0x988] sm:$0xff]   ;;  %v11568_v54 = vld [vmem:[%s11889_s29 + $0x990] sm:$0xff]  }
 0x31d   : > { %v3939_v0 = vmax.f32 %v3155_v1, 0.0  ;;  %v3940_v2 = vmax.f32 %v3156_v57, 0.0  ;;  %v9503_v21 = vpack.c.bf16 %v3935_v58, %v3935_v58  ;;  %v9504_v7 = vpack.c.bf16 %v3936_v59, %v3936_v59  ;;  %v11569_v59 = vld [vmem:[%s11889_s29 + $0x998] sm:$0xff]  }
 0x31e   : > { %v3941_v4 = vmax.f32 %v3157_v61, 0.0  ;;  %v3942_v5 = vmax.f32 %v3158_v16, 0.0  ;;  %v9505_v27 = vpack.c.bf16 %v3937_v62, %v3937_v62  ;;  %v9506_v25 = vpack.c.bf16 %v3938_v63, %v3938_v63 }
 0x31f   : > { %v9507_v9 = vpack.c.bf16 %v3939_v0, %v3939_v0  ;;  %v9508_v10 = vpack.c.bf16 %v3940_v2, %v3940_v2  ;;  %7856 = vst.msk [vmem:[%s11933_s6 + $0x940] sm:$0xf] %vm7263_vm0, %v9503_v21  ;;  %7857 = vst.msk [vmem:[%s11933_s6 + $0x944] sm:$0xf] %vm7263_vm0, %v9504_v7  ;;  %v10897_v31 = vunpack.c.l.bf16 %v11562_v3  ;;  %v10898_v13 = vunpack.c.h.bf16 %v11562_v3 }
 0x320   : > { %v9509_v12 = vpack.c.bf16 %v3941_v4, %v3941_v4  ;;  %v9510_v33 = vpack.c.bf16 %v3942_v5, %v3942_v5  ;;  %7858 = vst.msk [vmem:[%s11933_s6 + $0x948] sm:$0xf] %vm7263_vm0, %v9505_v27  ;;  %7859 = vst.msk [vmem:[%s11933_s6 + $0x94c] sm:$0xf] %vm7263_vm0, %v9506_v25  ;;  %v10901_v14 = vunpack.c.l.bf16 %v11563_v6  ;;  %v10902_v15 = vunpack.c.h.bf16 %v11563_v6 }
 0x321   : > { %7860 = vst.msk [vmem:[%s11933_s6 + $0x950] sm:$0xf] %vm7263_vm0, %v9507_v9  ;;  %7861 = vst.msk [vmem:[%s11933_s6 + $0x954] sm:$0xf] %vm7263_vm0, %v9508_v10  ;;  %v10905_v17 = vunpack.c.l.bf16 %v11564_v8  ;;  %v10906_v39 = vunpack.c.h.bf16 %v11564_v8  ;;  %v2368_v37 = vmul.f32 %v14502_v51, %v10897_v31  ;;  %v2369_v18 = vmul.f32 %v14502_v51, %v10898_v13 }
 0x322   : > { %7862 = vst.msk [vmem:[%s11933_s6 + $0x958] sm:$0xf] %vm7263_vm0, %v9509_v12  ;;  %7863 = vst.msk [vmem:[%s11933_s6 + $0x95c] sm:$0xf] %vm7263_vm0, %v9510_v33  ;;  %v10909_v19 = vunpack.c.l.bf16 %v11565_v11  ;;  %v10910_v20 = vunpack.c.h.bf16 %v11565_v11  ;;  %v2370_v22 = vmul.f32 %v14502_v51, %v10901_v14  ;;  %v2371_v45 = vmul.f32 %v14502_v51, %v10902_v15 }
 0x323   : > { %v2372_v43 = vmul.f32 %v14502_v51, %v10905_v17  ;;  %v2373_v23 = vmul.f32 %v14502_v51, %v10906_v39  ;;  %v3159_v24 = vadd.f32 %v14513_v60, %v2368_v37  ;;  %v3160_v26 = vadd.f32 %v14513_v60, %v2369_v18 }
 0x324   : > { %v2374_v28 = vmul.f32 %v14502_v51, %v10909_v19  ;;  %v2375_v49 = vmul.f32 %v14502_v51, %v10910_v20  ;;  %v3161_v29 = vadd.f32 %v14513_v60, %v2370_v22  ;;  %v3162_v30 = vadd.f32 %v14513_v60, %v2371_v45 }
 0x325   : > { %v3163_v32 = vadd.f32 %v14513_v60, %v2372_v43  ;;  %v3164_v34 = vadd.f32 %v14513_v60, %v2373_v23  ;;  %v3943_v55 = vmax.f32 %v3159_v24, 0.0  ;;  %v3944_v35 = vmax.f32 %v3160_v26, 0.0  ;;  %v11570_v43 = vld [vmem:[%s11889_s29 + $0x9a0] sm:$0xff]  }
 0x326   : > { %v3165_v36 = vadd.f32 %v14513_v60, %v2374_v28  ;;  %v3166_v38 = vadd.f32 %v14513_v60, %v2375_v49  ;;  %v3945_v40 = vmax.f32 %v3161_v29, 0.0  ;;  %v3946_v41 = vmax.f32 %v3162_v30, 0.0  ;;  %v11571_v49 = vld [vmem:[%s11889_s29 + $0x9a8] sm:$0xff]   ;;  %v11572_v29 = vld [vmem:[%s11889_s29 + $0x9b0] sm:$0xff]  }
 0x327   : > { %v3947_v42 = vmax.f32 %v3163_v32, 0.0  ;;  %v3948_v44 = vmax.f32 %v3164_v34, 0.0  ;;  %v9511_v47 = vpack.c.bf16 %v3943_v55, %v3943_v55  ;;  %v9512_v48 = vpack.c.bf16 %v3944_v35, %v3944_v35  ;;  %v11573_v35 = vld [vmem:[%s11889_s29 + $0x9b8] sm:$0xff]  }
 0x328   : > { %v3949_v50 = vmax.f32 %v3165_v36, 0.0  ;;  %v3950_v52 = vmax.f32 %v3166_v38, 0.0  ;;  %v9513_v56 = vpack.c.bf16 %v3945_v40, %v3945_v40  ;;  %v9514_v1 = vpack.c.bf16 %v3946_v41, %v3946_v41 }
 0x329   : > { %v9515_v57 = vpack.c.bf16 %v3947_v42, %v3947_v42  ;;  %v9516_v58 = vpack.c.bf16 %v3948_v44, %v3948_v44  ;;  %7864 = vst.msk [vmem:[%s11933_s6 + $0x960] sm:$0xf] %vm7263_vm0, %v9511_v47  ;;  %7865 = vst.msk [vmem:[%s11933_s6 + $0x964] sm:$0xf] %vm7263_vm0, %v9512_v48  ;;  %v10913_v62 = vunpack.c.l.bf16 %v11566_v46  ;;  %v10914_v63 = vunpack.c.h.bf16 %v11566_v46 }
 0x32a   : > { %v9517_v61 = vpack.c.bf16 %v3949_v50, %v3949_v50  ;;  %v9518_v16 = vpack.c.bf16 %v3950_v52, %v3950_v52  ;;  %7866 = vst.msk [vmem:[%s11933_s6 + $0x968] sm:$0xf] %vm7263_vm0, %v9513_v56  ;;  %7867 = vst.msk [vmem:[%s11933_s6 + $0x96c] sm:$0xf] %vm7263_vm0, %v9514_v1  ;;  %v10917_v0 = vunpack.c.l.bf16 %v11567_v53  ;;  %v10918_v2 = vunpack.c.h.bf16 %v11567_v53 }
 0x32b   : > { %7868 = vst.msk [vmem:[%s11933_s6 + $0x970] sm:$0xf] %vm7263_vm0, %v9515_v57  ;;  %7869 = vst.msk [vmem:[%s11933_s6 + $0x974] sm:$0xf] %vm7263_vm0, %v9516_v58  ;;  %v10921_v3 = vunpack.c.l.bf16 %v11568_v54  ;;  %v10922_v21 = vunpack.c.h.bf16 %v11568_v54  ;;  %v2376_v7 = vmul.f32 %v14502_v51, %v10913_v62  ;;  %v2377_v4 = vmul.f32 %v14502_v51, %v10914_v63 }
 0x32c   : > { %7870 = vst.msk [vmem:[%s11933_s6 + $0x978] sm:$0xf] %vm7263_vm0, %v9517_v61  ;;  %7871 = vst.msk [vmem:[%s11933_s6 + $0x97c] sm:$0xf] %vm7263_vm0, %v9518_v16  ;;  %v10925_v5 = vunpack.c.l.bf16 %v11569_v59  ;;  %v10926_v6 = vunpack.c.h.bf16 %v11569_v59  ;;  %v2378_v8 = vmul.f32 %v14502_v51, %v10917_v0  ;;  %v2379_v27 = vmul.f32 %v14502_v51, %v10918_v2 }
 0x32d   : > { %v2380_v25 = vmul.f32 %v14502_v51, %v10921_v3  ;;  %v2381_v9 = vmul.f32 %v14502_v51, %v10922_v21  ;;  %v3167_v10 = vadd.f32 %v14513_v60, %v2376_v7  ;;  %v3168_v11 = vadd.f32 %v14513_v60, %v2377_v4 }
 0x32e   : > { %v2382_v12 = vmul.f32 %v14502_v51, %v10925_v5  ;;  %v2383_v33 = vmul.f32 %v14502_v51, %v10926_v6  ;;  %v3169_v31 = vadd.f32 %v14513_v60, %v2378_v8  ;;  %v3170_v13 = vadd.f32 %v14513_v60, %v2379_v27 }
 0x32f   : > { %v3171_v14 = vadd.f32 %v14513_v60, %v2380_v25  ;;  %v3172_v15 = vadd.f32 %v14513_v60, %v2381_v9  ;;  %v3951_v17 = vmax.f32 %v3167_v10, 0.0  ;;  %v3952_v39 = vmax.f32 %v3168_v11, 0.0  ;;  %v11574_v25 = vld [vmem:[%s11889_s29 + $0x9c0] sm:$0xff]  }
 0x330   : > { %v3173_v37 = vadd.f32 %v14513_v60, %v2382_v12  ;;  %v3174_v18 = vadd.f32 %v14513_v60, %v2383_v33  ;;  %v3953_v19 = vmax.f32 %v3169_v31, 0.0  ;;  %v3954_v20 = vmax.f32 %v3170_v13, 0.0  ;;  %v11575_v33 = vld [vmem:[%s11889_s29 + $0x9c8] sm:$0xff]   ;;  %v11576_v31 = vld [vmem:[%s11889_s29 + $0x9d0] sm:$0xff]  }
 0x331   : > { %v3955_v22 = vmax.f32 %v3171_v14, 0.0  ;;  %v3956_v45 = vmax.f32 %v3172_v15, 0.0  ;;  %v9519_v23 = vpack.c.bf16 %v3951_v17, %v3951_v17  ;;  %v9520_v24 = vpack.c.bf16 %v3952_v39, %v3952_v39  ;;  %v11577_v39 = vld [vmem:[%s11889_s29 + $0x9d8] sm:$0xff]  }
 0x332   : > { %v3957_v26 = vmax.f32 %v3173_v37, 0.0  ;;  %v3958_v28 = vmax.f32 %v3174_v18, 0.0  ;;  %v9521_v30 = vpack.c.bf16 %v3953_v19, %v3953_v19  ;;  %v9522_v32 = vpack.c.bf16 %v3954_v20, %v3954_v20 }
 0x333   : > { %v9523_v34 = vpack.c.bf16 %v3955_v22, %v3955_v22  ;;  %v9524_v55 = vpack.c.bf16 %v3956_v45, %v3956_v45  ;;  %7872 = vst.msk [vmem:[%s11933_s6 + $0x980] sm:$0xf] %vm7263_vm0, %v9519_v23  ;;  %7873 = vst.msk [vmem:[%s11933_s6 + $0x984] sm:$0xf] %vm7263_vm0, %v9520_v24  ;;  %v10929_v40 = vunpack.c.l.bf16 %v11570_v43  ;;  %v10930_v41 = vunpack.c.h.bf16 %v11570_v43 }
 0x334   : > { %v9525_v36 = vpack.c.bf16 %v3957_v26, %v3957_v26  ;;  %v9526_v38 = vpack.c.bf16 %v3958_v28, %v3958_v28  ;;  %7874 = vst.msk [vmem:[%s11933_s6 + $0x988] sm:$0xf] %vm7263_vm0, %v9521_v30  ;;  %7875 = vst.msk [vmem:[%s11933_s6 + $0x98c] sm:$0xf] %vm7263_vm0, %v9522_v32  ;;  %v10933_v42 = vunpack.c.l.bf16 %v11571_v49  ;;  %v10934_v44 = vunpack.c.h.bf16 %v11571_v49 }
 0x335   : > { %7876 = vst.msk [vmem:[%s11933_s6 + $0x990] sm:$0xf] %vm7263_vm0, %v9523_v34  ;;  %7877 = vst.msk [vmem:[%s11933_s6 + $0x994] sm:$0xf] %vm7263_vm0, %v9524_v55  ;;  %v10937_v46 = vunpack.c.l.bf16 %v11572_v29  ;;  %v10938_v47 = vunpack.c.h.bf16 %v11572_v29  ;;  %v2384_v48 = vmul.f32 %v14502_v51, %v10929_v40  ;;  %v2385_v50 = vmul.f32 %v14502_v51, %v10930_v41 }
 0x336   : > { %7878 = vst.msk [vmem:[%s11933_s6 + $0x998] sm:$0xf] %vm7263_vm0, %v9525_v36  ;;  %7879 = vst.msk [vmem:[%s11933_s6 + $0x99c] sm:$0xf] %vm7263_vm0, %v9526_v38  ;;  %v10941_v52 = vunpack.c.l.bf16 %v11573_v35  ;;  %v10942_v53 = vunpack.c.h.bf16 %v11573_v35  ;;  %v2386_v54 = vmul.f32 %v14502_v51, %v10933_v42  ;;  %v2387_v56 = vmul.f32 %v14502_v51, %v10934_v44 }
 0x337   : > { %v2388_v1 = vmul.f32 %v14502_v51, %v10937_v46  ;;  %v2389_v57 = vmul.f32 %v14502_v51, %v10938_v47  ;;  %v3175_v58 = vadd.f32 %v14513_v60, %v2384_v48  ;;  %v3176_v59 = vadd.f32 %v14513_v60, %v2385_v50 }
 0x338   : > { %v2390_v61 = vmul.f32 %v14502_v51, %v10941_v52  ;;  %v2391_v16 = vmul.f32 %v14502_v51, %v10942_v53  ;;  %v3177_v62 = vadd.f32 %v14513_v60, %v2386_v54  ;;  %v3178_v63 = vadd.f32 %v14513_v60, %v2387_v56 }
 0x339   : > { %v3179_v0 = vadd.f32 %v14513_v60, %v2388_v1  ;;  %v3180_v2 = vadd.f32 %v14513_v60, %v2389_v57  ;;  %v3959_v3 = vmax.f32 %v3175_v58, 0.0  ;;  %v3960_v21 = vmax.f32 %v3176_v59, 0.0  ;;  %v11578_v1 = vld [vmem:[%s11889_s29 + $0x9e0] sm:$0xff]  }
 0x33a   : > { %v3181_v7 = vadd.f32 %v14513_v60, %v2390_v61  ;;  %v3182_v4 = vadd.f32 %v14513_v60, %v2391_v16  ;;  %v3961_v5 = vmax.f32 %v3177_v62, 0.0  ;;  %v3962_v6 = vmax.f32 %v3178_v63, 0.0  ;;  %v11579_v16 = vld [vmem:[%s11889_s29 + $0x9e8] sm:$0xff]   ;;  %v11580_v62 = vld [vmem:[%s11889_s29 + $0x9f0] sm:$0xff]  }
 0x33b   : > { %v3963_v8 = vmax.f32 %v3179_v0, 0.0  ;;  %v3964_v27 = vmax.f32 %v3180_v2, 0.0  ;;  %v9527_v9 = vpack.c.bf16 %v3959_v3, %v3959_v3  ;;  %v9528_v10 = vpack.c.bf16 %v3960_v21, %v3960_v21  ;;  %v11581_v21 = vld [vmem:[%s11889_s29 + $0x9f8] sm:$0xff]  }
 0x33c   : > { %v3965_v11 = vmax.f32 %v3181_v7, 0.0  ;;  %v3966_v12 = vmax.f32 %v3182_v4, 0.0  ;;  %v9529_v13 = vpack.c.bf16 %v3961_v5, %v3961_v5  ;;  %v9530_v14 = vpack.c.bf16 %v3962_v6, %v3962_v6 }
 0x33d   : > { %v9531_v15 = vpack.c.bf16 %v3963_v8, %v3963_v8  ;;  %v9532_v17 = vpack.c.bf16 %v3964_v27, %v3964_v27  ;;  %7880 = vst.msk [vmem:[%s11933_s6 + $0x9a0] sm:$0xf] %vm7263_vm0, %v9527_v9  ;;  %7881 = vst.msk [vmem:[%s11933_s6 + $0x9a4] sm:$0xf] %vm7263_vm0, %v9528_v10  ;;  %v10945_v19 = vunpack.c.l.bf16 %v11574_v25  ;;  %v10946_v20 = vunpack.c.h.bf16 %v11574_v25 }
 0x33e   : > { %v9533_v37 = vpack.c.bf16 %v3965_v11, %v3965_v11  ;;  %v9534_v18 = vpack.c.bf16 %v3966_v12, %v3966_v12  ;;  %7882 = vst.msk [vmem:[%s11933_s6 + $0x9a8] sm:$0xf] %vm7263_vm0, %v9529_v13  ;;  %7883 = vst.msk [vmem:[%s11933_s6 + $0x9ac] sm:$0xf] %vm7263_vm0, %v9530_v14  ;;  %v10949_v22 = vunpack.c.l.bf16 %v11575_v33  ;;  %v10950_v45 = vunpack.c.h.bf16 %v11575_v33 }
 0x33f   : > { %7884 = vst.msk [vmem:[%s11933_s6 + $0x9b0] sm:$0xf] %vm7263_vm0, %v9531_v15  ;;  %7885 = vst.msk [vmem:[%s11933_s6 + $0x9b4] sm:$0xf] %vm7263_vm0, %v9532_v17  ;;  %v10953_v43 = vunpack.c.l.bf16 %v11576_v31  ;;  %v10954_v23 = vunpack.c.h.bf16 %v11576_v31  ;;  %v2392_v24 = vmul.f32 %v14502_v51, %v10945_v19  ;;  %v2393_v26 = vmul.f32 %v14502_v51, %v10946_v20 }
 0x340   : > { %7886 = vst.msk [vmem:[%s11933_s6 + $0x9b8] sm:$0xf] %vm7263_vm0, %v9533_v37  ;;  %7887 = vst.msk [vmem:[%s11933_s6 + $0x9bc] sm:$0xf] %vm7263_vm0, %v9534_v18  ;;  %v10957_v28 = vunpack.c.l.bf16 %v11577_v39  ;;  %v10958_v49 = vunpack.c.h.bf16 %v11577_v39  ;;  %v2394_v29 = vmul.f32 %v14502_v51, %v10949_v22  ;;  %v2395_v30 = vmul.f32 %v14502_v51, %v10950_v45 }
 0x341   : > { %v2396_v32 = vmul.f32 %v14502_v51, %v10953_v43  ;;  %v2397_v34 = vmul.f32 %v14502_v51, %v10954_v23  ;;  %v3183_v55 = vadd.f32 %v14513_v60, %v2392_v24  ;;  %v3184_v35 = vadd.f32 %v14513_v60, %v2393_v26 }
 0x342   : > { %v2398_v36 = vmul.f32 %v14502_v51, %v10957_v28  ;;  %v2399_v38 = vmul.f32 %v14502_v51, %v10958_v49  ;;  %v3185_v40 = vadd.f32 %v14513_v60, %v2394_v29  ;;  %v3186_v41 = vadd.f32 %v14513_v60, %v2395_v30  ;;  %v11582_v30 = vld [vmem:[%s11889_s29 + $0xa00] sm:$0xff]  }
 0x343   : > { %v3187_v42 = vadd.f32 %v14513_v60, %v2396_v32  ;;  %v3188_v44 = vadd.f32 %v14513_v60, %v2397_v34  ;;  %v3967_v46 = vmax.f32 %v3183_v55, 0.0  ;;  %v3968_v47 = vmax.f32 %v3184_v35, 0.0 }
 0x344   : > { %v3189_v48 = vadd.f32 %v14513_v60, %v2398_v36  ;;  %v3190_v50 = vadd.f32 %v14513_v60, %v2399_v38  ;;  %v3969_v52 = vmax.f32 %v3185_v40, 0.0  ;;  %v3970_v53 = vmax.f32 %v3186_v41, 0.0  ;;  %v11583_v36 = vld [vmem:[%s11889_s29 + $0xa08] sm:$0xff]   ;;  %v11584_v38 = vld [vmem:[%s11889_s29 + $0xa10] sm:$0xff]  }
 0x345   : > { %v3971_v54 = vmax.f32 %v3187_v42, 0.0  ;;  %v3972_v56 = vmax.f32 %v3188_v44, 0.0  ;;  %v9535_v57 = vpack.c.bf16 %v3967_v46, %v3967_v46  ;;  %v9536_v58 = vpack.c.bf16 %v3968_v47, %v3968_v47  ;;  %v11585_v44 = vld [vmem:[%s11889_s29 + $0xa18] sm:$0xff]  }
 0x346   : > { %v3973_v59 = vmax.f32 %v3189_v48, 0.0  ;;  %v3974_v61 = vmax.f32 %v3190_v50, 0.0  ;;  %v9537_v63 = vpack.c.bf16 %v3969_v52, %v3969_v52  ;;  %v9538_v0 = vpack.c.bf16 %v3970_v53, %v3970_v53 }
 0x347   : > { %v9539_v2 = vpack.c.bf16 %v3971_v54, %v3971_v54  ;;  %v9540_v3 = vpack.c.bf16 %v3972_v56, %v3972_v56  ;;  %7888 = vst.msk [vmem:[%s11933_s6 + $0x9c0] sm:$0xf] %vm7263_vm0, %v9535_v57  ;;  %7889 = vst.msk [vmem:[%s11933_s6 + $0x9c4] sm:$0xf] %vm7263_vm0, %v9536_v58  ;;  %v10961_v5 = vunpack.c.l.bf16 %v11578_v1  ;;  %v10962_v6 = vunpack.c.h.bf16 %v11578_v1  ;;  %v14872_v1 = vld [vmem:[%s15547_s1] ss:$0 sm:$0xff] }
 0x348   : > { %v9541_v7 = vpack.c.bf16 %v3973_v59, %v3973_v59  ;;  %v9542_v4 = vpack.c.bf16 %v3974_v61, %v3974_v61  ;;  %7890 = vst.msk [vmem:[%s11933_s6 + $0x9c8] sm:$0xf] %vm7263_vm0, %v9537_v63  ;;  %7891 = vst.msk [vmem:[%s11933_s6 + $0x9cc] sm:$0xf] %vm7263_vm0, %v9538_v0  ;;  %v10965_v8 = vunpack.c.l.bf16 %v11579_v16  ;;  %v10966_v27 = vunpack.c.h.bf16 %v11579_v16 }
 0x349   : > { %7892 = vst.msk [vmem:[%s11933_s6 + $0x9d0] sm:$0xf] %vm7263_vm0, %v9539_v2  ;;  %7893 = vst.msk [vmem:[%s11933_s6 + $0x9d4] sm:$0xf] %vm7263_vm0, %v9540_v3  ;;  %v10969_v25 = vunpack.c.l.bf16 %v11580_v62  ;;  %v10970_v9 = vunpack.c.h.bf16 %v11580_v62  ;;  %v2400_v10 = vmul.f32 %v14502_v51, %v10961_v5  ;;  %v2401_v11 = vmul.f32 %v14502_v51, %v10962_v6  ;;  %v14883_v2 = vld [vmem:[%s15548_s2] ss:$0 sm:$0xff] }
 0x34a   : > { %7894 = vst.msk [vmem:[%s11933_s6 + $0x9d8] sm:$0xf] %vm7263_vm0, %v9541_v7  ;;  %7895 = vst.msk [vmem:[%s11933_s6 + $0x9dc] sm:$0xf] %vm7263_vm0, %v9542_v4  ;;  %v10973_v12 = vunpack.c.l.bf16 %v11581_v21  ;;  %v10974_v33 = vunpack.c.h.bf16 %v11581_v21  ;;  %v2402_v31 = vmul.f32 %v14502_v51, %v10965_v8  ;;  %v2403_v13 = vmul.f32 %v14502_v51, %v10966_v27 }
 0x34b   : > { %v2404_v14 = vmul.f32 %v14502_v51, %v10969_v25  ;;  %v2405_v15 = vmul.f32 %v14502_v51, %v10970_v9  ;;  %v3191_v17 = vadd.f32 %v14513_v60, %v2400_v10  ;;  %v3192_v39 = vadd.f32 %v14513_v60, %v2401_v11 }
 0x34c   : > { %v2406_v37 = vmul.f32 %v14502_v51, %v10973_v12  ;;  %v2407_v18 = vmul.f32 %v14502_v51, %v10974_v33  ;;  %v3193_v19 = vadd.f32 %v14513_v60, %v2402_v31  ;;  %v3194_v20 = vadd.f32 %v14513_v60, %v2403_v13 }
 0x34d   : > { %v3195_v22 = vadd.f32 %v14513_v60, %v2404_v14  ;;  %v3196_v45 = vadd.f32 %v14513_v60, %v2405_v15  ;;  %v3975_v43 = vmax.f32 %v3191_v17, 0.0  ;;  %v3976_v23 = vmax.f32 %v3192_v39, 0.0  ;;  %v11586_v14 = vld [vmem:[%s11889_s29 + $0xa20] sm:$0xff]  }
 0x34e   : > { %v3197_v24 = vadd.f32 %v14513_v60, %v2406_v37  ;;  %v3198_v26 = vadd.f32 %v14513_v60, %v2407_v18  ;;  %v3977_v28 = vmax.f32 %v3193_v19, 0.0  ;;  %v3978_v51 = vmax.f32 %v3194_v20, 0.0  ;;  %v11587_v18 = vld [vmem:[%s11889_s29 + $0xa28] sm:$0xff]   ;;  %v11588_v19 = vld [vmem:[%s11889_s29 + $0xa30] sm:$0xff]  }
 0x34f   : > { %v3979_v49 = vmax.f32 %v3195_v22, 0.0  ;;  %v3980_v29 = vmax.f32 %v3196_v45, 0.0  ;;  %v9543_v32 = vpack.c.bf16 %v3975_v43, %v3975_v43  ;;  %v9544_v34 = vpack.c.bf16 %v3976_v23, %v3976_v23  ;;  %v11589_v23 = vld [vmem:[%s11889_s29 + $0xa38] sm:$0xff]  }
 0x350   : > { %v3981_v55 = vmax.f32 %v3197_v24, 0.0  ;;  %v3982_v35 = vmax.f32 %v3198_v26, 0.0  ;;  %v9545_v40 = vpack.c.bf16 %v3977_v28, %v3977_v28  ;;  %v9546_v60 = vpack.c.bf16 %v3978_v51, %v3978_v51 }
 0x351   : > { %v9547_v41 = vpack.c.bf16 %v3979_v49, %v3979_v49  ;;  %v9548_v42 = vpack.c.bf16 %v3980_v29, %v3980_v29  ;;  %7896 = vst.msk [vmem:[%s11933_s6 + $0x9e0] sm:$0xf] %vm7263_vm0, %v9543_v32  ;;  %7897 = vst.msk [vmem:[%s11933_s6 + $0x9e4] sm:$0xf] %vm7263_vm0, %v9544_v34  ;;  %v10977_v48 = vunpack.c.l.bf16 %v11582_v30  ;;  %v10978_v50 = vunpack.c.h.bf16 %v11582_v30 }
 0x352   : > { %v9549_v46 = vpack.c.bf16 %v3981_v55, %v3981_v55  ;;  %v9550_v47 = vpack.c.bf16 %v3982_v35, %v3982_v35  ;;  %7898 = vst.msk [vmem:[%s11933_s6 + $0x9e8] sm:$0xf] %vm7263_vm0, %v9545_v40  ;;  %7899 = vst.msk [vmem:[%s11933_s6 + $0x9ec] sm:$0xf] %vm7263_vm0, %v9546_v60  ;;  %v10981_v52 = vunpack.c.l.bf16 %v11583_v36  ;;  %v10982_v53 = vunpack.c.h.bf16 %v11583_v36 }
 0x353   : > { %7900 = vst.msk [vmem:[%s11933_s6 + $0x9f0] sm:$0xf] %vm7263_vm0, %v9547_v41  ;;  %7901 = vst.msk [vmem:[%s11933_s6 + $0x9f4] sm:$0xf] %vm7263_vm0, %v9548_v42  ;;  %v10985_v54 = vunpack.c.l.bf16 %v11584_v38  ;;  %v10986_v56 = vunpack.c.h.bf16 %v11584_v38  ;;  %v2408_v57 = vmul.f32 %v14872_v1, %v10977_v48  ;;  %v2409_v58 = vmul.f32 %v14872_v1, %v10978_v50 }
 0x354   : > { %7902 = vst.msk [vmem:[%s11933_s6 + $0x9f8] sm:$0xf] %vm7263_vm0, %v9549_v46  ;;  %7903 = vst.msk [vmem:[%s11933_s6 + $0x9fc] sm:$0xf] %vm7263_vm0, %v9550_v47  ;;  %v10989_v59 = vunpack.c.l.bf16 %v11585_v44  ;;  %v10990_v61 = vunpack.c.h.bf16 %v11585_v44  ;;  %v2410_v16 = vmul.f32 %v14872_v1, %v10981_v52  ;;  %v2411_v62 = vmul.f32 %v14872_v1, %v10982_v53 }
 0x355   : > { %v2412_v63 = vmul.f32 %v14872_v1, %v10985_v54  ;;  %v2413_v0 = vmul.f32 %v14872_v1, %v10986_v56  ;;  %v3199_v3 = vadd.f32 %v14883_v2, %v2408_v57  ;;  %v3200_v21 = vadd.f32 %v14883_v2, %v2409_v58 }
 0x356   : > { %v2414_v7 = vmul.f32 %v14872_v1, %v10989_v59  ;;  %v2415_v4 = vmul.f32 %v14872_v1, %v10990_v61  ;;  %v3201_v5 = vadd.f32 %v14883_v2, %v2410_v16  ;;  %v3202_v6 = vadd.f32 %v14883_v2, %v2411_v62 }
 0x357   : > { %v3203_v8 = vadd.f32 %v14883_v2, %v2412_v63  ;;  %v3204_v27 = vadd.f32 %v14883_v2, %v2413_v0  ;;  %v3983_v25 = vmax.f32 %v3199_v3, 0.0  ;;  %v3984_v9 = vmax.f32 %v3200_v21, 0.0  ;;  %v11590_v63 = vld [vmem:[%s11889_s29 + $0xa40] sm:$0xff]  }
 0x358   : > { %v3205_v10 = vadd.f32 %v14883_v2, %v2414_v7  ;;  %v3206_v11 = vadd.f32 %v14883_v2, %v2415_v4  ;;  %v3985_v12 = vmax.f32 %v3201_v5, 0.0  ;;  %v3986_v33 = vmax.f32 %v3202_v6, 0.0  ;;  %v11591_v4 = vld [vmem:[%s11889_s29 + $0xa48] sm:$0xff]   ;;  %v11592_v5 = vld [vmem:[%s11889_s29 + $0xa50] sm:$0xff]  }
 0x359   : > { %v3987_v31 = vmax.f32 %v3203_v8, 0.0  ;;  %v3988_v13 = vmax.f32 %v3204_v27, 0.0  ;;  %v9551_v15 = vpack.c.bf16 %v3983_v25, %v3983_v25  ;;  %v9552_v17 = vpack.c.bf16 %v3984_v9, %v3984_v9  ;;  %v11593_v9 = vld [vmem:[%s11889_s29 + $0xa58] sm:$0xff]  }
 0x35a   : > { %v3989_v39 = vmax.f32 %v3205_v10, 0.0  ;;  %v3990_v37 = vmax.f32 %v3206_v11, 0.0  ;;  %v9553_v20 = vpack.c.bf16 %v3985_v12, %v3985_v12  ;;  %v9554_v22 = vpack.c.bf16 %v3986_v33, %v3986_v33 }
 0x35b   : > { %v9555_v45 = vpack.c.bf16 %v3987_v31, %v3987_v31  ;;  %v9556_v43 = vpack.c.bf16 %v3988_v13, %v3988_v13  ;;  %7904 = vst.msk [vmem:[%s11933_s6 + $0xa00] sm:$0xf] %vm7263_vm0, %v9551_v15  ;;  %7905 = vst.msk [vmem:[%s11933_s6 + $0xa04] sm:$0xf] %vm7263_vm0, %v9552_v17  ;;  %v10993_v28 = vunpack.c.l.bf16 %v11586_v14  ;;  %v10994_v51 = vunpack.c.h.bf16 %v11586_v14 }
 0x35c   : > { %v9557_v24 = vpack.c.bf16 %v3989_v39, %v3989_v39  ;;  %v9558_v26 = vpack.c.bf16 %v3990_v37, %v3990_v37  ;;  %7906 = vst.msk [vmem:[%s11933_s6 + $0xa08] sm:$0xf] %vm7263_vm0, %v9553_v20  ;;  %7907 = vst.msk [vmem:[%s11933_s6 + $0xa0c] sm:$0xf] %vm7263_vm0, %v9554_v22  ;;  %v10997_v49 = vunpack.c.l.bf16 %v11587_v18  ;;  %v10998_v29 = vunpack.c.h.bf16 %v11587_v18 }
 0x35d   : > { %7908 = vst.msk [vmem:[%s11933_s6 + $0xa10] sm:$0xf] %vm7263_vm0, %v9555_v45  ;;  %7909 = vst.msk [vmem:[%s11933_s6 + $0xa14] sm:$0xf] %vm7263_vm0, %v9556_v43  ;;  %v11001_v30 = vunpack.c.l.bf16 %v11588_v19  ;;  %v11002_v32 = vunpack.c.h.bf16 %v11588_v19  ;;  %v2416_v34 = vmul.f32 %v14872_v1, %v10993_v28  ;;  %v2417_v55 = vmul.f32 %v14872_v1, %v10994_v51 }
 0x35e   : > { %7910 = vst.msk [vmem:[%s11933_s6 + $0xa18] sm:$0xf] %vm7263_vm0, %v9557_v24  ;;  %7911 = vst.msk [vmem:[%s11933_s6 + $0xa1c] sm:$0xf] %vm7263_vm0, %v9558_v26  ;;  %v11005_v35 = vunpack.c.l.bf16 %v11589_v23  ;;  %v11006_v36 = vunpack.c.h.bf16 %v11589_v23  ;;  %v2418_v38 = vmul.f32 %v14872_v1, %v10997_v49  ;;  %v2419_v40 = vmul.f32 %v14872_v1, %v10998_v29 }
 0x35f   : > { %v2420_v60 = vmul.f32 %v14872_v1, %v11001_v30  ;;  %v2421_v41 = vmul.f32 %v14872_v1, %v11002_v32  ;;  %v3207_v42 = vadd.f32 %v14883_v2, %v2416_v34  ;;  %v3208_v44 = vadd.f32 %v14883_v2, %v2417_v55 }
 0x360   : > { %v2422_v46 = vmul.f32 %v14872_v1, %v11005_v35  ;;  %v2423_v47 = vmul.f32 %v14872_v1, %v11006_v36  ;;  %v3209_v48 = vadd.f32 %v14883_v2, %v2418_v38  ;;  %v3210_v50 = vadd.f32 %v14883_v2, %v2419_v40 }
 0x361   : > { %v3211_v52 = vadd.f32 %v14883_v2, %v2420_v60  ;;  %v3212_v53 = vadd.f32 %v14883_v2, %v2421_v41  ;;  %v3991_v54 = vmax.f32 %v3207_v42, 0.0  ;;  %v3992_v56 = vmax.f32 %v3208_v44, 0.0  ;;  %v11594_v60 = vld [vmem:[%s11889_s29 + $0xa60] sm:$0xff]  }
 0x362   : > { %v3213_v57 = vadd.f32 %v14883_v2, %v2422_v46  ;;  %v3214_v58 = vadd.f32 %v14883_v2, %v2423_v47  ;;  %v3993_v59 = vmax.f32 %v3209_v48, 0.0  ;;  %v3994_v61 = vmax.f32 %v3210_v50, 0.0  ;;  %v11595_v47 = vld [vmem:[%s11889_s29 + $0xa68] sm:$0xff]   ;;  %v11596_v48 = vld [vmem:[%s11889_s29 + $0xa70] sm:$0xff]  }
 0x363   : > { %v3995_v16 = vmax.f32 %v3211_v52, 0.0  ;;  %v3996_v62 = vmax.f32 %v3212_v53, 0.0  ;;  %v9559_v0 = vpack.c.bf16 %v3991_v54, %v3991_v54  ;;  %v9560_v3 = vpack.c.bf16 %v3992_v56, %v3992_v56  ;;  %v11597_v56 = vld [vmem:[%s11889_s29 + $0xa78] sm:$0xff]  }
 0x364   : > { %v3997_v21 = vmax.f32 %v3213_v57, 0.0  ;;  %v3998_v7 = vmax.f32 %v3214_v58, 0.0  ;;  %v9561_v6 = vpack.c.bf16 %v3993_v59, %v3993_v59  ;;  %v9562_v8 = vpack.c.bf16 %v3994_v61, %v3994_v61 }
 0x365   : > { %v9563_v27 = vpack.c.bf16 %v3995_v16, %v3995_v16  ;;  %v9564_v25 = vpack.c.bf16 %v3996_v62, %v3996_v62  ;;  %7912 = vst.msk [vmem:[%s11933_s6 + $0xa20] sm:$0xf] %vm7263_vm0, %v9559_v0  ;;  %7913 = vst.msk [vmem:[%s11933_s6 + $0xa24] sm:$0xf] %vm7263_vm0, %v9560_v3  ;;  %v11009_v12 = vunpack.c.l.bf16 %v11590_v63  ;;  %v11010_v33 = vunpack.c.h.bf16 %v11590_v63 }
 0x366   : > { %v9565_v10 = vpack.c.bf16 %v3997_v21, %v3997_v21  ;;  %v9566_v11 = vpack.c.bf16 %v3998_v7, %v3998_v7  ;;  %7914 = vst.msk [vmem:[%s11933_s6 + $0xa28] sm:$0xf] %vm7263_vm0, %v9561_v6  ;;  %7915 = vst.msk [vmem:[%s11933_s6 + $0xa2c] sm:$0xf] %vm7263_vm0, %v9562_v8  ;;  %v11013_v31 = vunpack.c.l.bf16 %v11591_v4  ;;  %v11014_v13 = vunpack.c.h.bf16 %v11591_v4 }
 0x367   : > { %7916 = vst.msk [vmem:[%s11933_s6 + $0xa30] sm:$0xf] %vm7263_vm0, %v9563_v27  ;;  %7917 = vst.msk [vmem:[%s11933_s6 + $0xa34] sm:$0xf] %vm7263_vm0, %v9564_v25  ;;  %v11017_v14 = vunpack.c.l.bf16 %v11592_v5  ;;  %v11018_v15 = vunpack.c.h.bf16 %v11592_v5  ;;  %v2424_v17 = vmul.f32 %v14872_v1, %v11009_v12  ;;  %v2425_v39 = vmul.f32 %v14872_v1, %v11010_v33 }
 0x368   : > { %7918 = vst.msk [vmem:[%s11933_s6 + $0xa38] sm:$0xf] %vm7263_vm0, %v9565_v10  ;;  %7919 = vst.msk [vmem:[%s11933_s6 + $0xa3c] sm:$0xf] %vm7263_vm0, %v9566_v11  ;;  %v11021_v37 = vunpack.c.l.bf16 %v11593_v9  ;;  %v11022_v18 = vunpack.c.h.bf16 %v11593_v9  ;;  %v2426_v19 = vmul.f32 %v14872_v1, %v11013_v31  ;;  %v2427_v20 = vmul.f32 %v14872_v1, %v11014_v13 }
 0x369   : > { %v2428_v22 = vmul.f32 %v14872_v1, %v11017_v14  ;;  %v2429_v45 = vmul.f32 %v14872_v1, %v11018_v15  ;;  %v3215_v43 = vadd.f32 %v14883_v2, %v2424_v17  ;;  %v3216_v23 = vadd.f32 %v14883_v2, %v2425_v39 }
 0x36a   : > { %v2430_v24 = vmul.f32 %v14872_v1, %v11021_v37  ;;  %v2431_v26 = vmul.f32 %v14872_v1, %v11022_v18  ;;  %v3217_v28 = vadd.f32 %v14883_v2, %v2426_v19  ;;  %v3218_v51 = vadd.f32 %v14883_v2, %v2427_v20 }
 0x36b   : > { %v3219_v49 = vadd.f32 %v14883_v2, %v2428_v22  ;;  %v3220_v29 = vadd.f32 %v14883_v2, %v2429_v45  ;;  %v3999_v30 = vmax.f32 %v3215_v43, 0.0  ;;  %v4000_v32 = vmax.f32 %v3216_v23, 0.0  ;;  %v11598_v22 = vld [vmem:[%s11889_s29 + $0xa80] sm:$0xff]  }
 0x36c   : > { %v3221_v34 = vadd.f32 %v14883_v2, %v2430_v24  ;;  %v3222_v55 = vadd.f32 %v14883_v2, %v2431_v26  ;;  %v4001_v35 = vmax.f32 %v3217_v28, 0.0  ;;  %v4002_v36 = vmax.f32 %v3218_v51, 0.0  ;;  %v11599_v26 = vld [vmem:[%s11889_s29 + $0xa88] sm:$0xff]   ;;  %v11600_v28 = vld [vmem:[%s11889_s29 + $0xa90] sm:$0xff]  }
 0x36d   : > { %v4003_v38 = vmax.f32 %v3219_v49, 0.0  ;;  %v4004_v40 = vmax.f32 %v3220_v29, 0.0  ;;  %v9567_v41 = vpack.c.bf16 %v3999_v30, %v3999_v30  ;;  %v9568_v42 = vpack.c.bf16 %v4000_v32, %v4000_v32  ;;  %v11601_v32 = vld [vmem:[%s11889_s29 + $0xa98] sm:$0xff]  }
 0x36e   : > { %v4005_v44 = vmax.f32 %v3221_v34, 0.0  ;;  %v4006_v46 = vmax.f32 %v3222_v55, 0.0  ;;  %v9569_v50 = vpack.c.bf16 %v4001_v35, %v4001_v35  ;;  %v9570_v52 = vpack.c.bf16 %v4002_v36, %v4002_v36 }
 0x36f   : > { %v9571_v53 = vpack.c.bf16 %v4003_v38, %v4003_v38  ;;  %v9572_v54 = vpack.c.bf16 %v4004_v40, %v4004_v40  ;;  %7920 = vst.msk [vmem:[%s11933_s6 + $0xa40] sm:$0xf] %vm7263_vm0, %v9567_v41  ;;  %7921 = vst.msk [vmem:[%s11933_s6 + $0xa44] sm:$0xf] %vm7263_vm0, %v9568_v42  ;;  %v11025_v59 = vunpack.c.l.bf16 %v11594_v60  ;;  %v11026_v61 = vunpack.c.h.bf16 %v11594_v60 }
 0x370   : > { %v9573_v57 = vpack.c.bf16 %v4005_v44, %v4005_v44  ;;  %v9574_v58 = vpack.c.bf16 %v4006_v46, %v4006_v46  ;;  %7922 = vst.msk [vmem:[%s11933_s6 + $0xa48] sm:$0xf] %vm7263_vm0, %v9569_v50  ;;  %7923 = vst.msk [vmem:[%s11933_s6 + $0xa4c] sm:$0xf] %vm7263_vm0, %v9570_v52  ;;  %v11029_v16 = vunpack.c.l.bf16 %v11595_v47  ;;  %v11030_v62 = vunpack.c.h.bf16 %v11595_v47 }
 0x371   : > { %7924 = vst.msk [vmem:[%s11933_s6 + $0xa50] sm:$0xf] %vm7263_vm0, %v9571_v53  ;;  %7925 = vst.msk [vmem:[%s11933_s6 + $0xa54] sm:$0xf] %vm7263_vm0, %v9572_v54  ;;  %v11033_v63 = vunpack.c.l.bf16 %v11596_v48  ;;  %v11034_v0 = vunpack.c.h.bf16 %v11596_v48  ;;  %v2432_v3 = vmul.f32 %v14872_v1, %v11025_v59  ;;  %v2433_v21 = vmul.f32 %v14872_v1, %v11026_v61 }
 0x372   : > { %7926 = vst.msk [vmem:[%s11933_s6 + $0xa58] sm:$0xf] %vm7263_vm0, %v9573_v57  ;;  %7927 = vst.msk [vmem:[%s11933_s6 + $0xa5c] sm:$0xf] %vm7263_vm0, %v9574_v58  ;;  %v11037_v7 = vunpack.c.l.bf16 %v11597_v56  ;;  %v11038_v4 = vunpack.c.h.bf16 %v11597_v56  ;;  %v2434_v5 = vmul.f32 %v14872_v1, %v11029_v16  ;;  %v2435_v6 = vmul.f32 %v14872_v1, %v11030_v62 }
 0x373   : > { %v2436_v8 = vmul.f32 %v14872_v1, %v11033_v63  ;;  %v2437_v27 = vmul.f32 %v14872_v1, %v11034_v0  ;;  %v3223_v25 = vadd.f32 %v14883_v2, %v2432_v3  ;;  %v3224_v9 = vadd.f32 %v14883_v2, %v2433_v21 }
 0x374   : > { %v2438_v10 = vmul.f32 %v14872_v1, %v11037_v7  ;;  %v2439_v11 = vmul.f32 %v14872_v1, %v11038_v4  ;;  %v3225_v12 = vadd.f32 %v14883_v2, %v2434_v5  ;;  %v3226_v33 = vadd.f32 %v14883_v2, %v2435_v6 }
 0x375   : > { %v3227_v31 = vadd.f32 %v14883_v2, %v2436_v8  ;;  %v3228_v13 = vadd.f32 %v14883_v2, %v2437_v27  ;;  %v4007_v14 = vmax.f32 %v3223_v25, 0.0  ;;  %v4008_v15 = vmax.f32 %v3224_v9, 0.0  ;;  %v11602_v8 = vld [vmem:[%s11889_s29 + $0xaa0] sm:$0xff]  }
 0x376   : > { %v3229_v17 = vadd.f32 %v14883_v2, %v2438_v10  ;;  %v3230_v39 = vadd.f32 %v14883_v2, %v2439_v11  ;;  %v4009_v37 = vmax.f32 %v3225_v12, 0.0  ;;  %v4010_v18 = vmax.f32 %v3226_v33, 0.0  ;;  %v11603_v11 = vld [vmem:[%s11889_s29 + $0xaa8] sm:$0xff]   ;;  %v11604_v12 = vld [vmem:[%s11889_s29 + $0xab0] sm:$0xff]  }
 0x377   : > { %v4011_v19 = vmax.f32 %v3227_v31, 0.0  ;;  %v4012_v20 = vmax.f32 %v3228_v13, 0.0  ;;  %v9575_v45 = vpack.c.bf16 %v4007_v14, %v4007_v14  ;;  %v9576_v43 = vpack.c.bf16 %v4008_v15, %v4008_v15  ;;  %v11605_v15 = vld [vmem:[%s11889_s29 + $0xab8] sm:$0xff]  }
 0x378   : > { %v4013_v23 = vmax.f32 %v3229_v17, 0.0  ;;  %v4014_v24 = vmax.f32 %v3230_v39, 0.0  ;;  %v9577_v51 = vpack.c.bf16 %v4009_v37, %v4009_v37  ;;  %v9578_v49 = vpack.c.bf16 %v4010_v18, %v4010_v18 }
 0x379   : > { %v9579_v29 = vpack.c.bf16 %v4011_v19, %v4011_v19  ;;  %v9580_v30 = vpack.c.bf16 %v4012_v20, %v4012_v20  ;;  %7928 = vst.msk [vmem:[%s11933_s6 + $0xa60] sm:$0xf] %vm7263_vm0, %v9575_v45  ;;  %7929 = vst.msk [vmem:[%s11933_s6 + $0xa64] sm:$0xf] %vm7263_vm0, %v9576_v43  ;;  %v11041_v35 = vunpack.c.l.bf16 %v11598_v22  ;;  %v11042_v36 = vunpack.c.h.bf16 %v11598_v22 }
 0x37a   : > { %v9581_v34 = vpack.c.bf16 %v4013_v23, %v4013_v23  ;;  %v9582_v55 = vpack.c.bf16 %v4014_v24, %v4014_v24  ;;  %7930 = vst.msk [vmem:[%s11933_s6 + $0xa68] sm:$0xf] %vm7263_vm0, %v9577_v51  ;;  %7931 = vst.msk [vmem:[%s11933_s6 + $0xa6c] sm:$0xf] %vm7263_vm0, %v9578_v49  ;;  %v11045_v38 = vunpack.c.l.bf16 %v11599_v26  ;;  %v11046_v40 = vunpack.c.h.bf16 %v11599_v26 }
 0x37b   : > { %7932 = vst.msk [vmem:[%s11933_s6 + $0xa70] sm:$0xf] %vm7263_vm0, %v9579_v29  ;;  %7933 = vst.msk [vmem:[%s11933_s6 + $0xa74] sm:$0xf] %vm7263_vm0, %v9580_v30  ;;  %v11049_v60 = vunpack.c.l.bf16 %v11600_v28  ;;  %v11050_v41 = vunpack.c.h.bf16 %v11600_v28  ;;  %v2440_v42 = vmul.f32 %v14872_v1, %v11041_v35  ;;  %v2441_v44 = vmul.f32 %v14872_v1, %v11042_v36 }
 0x37c   : > { %7934 = vst.msk [vmem:[%s11933_s6 + $0xa78] sm:$0xf] %vm7263_vm0, %v9581_v34  ;;  %7935 = vst.msk [vmem:[%s11933_s6 + $0xa7c] sm:$0xf] %vm7263_vm0, %v9582_v55  ;;  %v11053_v46 = vunpack.c.l.bf16 %v11601_v32  ;;  %v11054_v47 = vunpack.c.h.bf16 %v11601_v32  ;;  %v2442_v48 = vmul.f32 %v14872_v1, %v11045_v38  ;;  %v2443_v50 = vmul.f32 %v14872_v1, %v11046_v40 }
 0x37d   : > { %v2444_v52 = vmul.f32 %v14872_v1, %v11049_v60  ;;  %v2445_v53 = vmul.f32 %v14872_v1, %v11050_v41  ;;  %v3231_v54 = vadd.f32 %v14883_v2, %v2440_v42  ;;  %v3232_v56 = vadd.f32 %v14883_v2, %v2441_v44 }
 0x37e   : > { %v2446_v57 = vmul.f32 %v14872_v1, %v11053_v46  ;;  %v2447_v58 = vmul.f32 %v14872_v1, %v11054_v47  ;;  %v3233_v59 = vadd.f32 %v14883_v2, %v2442_v48  ;;  %v3234_v61 = vadd.f32 %v14883_v2, %v2443_v50 }
 0x37f   : > { %v3235_v16 = vadd.f32 %v14883_v2, %v2444_v52  ;;  %v3236_v62 = vadd.f32 %v14883_v2, %v2445_v53  ;;  %v4015_v63 = vmax.f32 %v3231_v54, 0.0  ;;  %v4016_v0 = vmax.f32 %v3232_v56, 0.0  ;;  %v11606_v52 = vld [vmem:[%s11889_s29 + $0xac0] sm:$0xff]  }
 0x380   : > { %v3237_v3 = vadd.f32 %v14883_v2, %v2446_v57  ;;  %v3238_v21 = vadd.f32 %v14883_v2, %v2447_v58  ;;  %v4017_v7 = vmax.f32 %v3233_v59, 0.0  ;;  %v4018_v4 = vmax.f32 %v3234_v61, 0.0  ;;  %v11607_v58 = vld [vmem:[%s11889_s29 + $0xac8] sm:$0xff]   ;;  %v11608_v59 = vld [vmem:[%s11889_s29 + $0xad0] sm:$0xff]  }
 0x381   : > { %v4019_v5 = vmax.f32 %v3235_v16, 0.0  ;;  %v4020_v6 = vmax.f32 %v3236_v62, 0.0  ;;  %v9583_v27 = vpack.c.bf16 %v4015_v63, %v4015_v63  ;;  %v9584_v25 = vpack.c.bf16 %v4016_v0, %v4016_v0  ;;  %v11609_v0 = vld [vmem:[%s11889_s29 + $0xad8] sm:$0xff]  }
 0x382   : > { %v4021_v9 = vmax.f32 %v3237_v3, 0.0  ;;  %v4022_v10 = vmax.f32 %v3238_v21, 0.0  ;;  %v9585_v33 = vpack.c.bf16 %v4017_v7, %v4017_v7  ;;  %v9586_v31 = vpack.c.bf16 %v4018_v4, %v4018_v4 }
 0x383   : > { %v9587_v13 = vpack.c.bf16 %v4019_v5, %v4019_v5  ;;  %v9588_v14 = vpack.c.bf16 %v4020_v6, %v4020_v6  ;;  %7936 = vst.msk [vmem:[%s11933_s6 + $0xa80] sm:$0xf] %vm7263_vm0, %v9583_v27  ;;  %7937 = vst.msk [vmem:[%s11933_s6 + $0xa84] sm:$0xf] %vm7263_vm0, %v9584_v25  ;;  %v11057_v37 = vunpack.c.l.bf16 %v11602_v8  ;;  %v11058_v18 = vunpack.c.h.bf16 %v11602_v8 }
 0x384   : > { %v9589_v17 = vpack.c.bf16 %v4021_v9, %v4021_v9  ;;  %v9590_v39 = vpack.c.bf16 %v4022_v10, %v4022_v10  ;;  %7938 = vst.msk [vmem:[%s11933_s6 + $0xa88] sm:$0xf] %vm7263_vm0, %v9585_v33  ;;  %7939 = vst.msk [vmem:[%s11933_s6 + $0xa8c] sm:$0xf] %vm7263_vm0, %v9586_v31  ;;  %v11061_v19 = vunpack.c.l.bf16 %v11603_v11  ;;  %v11062_v20 = vunpack.c.h.bf16 %v11603_v11 }
 0x385   : > { %7940 = vst.msk [vmem:[%s11933_s6 + $0xa90] sm:$0xf] %vm7263_vm0, %v9587_v13  ;;  %7941 = vst.msk [vmem:[%s11933_s6 + $0xa94] sm:$0xf] %vm7263_vm0, %v9588_v14  ;;  %v11065_v22 = vunpack.c.l.bf16 %v11604_v12  ;;  %v11066_v45 = vunpack.c.h.bf16 %v11604_v12  ;;  %v2448_v43 = vmul.f32 %v14872_v1, %v11057_v37  ;;  %v2449_v23 = vmul.f32 %v14872_v1, %v11058_v18 }
 0x386   : > { %7942 = vst.msk [vmem:[%s11933_s6 + $0xa98] sm:$0xf] %vm7263_vm0, %v9589_v17  ;;  %7943 = vst.msk [vmem:[%s11933_s6 + $0xa9c] sm:$0xf] %vm7263_vm0, %v9590_v39  ;;  %v11069_v24 = vunpack.c.l.bf16 %v11605_v15  ;;  %v11070_v26 = vunpack.c.h.bf16 %v11605_v15  ;;  %v2450_v28 = vmul.f32 %v14872_v1, %v11061_v19  ;;  %v2451_v51 = vmul.f32 %v14872_v1, %v11062_v20 }
 0x387   : > { %v2452_v49 = vmul.f32 %v14872_v1, %v11065_v22  ;;  %v2453_v29 = vmul.f32 %v14872_v1, %v11066_v45  ;;  %v3239_v30 = vadd.f32 %v14883_v2, %v2448_v43  ;;  %v3240_v32 = vadd.f32 %v14883_v2, %v2449_v23 }
 0x388   : > { %v2454_v34 = vmul.f32 %v14872_v1, %v11069_v24  ;;  %v2455_v55 = vmul.f32 %v14872_v1, %v11070_v26  ;;  %v3241_v35 = vadd.f32 %v14883_v2, %v2450_v28  ;;  %v3242_v36 = vadd.f32 %v14883_v2, %v2451_v51 }
 0x389   : > { %v3243_v38 = vadd.f32 %v14883_v2, %v2452_v49  ;;  %v3244_v40 = vadd.f32 %v14883_v2, %v2453_v29  ;;  %v4023_v60 = vmax.f32 %v3239_v30, 0.0  ;;  %v4024_v41 = vmax.f32 %v3240_v32, 0.0  ;;  %v11610_v49 = vld [vmem:[%s11889_s29 + $0xae0] sm:$0xff]  }
 0x38a   : > { %v3245_v42 = vadd.f32 %v14883_v2, %v2454_v34  ;;  %v3246_v44 = vadd.f32 %v14883_v2, %v2455_v55  ;;  %v4025_v46 = vmax.f32 %v3241_v35, 0.0  ;;  %v4026_v47 = vmax.f32 %v3242_v36, 0.0  ;;  %v11611_v55 = vld [vmem:[%s11889_s29 + $0xae8] sm:$0xff]   ;;  %v11612_v35 = vld [vmem:[%s11889_s29 + $0xaf0] sm:$0xff]  }
 0x38b   : > { %v4027_v48 = vmax.f32 %v3243_v38, 0.0  ;;  %v4028_v50 = vmax.f32 %v3244_v40, 0.0  ;;  %v9591_v53 = vpack.c.bf16 %v4023_v60, %v4023_v60  ;;  %v9592_v54 = vpack.c.bf16 %v4024_v41, %v4024_v41  ;;  %v11613_v41 = vld [vmem:[%s11889_s29 + $0xaf8] sm:$0xff]  }
 0x38c   : > { %v4029_v56 = vmax.f32 %v3245_v42, 0.0  ;;  %v4030_v57 = vmax.f32 %v3246_v44, 0.0  ;;  %v9593_v61 = vpack.c.bf16 %v4025_v46, %v4025_v46  ;;  %v9594_v16 = vpack.c.bf16 %v4026_v47, %v4026_v47 }
 0x38d   : > { %v9595_v62 = vpack.c.bf16 %v4027_v48, %v4027_v48  ;;  %v9596_v63 = vpack.c.bf16 %v4028_v50, %v4028_v50  ;;  %7944 = vst.msk [vmem:[%s11933_s6 + $0xaa0] sm:$0xf] %vm7263_vm0, %v9591_v53  ;;  %7945 = vst.msk [vmem:[%s11933_s6 + $0xaa4] sm:$0xf] %vm7263_vm0, %v9592_v54  ;;  %v11073_v7 = vunpack.c.l.bf16 %v11606_v52  ;;  %v11074_v4 = vunpack.c.h.bf16 %v11606_v52 }
 0x38e   : > { %v9597_v3 = vpack.c.bf16 %v4029_v56, %v4029_v56  ;;  %v9598_v21 = vpack.c.bf16 %v4030_v57, %v4030_v57  ;;  %7946 = vst.msk [vmem:[%s11933_s6 + $0xaa8] sm:$0xf] %vm7263_vm0, %v9593_v61  ;;  %7947 = vst.msk [vmem:[%s11933_s6 + $0xaac] sm:$0xf] %vm7263_vm0, %v9594_v16  ;;  %v11077_v5 = vunpack.c.l.bf16 %v11607_v58  ;;  %v11078_v6 = vunpack.c.h.bf16 %v11607_v58 }
 0x38f   : > { %7948 = vst.msk [vmem:[%s11933_s6 + $0xab0] sm:$0xf] %vm7263_vm0, %v9595_v62  ;;  %7949 = vst.msk [vmem:[%s11933_s6 + $0xab4] sm:$0xf] %vm7263_vm0, %v9596_v63  ;;  %v11081_v8 = vunpack.c.l.bf16 %v11608_v59  ;;  %v11082_v27 = vunpack.c.h.bf16 %v11608_v59  ;;  %v2456_v25 = vmul.f32 %v14872_v1, %v11073_v7  ;;  %v2457_v9 = vmul.f32 %v14872_v1, %v11074_v4 }
 0x390   : > { %7950 = vst.msk [vmem:[%s11933_s6 + $0xab8] sm:$0xf] %vm7263_vm0, %v9597_v3  ;;  %7951 = vst.msk [vmem:[%s11933_s6 + $0xabc] sm:$0xf] %vm7263_vm0, %v9598_v21  ;;  %v11085_v10 = vunpack.c.l.bf16 %v11609_v0  ;;  %v11086_v11 = vunpack.c.h.bf16 %v11609_v0  ;;  %v2458_v12 = vmul.f32 %v14872_v1, %v11077_v5  ;;  %v2459_v33 = vmul.f32 %v14872_v1, %v11078_v6 }
 0x391   : > { %v2460_v31 = vmul.f32 %v14872_v1, %v11081_v8  ;;  %v2461_v13 = vmul.f32 %v14872_v1, %v11082_v27  ;;  %v3247_v14 = vadd.f32 %v14883_v2, %v2456_v25  ;;  %v3248_v15 = vadd.f32 %v14883_v2, %v2457_v9 }
 0x392   : > { %v2462_v17 = vmul.f32 %v14872_v1, %v11085_v10  ;;  %v2463_v39 = vmul.f32 %v14872_v1, %v11086_v11  ;;  %v3249_v37 = vadd.f32 %v14883_v2, %v2458_v12  ;;  %v3250_v18 = vadd.f32 %v14883_v2, %v2459_v33 }
 0x393   : > { %v3251_v19 = vadd.f32 %v14883_v2, %v2460_v31  ;;  %v3252_v20 = vadd.f32 %v14883_v2, %v2461_v13  ;;  %v4031_v22 = vmax.f32 %v3247_v14, 0.0  ;;  %v4032_v45 = vmax.f32 %v3248_v15, 0.0  ;;  %v11614_v31 = vld [vmem:[%s11889_s29 + $0xb00] sm:$0xff]  }
 0x394   : > { %v3253_v43 = vadd.f32 %v14883_v2, %v2462_v17  ;;  %v3254_v23 = vadd.f32 %v14883_v2, %v2463_v39  ;;  %v4033_v24 = vmax.f32 %v3249_v37, 0.0  ;;  %v4034_v26 = vmax.f32 %v3250_v18, 0.0  ;;  %v11615_v39 = vld [vmem:[%s11889_s29 + $0xb08] sm:$0xff]   ;;  %v11616_v37 = vld [vmem:[%s11889_s29 + $0xb10] sm:$0xff]  }
 0x395   : > { %v4035_v28 = vmax.f32 %v3251_v19, 0.0  ;;  %v4036_v51 = vmax.f32 %v3252_v20, 0.0  ;;  %v9599_v29 = vpack.c.bf16 %v4031_v22, %v4031_v22  ;;  %v9600_v30 = vpack.c.bf16 %v4032_v45, %v4032_v45  ;;  %v11617_v45 = vld [vmem:[%s11889_s29 + $0xb18] sm:$0xff]  }
 0x396   : > { %v4037_v32 = vmax.f32 %v3253_v43, 0.0  ;;  %v4038_v34 = vmax.f32 %v3254_v23, 0.0  ;;  %v9601_v36 = vpack.c.bf16 %v4033_v24, %v4033_v24  ;;  %v9602_v38 = vpack.c.bf16 %v4034_v26, %v4034_v26 }
 0x397   : > { %v9603_v40 = vpack.c.bf16 %v4035_v28, %v4035_v28  ;;  %v9604_v60 = vpack.c.bf16 %v4036_v51, %v4036_v51  ;;  %7952 = vst.msk [vmem:[%s11933_s6 + $0xac0] sm:$0xf] %vm7263_vm0, %v9599_v29  ;;  %7953 = vst.msk [vmem:[%s11933_s6 + $0xac4] sm:$0xf] %vm7263_vm0, %v9600_v30  ;;  %v11089_v46 = vunpack.c.l.bf16 %v11610_v49  ;;  %v11090_v47 = vunpack.c.h.bf16 %v11610_v49 }
 0x398   : > { %v9605_v42 = vpack.c.bf16 %v4037_v32, %v4037_v32  ;;  %v9606_v44 = vpack.c.bf16 %v4038_v34, %v4038_v34  ;;  %7954 = vst.msk [vmem:[%s11933_s6 + $0xac8] sm:$0xf] %vm7263_vm0, %v9601_v36  ;;  %7955 = vst.msk [vmem:[%s11933_s6 + $0xacc] sm:$0xf] %vm7263_vm0, %v9602_v38  ;;  %v11093_v48 = vunpack.c.l.bf16 %v11611_v55  ;;  %v11094_v50 = vunpack.c.h.bf16 %v11611_v55 }
 0x399   : > { %7956 = vst.msk [vmem:[%s11933_s6 + $0xad0] sm:$0xf] %vm7263_vm0, %v9603_v40  ;;  %7957 = vst.msk [vmem:[%s11933_s6 + $0xad4] sm:$0xf] %vm7263_vm0, %v9604_v60  ;;  %v11097_v52 = vunpack.c.l.bf16 %v11612_v35  ;;  %v11098_v53 = vunpack.c.h.bf16 %v11612_v35  ;;  %v2464_v54 = vmul.f32 %v14872_v1, %v11089_v46  ;;  %v2465_v56 = vmul.f32 %v14872_v1, %v11090_v47 }
 0x39a   : > { %7958 = vst.msk [vmem:[%s11933_s6 + $0xad8] sm:$0xf] %vm7263_vm0, %v9605_v42  ;;  %7959 = vst.msk [vmem:[%s11933_s6 + $0xadc] sm:$0xf] %vm7263_vm0, %v9606_v44  ;;  %v11101_v57 = vunpack.c.l.bf16 %v11613_v41  ;;  %v11102_v58 = vunpack.c.h.bf16 %v11613_v41  ;;  %v2466_v59 = vmul.f32 %v14872_v1, %v11093_v48  ;;  %v2467_v61 = vmul.f32 %v14872_v1, %v11094_v50 }
 0x39b   : > { %v2468_v16 = vmul.f32 %v14872_v1, %v11097_v52  ;;  %v2469_v62 = vmul.f32 %v14872_v1, %v11098_v53  ;;  %v3255_v63 = vadd.f32 %v14883_v2, %v2464_v54  ;;  %v3256_v0 = vadd.f32 %v14883_v2, %v2465_v56 }
 0x39c   : > { %v2470_v3 = vmul.f32 %v14872_v1, %v11101_v57  ;;  %v2471_v21 = vmul.f32 %v14872_v1, %v11102_v58  ;;  %v3257_v7 = vadd.f32 %v14883_v2, %v2466_v59  ;;  %v3258_v4 = vadd.f32 %v14883_v2, %v2467_v61 }
 0x39d   : > { %v3259_v5 = vadd.f32 %v14883_v2, %v2468_v16  ;;  %v3260_v6 = vadd.f32 %v14883_v2, %v2469_v62  ;;  %v4039_v8 = vmax.f32 %v3255_v63, 0.0  ;;  %v4040_v27 = vmax.f32 %v3256_v0, 0.0  ;;  %v11618_v16 = vld [vmem:[%s11889_s29 + $0xb20] sm:$0xff]  }
 0x39e   : > { %v3261_v25 = vadd.f32 %v14883_v2, %v2470_v3  ;;  %v3262_v9 = vadd.f32 %v14883_v2, %v2471_v21  ;;  %v4041_v10 = vmax.f32 %v3257_v7, 0.0  ;;  %v4042_v11 = vmax.f32 %v3258_v4, 0.0  ;;  %v11619_v21 = vld [vmem:[%s11889_s29 + $0xb28] sm:$0xff]   ;;  %v11620_v7 = vld [vmem:[%s11889_s29 + $0xb30] sm:$0xff]  }
 0x39f   : > { %v4043_v12 = vmax.f32 %v3259_v5, 0.0  ;;  %v4044_v33 = vmax.f32 %v3260_v6, 0.0  ;;  %v9607_v13 = vpack.c.bf16 %v4039_v8, %v4039_v8  ;;  %v9608_v14 = vpack.c.bf16 %v4040_v27, %v4040_v27  ;;  %v11621_v27 = vld [vmem:[%s11889_s29 + $0xb38] sm:$0xff]  }
 0x3a0   : > { %v4045_v15 = vmax.f32 %v3261_v25, 0.0  ;;  %v4046_v17 = vmax.f32 %v3262_v9, 0.0  ;;  %v9609_v18 = vpack.c.bf16 %v4041_v10, %v4041_v10  ;;  %v9610_v19 = vpack.c.bf16 %v4042_v11, %v4042_v11 }
 0x3a1   : > { %v9611_v20 = vpack.c.bf16 %v4043_v12, %v4043_v12  ;;  %v9612_v22 = vpack.c.bf16 %v4044_v33, %v4044_v33  ;;  %7960 = vst.msk [vmem:[%s11933_s6 + $0xae0] sm:$0xf] %vm7263_vm0, %v9607_v13  ;;  %7961 = vst.msk [vmem:[%s11933_s6 + $0xae4] sm:$0xf] %vm7263_vm0, %v9608_v14  ;;  %v11105_v24 = vunpack.c.l.bf16 %v11614_v31  ;;  %v11106_v26 = vunpack.c.h.bf16 %v11614_v31 }
 0x3a2   : > { %v9613_v43 = vpack.c.bf16 %v4045_v15, %v4045_v15  ;;  %v9614_v23 = vpack.c.bf16 %v4046_v17, %v4046_v17  ;;  %7962 = vst.msk [vmem:[%s11933_s6 + $0xae8] sm:$0xf] %vm7263_vm0, %v9609_v18  ;;  %7963 = vst.msk [vmem:[%s11933_s6 + $0xaec] sm:$0xf] %vm7263_vm0, %v9610_v19  ;;  %v11109_v28 = vunpack.c.l.bf16 %v11615_v39  ;;  %v11110_v51 = vunpack.c.h.bf16 %v11615_v39 }
 0x3a3   : > { %7964 = vst.msk [vmem:[%s11933_s6 + $0xaf0] sm:$0xf] %vm7263_vm0, %v9611_v20  ;;  %7965 = vst.msk [vmem:[%s11933_s6 + $0xaf4] sm:$0xf] %vm7263_vm0, %v9612_v22  ;;  %v11113_v49 = vunpack.c.l.bf16 %v11616_v37  ;;  %v11114_v29 = vunpack.c.h.bf16 %v11616_v37  ;;  %v2472_v30 = vmul.f32 %v14872_v1, %v11105_v24  ;;  %v2473_v32 = vmul.f32 %v14872_v1, %v11106_v26 }
 0x3a4   : > { %7966 = vst.msk [vmem:[%s11933_s6 + $0xaf8] sm:$0xf] %vm7263_vm0, %v9613_v43  ;;  %7967 = vst.msk [vmem:[%s11933_s6 + $0xafc] sm:$0xf] %vm7263_vm0, %v9614_v23  ;;  %v11117_v34 = vunpack.c.l.bf16 %v11617_v45  ;;  %v11118_v55 = vunpack.c.h.bf16 %v11617_v45  ;;  %v2474_v35 = vmul.f32 %v14872_v1, %v11109_v28  ;;  %v2475_v36 = vmul.f32 %v14872_v1, %v11110_v51 }
 0x3a5   : > { %v2476_v38 = vmul.f32 %v14872_v1, %v11113_v49  ;;  %v2477_v40 = vmul.f32 %v14872_v1, %v11114_v29  ;;  %v3263_v60 = vadd.f32 %v14883_v2, %v2472_v30  ;;  %v3264_v41 = vadd.f32 %v14883_v2, %v2473_v32 }
 0x3a6   : > { %v2478_v42 = vmul.f32 %v14872_v1, %v11117_v34  ;;  %v2479_v44 = vmul.f32 %v14872_v1, %v11118_v55  ;;  %v3265_v46 = vadd.f32 %v14883_v2, %v2474_v35  ;;  %v3266_v47 = vadd.f32 %v14883_v2, %v2475_v36  ;;  %v11622_v36 = vld [vmem:[%s11889_s29 + $0xb40] sm:$0xff]  }
 0x3a7   : > { %v3267_v48 = vadd.f32 %v14883_v2, %v2476_v38  ;;  %v3268_v50 = vadd.f32 %v14883_v2, %v2477_v40  ;;  %v4047_v52 = vmax.f32 %v3263_v60, 0.0  ;;  %v4048_v53 = vmax.f32 %v3264_v41, 0.0 }
 0x3a8   : > { %v3269_v54 = vadd.f32 %v14883_v2, %v2478_v42  ;;  %v3270_v56 = vadd.f32 %v14883_v2, %v2479_v44  ;;  %v4049_v57 = vmax.f32 %v3265_v46, 0.0  ;;  %v4050_v58 = vmax.f32 %v3266_v47, 0.0  ;;  %v11623_v42 = vld [vmem:[%s11889_s29 + $0xb48] sm:$0xff]   ;;  %v11624_v44 = vld [vmem:[%s11889_s29 + $0xb50] sm:$0xff]  }
 0x3a9   : > { %v4051_v59 = vmax.f32 %v3267_v48, 0.0  ;;  %v4052_v61 = vmax.f32 %v3268_v50, 0.0  ;;  %v9615_v62 = vpack.c.bf16 %v4047_v52, %v4047_v52  ;;  %v9616_v63 = vpack.c.bf16 %v4048_v53, %v4048_v53  ;;  %v11625_v50 = vld [vmem:[%s11889_s29 + $0xb58] sm:$0xff]  }
 0x3aa   : > { %v4053_v0 = vmax.f32 %v3269_v54, 0.0  ;;  %v4054_v3 = vmax.f32 %v3270_v56, 0.0  ;;  %v9617_v4 = vpack.c.bf16 %v4049_v57, %v4049_v57  ;;  %v9618_v5 = vpack.c.bf16 %v4050_v58, %v4050_v58 }
 0x3ab   : > { %v9619_v6 = vpack.c.bf16 %v4051_v59, %v4051_v59  ;;  %v9620_v8 = vpack.c.bf16 %v4052_v61, %v4052_v61  ;;  %7968 = vst.msk [vmem:[%s11933_s6 + $0xb00] sm:$0xf] %vm7263_vm0, %v9615_v62  ;;  %7969 = vst.msk [vmem:[%s11933_s6 + $0xb04] sm:$0xf] %vm7263_vm0, %v9616_v63  ;;  %v11121_v10 = vunpack.c.l.bf16 %v11618_v16  ;;  %v11122_v11 = vunpack.c.h.bf16 %v11618_v16  ;;  %v15242_v16 = vld [vmem:[%s15547_s1] ss:$0 sm:$0xff] }
 0x3ac   : > { %v9621_v25 = vpack.c.bf16 %v4053_v0, %v4053_v0  ;;  %v9622_v9 = vpack.c.bf16 %v4054_v3, %v4054_v3  ;;  %7970 = vst.msk [vmem:[%s11933_s6 + $0xb08] sm:$0xf] %vm7263_vm0, %v9617_v4  ;;  %7971 = vst.msk [vmem:[%s11933_s6 + $0xb0c] sm:$0xf] %vm7263_vm0, %v9618_v5  ;;  %v11125_v12 = vunpack.c.l.bf16 %v11619_v21  ;;  %v11126_v33 = vunpack.c.h.bf16 %v11619_v21 }
 0x3ad   : > { %7972 = vst.msk [vmem:[%s11933_s6 + $0xb10] sm:$0xf] %vm7263_vm0, %v9619_v6  ;;  %7973 = vst.msk [vmem:[%s11933_s6 + $0xb14] sm:$0xf] %vm7263_vm0, %v9620_v8  ;;  %v11129_v31 = vunpack.c.l.bf16 %v11620_v7  ;;  %v11130_v13 = vunpack.c.h.bf16 %v11620_v7  ;;  %v2480_v14 = vmul.f32 %v14872_v1, %v11121_v10  ;;  %v2481_v15 = vmul.f32 %v14872_v1, %v11122_v11  ;;  %v15253_v6 = vld [vmem:[%s15548_s2] ss:$0 sm:$0xff] }
 0x3ae   : > { %7974 = vst.msk [vmem:[%s11933_s6 + $0xb18] sm:$0xf] %vm7263_vm0, %v9621_v25  ;;  %7975 = vst.msk [vmem:[%s11933_s6 + $0xb1c] sm:$0xf] %vm7263_vm0, %v9622_v9  ;;  %v11133_v17 = vunpack.c.l.bf16 %v11621_v27  ;;  %v11134_v39 = vunpack.c.h.bf16 %v11621_v27  ;;  %v2482_v37 = vmul.f32 %v14872_v1, %v11125_v12  ;;  %v2483_v18 = vmul.f32 %v14872_v1, %v11126_v33 }
 0x3af   : > { %v2484_v19 = vmul.f32 %v14872_v1, %v11129_v31  ;;  %v2485_v20 = vmul.f32 %v14872_v1, %v11130_v13  ;;  %v3271_v22 = vadd.f32 %v14883_v2, %v2480_v14  ;;  %v3272_v45 = vadd.f32 %v14883_v2, %v2481_v15 }
 0x3b0   : > { %v2486_v43 = vmul.f32 %v14872_v1, %v11133_v17  ;;  %v2487_v23 = vmul.f32 %v14872_v1, %v11134_v39  ;;  %v3273_v24 = vadd.f32 %v14883_v2, %v2482_v37  ;;  %v3274_v26 = vadd.f32 %v14883_v2, %v2483_v18 }
 0x3b1   : > { %v3275_v28 = vadd.f32 %v14883_v2, %v2484_v19  ;;  %v3276_v51 = vadd.f32 %v14883_v2, %v2485_v20  ;;  %v4055_v49 = vmax.f32 %v3271_v22, 0.0  ;;  %v4056_v29 = vmax.f32 %v3272_v45, 0.0  ;;  %v11626_v19 = vld [vmem:[%s11889_s29 + $0xb60] sm:$0xff]  }
 0x3b2   : > { %v3277_v30 = vadd.f32 %v14883_v2, %v2486_v43  ;;  %v3278_v32 = vadd.f32 %v14883_v2, %v2487_v23  ;;  %v4057_v34 = vmax.f32 %v3273_v24, 0.0  ;;  %v4058_v1 = vmax.f32 %v3274_v26, 0.0  ;;  %v11627_v23 = vld [vmem:[%s11889_s29 + $0xb68] sm:$0xff]   ;;  %v11628_v24 = vld [vmem:[%s11889_s29 + $0xb70] sm:$0xff]  }
 0x3b3   : > { %v4059_v55 = vmax.f32 %v3275_v28, 0.0  ;;  %v4060_v35 = vmax.f32 %v3276_v51, 0.0  ;;  %v9623_v38 = vpack.c.bf16 %v4055_v49, %v4055_v49  ;;  %v9624_v40 = vpack.c.bf16 %v4056_v29, %v4056_v29  ;;  %v11629_v29 = vld [vmem:[%s11889_s29 + $0xb78] sm:$0xff]  }
 0x3b4   : > { %v4061_v60 = vmax.f32 %v3277_v30, 0.0  ;;  %v4062_v41 = vmax.f32 %v3278_v32, 0.0  ;;  %v9625_v46 = vpack.c.bf16 %v4057_v34, %v4057_v34  ;;  %v9626_v2 = vpack.c.bf16 %v4058_v1, %v4058_v1 }
 0x3b5   : > { %v9627_v47 = vpack.c.bf16 %v4059_v55, %v4059_v55  ;;  %v9628_v48 = vpack.c.bf16 %v4060_v35, %v4060_v35  ;;  %7976 = vst.msk [vmem:[%s11933_s6 + $0xb20] sm:$0xf] %vm7263_vm0, %v9623_v38  ;;  %7977 = vst.msk [vmem:[%s11933_s6 + $0xb24] sm:$0xf] %vm7263_vm0, %v9624_v40  ;;  %v11137_v54 = vunpack.c.l.bf16 %v11622_v36  ;;  %v11138_v56 = vunpack.c.h.bf16 %v11622_v36 }
 0x3b6   : > { %v9629_v52 = vpack.c.bf16 %v4061_v60, %v4061_v60  ;;  %v9630_v53 = vpack.c.bf16 %v4062_v41, %v4062_v41  ;;  %7978 = vst.msk [vmem:[%s11933_s6 + $0xb28] sm:$0xf] %vm7263_vm0, %v9625_v46  ;;  %7979 = vst.msk [vmem:[%s11933_s6 + $0xb2c] sm:$0xf] %vm7263_vm0, %v9626_v2  ;;  %v11141_v57 = vunpack.c.l.bf16 %v11623_v42  ;;  %v11142_v58 = vunpack.c.h.bf16 %v11623_v42 }
 0x3b7   : > { %7980 = vst.msk [vmem:[%s11933_s6 + $0xb30] sm:$0xf] %vm7263_vm0, %v9627_v47  ;;  %7981 = vst.msk [vmem:[%s11933_s6 + $0xb34] sm:$0xf] %vm7263_vm0, %v9628_v48  ;;  %v11145_v59 = vunpack.c.l.bf16 %v11624_v44  ;;  %v11146_v61 = vunpack.c.h.bf16 %v11624_v44  ;;  %v2488_v62 = vmul.f32 %v15242_v16, %v11137_v54  ;;  %v2489_v63 = vmul.f32 %v15242_v16, %v11138_v56 }
 0x3b8   : > { %7982 = vst.msk [vmem:[%s11933_s6 + $0xb38] sm:$0xf] %vm7263_vm0, %v9629_v52  ;;  %7983 = vst.msk [vmem:[%s11933_s6 + $0xb3c] sm:$0xf] %vm7263_vm0, %v9630_v53  ;;  %v11149_v0 = vunpack.c.l.bf16 %v11625_v50  ;;  %v11150_v3 = vunpack.c.h.bf16 %v11625_v50  ;;  %v2490_v21 = vmul.f32 %v15242_v16, %v11141_v57  ;;  %v2491_v7 = vmul.f32 %v15242_v16, %v11142_v58 }
 0x3b9   : > { %v2492_v4 = vmul.f32 %v15242_v16, %v11145_v59  ;;  %v2493_v5 = vmul.f32 %v15242_v16, %v11146_v61  ;;  %v3279_v8 = vadd.f32 %v15253_v6, %v2488_v62  ;;  %v3280_v27 = vadd.f32 %v15253_v6, %v2489_v63 }
 0x3ba   : > { %v2494_v25 = vmul.f32 %v15242_v16, %v11149_v0  ;;  %v2495_v9 = vmul.f32 %v15242_v16, %v11150_v3  ;;  %v3281_v10 = vadd.f32 %v15253_v6, %v2490_v21  ;;  %v3282_v11 = vadd.f32 %v15253_v6, %v2491_v7 }
 0x3bb   : > { %v3283_v12 = vadd.f32 %v15253_v6, %v2492_v4  ;;  %v3284_v33 = vadd.f32 %v15253_v6, %v2493_v5  ;;  %v4063_v31 = vmax.f32 %v3279_v8, 0.0  ;;  %v4064_v13 = vmax.f32 %v3280_v27, 0.0  ;;  %v11630_v4 = vld [vmem:[%s11889_s29 + $0xb80] sm:$0xff]  }
 0x3bc   : > { %v3285_v14 = vadd.f32 %v15253_v6, %v2494_v25  ;;  %v3286_v15 = vadd.f32 %v15253_v6, %v2495_v9  ;;  %v4065_v17 = vmax.f32 %v3281_v10, 0.0  ;;  %v4066_v39 = vmax.f32 %v3282_v11, 0.0  ;;  %v11631_v9 = vld [vmem:[%s11889_s29 + $0xb88] sm:$0xff]   ;;  %v11632_v10 = vld [vmem:[%s11889_s29 + $0xb90] sm:$0xff]  }
 0x3bd   : > { %v4067_v37 = vmax.f32 %v3283_v12, 0.0  ;;  %v4068_v18 = vmax.f32 %v3284_v33, 0.0  ;;  %v9631_v20 = vpack.c.bf16 %v4063_v31, %v4063_v31  ;;  %v9632_v22 = vpack.c.bf16 %v4064_v13, %v4064_v13  ;;  %v11633_v13 = vld [vmem:[%s11889_s29 + $0xb98] sm:$0xff]  }
 0x3be   : > { %v4069_v45 = vmax.f32 %v3285_v14, 0.0  ;;  %v4070_v43 = vmax.f32 %v3286_v15, 0.0  ;;  %v9633_v26 = vpack.c.bf16 %v4065_v17, %v4065_v17  ;;  %v9634_v28 = vpack.c.bf16 %v4066_v39, %v4066_v39 }
 0x3bf   : > { %v9635_v51 = vpack.c.bf16 %v4067_v37, %v4067_v37  ;;  %v9636_v49 = vpack.c.bf16 %v4068_v18, %v4068_v18  ;;  %7984 = vst.msk [vmem:[%s11933_s6 + $0xb40] sm:$0xf] %vm7263_vm0, %v9631_v20  ;;  %7985 = vst.msk [vmem:[%s11933_s6 + $0xb44] sm:$0xf] %vm7263_vm0, %v9632_v22  ;;  %v11153_v34 = vunpack.c.l.bf16 %v11626_v19  ;;  %v11154_v1 = vunpack.c.h.bf16 %v11626_v19 }
 0x3c0   : > { %v9637_v30 = vpack.c.bf16 %v4069_v45, %v4069_v45  ;;  %v9638_v32 = vpack.c.bf16 %v4070_v43, %v4070_v43  ;;  %7986 = vst.msk [vmem:[%s11933_s6 + $0xb48] sm:$0xf] %vm7263_vm0, %v9633_v26  ;;  %7987 = vst.msk [vmem:[%s11933_s6 + $0xb4c] sm:$0xf] %vm7263_vm0, %v9634_v28  ;;  %v11157_v55 = vunpack.c.l.bf16 %v11627_v23  ;;  %v11158_v35 = vunpack.c.h.bf16 %v11627_v23 }
 0x3c1   : > { %7988 = vst.msk [vmem:[%s11933_s6 + $0xb50] sm:$0xf] %vm7263_vm0, %v9635_v51  ;;  %7989 = vst.msk [vmem:[%s11933_s6 + $0xb54] sm:$0xf] %vm7263_vm0, %v9636_v49  ;;  %v11161_v36 = vunpack.c.l.bf16 %v11628_v24  ;;  %v11162_v38 = vunpack.c.h.bf16 %v11628_v24  ;;  %v2496_v40 = vmul.f32 %v15242_v16, %v11153_v34  ;;  %v2497_v60 = vmul.f32 %v15242_v16, %v11154_v1 }
 0x3c2   : > { %7990 = vst.msk [vmem:[%s11933_s6 + $0xb58] sm:$0xf] %vm7263_vm0, %v9637_v30  ;;  %7991 = vst.msk [vmem:[%s11933_s6 + $0xb5c] sm:$0xf] %vm7263_vm0, %v9638_v32  ;;  %v11165_v41 = vunpack.c.l.bf16 %v11629_v29  ;;  %v11166_v42 = vunpack.c.h.bf16 %v11629_v29  ;;  %v2498_v44 = vmul.f32 %v15242_v16, %v11157_v55  ;;  %v2499_v46 = vmul.f32 %v15242_v16, %v11158_v35 }
 0x3c3   : > { %v2500_v2 = vmul.f32 %v15242_v16, %v11161_v36  ;;  %v2501_v47 = vmul.f32 %v15242_v16, %v11162_v38  ;;  %v3287_v48 = vadd.f32 %v15253_v6, %v2496_v40  ;;  %v3288_v50 = vadd.f32 %v15253_v6, %v2497_v60 }
 0x3c4   : > { %v2502_v52 = vmul.f32 %v15242_v16, %v11165_v41  ;;  %v2503_v53 = vmul.f32 %v15242_v16, %v11166_v42  ;;  %v3289_v54 = vadd.f32 %v15253_v6, %v2498_v44  ;;  %v3290_v56 = vadd.f32 %v15253_v6, %v2499_v46 }
 0x3c5   : > { %v3291_v57 = vadd.f32 %v15253_v6, %v2500_v2  ;;  %v3292_v58 = vadd.f32 %v15253_v6, %v2501_v47  ;;  %v4071_v59 = vmax.f32 %v3287_v48, 0.0  ;;  %v4072_v61 = vmax.f32 %v3288_v50, 0.0  ;;  %v11634_v2 = vld [vmem:[%s11889_s29 + $0xba0] sm:$0xff]  }
 0x3c6   : > { %v3293_v62 = vadd.f32 %v15253_v6, %v2502_v52  ;;  %v3294_v63 = vadd.f32 %v15253_v6, %v2503_v53  ;;  %v4073_v0 = vmax.f32 %v3289_v54, 0.0  ;;  %v4074_v3 = vmax.f32 %v3290_v56, 0.0  ;;  %v11635_v53 = vld [vmem:[%s11889_s29 + $0xba8] sm:$0xff]   ;;  %v11636_v54 = vld [vmem:[%s11889_s29 + $0xbb0] sm:$0xff]  }
 0x3c7   : > { %v4075_v21 = vmax.f32 %v3291_v57, 0.0  ;;  %v4076_v7 = vmax.f32 %v3292_v58, 0.0  ;;  %v9639_v5 = vpack.c.bf16 %v4071_v59, %v4071_v59  ;;  %v9640_v8 = vpack.c.bf16 %v4072_v61, %v4072_v61  ;;  %v11637_v61 = vld [vmem:[%s11889_s29 + $0xbb8] sm:$0xff]  }
 0x3c8   : > { %v4077_v27 = vmax.f32 %v3293_v62, 0.0  ;;  %v4078_v25 = vmax.f32 %v3294_v63, 0.0  ;;  %v9641_v11 = vpack.c.bf16 %v4073_v0, %v4073_v0  ;;  %v9642_v12 = vpack.c.bf16 %v4074_v3, %v4074_v3 }
 0x3c9   : > { %v9643_v33 = vpack.c.bf16 %v4075_v21, %v4075_v21  ;;  %v9644_v31 = vpack.c.bf16 %v4076_v7, %v4076_v7  ;;  %7992 = vst.msk [vmem:[%s11933_s6 + $0xb60] sm:$0xf] %vm7263_vm0, %v9639_v5  ;;  %7993 = vst.msk [vmem:[%s11933_s6 + $0xb64] sm:$0xf] %vm7263_vm0, %v9640_v8  ;;  %v11169_v17 = vunpack.c.l.bf16 %v11630_v4  ;;  %v11170_v39 = vunpack.c.h.bf16 %v11630_v4 }
 0x3ca   : > { %v9645_v14 = vpack.c.bf16 %v4077_v27, %v4077_v27  ;;  %v9646_v15 = vpack.c.bf16 %v4078_v25, %v4078_v25  ;;  %7994 = vst.msk [vmem:[%s11933_s6 + $0xb68] sm:$0xf] %vm7263_vm0, %v9641_v11  ;;  %7995 = vst.msk [vmem:[%s11933_s6 + $0xb6c] sm:$0xf] %vm7263_vm0, %v9642_v12  ;;  %v11173_v37 = vunpack.c.l.bf16 %v11631_v9  ;;  %v11174_v18 = vunpack.c.h.bf16 %v11631_v9 }
 0x3cb   : > { %7996 = vst.msk [vmem:[%s11933_s6 + $0xb70] sm:$0xf] %vm7263_vm0, %v9643_v33  ;;  %7997 = vst.msk [vmem:[%s11933_s6 + $0xb74] sm:$0xf] %vm7263_vm0, %v9644_v31  ;;  %v11177_v19 = vunpack.c.l.bf16 %v11632_v10  ;;  %v11178_v20 = vunpack.c.h.bf16 %v11632_v10  ;;  %v2504_v22 = vmul.f32 %v15242_v16, %v11169_v17  ;;  %v2505_v45 = vmul.f32 %v15242_v16, %v11170_v39 }
 0x3cc   : > { %7998 = vst.msk [vmem:[%s11933_s6 + $0xb78] sm:$0xf] %vm7263_vm0, %v9645_v14  ;;  %7999 = vst.msk [vmem:[%s11933_s6 + $0xb7c] sm:$0xf] %vm7263_vm0, %v9646_v15  ;;  %v11181_v43 = vunpack.c.l.bf16 %v11633_v13  ;;  %v11182_v23 = vunpack.c.h.bf16 %v11633_v13  ;;  %v2506_v24 = vmul.f32 %v15242_v16, %v11173_v37  ;;  %v2507_v26 = vmul.f32 %v15242_v16, %v11174_v18 }
 0x3cd   : > { %v2508_v28 = vmul.f32 %v15242_v16, %v11177_v19  ;;  %v2509_v51 = vmul.f32 %v15242_v16, %v11178_v20  ;;  %v3295_v49 = vadd.f32 %v15253_v6, %v2504_v22  ;;  %v3296_v29 = vadd.f32 %v15253_v6, %v2505_v45 }
 0x3ce   : > { %v2510_v30 = vmul.f32 %v15242_v16, %v11181_v43  ;;  %v2511_v32 = vmul.f32 %v15242_v16, %v11182_v23  ;;  %v3297_v34 = vadd.f32 %v15253_v6, %v2506_v24  ;;  %v3298_v1 = vadd.f32 %v15253_v6, %v2507_v26 }
 0x3cf   : > { %v3299_v55 = vadd.f32 %v15253_v6, %v2508_v28  ;;  %v3300_v35 = vadd.f32 %v15253_v6, %v2509_v51  ;;  %v4079_v36 = vmax.f32 %v3295_v49, 0.0  ;;  %v4080_v38 = vmax.f32 %v3296_v29, 0.0  ;;  %v11638_v28 = vld [vmem:[%s11889_s29 + $0xbc0] sm:$0xff]  }
 0x3d0   : > { %v3301_v40 = vadd.f32 %v15253_v6, %v2510_v30  ;;  %v3302_v60 = vadd.f32 %v15253_v6, %v2511_v32  ;;  %v4081_v41 = vmax.f32 %v3297_v34, 0.0  ;;  %v4082_v42 = vmax.f32 %v3298_v1, 0.0  ;;  %v11639_v32 = vld [vmem:[%s11889_s29 + $0xbc8] sm:$0xff]   ;;  %v11640_v34 = vld [vmem:[%s11889_s29 + $0xbd0] sm:$0xff]  }
 0x3d1   : > { %v4083_v44 = vmax.f32 %v3299_v55, 0.0  ;;  %v4084_v46 = vmax.f32 %v3300_v35, 0.0  ;;  %v9647_v47 = vpack.c.bf16 %v4079_v36, %v4079_v36  ;;  %v9648_v48 = vpack.c.bf16 %v4080_v38, %v4080_v38  ;;  %v11641_v38 = vld [vmem:[%s11889_s29 + $0xbd8] sm:$0xff]  }
 0x3d2   : > { %v4085_v50 = vmax.f32 %v3301_v40, 0.0  ;;  %v4086_v52 = vmax.f32 %v3302_v60, 0.0  ;;  %v9649_v56 = vpack.c.bf16 %v4081_v41, %v4081_v41  ;;  %v9650_v57 = vpack.c.bf16 %v4082_v42, %v4082_v42 }
 0x3d3   : > { %v9651_v58 = vpack.c.bf16 %v4083_v44, %v4083_v44  ;;  %v9652_v59 = vpack.c.bf16 %v4084_v46, %v4084_v46  ;;  %8000 = vst.msk [vmem:[%s11933_s6 + $0xb80] sm:$0xf] %vm7263_vm0, %v9647_v47  ;;  %8001 = vst.msk [vmem:[%s11933_s6 + $0xb84] sm:$0xf] %vm7263_vm0, %v9648_v48  ;;  %v11185_v0 = vunpack.c.l.bf16 %v11634_v2  ;;  %v11186_v3 = vunpack.c.h.bf16 %v11634_v2 }
 0x3d4   : > { %v9653_v62 = vpack.c.bf16 %v4085_v50, %v4085_v50  ;;  %v9654_v63 = vpack.c.bf16 %v4086_v52, %v4086_v52  ;;  %8002 = vst.msk [vmem:[%s11933_s6 + $0xb88] sm:$0xf] %vm7263_vm0, %v9649_v56  ;;  %8003 = vst.msk [vmem:[%s11933_s6 + $0xb8c] sm:$0xf] %vm7263_vm0, %v9650_v57  ;;  %v11189_v21 = vunpack.c.l.bf16 %v11635_v53  ;;  %v11190_v7 = vunpack.c.h.bf16 %v11635_v53 }
 0x3d5   : > { %8004 = vst.msk [vmem:[%s11933_s6 + $0xb90] sm:$0xf] %vm7263_vm0, %v9651_v58  ;;  %8005 = vst.msk [vmem:[%s11933_s6 + $0xb94] sm:$0xf] %vm7263_vm0, %v9652_v59  ;;  %v11193_v4 = vunpack.c.l.bf16 %v11636_v54  ;;  %v11194_v5 = vunpack.c.h.bf16 %v11636_v54  ;;  %v2512_v8 = vmul.f32 %v15242_v16, %v11185_v0  ;;  %v2513_v27 = vmul.f32 %v15242_v16, %v11186_v3 }
 0x3d6   : > { %8006 = vst.msk [vmem:[%s11933_s6 + $0xb98] sm:$0xf] %vm7263_vm0, %v9653_v62  ;;  %8007 = vst.msk [vmem:[%s11933_s6 + $0xb9c] sm:$0xf] %vm7263_vm0, %v9654_v63  ;;  %v11197_v25 = vunpack.c.l.bf16 %v11637_v61  ;;  %v11198_v9 = vunpack.c.h.bf16 %v11637_v61  ;;  %v2514_v10 = vmul.f32 %v15242_v16, %v11189_v21  ;;  %v2515_v11 = vmul.f32 %v15242_v16, %v11190_v7 }
 0x3d7   : > { %v2516_v12 = vmul.f32 %v15242_v16, %v11193_v4  ;;  %v2517_v33 = vmul.f32 %v15242_v16, %v11194_v5  ;;  %v3303_v31 = vadd.f32 %v15253_v6, %v2512_v8  ;;  %v3304_v13 = vadd.f32 %v15253_v6, %v2513_v27 }
 0x3d8   : > { %v2518_v14 = vmul.f32 %v15242_v16, %v11197_v25  ;;  %v2519_v15 = vmul.f32 %v15242_v16, %v11198_v9  ;;  %v3305_v17 = vadd.f32 %v15253_v6, %v2514_v10  ;;  %v3306_v39 = vadd.f32 %v15253_v6, %v2515_v11 }
 0x3d9   : > { %v3307_v37 = vadd.f32 %v15253_v6, %v2516_v12  ;;  %v3308_v18 = vadd.f32 %v15253_v6, %v2517_v33  ;;  %v4087_v19 = vmax.f32 %v3303_v31, 0.0  ;;  %v4088_v20 = vmax.f32 %v3304_v13, 0.0  ;;  %v11642_v12 = vld [vmem:[%s11889_s29 + $0xbe0] sm:$0xff]  }
 0x3da   : > { %v3309_v22 = vadd.f32 %v15253_v6, %v2518_v14  ;;  %v3310_v45 = vadd.f32 %v15253_v6, %v2519_v15  ;;  %v4089_v43 = vmax.f32 %v3305_v17, 0.0  ;;  %v4090_v23 = vmax.f32 %v3306_v39, 0.0  ;;  %v11643_v15 = vld [vmem:[%s11889_s29 + $0xbe8] sm:$0xff]   ;;  %v11644_v17 = vld [vmem:[%s11889_s29 + $0xbf0] sm:$0xff]  }
 0x3db   : > { %v4091_v24 = vmax.f32 %v3307_v37, 0.0  ;;  %v4092_v26 = vmax.f32 %v3308_v18, 0.0  ;;  %v9655_v51 = vpack.c.bf16 %v4087_v19, %v4087_v19  ;;  %v9656_v49 = vpack.c.bf16 %v4088_v20, %v4088_v20  ;;  %v11645_v20 = vld [vmem:[%s11889_s29 + $0xbf8] sm:$0xff]  }
 0x3dc   : > { %v4093_v29 = vmax.f32 %v3309_v22, 0.0  ;;  %v4094_v30 = vmax.f32 %v3310_v45, 0.0  ;;  %v9657_v1 = vpack.c.bf16 %v4089_v43, %v4089_v43  ;;  %v9658_v55 = vpack.c.bf16 %v4090_v23, %v4090_v23 }
 0x3dd   : > { %v9659_v35 = vpack.c.bf16 %v4091_v24, %v4091_v24  ;;  %v9660_v36 = vpack.c.bf16 %v4092_v26, %v4092_v26  ;;  %8008 = vst.msk [vmem:[%s11933_s6 + $0xba0] sm:$0xf] %vm7263_vm0, %v9655_v51  ;;  %8009 = vst.msk [vmem:[%s11933_s6 + $0xba4] sm:$0xf] %vm7263_vm0, %v9656_v49  ;;  %v11201_v41 = vunpack.c.l.bf16 %v11638_v28  ;;  %v11202_v42 = vunpack.c.h.bf16 %v11638_v28 }
 0x3de   : > { %v9661_v40 = vpack.c.bf16 %v4093_v29, %v4093_v29  ;;  %v9662_v60 = vpack.c.bf16 %v4094_v30, %v4094_v30  ;;  %8010 = vst.msk [vmem:[%s11933_s6 + $0xba8] sm:$0xf] %vm7263_vm0, %v9657_v1  ;;  %8011 = vst.msk [vmem:[%s11933_s6 + $0xbac] sm:$0xf] %vm7263_vm0, %v9658_v55  ;;  %v11205_v44 = vunpack.c.l.bf16 %v11639_v32  ;;  %v11206_v46 = vunpack.c.h.bf16 %v11639_v32 }
 0x3df   : > { %8012 = vst.msk [vmem:[%s11933_s6 + $0xbb0] sm:$0xf] %vm7263_vm0, %v9659_v35  ;;  %8013 = vst.msk [vmem:[%s11933_s6 + $0xbb4] sm:$0xf] %vm7263_vm0, %v9660_v36  ;;  %v11209_v2 = vunpack.c.l.bf16 %v11640_v34  ;;  %v11210_v47 = vunpack.c.h.bf16 %v11640_v34  ;;  %v2520_v48 = vmul.f32 %v15242_v16, %v11201_v41  ;;  %v2521_v50 = vmul.f32 %v15242_v16, %v11202_v42 }
 0x3e0   : > { %8014 = vst.msk [vmem:[%s11933_s6 + $0xbb8] sm:$0xf] %vm7263_vm0, %v9661_v40  ;;  %8015 = vst.msk [vmem:[%s11933_s6 + $0xbbc] sm:$0xf] %vm7263_vm0, %v9662_v60  ;;  %v11213_v52 = vunpack.c.l.bf16 %v11641_v38  ;;  %v11214_v53 = vunpack.c.h.bf16 %v11641_v38  ;;  %v2522_v54 = vmul.f32 %v15242_v16, %v11205_v44  ;;  %v2523_v56 = vmul.f32 %v15242_v16, %v11206_v46 }
 0x3e1   : > { %v2524_v57 = vmul.f32 %v15242_v16, %v11209_v2  ;;  %v2525_v58 = vmul.f32 %v15242_v16, %v11210_v47  ;;  %v3311_v59 = vadd.f32 %v15253_v6, %v2520_v48  ;;  %v3312_v61 = vadd.f32 %v15253_v6, %v2521_v50 }
 0x3e2   : > { %v2526_v62 = vmul.f32 %v15242_v16, %v11213_v52  ;;  %v2527_v63 = vmul.f32 %v15242_v16, %v11214_v53  ;;  %v3313_v0 = vadd.f32 %v15253_v6, %v2522_v54  ;;  %v3314_v3 = vadd.f32 %v15253_v6, %v2523_v56 }
 0x3e3   : > { %v3315_v21 = vadd.f32 %v15253_v6, %v2524_v57  ;;  %v3316_v7 = vadd.f32 %v15253_v6, %v2525_v58  ;;  %v4095_v4 = vmax.f32 %v3311_v59, 0.0  ;;  %v4096_v5 = vmax.f32 %v3312_v61, 0.0  ;;  %v11646_v57 = vld [vmem:[%s11889_s29 + $0xc00] sm:$0xff]  }
 0x3e4   : > { %v3317_v8 = vadd.f32 %v15253_v6, %v2526_v62  ;;  %v3318_v27 = vadd.f32 %v15253_v6, %v2527_v63  ;;  %v4097_v25 = vmax.f32 %v3313_v0, 0.0  ;;  %v4098_v9 = vmax.f32 %v3314_v3, 0.0  ;;  %v11647_v63 = vld [vmem:[%s11889_s29 + $0xc08] sm:$0xff]   ;;  %v11648_v0 = vld [vmem:[%s11889_s29 + $0xc10] sm:$0xff]  }
 0x3e5   : > { %v4099_v10 = vmax.f32 %v3315_v21, 0.0  ;;  %v4100_v11 = vmax.f32 %v3316_v7, 0.0  ;;  %v9663_v33 = vpack.c.bf16 %v4095_v4, %v4095_v4  ;;  %v9664_v31 = vpack.c.bf16 %v4096_v5, %v4096_v5  ;;  %v11649_v5 = vld [vmem:[%s11889_s29 + $0xc18] sm:$0xff]  }
 0x3e6   : > { %v4101_v13 = vmax.f32 %v3317_v8, 0.0  ;;  %v4102_v14 = vmax.f32 %v3318_v27, 0.0  ;;  %v9665_v39 = vpack.c.bf16 %v4097_v25, %v4097_v25  ;;  %v9666_v37 = vpack.c.bf16 %v4098_v9, %v4098_v9 }
 0x3e7   : > { %v9667_v18 = vpack.c.bf16 %v4099_v10, %v4099_v10  ;;  %v9668_v19 = vpack.c.bf16 %v4100_v11, %v4100_v11  ;;  %8016 = vst.msk [vmem:[%s11933_s6 + $0xbc0] sm:$0xf] %vm7263_vm0, %v9663_v33  ;;  %8017 = vst.msk [vmem:[%s11933_s6 + $0xbc4] sm:$0xf] %vm7263_vm0, %v9664_v31  ;;  %v11217_v43 = vunpack.c.l.bf16 %v11642_v12  ;;  %v11218_v23 = vunpack.c.h.bf16 %v11642_v12 }
 0x3e8   : > { %v9669_v22 = vpack.c.bf16 %v4101_v13, %v4101_v13  ;;  %v9670_v45 = vpack.c.bf16 %v4102_v14, %v4102_v14  ;;  %8018 = vst.msk [vmem:[%s11933_s6 + $0xbc8] sm:$0xf] %vm7263_vm0, %v9665_v39  ;;  %8019 = vst.msk [vmem:[%s11933_s6 + $0xbcc] sm:$0xf] %vm7263_vm0, %v9666_v37  ;;  %v11221_v24 = vunpack.c.l.bf16 %v11643_v15  ;;  %v11222_v26 = vunpack.c.h.bf16 %v11643_v15 }
 0x3e9   : > { %8020 = vst.msk [vmem:[%s11933_s6 + $0xbd0] sm:$0xf] %vm7263_vm0, %v9667_v18  ;;  %8021 = vst.msk [vmem:[%s11933_s6 + $0xbd4] sm:$0xf] %vm7263_vm0, %v9668_v19  ;;  %v11225_v28 = vunpack.c.l.bf16 %v11644_v17  ;;  %v11226_v51 = vunpack.c.h.bf16 %v11644_v17  ;;  %v2528_v49 = vmul.f32 %v15242_v16, %v11217_v43  ;;  %v2529_v29 = vmul.f32 %v15242_v16, %v11218_v23 }
 0x3ea   : > { %8022 = vst.msk [vmem:[%s11933_s6 + $0xbd8] sm:$0xf] %vm7263_vm0, %v9669_v22  ;;  %8023 = vst.msk [vmem:[%s11933_s6 + $0xbdc] sm:$0xf] %vm7263_vm0, %v9670_v45  ;;  %v11229_v30 = vunpack.c.l.bf16 %v11645_v20  ;;  %v11230_v32 = vunpack.c.h.bf16 %v11645_v20  ;;  %v2530_v34 = vmul.f32 %v15242_v16, %v11221_v24  ;;  %v2531_v1 = vmul.f32 %v15242_v16, %v11222_v26 }
 0x3eb   : > { %v2532_v55 = vmul.f32 %v15242_v16, %v11225_v28  ;;  %v2533_v35 = vmul.f32 %v15242_v16, %v11226_v51  ;;  %v3319_v36 = vadd.f32 %v15253_v6, %v2528_v49  ;;  %v3320_v38 = vadd.f32 %v15253_v6, %v2529_v29 }
 0x3ec   : > { %v2534_v40 = vmul.f32 %v15242_v16, %v11229_v30  ;;  %v2535_v60 = vmul.f32 %v15242_v16, %v11230_v32  ;;  %v3321_v41 = vadd.f32 %v15253_v6, %v2530_v34  ;;  %v3322_v42 = vadd.f32 %v15253_v6, %v2531_v1 }
 0x3ed   : > { %v3323_v44 = vadd.f32 %v15253_v6, %v2532_v55  ;;  %v3324_v46 = vadd.f32 %v15253_v6, %v2533_v35  ;;  %v4103_v2 = vmax.f32 %v3319_v36, 0.0  ;;  %v4104_v47 = vmax.f32 %v3320_v38, 0.0  ;;  %v11650_v55 = vld [vmem:[%s11889_s29 + $0xc20] sm:$0xff]  }
 0x3ee   : > { %v3325_v48 = vadd.f32 %v15253_v6, %v2534_v40  ;;  %v3326_v50 = vadd.f32 %v15253_v6, %v2535_v60  ;;  %v4105_v52 = vmax.f32 %v3321_v41, 0.0  ;;  %v4106_v53 = vmax.f32 %v3322_v42, 0.0  ;;  %v11651_v60 = vld [vmem:[%s11889_s29 + $0xc28] sm:$0xff]   ;;  %v11652_v41 = vld [vmem:[%s11889_s29 + $0xc30] sm:$0xff]  }
 0x3ef   : > { %v4107_v54 = vmax.f32 %v3323_v44, 0.0  ;;  %v4108_v56 = vmax.f32 %v3324_v46, 0.0  ;;  %v9671_v58 = vpack.c.bf16 %v4103_v2, %v4103_v2  ;;  %v9672_v59 = vpack.c.bf16 %v4104_v47, %v4104_v47  ;;  %v11653_v47 = vld [vmem:[%s11889_s29 + $0xc38] sm:$0xff]  }
 0x3f0   : > { %v4109_v61 = vmax.f32 %v3325_v48, 0.0  ;;  %v4110_v62 = vmax.f32 %v3326_v50, 0.0  ;;  %v9673_v3 = vpack.c.bf16 %v4105_v52, %v4105_v52  ;;  %v9674_v21 = vpack.c.bf16 %v4106_v53, %v4106_v53 }
 0x3f1   : > { %v9675_v7 = vpack.c.bf16 %v4107_v54, %v4107_v54  ;;  %v9676_v4 = vpack.c.bf16 %v4108_v56, %v4108_v56  ;;  %8024 = vst.msk [vmem:[%s11933_s6 + $0xbe0] sm:$0xf] %vm7263_vm0, %v9671_v58  ;;  %8025 = vst.msk [vmem:[%s11933_s6 + $0xbe4] sm:$0xf] %vm7263_vm0, %v9672_v59  ;;  %v11233_v25 = vunpack.c.l.bf16 %v11646_v57  ;;  %v11234_v9 = vunpack.c.h.bf16 %v11646_v57 }
 0x3f2   : > { %v9677_v8 = vpack.c.bf16 %v4109_v61, %v4109_v61  ;;  %v9678_v27 = vpack.c.bf16 %v4110_v62, %v4110_v62  ;;  %8026 = vst.msk [vmem:[%s11933_s6 + $0xbe8] sm:$0xf] %vm7263_vm0, %v9673_v3  ;;  %8027 = vst.msk [vmem:[%s11933_s6 + $0xbec] sm:$0xf] %vm7263_vm0, %v9674_v21  ;;  %v11237_v10 = vunpack.c.l.bf16 %v11647_v63  ;;  %v11238_v11 = vunpack.c.h.bf16 %v11647_v63 }
 0x3f3   : > { %8028 = vst.msk [vmem:[%s11933_s6 + $0xbf0] sm:$0xf] %vm7263_vm0, %v9675_v7  ;;  %8029 = vst.msk [vmem:[%s11933_s6 + $0xbf4] sm:$0xf] %vm7263_vm0, %v9676_v4  ;;  %v11241_v12 = vunpack.c.l.bf16 %v11648_v0  ;;  %v11242_v33 = vunpack.c.h.bf16 %v11648_v0  ;;  %v2536_v31 = vmul.f32 %v15242_v16, %v11233_v25  ;;  %v2537_v13 = vmul.f32 %v15242_v16, %v11234_v9 }
 0x3f4   : > { %8030 = vst.msk [vmem:[%s11933_s6 + $0xbf8] sm:$0xf] %vm7263_vm0, %v9677_v8  ;;  %8031 = vst.msk [vmem:[%s11933_s6 + $0xbfc] sm:$0xf] %vm7263_vm0, %v9678_v27  ;;  %v11245_v14 = vunpack.c.l.bf16 %v11649_v5  ;;  %v11246_v15 = vunpack.c.h.bf16 %v11649_v5  ;;  %v2538_v17 = vmul.f32 %v15242_v16, %v11237_v10  ;;  %v2539_v39 = vmul.f32 %v15242_v16, %v11238_v11 }
 0x3f5   : > { %v2540_v37 = vmul.f32 %v15242_v16, %v11241_v12  ;;  %v2541_v18 = vmul.f32 %v15242_v16, %v11242_v33  ;;  %v3327_v19 = vadd.f32 %v15253_v6, %v2536_v31  ;;  %v3328_v20 = vadd.f32 %v15253_v6, %v2537_v13 }
 0x3f6   : > { %v2542_v22 = vmul.f32 %v15242_v16, %v11245_v14  ;;  %v2543_v45 = vmul.f32 %v15242_v16, %v11246_v15  ;;  %v3329_v43 = vadd.f32 %v15253_v6, %v2538_v17  ;;  %v3330_v23 = vadd.f32 %v15253_v6, %v2539_v39 }
 0x3f7   : > { %v3331_v24 = vadd.f32 %v15253_v6, %v2540_v37  ;;  %v3332_v26 = vadd.f32 %v15253_v6, %v2541_v18  ;;  %v4111_v28 = vmax.f32 %v3327_v19, 0.0  ;;  %v4112_v51 = vmax.f32 %v3328_v20, 0.0 }
 0x3f8   : > { %v3333_v49 = vadd.f32 %v15253_v6, %v2542_v22  ;;  %v3334_v29 = vadd.f32 %v15253_v6, %v2543_v45  ;;  %v4113_v30 = vmax.f32 %v3329_v43, 0.0  ;;  %v4114_v32 = vmax.f32 %v3330_v23, 0.0 }
 0x3f9   : > { %v4115_v34 = vmax.f32 %v3331_v24, 0.0  ;;  %v4116_v1 = vmax.f32 %v3332_v26, 0.0  ;;  %v9679_v35 = vpack.c.bf16 %v4111_v28, %v4111_v28  ;;  %v9680_v36 = vpack.c.bf16 %v4112_v51, %v4112_v51 }
 0x3fa   : > { %v4117_v38 = vmax.f32 %v3333_v49, 0.0  ;;  %v4118_v40 = vmax.f32 %v3334_v29, 0.0  ;;  %v9681_v42 = vpack.c.bf16 %v4113_v30, %v4113_v30  ;;  %v9682_v44 = vpack.c.bf16 %v4114_v32, %v4114_v32 }
 0x3fb   : > { %v9683_v46 = vpack.c.bf16 %v4115_v34, %v4115_v34  ;;  %v9684_v2 = vpack.c.bf16 %v4116_v1, %v4116_v1  ;;  %8032 = vst.msk [vmem:[%s11933_s6 + $0xc00] sm:$0xf] %vm7263_vm0, %v9679_v35  ;;  %8033 = vst.msk [vmem:[%s11933_s6 + $0xc04] sm:$0xf] %vm7263_vm0, %v9680_v36  ;;  %v11249_v52 = vunpack.c.l.bf16 %v11650_v55  ;;  %v11250_v53 = vunpack.c.h.bf16 %v11650_v55 }
 0x3fc   : > { %v9685_v48 = vpack.c.bf16 %v4117_v38, %v4117_v38  ;;  %v9686_v50 = vpack.c.bf16 %v4118_v40, %v4118_v40  ;;  %8034 = vst.msk [vmem:[%s11933_s6 + $0xc08] sm:$0xf] %vm7263_vm0, %v9681_v42  ;;  %8035 = vst.msk [vmem:[%s11933_s6 + $0xc0c] sm:$0xf] %vm7263_vm0, %v9682_v44  ;;  %v11253_v54 = vunpack.c.l.bf16 %v11651_v60  ;;  %v11254_v56 = vunpack.c.h.bf16 %v11651_v60 }
 0x3fd   : > { %8036 = vst.msk [vmem:[%s11933_s6 + $0xc10] sm:$0xf] %vm7263_vm0, %v9683_v46  ;;  %8037 = vst.msk [vmem:[%s11933_s6 + $0xc14] sm:$0xf] %vm7263_vm0, %v9684_v2  ;;  %v11257_v57 = vunpack.c.l.bf16 %v11652_v41  ;;  %v11258_v58 = vunpack.c.h.bf16 %v11652_v41  ;;  %v2544_v59 = vmul.f32 %v15242_v16, %v11249_v52  ;;  %v2545_v61 = vmul.f32 %v15242_v16, %v11250_v53 }
 0x3fe   : > { %8038 = vst.msk [vmem:[%s11933_s6 + $0xc18] sm:$0xf] %vm7263_vm0, %v9685_v48  ;;  %8039 = vst.msk [vmem:[%s11933_s6 + $0xc1c] sm:$0xf] %vm7263_vm0, %v9686_v50  ;;  %v11261_v62 = vunpack.c.l.bf16 %v11653_v47  ;;  %v11262_v63 = vunpack.c.h.bf16 %v11653_v47  ;;  %v2546_v0 = vmul.f32 %v15242_v16, %v11253_v54  ;;  %v2547_v3 = vmul.f32 %v15242_v16, %v11254_v56 }
 0x3ff   : > { %v2548_v21 = vmul.f32 %v15242_v16, %v11257_v57  ;;  %v2549_v7 = vmul.f32 %v15242_v16, %v11258_v58  ;;  %v3335_v4 = vadd.f32 %v15253_v6, %v2544_v59  ;;  %v3336_v5 = vadd.f32 %v15253_v6, %v2545_v61 }
 0x400   : > { %v2550_v8 = vmul.f32 %v15242_v16, %v11261_v62  ;;  %v2551_v27 = vmul.f32 %v15242_v16, %v11262_v63  ;;  %v3337_v25 = vadd.f32 %v15253_v6, %v2546_v0  ;;  %v3338_v9 = vadd.f32 %v15253_v6, %v2547_v3 }
 0x401   : > { %v3339_v10 = vadd.f32 %v15253_v6, %v2548_v21  ;;  %v3340_v11 = vadd.f32 %v15253_v6, %v2549_v7  ;;  %v4119_v12 = vmax.f32 %v3335_v4, 0.0  ;;  %v4120_v33 = vmax.f32 %v3336_v5, 0.0 }
 0x402   : > { %v3341_v31 = vadd.f32 %v15253_v6, %v2550_v8  ;;  %v3342_v13 = vadd.f32 %v15253_v6, %v2551_v27  ;;  %v4121_v14 = vmax.f32 %v3337_v25, 0.0  ;;  %v4122_v15 = vmax.f32 %v3338_v9, 0.0 }
 0x403   : > { %v4123_v16 = vmax.f32 %v3339_v10, 0.0  ;;  %v4124_v17 = vmax.f32 %v3340_v11, 0.0  ;;  %v9687_v39 = vpack.c.bf16 %v4119_v12, %v4119_v12  ;;  %v9688_v37 = vpack.c.bf16 %v4120_v33, %v4120_v33 }
 0x404   : > { %v4125_v18 = vmax.f32 %v3341_v31, 0.0  ;;  %v4126_v19 = vmax.f32 %v3342_v13, 0.0  ;;  %v9689_v20 = vpack.c.bf16 %v4121_v14, %v4121_v14  ;;  %v9690_v22 = vpack.c.bf16 %v4122_v15, %v4122_v15 }
 0x405   : > { %v9691_v45 = vpack.c.bf16 %v4123_v16, %v4123_v16  ;;  %v9692_v43 = vpack.c.bf16 %v4124_v17, %v4124_v17  ;;  %8040 = vst.msk [vmem:[%s11933_s6 + $0xc20] sm:$0xf] %vm7263_vm0, %v9687_v39  ;;  %8041 = vst.msk [vmem:[%s11933_s6 + $0xc24] sm:$0xf] %vm7263_vm0, %v9688_v37 }
 0x406   : > { %v9693_v6 = vpack.c.bf16 %v4125_v18, %v4125_v18  ;;  %v9694_v23 = vpack.c.bf16 %v4126_v19, %v4126_v19  ;;  %8042 = vst.msk [vmem:[%s11933_s6 + $0xc28] sm:$0xf] %vm7263_vm0, %v9689_v20  ;;  %8043 = vst.msk [vmem:[%s11933_s6 + $0xc2c] sm:$0xf] %vm7263_vm0, %v9690_v22 }
 0x407   : > { %8044 = vst.msk [vmem:[%s11933_s6 + $0xc30] sm:$0xf] %vm7263_vm0, %v9691_v45  ;;  %8045 = vst.msk [vmem:[%s11933_s6 + $0xc34] sm:$0xf] %vm7263_vm0, %v9692_v43 }
 0x408   : > { %8046 = vst.msk [vmem:[%s11933_s6 + $0xc38] sm:$0xf] %vm7263_vm0, %v9693_v6  ;;  %8047 = vst.msk [vmem:[%s11933_s6 + $0xc3c] sm:$0xf] %vm7263_vm0, %v9694_v23 }
 0x409 PF: > { %p13_p7 = scmp.ge.s32.totalorder %s11824_s17, 6   ;;  %s15553_s12 = smov %s11771_s13 }
 0x40a   : > { %s15554_s13 = smov %s11775_s14  ;;  %s15555_s14 = smov %s11834_s20 }
 0x40b   : > { %s15556_s15 = smov %s11824_s17  ;;  %15 = sbr.rel (!%p13_p7) target bundleno = 3 (0x3), region = 72 }
 0x412   :  { %8070 = vsyncpa [#allocation3], 1 }
 0x413   :  { %8072 = vsyncpa [#allocation3 + $0x1], 1 }

</bundles_post_ra>
